<compile_context>
chip_gen: v6e
topology: v6e:2x2x1
jax: 0.10.0
libtpu: 0.0.40
codegen_flags: <defaults>
</compile_context>

<pallas_src>
import jax
import jax.numpy as jnp
from jax import lax
from jax.experimental import pallas as pl
from jax.experimental.pallas import tpu as pltpu


def _round_up(n, m):
    return ((n + m - 1) // m) * m


def _vmem_limit_bytes():
    """Per-generation scoped-VMEM budget (leave headroom; cap at 100 MiB)."""
    try:
        cap = int(pltpu.get_tpu_info().vmem_capacity_bytes)
    except Exception:
        return None                      # fall back to the compiler default
    return min(int(cap * 0.8), 100 * 1024 * 1024)


# --------------------------------------------------------------------------
# Fused forward kernel (one grid step == one batch tile)
# --------------------------------------------------------------------------

def _make_vae_kernel(num_layers, T, Hp):
    """Ref order (inputs, outputs, scratch):
      inputs : x (T,BT,Din_p) bf16, eps (BT,Zp) f32,
               [w_ih bf16, w_hh bf16, b f32] * num_layers   (encoder)
               w_head bf16 (Hp,2Zp), b_head f32 (1,2Zp)
               [w_ih bf16, w_hh bf16, b f32] * num_layers   (decoder)
               w_out bf16 (Hp,Dout_p), b_out f32 (1,Dout_p)
      outputs: mu (BT,Zp) f32, logvar (BT,Zp) f32, z (BT,Zp) f32,
               logits (T,BT,Dout_p) bf16
      scratch: seq (T,BT,Hp) f32, pre (T,BT,4Hp) f32
    """
    f32 = jnp.float32
    bf16 = jnp.bfloat16

    def kernel(*refs):
        it = iter(refs)
        x_ref = next(it)
        eps_ref = next(it)
        enc = [(next(it), next(it), next(it)) for _ in range(num_layers)]
        w_head_ref, b_head_ref = next(it), next(it)
        dec = [(next(it), next(it), next(it)) for _ in range(num_layers)]
        w_out_ref, b_out_ref = next(it), next(it)
        mu_ref, lv_ref, z_ref, out_ref = next(it), next(it), next(it), next(it)
        seq_ref, pre_ref = next(it), next(it)

        BT = eps_ref.shape[0]
        Zp = eps_ref.shape[1]

        def input_proj(x2d_bf16, w_ih_ref, b_ref):
            # ONE big (T*BT, Din) @ (Din, 4Hp) MXU matmul + bias for all steps;
            # this moves the majority of FLOPs off the sequential chain.
            return (jnp.dot(x2d_bf16, w_ih_ref[...],
                            preferred_element_type=f32) + b_ref[...])

        def recurrence(read_pre, w_hh_ref, write_seq):
            """Serial path: gates = pre[t] + h @ W_hh (W_hh loaded once)."""
            # TODO(synk): optionally pin W_hh in MXU staging registers across
            # the T-step loop via pltpu.matmul_push_rhs/acc_lhs/pop.
            w_hh = w_hh_ref[...]                       # hoisted out of the loop
            h0 = jnp.zeros((BT, Hp), f32)
            c0 = jnp.zeros((BT, Hp), f32)

            def step(t, carry):
                h, c = carry
                gates = read_pre(t) + jnp.dot(h.astype(bf16), w_hh,
                                              preferred_element_type=f32)
                i = jax.nn.sigmoid(gates[:, 0 * Hp:1 * Hp])
                f = jax.nn.sigmoid(gates[:, 1 * Hp:2 * Hp])
                g = jnp.tanh(gates[:, 2 * Hp:3 * Hp])
                o = jax.nn.sigmoid(gates[:, 3 * Hp:4 * Hp])
                c_new = f * c + i * g
                h_new = o * jnp.tanh(c_new)
                if write_seq:
                    seq_ref[t] = h_new
                return (h_new, c_new)

            if T <= 16:
                # Small static T: full unroll so MXU/VPU/EUP work interleaves
                # across adjacent steps.
                carry = (h0, c0)
                for t in range(T):
                    carry = step(t, carry)
            else:
                # Real config (T=256): bound vreg live ranges / compile time.
                carry = lax.fori_loop(0, T, step, (h0, c0), unroll=4)
            return carry[0]

        def seq_as_bf16_2d():
            return seq_ref[...].reshape(T * BT, Hp).astype(bf16)

        # ---------------- encoder ----------------
        x2d = x_ref[...].reshape(T * BT, x_ref.shape[2])        # bf16 already
        pre_ref[...] = input_proj(x2d, enc[0][0],
                                  enc[0][2]).reshape(T, BT, 4 * Hp)
        h_last = recurrence(lambda t: pre_ref[t], enc[0][1],
                            write_seq=(num_layers > 1))
        for l in range(1, num_layers):
            pre_ref[...] = input_proj(seq_as_bf16_2d(), enc[l][0],
                                      enc[l][2]).reshape(T, BT, 4 * Hp)
            # Last encoder layer's per-step hiddens are never read: skip the
            # dead seq stores.
            h_last = recurrence(lambda t: pre_ref[t], enc[l][1],
                                write_seq=(l < num_layers - 1))

        # ------------- heads + reparameterize (fused epilogue) -------------
        head = (jnp.dot(h_last.astype(bf16), w_head_ref[...],
                        preferred_element_type=f32) + b_head_ref[...])
        mu = head[:, :Zp]
        logvar = head[:, Zp:]
        z = eps_ref[...] * jnp.exp(0.5 * logvar) + mu
        mu_ref[...] = mu
        lv_ref[...] = logvar
        z_ref[...] = z

        # ---------------- decoder ----------------
        # z is identical at every timestep: its input projection is computed
        # exactly once and reused for all T steps (never materialized (T,B,Z)).
        pre_z = (jnp.dot(z.astype(bf16), dec[0][0][...],
                         preferred_element_type=f32) + dec[0][2][...])
        recurrence(lambda t: pre_z, dec[0][1], write_seq=True)
        for l in range(1, num_layers):
            pre_ref[...] = input_proj(seq_as_bf16_2d(), dec[l][0],
                                      dec[l][2]).reshape(T, BT, 4 * Hp)
            recurrence(lambda t: pre_ref[t], dec[l][1], write_seq=True)

        # ---------------- output projection ----------------
        # One (T*BT, Hp) @ (Hp, Dout_p) matmul; lane-dense bf16 logits slab.
        # TODO(synk): at the real config, chunk this over T to shave peak VMEM.
        logits = (jnp.dot(seq_as_bf16_2d(), w_out_ref[...],
                          preferred_element_type=f32) + b_out_ref[...])
        out_ref[...] = logits.reshape(T, BT, out_ref.shape[2]).astype(
            out_ref.dtype)

    return kernel


# --------------------------------------------------------------------------
# Model wrapper (parameter setup + padding in plain JAX, compute in kernel)
# --------------------------------------------------------------------------

class MidiocrityVAEPallas:
    def __init__(self, z_dim, phrase_size, hidden_size, num_layers,
                 n_tracks, n_cropped_notes, key, batch_tile=16):
        self.z_dim = z_dim
        self.phrase_size = phrase_size
        self.hidden_size = hidden_size
        self.num_layers = num_layers
        self.n_tracks = n_tracks
        self.n_cropped_notes = n_cropped_notes
        self.d_in = n_tracks * n_cropped_notes
        self.kl_norm = z_dim / phrase_size
        self.BT = batch_tile                  # bf16 packs 16 sublanes per vreg

        H = hidden_size
        self.Hp = _round_up(H, 128)
        self.Zp = _round_up(z_dim, 128)
        self.Din_p = _round_up(self.d_in, 128)
        self.Dout_p = _round_up(self.d_in, 128)

        k = 1.0 / float(H) ** 0.5

        def uni(kk, shape):
            return jax.random.uniform(kk, shape, jnp.float32, -k, k)

        keys = iter(jax.random.split(key, 8 * num_layers + 6))

        def lstm_params(din):
            # PyTorch-LSTM style: separate b_ih/b_hh (their sum is the
            # effective bias); weights stored transposed as (Din, 4H).
            return dict(
                w_ih=uni(next(keys), (din, 4 * H)),
                w_hh=uni(next(keys), (H, 4 * H)),
                b_ih=uni(next(keys), (4 * H,)),
                b_hh=uni(next(keys), (4 * H,)),
            )

        # Encoder stack
        self.enc_ref = []
        din = self.d_in
        for _ in range(num_layers):
            self.enc_ref.append(lstm_params(din))
            din = H
        # mu / logvar heads
        self.w_mu = uni(next(keys), (H, z_dim))
        self.b_mu = uni(next(keys), (z_dim,))
        self.w_lv = uni(next(keys), (H, z_dim))
        self.b_lv = uni(next(keys), (z_dim,))
        # Decoder stack
        self.dec_ref = []
        din = z_dim
        for _ in range(num_layers):
            self.dec_ref.append(lstm_params(din))
            din = H
        # Output projection
        self.w_out = uni(next(keys), (H, self.d_in))
        self.b_out = uni(next(keys), (self.d_in,))

        # ---- padded / bf16 parameters consumed by the kernel ----
        self.enc_p = [self._pad_lstm(p, self.Din_p if i == 0 else self.Hp)
                      for i, p in enumerate(self.enc_ref)]
        self.dec_p = [self._pad_lstm(p, self.Zp if i == 0 else self.Hp)
                      for i, p in enumerate(self.dec_ref)]

        # Fused mu/logvar head: one (Hp, 2*Zp) weight, lane-aligned halves.
        w_head = jnp.zeros((self.Hp, 2 * self.Zp), jnp.float32)
        w_head = w_head.at[:H, :z_dim].set(self.w_mu)
        w_head = w_head.at[:H, self.Zp:self.Zp + z_dim].set(self.w_lv)
        b_head = jnp.zeros((1, 2 * self.Zp), jnp.float32)
        b_head = b_head.at[0, :z_dim].set(self.b_mu)
        b_head = b_head.at[0, self.Zp:self.Zp + z_dim].set(self.b_lv)
        self.w_head_p = w_head.astype(jnp.bfloat16)
        self.b_head_p = b_head

        self.w_out_p = self._pad2d(self.w_out, self.Hp,
                                   self.Dout_p).astype(jnp.bfloat16)
        self.b_out_p = self._pad_row(self.b_out, self.Dout_p)

    # -------------------- padding helpers --------------------
    @staticmethod
    def _pad2d(w, rp, cp):
        return jnp.zeros((rp, cp), jnp.float32).at[:w.shape[0], :w.shape[1]].set(w)

    @staticmethod
    def _pad_row(b, cp):
        return jnp.zeros((1, cp), jnp.float32).at[0, :b.shape[0]].set(b)

    def _pad_lstm(self, p, din_p):
        """Pad W_ih / W_hh so every gate block is 128-lane aligned; combine the
        biases.  Pad regions are zero, self-consistent with zero-padded hidden
        lanes.  Weights stored bf16 (MXU-native), bias f32."""
        H, Hp = self.hidden_size, self.Hp
        din = p["w_ih"].shape[0]
        w_ih = jnp.zeros((din_p, 4 * Hp), jnp.float32)
        w_hh = jnp.zeros((Hp, 4 * Hp), jnp.float32)
        b = jnp.zeros((1, 4 * Hp), jnp.float32)
        b_sum = p["b_ih"] + p["b_hh"]
        for g in range(4):
            w_ih = w_ih.at[:din, g * Hp:g * Hp + H].set(
                p["w_ih"][:, g * H:(g + 1) * H])
            w_hh = w_hh.at[:H, g * Hp:g * Hp + H].set(
                p["w_hh"][:, g * H:(g + 1) * H])
            b = b.at[0, g * Hp:g * Hp + H].set(b_sum[g * H:(g + 1) * H])
        return dict(w_ih=w_ih.astype(jnp.bfloat16),
                    w_hh=w_hh.astype(jnp.bfloat16),
                    b=b)

    # -------------------- fused forward (single pallas_call) ---------------
    def forward(self, x, key):
        B, T = x.shape[0], x.shape[1]
        BT = self.BT
        Bp = _round_up(max(B, 1), BT)
        nb = Bp // BT

        eps = jax.random.normal(key, (B, self.z_dim), jnp.float32)

        # Time-major, zero-padded, bf16 input (cheap one-time XLA reshapes).
        x_tbd = x.reshape(B, T, self.d_in).transpose(1, 0, 2)
        x_p = jnp.zeros((T, Bp, self.Din_p), jnp.bfloat16
                        ).at[:, :B, :self.d_in].set(x_tbd.astype(jnp.bfloat16))
        eps_p = jnp.zeros((Bp, self.Zp), jnp.float32
                          ).at[:B, :self.z_dim].set(eps)

        args = [x_p, eps_p]
        in_specs = [
            pl.BlockSpec((T, BT, self.Din_p), lambda b: (0, b, 0)),   # x tile
            pl.BlockSpec((BT, self.Zp), lambda b: (b, 0)),            # eps tile
        ]

        def add_weight(w):
            # Weights: full block, constant index_map -> fetched once, resident
            # across the (parallel) batch grid.
            args.append(w)
            in_specs.append(pl.BlockSpec(w.shape, lambda b: (0, 0)))

        for l in self.enc_p:
            add_weight(l["w_ih"]); add_weight(l["w_hh"]); add_weight(l["b"])
        add_weight(self.w_head_p); add_weight(self.b_head_p)
        for l in self.dec_p:
            add_weight(l["w_ih"]); add_weight(l["w_hh"]); add_weight(l["b"])
        add_weight(self.w_out_p); add_weight(self.b_out_p)

        out_shape = (
            jax.ShapeDtypeStruct((Bp, self.Zp), jnp.float32),          # mu
            jax.ShapeDtypeStruct((Bp, self.Zp), jnp.float32),          # logvar
            jax.ShapeDtypeStruct((Bp, self.Zp), jnp.float32),          # z
            jax.ShapeDtypeStruct((T, Bp, self.Dout_p), jnp.bfloat16),  # logits
        )
        out_specs = (
            pl.BlockSpec((BT, self.Zp), lambda b: (b, 0)),
            pl.BlockSpec((BT, self.Zp), lambda b: (b, 0)),
            pl.BlockSpec((BT, self.Zp), lambda b: (b, 0)),
            pl.BlockSpec((T, BT, self.Dout_p), lambda b: (0, b, 0)),
        )

        fused = pl.pallas_call(
            _make_vae_kernel(self.num_layers, T, self.Hp),
            out_shape=out_shape,
            grid_spec=pltpu.PrefetchScalarGridSpec(
                num_scalar_prefetch=0,
                grid=(nb,),
                in_specs=in_specs,
                out_specs=out_specs,
                scratch_shapes=[
                    pltpu.VMEM((T, BT, self.Hp), jnp.float32),      # seq
                    pltpu.VMEM((T, BT, 4 * self.Hp), jnp.float32),  # pre-gates
                ]),
            compiler_params=pltpu.CompilerParams(
                dimension_semantics=("parallel",),
                vmem_limit_bytes=_vmem_limit_bytes()),
        )
        mu_p, lv_p, z_p, out_p = fused(*args)

        mu = mu_p[:B, :self.z_dim]
        logvar = lv_p[:B, :self.z_dim]
        z = z_p[:B, :self.z_dim]
        out = out_p[:, :B, :self.d_in].astype(jnp.float32).reshape(
            T, B, self.n_tracks, self.n_cropped_notes).transpose(1, 0, 2, 3)
        return mu, logvar, z, out

    # -------------------- pure-JAX reference (for validation) --------------
    # Mirrors the kernel's numerics: weights + dot operands rounded to bf16,
    # f32 accumulation / gate math (precision=HIGHEST for the f32 dots).
    @staticmethod
    def _q(a):
        return a.astype(jnp.bfloat16).astype(jnp.float32)

    def _lstm_ref(self, x_tbd, p):
        H = self.hidden_size
        B = x_tbd.shape[1]
        hp = lax.Precision.HIGHEST
        w_ih = self._q(p["w_ih"])
        w_hh = self._q(p["w_hh"])
        b = p["b_ih"] + p["b_hh"]

        def step(carry, x_t):
            h, c = carry
            gates = (jnp.dot(self._q(x_t), w_ih, precision=hp)
                     + jnp.dot(self._q(h), w_hh, precision=hp) + b)
            i = jax.nn.sigmoid(gates[:, 0:H])
            f = jax.nn.sigmoid(gates[:, H:2 * H])
            g = jnp.tanh(gates[:, 2 * H:3 * H])
            o = jax.nn.sigmoid(gates[:, 3 * H:4 * H])
            c = f * c + i * g
            h = o * jnp.tanh(c)
            return (h, c), h

        init = (jnp.zeros((B, H), jnp.float32), jnp.zeros((B, H), jnp.float32))
        (h_last, _), hs = lax.scan(step, init, x_tbd)
        return hs, h_last

    def forward_reference(self, x, eps):
        B, T = x.shape[0], x.shape[1]
        hp = lax.Precision.HIGHEST
        h_seq = x.reshape(B, T, self.d_in).transpose(1, 0, 2)
        h_last = None
        for p in self.enc_ref:
            h_seq, h_last = self._lstm_ref(h_seq, p)
        mu = jnp.dot(self._q(h_last), self._q(self.w_mu),
                     precision=hp) + self.b_mu
        logvar = jnp.dot(self._q(h_last), self._q(self.w_lv),
                         precision=hp) + self.b_lv
        z = eps * jnp.exp(0.5 * logvar) + mu
        h_seq = jnp.broadcast_to(z[None], (T, B, self.z_dim))
        for p in self.dec_ref:
            h_seq, _ = self._lstm_ref(h_seq, p)
        logits = (jnp.dot(self._q(h_seq.reshape(T * B, self.hidden_size)),
                          self._q(self.w_out), precision=hp) + self.b_out)
        out = logits.reshape(T, B, self.n_tracks,
                             self.n_cropped_notes).transpose(1, 0, 2, 3)
        return mu, logvar, z, out


# --------------------------------------------------------------------------
# main
# --------------------------------------------------------------------------

if __name__ == "__main__":
    # Small shapes consistent with the module's parameterization
    B = 2              # batch_size
    T = 8              # phrase_size
    N_TRACKS = 4       # n_tracks
    N_NOTES = 16       # n_cropped_notes
    HIDDEN = 32        # hidden_size
    Z_DIM = 16         # z_dim
    N_LAYERS = 2       # num_layers

    key = jax.random.PRNGKey(0)
    k_params, k_x, k_eps = jax.random.split(key, 3)

    model = MidiocrityVAEPallas(
        z_dim=Z_DIM, phrase_size=T, hidden_size=HIDDEN, num_layers=N_LAYERS,
        n_tracks=N_TRACKS, n_cropped_notes=N_NOTES, key=k_params)

    # layout: x is (B, T, n_tracks, n_cropped_notes)
    x = jax.random.normal(k_x, (B, T, N_TRACKS, N_NOTES), jnp.float32)

    mu, logvar, z, out = model.forward(x, k_eps)
    jax.block_until_ready((mu, logvar, z, out))

    assert mu.shape == (B, Z_DIM)
    assert logvar.shape == (B, Z_DIM)
    assert z.shape == (B, Z_DIM)
    assert out.shape == (B, T, N_TRACKS, N_NOTES)
    assert all(bool(jnp.all(jnp.isfinite(a))) for a in (mu, logvar, z, out))

    # Validate against a bf16-weight pure-JAX reference with the same eps
    eps = jax.random.normal(k_eps, (B, Z_DIM), jnp.float32)
    mu_r, lv_r, z_r, out_r = model.forward_reference(x, eps)
    for name, a, b in (("mu", mu, mu_r), ("logvar", logvar, lv_r),
                       ("z", z, z_r), ("out", out, out_r)):
        err = float(jnp.max(jnp.abs(a - b)))
        assert err < 3e-2, f"{name} mismatch vs reference: max abs err {err}"

    print("KERNEL_OK")
</pallas_src>

<mosaic_0001>
module attributes {stable_mosaic.version = 11 : i64} {
  func.func @kernel(%arg0: i32, %arg1: memref<8x16x128xbf16, #tpu.memory_space<vmem>>, %arg2: memref<16x128xf32, #tpu.memory_space<vmem>>, %arg3: memref<128x512xbf16, #tpu.memory_space<vmem>>, %arg4: memref<128x512xbf16, #tpu.memory_space<vmem>>, %arg5: memref<1x512xf32, #tpu.memory_space<vmem>>, %arg6: memref<128x512xbf16, #tpu.memory_space<vmem>>, %arg7: memref<128x512xbf16, #tpu.memory_space<vmem>>, %arg8: memref<1x512xf32, #tpu.memory_space<vmem>>, %arg9: memref<128x256xbf16, #tpu.memory_space<vmem>>, %arg10: memref<1x256xf32, #tpu.memory_space<vmem>>, %arg11: memref<128x512xbf16, #tpu.memory_space<vmem>>, %arg12: memref<128x512xbf16, #tpu.memory_space<vmem>>, %arg13: memref<1x512xf32, #tpu.memory_space<vmem>>, %arg14: memref<128x512xbf16, #tpu.memory_space<vmem>>, %arg15: memref<128x512xbf16, #tpu.memory_space<vmem>>, %arg16: memref<1x512xf32, #tpu.memory_space<vmem>>, %arg17: memref<128x128xbf16, #tpu.memory_space<vmem>>, %arg18: memref<1x128xf32, #tpu.memory_space<vmem>>, %arg19: memref<16x128xf32, #tpu.memory_space<vmem>>, %arg20: memref<16x128xf32, #tpu.memory_space<vmem>>, %arg21: memref<16x128xf32, #tpu.memory_space<vmem>>, %arg22: memref<8x16x128xbf16, #tpu.memory_space<vmem>>, %arg23: memref<8x16x128xf32, #tpu.memory_space<vmem>>, %arg24: memref<8x16x512xf32, #tpu.memory_space<vmem>>) attributes {dimension_semantics = [#tpu.dimension_semantics<parallel>], iteration_bounds = array<i64: 1>, scalar_prefetch = 0 : i64, scratch_operands = 2 : i64, tpu.core_type = #tpu.core_type<tc>, window_params = [{transform_indices = @transform_0, window_bounds = array<i64: 8, 16, 128>}, {transform_indices = @transform_1, window_bounds = array<i64: 16, 128>}, {pipeline_mode = #tpu.pipeline_mode<synchronous>, transform_indices = @transform_2, window_bounds = array<i64: 128, 512>}, {pipeline_mode = #tpu.pipeline_mode<synchronous>, transform_indices = @transform_3, window_bounds = array<i64: 128, 512>}, {pipeline_mode = #tpu.pipeline_mode<synchronous>, transform_indices = @transform_4, window_bounds = array<i64: 1, 512>}, {pipeline_mode = #tpu.pipeline_mode<synchronous>, transform_indices = @transform_5, window_bounds = array<i64: 128, 512>}, {pipeline_mode = #tpu.pipeline_mode<synchronous>, transform_indices = @transform_6, window_bounds = array<i64: 128, 512>}, {pipeline_mode = #tpu.pipeline_mode<synchronous>, transform_indices = @transform_7, window_bounds = array<i64: 1, 512>}, {pipeline_mode = #tpu.pipeline_mode<synchronous>, transform_indices = @transform_8, window_bounds = array<i64: 128, 256>}, {pipeline_mode = #tpu.pipeline_mode<synchronous>, transform_indices = @transform_9, window_bounds = array<i64: 1, 256>}, {pipeline_mode = #tpu.pipeline_mode<synchronous>, transform_indices = @transform_10, window_bounds = array<i64: 128, 512>}, {pipeline_mode = #tpu.pipeline_mode<synchronous>, transform_indices = @transform_11, window_bounds = array<i64: 128, 512>}, {pipeline_mode = #tpu.pipeline_mode<synchronous>, transform_indices = @transform_12, window_bounds = array<i64: 1, 512>}, {pipeline_mode = #tpu.pipeline_mode<synchronous>, transform_indices = @transform_13, window_bounds = array<i64: 128, 512>}, {pipeline_mode = #tpu.pipeline_mode<synchronous>, transform_indices = @transform_14, window_bounds = array<i64: 128, 512>}, {pipeline_mode = #tpu.pipeline_mode<synchronous>, transform_indices = @transform_15, window_bounds = array<i64: 1, 512>}, {pipeline_mode = #tpu.pipeline_mode<synchronous>, transform_indices = @transform_16, window_bounds = array<i64: 128, 128>}, {pipeline_mode = #tpu.pipeline_mode<synchronous>, transform_indices = @transform_17, window_bounds = array<i64: 1, 128>}, {transform_indices = @transform_18, window_bounds = array<i64: 16, 128>}, {transform_indices = @transform_19, window_bounds = array<i64: 16, 128>}, {transform_indices = @transform_20, window_bounds = array<i64: 16, 128>}, {transform_indices = @transform_21, window_bounds = array<i64: 8, 16, 128>}]} {
    %c0 = arith.constant 0 : index
    %c0_0 = arith.constant 0 : index
    %c0_1 = arith.constant 0 : index
    %0 = vector.load %arg1[%c0, %c0_0, %c0_1] : memref<8x16x128xbf16, #tpu.memory_space<vmem>>, vector<8x16x128xbf16>
    %1 = vector.shape_cast %0 : vector<8x16x128xbf16> to vector<128x128xbf16>
    %c0_2 = arith.constant 0 : index
    %c0_3 = arith.constant 0 : index
    %2 = vector.load %arg3[%c0_2, %c0_3] : memref<128x512xbf16, #tpu.memory_space<vmem>>, vector<128x512xbf16>
    %cst = arith.constant dense<0.000000e+00> : vector<128x512xf32>
    %3 = tpu.matmul %1, %2, %cst {dimension_numbers = #tpu.dot_dimension_numbers<[1], [0], [0], [1], [0, 0, 1, 1], [], []>} : vector<128x128xbf16>, vector<128x512xbf16>, vector<128x512xf32> -> vector<128x512xf32>
    %c0_4 = arith.constant 0 : index
    %c0_5 = arith.constant 0 : index
    %4 = vector.load %arg5[%c0_4, %c0_5] : memref<1x512xf32, #tpu.memory_space<vmem>>, vector<1x512xf32>
    %5 = vector.broadcast %4 : vector<1x512xf32> to vector<128x512xf32>
    %6 = arith.addf %3, %5 : vector<128x512xf32>
    %7 = vector.shape_cast %6 : vector<128x512xf32> to vector<8x16x512xf32>
    %c0_6 = arith.constant 0 : index
    %c0_7 = arith.constant 0 : index
    %c0_8 = arith.constant 0 : index
    %8 = vector.load %arg24[%c0_6, %c0_7, %c0_8] : memref<8x16x512xf32, #tpu.memory_space<vmem>>, vector<8x16x512xf32>
    tpu.vector_store %arg24[%c0_6, %c0_7, %c0_8], %7 {strides = array<i32>} : memref<8x16x512xf32, #tpu.memory_space<vmem>>, vector<8x16x512xf32>,
    %c0_9 = arith.constant 0 : index
    %c0_10 = arith.constant 0 : index
    %9 = vector.load %arg4[%c0_9, %c0_10] : memref<128x512xbf16, #tpu.memory_space<vmem>>, vector<128x512xbf16>
    %cst_11 = arith.constant 0.000000e+00 : f32
    %10 = vector.broadcast %cst_11 : f32 to vector<16x128xf32>
    %cst_12 = arith.constant 0.000000e+00 : f32
    %11 = vector.broadcast %cst_12 : f32 to vector<16x128xf32>
    %c0_13 = arith.constant 0 : index
    %c0_14 = arith.constant 0 : index
    %c0_15 = arith.constant 0 : index
    %12 = vector.load %arg24[%c0_13, %c0_14, %c0_15] : memref<8x16x512xf32, #tpu.memory_space<vmem>>, vector<1x16x512xf32>
    %13 = vector.shape_cast %12 : vector<1x16x512xf32> to vector<16x512xf32>
    %14 = arith.truncf %10 : vector<16x128xf32> to vector<16x128xbf16>
    %cst_16 = arith.constant dense<0.000000e+00> : vector<16x512xf32>
    %15 = tpu.matmul %14, %9, %cst_16 {dimension_numbers = #tpu.dot_dimension_numbers<[1], [0], [0], [1], [0, 0, 1, 1], [], []>} : vector<16x128xbf16>, vector<128x512xbf16>, vector<16x512xf32> -> vector<16x512xf32>
    %16 = arith.addf %13, %15 : vector<16x512xf32>
    %17 = vector.extract_strided_slice %16 {offsets = [0, 0], sizes = [16, 128], strides = [1, 1]} : vector<16x512xf32> to vector<16x128xf32>
    %18 = arith.negf %17 : vector<16x128xf32>
    %19 = math.exp %18 : vector<16x128xf32>
    %cst_17 = arith.constant 1.000000e+00 : f32
    %20 = vector.broadcast %cst_17 : f32 to vector<16x128xf32>
    %21 = arith.addf %20, %19 : vector<16x128xf32>
    %22 = arith.divf %20, %21 : vector<16x128xf32>
    %23 = vector.extract_strided_slice %16 {offsets = [0, 128], sizes = [16, 128], strides = [1, 1]} : vector<16x512xf32> to vector<16x128xf32>
    %24 = arith.negf %23 : vector<16x128xf32>
    %25 = math.exp %24 : vector<16x128xf32>
    %cst_18 = arith.constant 1.000000e+00 : f32
    %26 = vector.broadcast %cst_18 : f32 to vector<16x128xf32>
    %27 = arith.addf %26, %25 : vector<16x128xf32>
    %28 = arith.divf %26, %27 : vector<16x128xf32>
    %29 = vector.extract_strided_slice %16 {offsets = [0, 256], sizes = [16, 128], strides = [1, 1]} : vector<16x512xf32> to vector<16x128xf32>
    %30 = math.tanh %29 : vector<16x128xf32>
    %31 = vector.extract_strided_slice %16 {offsets = [0, 384], sizes = [16, 128], strides = [1, 1]} : vector<16x512xf32> to vector<16x128xf32>
    %32 = arith.negf %31 : vector<16x128xf32>
    %33 = math.exp %32 : vector<16x128xf32>
    %cst_19 = arith.constant 1.000000e+00 : f32
    %34 = vector.broadcast %cst_19 : f32 to vector<16x128xf32>
    %35 = arith.addf %34, %33 : vector<16x128xf32>
    %36 = arith.divf %34, %35 : vector<16x128xf32>
    %37 = arith.mulf %28, %11 : vector<16x128xf32>
    %38 = arith.mulf %22, %30 : vector<16x128xf32>
    %39 = arith.addf %37, %38 : vector<16x128xf32>
    %40 = math.tanh %39 : vector<16x128xf32>
    %41 = arith.mulf %36, %40 : vector<16x128xf32>
    %c0_20 = arith.constant 0 : index
    %c0_21 = arith.constant 0 : index
    %c0_22 = arith.constant 0 : index
    %42 = vector.load %arg23[%c0_20, %c0_21, %c0_22] : memref<8x16x128xf32, #tpu.memory_space<vmem>>, vector<1x16x128xf32>
    %43 = vector.shape_cast %42 : vector<1x16x128xf32> to vector<16x128xf32>
    %44 = vector.shape_cast %41 : vector<16x128xf32> to vector<1x16x128xf32>
    tpu.vector_store %arg23[%c0_20, %c0_21, %c0_22], %44 {strides = array<i32>} : memref<8x16x128xf32, #tpu.memory_space<vmem>>, vector<1x16x128xf32>,
    %c1 = arith.constant 1 : index
    %c0_23 = arith.constant 0 : index
    %c0_24 = arith.constant 0 : index
    %45 = vector.load %arg24[%c1, %c0_23, %c0_24] : memref<8x16x512xf32, #tpu.memory_space<vmem>>, vector<1x16x512xf32>
    %46 = vector.shape_cast %45 : vector<1x16x512xf32> to vector<16x512xf32>
    %47 = arith.truncf %41 : vector<16x128xf32> to vector<16x128xbf16>
    %cst_25 = arith.constant dense<0.000000e+00> : vector<16x512xf32>
    %48 = tpu.matmul %47, %9, %cst_25 {dimension_numbers = #tpu.dot_dimension_numbers<[1], [0], [0], [1], [0, 0, 1, 1], [], []>} : vector<16x128xbf16>, vector<128x512xbf16>, vector<16x512xf32> -> vector<16x512xf32>
    %49 = arith.addf %46, %48 : vector<16x512xf32>
    %50 = vector.extract_strided_slice %49 {offsets = [0, 0], sizes = [16, 128], strides = [1, 1]} : vector<16x512xf32> to vector<16x128xf32>
    %51 = arith.negf %50 : vector<16x128xf32>
    %52 = math.exp %51 : vector<16x128xf32>
    %cst_26 = arith.constant 1.000000e+00 : f32
    %53 = vector.broadcast %cst_26 : f32 to vector<16x128xf32>
    %54 = arith.addf %53, %52 : vector<16x128xf32>
    %55 = arith.divf %53, %54 : vector<16x128xf32>
    %56 = vector.extract_strided_slice %49 {offsets = [0, 128], sizes = [16, 128], strides = [1, 1]} : vector<16x512xf32> to vector<16x128xf32>
    %57 = arith.negf %56 : vector<16x128xf32>
    %58 = math.exp %57 : vector<16x128xf32>
    %cst_27 = arith.constant 1.000000e+00 : f32
    %59 = vector.broadcast %cst_27 : f32 to vector<16x128xf32>
    %60 = arith.addf %59, %58 : vector<16x128xf32>
    %61 = arith.divf %59, %60 : vector<16x128xf32>
    %62 = vector.extract_strided_slice %49 {offsets = [0, 256], sizes = [16, 128], strides = [1, 1]} : vector<16x512xf32> to vector<16x128xf32>
    %63 = math.tanh %62 : vector<16x128xf32>
    %64 = vector.extract_strided_slice %49 {offsets = [0, 384], sizes = [16, 128], strides = [1, 1]} : vector<16x512xf32> to vector<16x128xf32>
    %65 = arith.negf %64 : vector<16x128xf32>
    %66 = math.exp %65 : vector<16x128xf32>
    %cst_28 = arith.constant 1.000000e+00 : f32
    %67 = vector.broadcast %cst_28 : f32 to vector<16x128xf32>
    %68 = arith.addf %67, %66 : vector<16x128xf32>
    %69 = arith.divf %67, %68 : vector<16x128xf32>
    %70 = arith.mulf %61, %39 : vector<16x128xf32>
    %71 = arith.mulf %55, %63 : vector<16x128xf32>
    %72 = arith.addf %70, %71 : vector<16x128xf32>
    %73 = math.tanh %72 : vector<16x128xf32>
    %74 = arith.mulf %69, %73 : vector<16x128xf32>
    %c1_29 = arith.constant 1 : index
    %c0_30 = arith.constant 0 : index
    %c0_31 = arith.constant 0 : index
    %75 = vector.load %arg23[%c1_29, %c0_30, %c0_31] : memref<8x16x128xf32, #tpu.memory_space<vmem>>, vector<1x16x128xf32>
    %76 = vector.shape_cast %75 : vector<1x16x128xf32> to vector<16x128xf32>
    %77 = vector.shape_cast %74 : vector<16x128xf32> to vector<1x16x128xf32>
    tpu.vector_store %arg23[%c1_29, %c0_30, %c0_31], %77 {strides = array<i32>} : memref<8x16x128xf32, #tpu.memory_space<vmem>>, vector<1x16x128xf32>,
    %c2 = arith.constant 2 : index
    %c0_32 = arith.constant 0 : index
    %c0_33 = arith.constant 0 : index
    %78 = vector.load %arg24[%c2, %c0_32, %c0_33] : memref<8x16x512xf32, #tpu.memory_space<vmem>>, vector<1x16x512xf32>
    %79 = vector.shape_cast %78 : vector<1x16x512xf32> to vector<16x512xf32>
    %80 = arith.truncf %74 : vector<16x128xf32> to vector<16x128xbf16>
    %cst_34 = arith.constant dense<0.000000e+00> : vector<16x512xf32>
    %81 = tpu.matmul %80, %9, %cst_34 {dimension_numbers = #tpu.dot_dimension_numbers<[1], [0], [0], [1], [0, 0, 1, 1], [], []>} : vector<16x128xbf16>, vector<128x512xbf16>, vector<16x512xf32> -> vector<16x512xf32>
    %82 = arith.addf %79, %81 : vector<16x512xf32>
    %83 = vector.extract_strided_slice %82 {offsets = [0, 0], sizes = [16, 128], strides = [1, 1]} : vector<16x512xf32> to vector<16x128xf32>
    %84 = arith.negf %83 : vector<16x128xf32>
    %85 = math.exp %84 : vector<16x128xf32>
    %cst_35 = arith.constant 1.000000e+00 : f32
    %86 = vector.broadcast %cst_35 : f32 to vector<16x128xf32>
    %87 = arith.addf %86, %85 : vector<16x128xf32>
    %88 = arith.divf %86, %87 : vector<16x128xf32>
    %89 = vector.extract_strided_slice %82 {offsets = [0, 128], sizes = [16, 128], strides = [1, 1]} : vector<16x512xf32> to vector<16x128xf32>
    %90 = arith.negf %89 : vector<16x128xf32>
    %91 = math.exp %90 : vector<16x128xf32>
    %cst_36 = arith.constant 1.000000e+00 : f32
    %92 = vector.broadcast %cst_36 : f32 to vector<16x128xf32>
    %93 = arith.addf %92, %91 : vector<16x128xf32>
    %94 = arith.divf %92, %93 : vector<16x128xf32>
    %95 = vector.extract_strided_slice %82 {offsets = [0, 256], sizes = [16, 128], strides = [1, 1]} : vector<16x512xf32> to vector<16x128xf32>
    %96 = math.tanh %95 : vector<16x128xf32>
    %97 = vector.extract_strided_slice %82 {offsets = [0, 384], sizes = [16, 128], strides = [1, 1]} : vector<16x512xf32> to vector<16x128xf32>
    %98 = arith.negf %97 : vector<16x128xf32>
    %99 = math.exp %98 : vector<16x128xf32>
    %cst_37 = arith.constant 1.000000e+00 : f32
    %100 = vector.broadcast %cst_37 : f32 to vector<16x128xf32>
    %101 = arith.addf %100, %99 : vector<16x128xf32>
    %102 = arith.divf %100, %101 : vector<16x128xf32>
    %103 = arith.mulf %94, %72 : vector<16x128xf32>
    %104 = arith.mulf %88, %96 : vector<16x128xf32>
    %105 = arith.addf %103, %104 : vector<16x128xf32>
    %106 = math.tanh %105 : vector<16x128xf32>
    %107 = arith.mulf %102, %106 : vector<16x128xf32>
    %c2_38 = arith.constant 2 : index
    %c0_39 = arith.constant 0 : index
    %c0_40 = arith.constant 0 : index
    %108 = vector.load %arg23[%c2_38, %c0_39, %c0_40] : memref<8x16x128xf32, #tpu.memory_space<vmem>>, vector<1x16x128xf32>
    %109 = vector.shape_cast %108 : vector<1x16x128xf32> to vector<16x128xf32>
    %110 = vector.shape_cast %107 : vector<16x128xf32> to vector<1x16x128xf32>
    tpu.vector_store %arg23[%c2_38, %c0_39, %c0_40], %110 {strides = array<i32>} : memref<8x16x128xf32, #tpu.memory_space<vmem>>, vector<1x16x128xf32>,
    %c3 = arith.constant 3 : index
    %c0_41 = arith.constant 0 : index
    %c0_42 = arith.constant 0 : index
    %111 = vector.load %arg24[%c3, %c0_41, %c0_42] : memref<8x16x512xf32, #tpu.memory_space<vmem>>, vector<1x16x512xf32>
    %112 = vector.shape_cast %111 : vector<1x16x512xf32> to vector<16x512xf32>
    %113 = arith.truncf %107 : vector<16x128xf32> to vector<16x128xbf16>
    %cst_43 = arith.constant dense<0.000000e+00> : vector<16x512xf32>
    %114 = tpu.matmul %113, %9, %cst_43 {dimension_numbers = #tpu.dot_dimension_numbers<[1], [0], [0], [1], [0, 0, 1, 1], [], []>} : vector<16x128xbf16>, vector<128x512xbf16>, vector<16x512xf32> -> vector<16x512xf32>
    %115 = arith.addf %112, %114 : vector<16x512xf32>
    %116 = vector.extract_strided_slice %115 {offsets = [0, 0], sizes = [16, 128], strides = [1, 1]} : vector<16x512xf32> to vector<16x128xf32>
    %117 = arith.negf %116 : vector<16x128xf32>
    %118 = math.exp %117 : vector<16x128xf32>
    %cst_44 = arith.constant 1.000000e+00 : f32
    %119 = vector.broadcast %cst_44 : f32 to vector<16x128xf32>
    %120 = arith.addf %119, %118 : vector<16x128xf32>
    %121 = arith.divf %119, %120 : vector<16x128xf32>
    %122 = vector.extract_strided_slice %115 {offsets = [0, 128], sizes = [16, 128], strides = [1, 1]} : vector<16x512xf32> to vector<16x128xf32>
    %123 = arith.negf %122 : vector<16x128xf32>
    %124 = math.exp %123 : vector<16x128xf32>
    %cst_45 = arith.constant 1.000000e+00 : f32
    %125 = vector.broadcast %cst_45 : f32 to vector<16x128xf32>
    %126 = arith.addf %125, %124 : vector<16x128xf32>
    %127 = arith.divf %125, %126 : vector<16x128xf32>
    %128 = vector.extract_strided_slice %115 {offsets = [0, 256], sizes = [16, 128], strides = [1, 1]} : vector<16x512xf32> to vector<16x128xf32>
    %129 = math.tanh %128 : vector<16x128xf32>
    %130 = vector.extract_strided_slice %115 {offsets = [0, 384], sizes = [16, 128], strides = [1, 1]} : vector<16x512xf32> to vector<16x128xf32>
    %131 = arith.negf %130 : vector<16x128xf32>
    %132 = math.exp %131 : vector<16x128xf32>
    %cst_46 = arith.constant 1.000000e+00 : f32
    %133 = vector.broadcast %cst_46 : f32 to vector<16x128xf32>
    %134 = arith.addf %133, %132 : vector<16x128xf32>
    %135 = arith.divf %133, %134 : vector<16x128xf32>
    %136 = arith.mulf %127, %105 : vector<16x128xf32>
    %137 = arith.mulf %121, %129 : vector<16x128xf32>
    %138 = arith.addf %136, %137 : vector<16x128xf32>
    %139 = math.tanh %138 : vector<16x128xf32>
    %140 = arith.mulf %135, %139 : vector<16x128xf32>
    %c3_47 = arith.constant 3 : index
    %c0_48 = arith.constant 0 : index
    %c0_49 = arith.constant 0 : index
    %141 = vector.load %arg23[%c3_47, %c0_48, %c0_49] : memref<8x16x128xf32, #tpu.memory_space<vmem>>, vector<1x16x128xf32>
    %142 = vector.shape_cast %141 : vector<1x16x128xf32> to vector<16x128xf32>
    %143 = vector.shape_cast %140 : vector<16x128xf32> to vector<1x16x128xf32>
    tpu.vector_store %arg23[%c3_47, %c0_48, %c0_49], %143 {strides = array<i32>} : memref<8x16x128xf32, #tpu.memory_space<vmem>>, vector<1x16x128xf32>,
    %c4 = arith.constant 4 : index
    %c0_50 = arith.constant 0 : index
    %c0_51 = arith.constant 0 : index
    %144 = vector.load %arg24[%c4, %c0_50, %c0_51] : memref<8x16x512xf32, #tpu.memory_space<vmem>>, vector<1x16x512xf32>
    %145 = vector.shape_cast %144 : vector<1x16x512xf32> to vector<16x512xf32>
    %146 = arith.truncf %140 : vector<16x128xf32> to vector<16x128xbf16>
    %cst_52 = arith.constant dense<0.000000e+00> : vector<16x512xf32>
    %147 = tpu.matmul %146, %9, %cst_52 {dimension_numbers = #tpu.dot_dimension_numbers<[1], [0], [0], [1], [0, 0, 1, 1], [], []>} : vector<16x128xbf16>, vector<128x512xbf16>, vector<16x512xf32> -> vector<16x512xf32>
    %148 = arith.addf %145, %147 : vector<16x512xf32>
    %149 = vector.extract_strided_slice %148 {offsets = [0, 0], sizes = [16, 128], strides = [1, 1]} : vector<16x512xf32> to vector<16x128xf32>
    %150 = arith.negf %149 : vector<16x128xf32>
    %151 = math.exp %150 : vector<16x128xf32>
    %cst_53 = arith.constant 1.000000e+00 : f32
    %152 = vector.broadcast %cst_53 : f32 to vector<16x128xf32>
    %153 = arith.addf %152, %151 : vector<16x128xf32>
    %154 = arith.divf %152, %153 : vector<16x128xf32>
    %155 = vector.extract_strided_slice %148 {offsets = [0, 128], sizes = [16, 128], strides = [1, 1]} : vector<16x512xf32> to vector<16x128xf32>
    %156 = arith.negf %155 : vector<16x128xf32>
    %157 = math.exp %156 : vector<16x128xf32>
    %cst_54 = arith.constant 1.000000e+00 : f32
    %158 = vector.broadcast %cst_54 : f32 to vector<16x128xf32>
    %159 = arith.addf %158, %157 : vector<16x128xf32>
    %160 = arith.divf %158, %159 : vector<16x128xf32>
    %161 = vector.extract_strided_slice %148 {offsets = [0, 256], sizes = [16, 128], strides = [1, 1]} : vector<16x512xf32> to vector<16x128xf32>
    %162 = math.tanh %161 : vector<16x128xf32>
    %163 = vector.extract_strided_slice %148 {offsets = [0, 384], sizes = [16, 128], strides = [1, 1]} : vector<16x512xf32> to vector<16x128xf32>
    %164 = arith.negf %163 : vector<16x128xf32>
    %165 = math.exp %164 : vector<16x128xf32>
    %cst_55 = arith.constant 1.000000e+00 : f32
    %166 = vector.broadcast %cst_55 : f32 to vector<16x128xf32>
    %167 = arith.addf %166, %165 : vector<16x128xf32>
    %168 = arith.divf %166, %167 : vector<16x128xf32>
    %169 = arith.mulf %160, %138 : vector<16x128xf32>
    %170 = arith.mulf %154, %162 : vector<16x128xf32>
    %171 = arith.addf %169, %170 : vector<16x128xf32>
    %172 = math.tanh %171 : vector<16x128xf32>
    %173 = arith.mulf %168, %172 : vector<16x128xf32>
    %c4_56 = arith.constant 4 : index
    %c0_57 = arith.constant 0 : index
    %c0_58 = arith.constant 0 : index
    %174 = vector.load %arg23[%c4_56, %c0_57, %c0_58] : memref<8x16x128xf32, #tpu.memory_space<vmem>>, vector<1x16x128xf32>
    %175 = vector.shape_cast %174 : vector<1x16x128xf32> to vector<16x128xf32>
    %176 = vector.shape_cast %173 : vector<16x128xf32> to vector<1x16x128xf32>
    tpu.vector_store %arg23[%c4_56, %c0_57, %c0_58], %176 {strides = array<i32>} : memref<8x16x128xf32, #tpu.memory_space<vmem>>, vector<1x16x128xf32>,
    %c5 = arith.constant 5 : index
    %c0_59 = arith.constant 0 : index
    %c0_60 = arith.constant 0 : index
    %177 = vector.load %arg24[%c5, %c0_59, %c0_60] : memref<8x16x512xf32, #tpu.memory_space<vmem>>, vector<1x16x512xf32>
    %178 = vector.shape_cast %177 : vector<1x16x512xf32> to vector<16x512xf32>
    %179 = arith.truncf %173 : vector<16x128xf32> to vector<16x128xbf16>
    %cst_61 = arith.constant dense<0.000000e+00> : vector<16x512xf32>
    %180 = tpu.matmul %179, %9, %cst_61 {dimension_numbers = #tpu.dot_dimension_numbers<[1], [0], [0], [1], [0, 0, 1, 1], [], []>} : vector<16x128xbf16>, vector<128x512xbf16>, vector<16x512xf32> -> vector<16x512xf32>
    %181 = arith.addf %178, %180 : vector<16x512xf32>
    %182 = vector.extract_strided_slice %181 {offsets = [0, 0], sizes = [16, 128], strides = [1, 1]} : vector<16x512xf32> to vector<16x128xf32>
    %183 = arith.negf %182 : vector<16x128xf32>
    %184 = math.exp %183 : vector<16x128xf32>
    %cst_62 = arith.constant 1.000000e+00 : f32
    %185 = vector.broadcast %cst_62 : f32 to vector<16x128xf32>
    %186 = arith.addf %185, %184 : vector<16x128xf32>
    %187 = arith.divf %185, %186 : vector<16x128xf32>
    %188 = vector.extract_strided_slice %181 {offsets = [0, 128], sizes = [16, 128], strides = [1, 1]} : vector<16x512xf32> to vector<16x128xf32>
    %189 = arith.negf %188 : vector<16x128xf32>
    %190 = math.exp %189 : vector<16x128xf32>
    %cst_63 = arith.constant 1.000000e+00 : f32
    %191 = vector.broadcast %cst_63 : f32 to vector<16x128xf32>
    %192 = arith.addf %191, %190 : vector<16x128xf32>
    %193 = arith.divf %191, %192 : vector<16x128xf32>
    %194 = vector.extract_strided_slice %181 {offsets = [0, 256], sizes = [16, 128], strides = [1, 1]} : vector<16x512xf32> to vector<16x128xf32>
    %195 = math.tanh %194 : vector<16x128xf32>
    %196 = vector.extract_strided_slice %181 {offsets = [0, 384], sizes = [16, 128], strides = [1, 1]} : vector<16x512xf32> to vector<16x128xf32>
    %197 = arith.negf %196 : vector<16x128xf32>
    %198 = math.exp %197 : vector<16x128xf32>
    %cst_64 = arith.constant 1.000000e+00 : f32
    %199 = vector.broadcast %cst_64 : f32 to vector<16x128xf32>
    %200 = arith.addf %199, %198 : vector<16x128xf32>
    %201 = arith.divf %199, %200 : vector<16x128xf32>
    %202 = arith.mulf %193, %171 : vector<16x128xf32>
    %203 = arith.mulf %187, %195 : vector<16x128xf32>
    %204 = arith.addf %202, %203 : vector<16x128xf32>
    %205 = math.tanh %204 : vector<16x128xf32>
    %206 = arith.mulf %201, %205 : vector<16x128xf32>
    %c5_65 = arith.constant 5 : index
    %c0_66 = arith.constant 0 : index
    %c0_67 = arith.constant 0 : index
    %207 = vector.load %arg23[%c5_65, %c0_66, %c0_67] : memref<8x16x128xf32, #tpu.memory_space<vmem>>, vector<1x16x128xf32>
    %208 = vector.shape_cast %207 : vector<1x16x128xf32> to vector<16x128xf32>
    %209 = vector.shape_cast %206 : vector<16x128xf32> to vector<1x16x128xf32>
    tpu.vector_store %arg23[%c5_65, %c0_66, %c0_67], %209 {strides = array<i32>} : memref<8x16x128xf32, #tpu.memory_space<vmem>>, vector<1x16x128xf32>,
    %c6 = arith.constant 6 : index
    %c0_68 = arith.constant 0 : index
    %c0_69 = arith.constant 0 : index
    %210 = vector.load %arg24[%c6, %c0_68, %c0_69] : memref<8x16x512xf32, #tpu.memory_space<vmem>>, vector<1x16x512xf32>
    %211 = vector.shape_cast %210 : vector<1x16x512xf32> to vector<16x512xf32>
    %212 = arith.truncf %206 : vector<16x128xf32> to vector<16x128xbf16>
    %cst_70 = arith.constant dense<0.000000e+00> : vector<16x512xf32>
    %213 = tpu.matmul %212, %9, %cst_70 {dimension_numbers = #tpu.dot_dimension_numbers<[1], [0], [0], [1], [0, 0, 1, 1], [], []>} : vector<16x128xbf16>, vector<128x512xbf16>, vector<16x512xf32> -> vector<16x512xf32>
    %214 = arith.addf %211, %213 : vector<16x512xf32>
    %215 = vector.extract_strided_slice %214 {offsets = [0, 0], sizes = [16, 128], strides = [1, 1]} : vector<16x512xf32> to vector<16x128xf32>
    %216 = arith.negf %215 : vector<16x128xf32>
    %217 = math.exp %216 : vector<16x128xf32>
    %cst_71 = arith.constant 1.000000e+00 : f32
    %218 = vector.broadcast %cst_71 : f32 to vector<16x128xf32>
    %219 = arith.addf %218, %217 : vector<16x128xf32>
    %220 = arith.divf %218, %219 : vector<16x128xf32>
    %221 = vector.extract_strided_slice %214 {offsets = [0, 128], sizes = [16, 128], strides = [1, 1]} : vector<16x512xf32> to vector<16x128xf32>
    %222 = arith.negf %221 : vector<16x128xf32>
    %223 = math.exp %222 : vector<16x128xf32>
    %cst_72 = arith.constant 1.000000e+00 : f32
    %224 = vector.broadcast %cst_72 : f32 to vector<16x128xf32>
    %225 = arith.addf %224, %223 : vector<16x128xf32>
    %226 = arith.divf %224, %225 : vector<16x128xf32>
    %227 = vector.extract_strided_slice %214 {offsets = [0, 256], sizes = [16, 128], strides = [1, 1]} : vector<16x512xf32> to vector<16x128xf32>
    %228 = math.tanh %227 : vector<16x128xf32>
    %229 = vector.extract_strided_slice %214 {offsets = [0, 384], sizes = [16, 128], strides = [1, 1]} : vector<16x512xf32> to vector<16x128xf32>
    %230 = arith.negf %229 : vector<16x128xf32>
    %231 = math.exp %230 : vector<16x128xf32>
    %cst_73 = arith.constant 1.000000e+00 : f32
    %232 = vector.broadcast %cst_73 : f32 to vector<16x128xf32>
    %233 = arith.addf %232, %231 : vector<16x128xf32>
    %234 = arith.divf %232, %233 : vector<16x128xf32>
    %235 = arith.mulf %226, %204 : vector<16x128xf32>
    %236 = arith.mulf %220, %228 : vector<16x128xf32>
    %237 = arith.addf %235, %236 : vector<16x128xf32>
    %238 = math.tanh %237 : vector<16x128xf32>
    %239 = arith.mulf %234, %238 : vector<16x128xf32>
    %c6_74 = arith.constant 6 : index
    %c0_75 = arith.constant 0 : index
    %c0_76 = arith.constant 0 : index
    %240 = vector.load %arg23[%c6_74, %c0_75, %c0_76] : memref<8x16x128xf32, #tpu.memory_space<vmem>>, vector<1x16x128xf32>
    %241 = vector.shape_cast %240 : vector<1x16x128xf32> to vector<16x128xf32>
    %242 = vector.shape_cast %239 : vector<16x128xf32> to vector<1x16x128xf32>
    tpu.vector_store %arg23[%c6_74, %c0_75, %c0_76], %242 {strides = array<i32>} : memref<8x16x128xf32, #tpu.memory_space<vmem>>, vector<1x16x128xf32>,
    %c7 = arith.constant 7 : index
    %c0_77 = arith.constant 0 : index
    %c0_78 = arith.constant 0 : index
    %243 = vector.load %arg24[%c7, %c0_77, %c0_78] : memref<8x16x512xf32, #tpu.memory_space<vmem>>, vector<1x16x512xf32>
    %244 = vector.shape_cast %243 : vector<1x16x512xf32> to vector<16x512xf32>
    %245 = arith.truncf %239 : vector<16x128xf32> to vector<16x128xbf16>
    %cst_79 = arith.constant dense<0.000000e+00> : vector<16x512xf32>
    %246 = tpu.matmul %245, %9, %cst_79 {dimension_numbers = #tpu.dot_dimension_numbers<[1], [0], [0], [1], [0, 0, 1, 1], [], []>} : vector<16x128xbf16>, vector<128x512xbf16>, vector<16x512xf32> -> vector<16x512xf32>
    %247 = arith.addf %244, %246 : vector<16x512xf32>
    %248 = vector.extract_strided_slice %247 {offsets = [0, 0], sizes = [16, 128], strides = [1, 1]} : vector<16x512xf32> to vector<16x128xf32>
    %249 = arith.negf %248 : vector<16x128xf32>
    %250 = math.exp %249 : vector<16x128xf32>
    %cst_80 = arith.constant 1.000000e+00 : f32
    %251 = vector.broadcast %cst_80 : f32 to vector<16x128xf32>
    %252 = arith.addf %251, %250 : vector<16x128xf32>
    %253 = arith.divf %251, %252 : vector<16x128xf32>
    %254 = vector.extract_strided_slice %247 {offsets = [0, 128], sizes = [16, 128], strides = [1, 1]} : vector<16x512xf32> to vector<16x128xf32>
    %255 = arith.negf %254 : vector<16x128xf32>
    %256 = math.exp %255 : vector<16x128xf32>
    %cst_81 = arith.constant 1.000000e+00 : f32
    %257 = vector.broadcast %cst_81 : f32 to vector<16x128xf32>
    %258 = arith.addf %257, %256 : vector<16x128xf32>
    %259 = arith.divf %257, %258 : vector<16x128xf32>
    %260 = vector.extract_strided_slice %247 {offsets = [0, 256], sizes = [16, 128], strides = [1, 1]} : vector<16x512xf32> to vector<16x128xf32>
    %261 = math.tanh %260 : vector<16x128xf32>
    %262 = vector.extract_strided_slice %247 {offsets = [0, 384], sizes = [16, 128], strides = [1, 1]} : vector<16x512xf32> to vector<16x128xf32>
    %263 = arith.negf %262 : vector<16x128xf32>
    %264 = math.exp %263 : vector<16x128xf32>
    %cst_82 = arith.constant 1.000000e+00 : f32
    %265 = vector.broadcast %cst_82 : f32 to vector<16x128xf32>
    %266 = arith.addf %265, %264 : vector<16x128xf32>
    %267 = arith.divf %265, %266 : vector<16x128xf32>
    %268 = arith.mulf %259, %237 : vector<16x128xf32>
    %269 = arith.mulf %253, %261 : vector<16x128xf32>
    %270 = arith.addf %268, %269 : vector<16x128xf32>
    %271 = math.tanh %270 : vector<16x128xf32>
    %272 = arith.mulf %267, %271 : vector<16x128xf32>
    %c7_83 = arith.constant 7 : index
    %c0_84 = arith.constant 0 : index
    %c0_85 = arith.constant 0 : index
    %273 = vector.load %arg23[%c7_83, %c0_84, %c0_85] : memref<8x16x128xf32, #tpu.memory_space<vmem>>, vector<1x16x128xf32>
    %274 = vector.shape_cast %273 : vector<1x16x128xf32> to vector<16x128xf32>
    %275 = vector.shape_cast %272 : vector<16x128xf32> to vector<1x16x128xf32>
    tpu.vector_store %arg23[%c7_83, %c0_84, %c0_85], %275 {strides = array<i32>} : memref<8x16x128xf32, #tpu.memory_space<vmem>>, vector<1x16x128xf32>,
    %c0_86 = arith.constant 0 : index
    %c0_87 = arith.constant 0 : index
    %c0_88 = arith.constant 0 : index
    %276 = vector.load %arg23[%c0_86, %c0_87, %c0_88] : memref<8x16x128xf32, #tpu.memory_space<vmem>>, vector<8x16x128xf32>
    %277 = vector.shape_cast %276 : vector<8x16x128xf32> to vector<128x128xf32>
    %278 = arith.truncf %277 : vector<128x128xf32> to vector<128x128xbf16>
    %c0_89 = arith.constant 0 : index
    %c0_90 = arith.constant 0 : index
    %279 = vector.load %arg6[%c0_89, %c0_90] : memref<128x512xbf16, #tpu.memory_space<vmem>>, vector<128x512xbf16>
    %cst_91 = arith.constant dense<0.000000e+00> : vector<128x512xf32>
    %280 = tpu.matmul %278, %279, %cst_91 {dimension_numbers = #tpu.dot_dimension_numbers<[1], [0], [0], [1], [0, 0, 1, 1], [], []>} : vector<128x128xbf16>, vector<128x512xbf16>, vector<128x512xf32> -> vector<128x512xf32>
    %c0_92 = arith.constant 0 : index
    %c0_93 = arith.constant 0 : index
    %281 = vector.load %arg8[%c0_92, %c0_93] : memref<1x512xf32, #tpu.memory_space<vmem>>, vector<1x512xf32>
    %282 = vector.broadcast %281 : vector<1x512xf32> to vector<128x512xf32>
    %283 = arith.addf %280, %282 : vector<128x512xf32>
    %284 = vector.shape_cast %283 : vector<128x512xf32> to vector<8x16x512xf32>
    %c0_94 = arith.constant 0 : index
    %c0_95 = arith.constant 0 : index
    %c0_96 = arith.constant 0 : index
    %285 = vector.load %arg24[%c0_94, %c0_95, %c0_96] : memref<8x16x512xf32, #tpu.memory_space<vmem>>, vector<8x16x512xf32>
    tpu.vector_store %arg24[%c0_94, %c0_95, %c0_96], %284 {strides = array<i32>} : memref<8x16x512xf32, #tpu.memory_space<vmem>>, vector<8x16x512xf32>,
    %c0_97 = arith.constant 0 : index
    %c0_98 = arith.constant 0 : index
    %286 = vector.load %arg7[%c0_97, %c0_98] : memref<128x512xbf16, #tpu.memory_space<vmem>>, vector<128x512xbf16>
    %cst_99 = arith.constant 0.000000e+00 : f32
    %287 = vector.broadcast %cst_99 : f32 to vector<16x128xf32>
    %cst_100 = arith.constant 0.000000e+00 : f32
    %288 = vector.broadcast %cst_100 : f32 to vector<16x128xf32>
    %c0_101 = arith.constant 0 : index
    %c0_102 = arith.constant 0 : index
    %c0_103 = arith.constant 0 : index
    %289 = vector.load %arg24[%c0_101, %c0_102, %c0_103] : memref<8x16x512xf32, #tpu.memory_space<vmem>>, vector<1x16x512xf32>
    %290 = vector.shape_cast %289 : vector<1x16x512xf32> to vector<16x512xf32>
    %291 = arith.truncf %287 : vector<16x128xf32> to vector<16x128xbf16>
    %cst_104 = arith.constant dense<0.000000e+00> : vector<16x512xf32>
    %292 = tpu.matmul %291, %286, %cst_104 {dimension_numbers = #tpu.dot_dimension_numbers<[1], [0], [0], [1], [0, 0, 1, 1], [], []>} : vector<16x128xbf16>, vector<128x512xbf16>, vector<16x512xf32> -> vector<16x512xf32>
    %293 = arith.addf %290, %292 : vector<16x512xf32>
    %294 = vector.extract_strided_slice %293 {offsets = [0, 0], sizes = [16, 128], strides = [1, 1]} : vector<16x512xf32> to vector<16x128xf32>
    %295 = arith.negf %294 : vector<16x128xf32>
    %296 = math.exp %295 : vector<16x128xf32>
    %cst_105 = arith.constant 1.000000e+00 : f32
    %297 = vector.broadcast %cst_105 : f32 to vector<16x128xf32>
    %298 = arith.addf %297, %296 : vector<16x128xf32>
    %299 = arith.divf %297, %298 : vector<16x128xf32>
    %300 = vector.extract_strided_slice %293 {offsets = [0, 128], sizes = [16, 128], strides = [1, 1]} : vector<16x512xf32> to vector<16x128xf32>
    %301 = arith.negf %300 : vector<16x128xf32>
    %302 = math.exp %301 : vector<16x128xf32>
    %cst_106 = arith.constant 1.000000e+00 : f32
    %303 = vector.broadcast %cst_106 : f32 to vector<16x128xf32>
    %304 = arith.addf %303, %302 : vector<16x128xf32>
    %305 = arith.divf %303, %304 : vector<16x128xf32>
    %306 = vector.extract_strided_slice %293 {offsets = [0, 256], sizes = [16, 128], strides = [1, 1]} : vector<16x512xf32> to vector<16x128xf32>
    %307 = math.tanh %306 : vector<16x128xf32>
    %308 = vector.extract_strided_slice %293 {offsets = [0, 384], sizes = [16, 128], strides = [1, 1]} : vector<16x512xf32> to vector<16x128xf32>
    %309 = arith.negf %308 : vector<16x128xf32>
    %310 = math.exp %309 : vector<16x128xf32>
    %cst_107 = arith.constant 1.000000e+00 : f32
    %311 = vector.broadcast %cst_107 : f32 to vector<16x128xf32>
    %312 = arith.addf %311, %310 : vector<16x128xf32>
    %313 = arith.divf %311, %312 : vector<16x128xf32>
    %314 = arith.mulf %305, %288 : vector<16x128xf32>
    %315 = arith.mulf %299, %307 : vector<16x128xf32>
    %316 = arith.addf %314, %315 : vector<16x128xf32>
    %317 = math.tanh %316 : vector<16x128xf32>
    %318 = arith.mulf %313, %317 : vector<16x128xf32>
    %c1_108 = arith.constant 1 : index
    %c0_109 = arith.constant 0 : index
    %c0_110 = arith.constant 0 : index
    %319 = vector.load %arg24[%c1_108, %c0_109, %c0_110] : memref<8x16x512xf32, #tpu.memory_space<vmem>>, vector<1x16x512xf32>
    %320 = vector.shape_cast %319 : vector<1x16x512xf32> to vector<16x512xf32>
    %321 = arith.truncf %318 : vector<16x128xf32> to vector<16x128xbf16>
    %cst_111 = arith.constant dense<0.000000e+00> : vector<16x512xf32>
    %322 = tpu.matmul %321, %286, %cst_111 {dimension_numbers = #tpu.dot_dimension_numbers<[1], [0], [0], [1], [0, 0, 1, 1], [], []>} : vector<16x128xbf16>, vector<128x512xbf16>, vector<16x512xf32> -> vector<16x512xf32>
    %323 = arith.addf %320, %322 : vector<16x512xf32>
    %324 = vector.extract_strided_slice %323 {offsets = [0, 0], sizes = [16, 128], strides = [1, 1]} : vector<16x512xf32> to vector<16x128xf32>
    %325 = arith.negf %324 : vector<16x128xf32>
    %326 = math.exp %325 : vector<16x128xf32>
    %cst_112 = arith.constant 1.000000e+00 : f32
    %327 = vector.broadcast %cst_112 : f32 to vector<16x128xf32>
    %328 = arith.addf %327, %326 : vector<16x128xf32>
    %329 = arith.divf %327, %328 : vector<16x128xf32>
    %330 = vector.extract_strided_slice %323 {offsets = [0, 128], sizes = [16, 128], strides = [1, 1]} : vector<16x512xf32> to vector<16x128xf32>
    %331 = arith.negf %330 : vector<16x128xf32>
    %332 = math.exp %331 : vector<16x128xf32>
    %cst_113 = arith.constant 1.000000e+00 : f32
    %333 = vector.broadcast %cst_113 : f32 to vector<16x128xf32>
    %334 = arith.addf %333, %332 : vector<16x128xf32>
    %335 = arith.divf %333, %334 : vector<16x128xf32>
    %336 = vector.extract_strided_slice %323 {offsets = [0, 256], sizes = [16, 128], strides = [1, 1]} : vector<16x512xf32> to vector<16x128xf32>
    %337 = math.tanh %336 : vector<16x128xf32>
    %338 = vector.extract_strided_slice %323 {offsets = [0, 384], sizes = [16, 128], strides = [1, 1]} : vector<16x512xf32> to vector<16x128xf32>
    %339 = arith.negf %338 : vector<16x128xf32>
    %340 = math.exp %339 : vector<16x128xf32>
    %cst_114 = arith.constant 1.000000e+00 : f32
    %341 = vector.broadcast %cst_114 : f32 to vector<16x128xf32>
    %342 = arith.addf %341, %340 : vector<16x128xf32>
    %343 = arith.divf %341, %342 : vector<16x128xf32>
    %344 = arith.mulf %335, %316 : vector<16x128xf32>
    %345 = arith.mulf %329, %337 : vector<16x128xf32>
    %346 = arith.addf %344, %345 : vector<16x128xf32>
    %347 = math.tanh %346 : vector<16x128xf32>
    %348 = arith.mulf %343, %347 : vector<16x128xf32>
    %c2_115 = arith.constant 2 : index
    %c0_116 = arith.constant 0 : index
    %c0_117 = arith.constant 0 : index
    %349 = vector.load %arg24[%c2_115, %c0_116, %c0_117] : memref<8x16x512xf32, #tpu.memory_space<vmem>>, vector<1x16x512xf32>
    %350 = vector.shape_cast %349 : vector<1x16x512xf32> to vector<16x512xf32>
    %351 = arith.truncf %348 : vector<16x128xf32> to vector<16x128xbf16>
    %cst_118 = arith.constant dense<0.000000e+00> : vector<16x512xf32>
    %352 = tpu.matmul %351, %286, %cst_118 {dimension_numbers = #tpu.dot_dimension_numbers<[1], [0], [0], [1], [0, 0, 1, 1], [], []>} : vector<16x128xbf16>, vector<128x512xbf16>, vector<16x512xf32> -> vector<16x512xf32>
    %353 = arith.addf %350, %352 : vector<16x512xf32>
    %354 = vector.extract_strided_slice %353 {offsets = [0, 0], sizes = [16, 128], strides = [1, 1]} : vector<16x512xf32> to vector<16x128xf32>
    %355 = arith.negf %354 : vector<16x128xf32>
    %356 = math.exp %355 : vector<16x128xf32>
    %cst_119 = arith.constant 1.000000e+00 : f32
    %357 = vector.broadcast %cst_119 : f32 to vector<16x128xf32>
    %358 = arith.addf %357, %356 : vector<16x128xf32>
    %359 = arith.divf %357, %358 : vector<16x128xf32>
    %360 = vector.extract_strided_slice %353 {offsets = [0, 128], sizes = [16, 128], strides = [1, 1]} : vector<16x512xf32> to vector<16x128xf32>
    %361 = arith.negf %360 : vector<16x128xf32>
    %362 = math.exp %361 : vector<16x128xf32>
    %cst_120 = arith.constant 1.000000e+00 : f32
    %363 = vector.broadcast %cst_120 : f32 to vector<16x128xf32>
    %364 = arith.addf %363, %362 : vector<16x128xf32>
    %365 = arith.divf %363, %364 : vector<16x128xf32>
    %366 = vector.extract_strided_slice %353 {offsets = [0, 256], sizes = [16, 128], strides = [1, 1]} : vector<16x512xf32> to vector<16x128xf32>
    %367 = math.tanh %366 : vector<16x128xf32>
    %368 = vector.extract_strided_slice %353 {offsets = [0, 384], sizes = [16, 128], strides = [1, 1]} : vector<16x512xf32> to vector<16x128xf32>
    %369 = arith.negf %368 : vector<16x128xf32>
    %370 = math.exp %369 : vector<16x128xf32>
    %cst_121 = arith.constant 1.000000e+00 : f32
    %371 = vector.broadcast %cst_121 : f32 to vector<16x128xf32>
    %372 = arith.addf %371, %370 : vector<16x128xf32>
    %373 = arith.divf %371, %372 : vector<16x128xf32>
    %374 = arith.mulf %365, %346 : vector<16x128xf32>
    %375 = arith.mulf %359, %367 : vector<16x128xf32>
    %376 = arith.addf %374, %375 : vector<16x128xf32>
    %377 = math.tanh %376 : vector<16x128xf32>
    %378 = arith.mulf %373, %377 : vector<16x128xf32>
    %c3_122 = arith.constant 3 : index
    %c0_123 = arith.constant 0 : index
    %c0_124 = arith.constant 0 : index
    %379 = vector.load %arg24[%c3_122, %c0_123, %c0_124] : memref<8x16x512xf32, #tpu.memory_space<vmem>>, vector<1x16x512xf32>
    %380 = vector.shape_cast %379 : vector<1x16x512xf32> to vector<16x512xf32>
    %381 = arith.truncf %378 : vector<16x128xf32> to vector<16x128xbf16>
    %cst_125 = arith.constant dense<0.000000e+00> : vector<16x512xf32>
    %382 = tpu.matmul %381, %286, %cst_125 {dimension_numbers = #tpu.dot_dimension_numbers<[1], [0], [0], [1], [0, 0, 1, 1], [], []>} : vector<16x128xbf16>, vector<128x512xbf16>, vector<16x512xf32> -> vector<16x512xf32>
    %383 = arith.addf %380, %382 : vector<16x512xf32>
    %384 = vector.extract_strided_slice %383 {offsets = [0, 0], sizes = [16, 128], strides = [1, 1]} : vector<16x512xf32> to vector<16x128xf32>
    %385 = arith.negf %384 : vector<16x128xf32>
    %386 = math.exp %385 : vector<16x128xf32>
    %cst_126 = arith.constant 1.000000e+00 : f32
    %387 = vector.broadcast %cst_126 : f32 to vector<16x128xf32>
    %388 = arith.addf %387, %386 : vector<16x128xf32>
    %389 = arith.divf %387, %388 : vector<16x128xf32>
    %390 = vector.extract_strided_slice %383 {offsets = [0, 128], sizes = [16, 128], strides = [1, 1]} : vector<16x512xf32> to vector<16x128xf32>
    %391 = arith.negf %390 : vector<16x128xf32>
    %392 = math.exp %391 : vector<16x128xf32>
    %cst_127 = arith.constant 1.000000e+00 : f32
    %393 = vector.broadcast %cst_127 : f32 to vector<16x128xf32>
    %394 = arith.addf %393, %392 : vector<16x128xf32>
    %395 = arith.divf %393, %394 : vector<16x128xf32>
    %396 = vector.extract_strided_slice %383 {offsets = [0, 256], sizes = [16, 128], strides = [1, 1]} : vector<16x512xf32> to vector<16x128xf32>
    %397 = math.tanh %396 : vector<16x128xf32>
    %398 = vector.extract_strided_slice %383 {offsets = [0, 384], sizes = [16, 128], strides = [1, 1]} : vector<16x512xf32> to vector<16x128xf32>
    %399 = arith.negf %398 : vector<16x128xf32>
    %400 = math.exp %399 : vector<16x128xf32>
    %cst_128 = arith.constant 1.000000e+00 : f32
    %401 = vector.broadcast %cst_128 : f32 to vector<16x128xf32>
    %402 = arith.addf %401, %400 : vector<16x128xf32>
    %403 = arith.divf %401, %402 : vector<16x128xf32>
    %404 = arith.mulf %395, %376 : vector<16x128xf32>
    %405 = arith.mulf %389, %397 : vector<16x128xf32>
    %406 = arith.addf %404, %405 : vector<16x128xf32>
    %407 = math.tanh %406 : vector<16x128xf32>
    %408 = arith.mulf %403, %407 : vector<16x128xf32>
    %c4_129 = arith.constant 4 : index
    %c0_130 = arith.constant 0 : index
    %c0_131 = arith.constant 0 : index
    %409 = vector.load %arg24[%c4_129, %c0_130, %c0_131] : memref<8x16x512xf32, #tpu.memory_space<vmem>>, vector<1x16x512xf32>
    %410 = vector.shape_cast %409 : vector<1x16x512xf32> to vector<16x512xf32>
    %411 = arith.truncf %408 : vector<16x128xf32> to vector<16x128xbf16>
    %cst_132 = arith.constant dense<0.000000e+00> : vector<16x512xf32>
    %412 = tpu.matmul %411, %286, %cst_132 {dimension_numbers = #tpu.dot_dimension_numbers<[1], [0], [0], [1], [0, 0, 1, 1], [], []>} : vector<16x128xbf16>, vector<128x512xbf16>, vector<16x512xf32> -> vector<16x512xf32>
    %413 = arith.addf %410, %412 : vector<16x512xf32>
    %414 = vector.extract_strided_slice %413 {offsets = [0, 0], sizes = [16, 128], strides = [1, 1]} : vector<16x512xf32> to vector<16x128xf32>
    %415 = arith.negf %414 : vector<16x128xf32>
    %416 = math.exp %415 : vector<16x128xf32>
    %cst_133 = arith.constant 1.000000e+00 : f32
    %417 = vector.broadcast %cst_133 : f32 to vector<16x128xf32>
    %418 = arith.addf %417, %416 : vector<16x128xf32>
    %419 = arith.divf %417, %418 : vector<16x128xf32>
    %420 = vector.extract_strided_slice %413 {offsets = [0, 128], sizes = [16, 128], strides = [1, 1]} : vector<16x512xf32> to vector<16x128xf32>
    %421 = arith.negf %420 : vector<16x128xf32>
    %422 = math.exp %421 : vector<16x128xf32>
    %cst_134 = arith.constant 1.000000e+00 : f32
    %423 = vector.broadcast %cst_134 : f32 to vector<16x128xf32>
    %424 = arith.addf %423, %422 : vector<16x128xf32>
    %425 = arith.divf %423, %424 : vector<16x128xf32>
    %426 = vector.extract_strided_slice %413 {offsets = [0, 256], sizes = [16, 128], strides = [1, 1]} : vector<16x512xf32> to vector<16x128xf32>
    %427 = math.tanh %426 : vector<16x128xf32>
    %428 = vector.extract_strided_slice %413 {offsets = [0, 384], sizes = [16, 128], strides = [1, 1]} : vector<16x512xf32> to vector<16x128xf32>
    %429 = arith.negf %428 : vector<16x128xf32>
    %430 = math.exp %429 : vector<16x128xf32>
    %cst_135 = arith.constant 1.000000e+00 : f32
    %431 = vector.broadcast %cst_135 : f32 to vector<16x128xf32>
    %432 = arith.addf %431, %430 : vector<16x128xf32>
    %433 = arith.divf %431, %432 : vector<16x128xf32>
    %434 = arith.mulf %425, %406 : vector<16x128xf32>
    %435 = arith.mulf %419, %427 : vector<16x128xf32>
    %436 = arith.addf %434, %435 : vector<16x128xf32>
    %437 = math.tanh %436 : vector<16x128xf32>
    %438 = arith.mulf %433, %437 : vector<16x128xf32>
    %c5_136 = arith.constant 5 : index
    %c0_137 = arith.constant 0 : index
    %c0_138 = arith.constant 0 : index
    %439 = vector.load %arg24[%c5_136, %c0_137, %c0_138] : memref<8x16x512xf32, #tpu.memory_space<vmem>>, vector<1x16x512xf32>
    %440 = vector.shape_cast %439 : vector<1x16x512xf32> to vector<16x512xf32>
    %441 = arith.truncf %438 : vector<16x128xf32> to vector<16x128xbf16>
    %cst_139 = arith.constant dense<0.000000e+00> : vector<16x512xf32>
    %442 = tpu.matmul %441, %286, %cst_139 {dimension_numbers = #tpu.dot_dimension_numbers<[1], [0], [0], [1], [0, 0, 1, 1], [], []>} : vector<16x128xbf16>, vector<128x512xbf16>, vector<16x512xf32> -> vector<16x512xf32>
    %443 = arith.addf %440, %442 : vector<16x512xf32>
    %444 = vector.extract_strided_slice %443 {offsets = [0, 0], sizes = [16, 128], strides = [1, 1]} : vector<16x512xf32> to vector<16x128xf32>
    %445 = arith.negf %444 : vector<16x128xf32>
    %446 = math.exp %445 : vector<16x128xf32>
    %cst_140 = arith.constant 1.000000e+00 : f32
    %447 = vector.broadcast %cst_140 : f32 to vector<16x128xf32>
    %448 = arith.addf %447, %446 : vector<16x128xf32>
    %449 = arith.divf %447, %448 : vector<16x128xf32>
    %450 = vector.extract_strided_slice %443 {offsets = [0, 128], sizes = [16, 128], strides = [1, 1]} : vector<16x512xf32> to vector<16x128xf32>
    %451 = arith.negf %450 : vector<16x128xf32>
    %452 = math.exp %451 : vector<16x128xf32>
    %cst_141 = arith.constant 1.000000e+00 : f32
    %453 = vector.broadcast %cst_141 : f32 to vector<16x128xf32>
    %454 = arith.addf %453, %452 : vector<16x128xf32>
    %455 = arith.divf %453, %454 : vector<16x128xf32>
    %456 = vector.extract_strided_slice %443 {offsets = [0, 256], sizes = [16, 128], strides = [1, 1]} : vector<16x512xf32> to vector<16x128xf32>
    %457 = math.tanh %456 : vector<16x128xf32>
    %458 = vector.extract_strided_slice %443 {offsets = [0, 384], sizes = [16, 128], strides = [1, 1]} : vector<16x512xf32> to vector<16x128xf32>
    %459 = arith.negf %458 : vector<16x128xf32>
    %460 = math.exp %459 : vector<16x128xf32>
    %cst_142 = arith.constant 1.000000e+00 : f32
    %461 = vector.broadcast %cst_142 : f32 to vector<16x128xf32>
    %462 = arith.addf %461, %460 : vector<16x128xf32>
    %463 = arith.divf %461, %462 : vector<16x128xf32>
    %464 = arith.mulf %455, %436 : vector<16x128xf32>
    %465 = arith.mulf %449, %457 : vector<16x128xf32>
    %466 = arith.addf %464, %465 : vector<16x128xf32>
    %467 = math.tanh %466 : vector<16x128xf32>
    %468 = arith.mulf %463, %467 : vector<16x128xf32>
    %c6_143 = arith.constant 6 : index
    %c0_144 = arith.constant 0 : index
    %c0_145 = arith.constant 0 : index
    %469 = vector.load %arg24[%c6_143, %c0_144, %c0_145] : memref<8x16x512xf32, #tpu.memory_space<vmem>>, vector<1x16x512xf32>
    %470 = vector.shape_cast %469 : vector<1x16x512xf32> to vector<16x512xf32>
    %471 = arith.truncf %468 : vector<16x128xf32> to vector<16x128xbf16>
    %cst_146 = arith.constant dense<0.000000e+00> : vector<16x512xf32>
    %472 = tpu.matmul %471, %286, %cst_146 {dimension_numbers = #tpu.dot_dimension_numbers<[1], [0], [0], [1], [0, 0, 1, 1], [], []>} : vector<16x128xbf16>, vector<128x512xbf16>, vector<16x512xf32> -> vector<16x512xf32>
    %473 = arith.addf %470, %472 : vector<16x512xf32>
    %474 = vector.extract_strided_slice %473 {offsets = [0, 0], sizes = [16, 128], strides = [1, 1]} : vector<16x512xf32> to vector<16x128xf32>
    %475 = arith.negf %474 : vector<16x128xf32>
    %476 = math.exp %475 : vector<16x128xf32>
    %cst_147 = arith.constant 1.000000e+00 : f32
    %477 = vector.broadcast %cst_147 : f32 to vector<16x128xf32>
    %478 = arith.addf %477, %476 : vector<16x128xf32>
    %479 = arith.divf %477, %478 : vector<16x128xf32>
    %480 = vector.extract_strided_slice %473 {offsets = [0, 128], sizes = [16, 128], strides = [1, 1]} : vector<16x512xf32> to vector<16x128xf32>
    %481 = arith.negf %480 : vector<16x128xf32>
    %482 = math.exp %481 : vector<16x128xf32>
    %cst_148 = arith.constant 1.000000e+00 : f32
    %483 = vector.broadcast %cst_148 : f32 to vector<16x128xf32>
    %484 = arith.addf %483, %482 : vector<16x128xf32>
    %485 = arith.divf %483, %484 : vector<16x128xf32>
    %486 = vector.extract_strided_slice %473 {offsets = [0, 256], sizes = [16, 128], strides = [1, 1]} : vector<16x512xf32> to vector<16x128xf32>
    %487 = math.tanh %486 : vector<16x128xf32>
    %488 = vector.extract_strided_slice %473 {offsets = [0, 384], sizes = [16, 128], strides = [1, 1]} : vector<16x512xf32> to vector<16x128xf32>
    %489 = arith.negf %488 : vector<16x128xf32>
    %490 = math.exp %489 : vector<16x128xf32>
    %cst_149 = arith.constant 1.000000e+00 : f32
    %491 = vector.broadcast %cst_149 : f32 to vector<16x128xf32>
    %492 = arith.addf %491, %490 : vector<16x128xf32>
    %493 = arith.divf %491, %492 : vector<16x128xf32>
    %494 = arith.mulf %485, %466 : vector<16x128xf32>
    %495 = arith.mulf %479, %487 : vector<16x128xf32>
    %496 = arith.addf %494, %495 : vector<16x128xf32>
    %497 = math.tanh %496 : vector<16x128xf32>
    %498 = arith.mulf %493, %497 : vector<16x128xf32>
    %c7_150 = arith.constant 7 : index
    %c0_151 = arith.constant 0 : index
    %c0_152 = arith.constant 0 : index
    %499 = vector.load %arg24[%c7_150, %c0_151, %c0_152] : memref<8x16x512xf32, #tpu.memory_space<vmem>>, vector<1x16x512xf32>
    %500 = vector.shape_cast %499 : vector<1x16x512xf32> to vector<16x512xf32>
    %501 = arith.truncf %498 : vector<16x128xf32> to vector<16x128xbf16>
    %cst_153 = arith.constant dense<0.000000e+00> : vector<16x512xf32>
    %502 = tpu.matmul %501, %286, %cst_153 {dimension_numbers = #tpu.dot_dimension_numbers<[1], [0], [0], [1], [0, 0, 1, 1], [], []>} : vector<16x128xbf16>, vector<128x512xbf16>, vector<16x512xf32> -> vector<16x512xf32>
    %503 = arith.addf %500, %502 : vector<16x512xf32>
    %504 = vector.extract_strided_slice %503 {offsets = [0, 0], sizes = [16, 128], strides = [1, 1]} : vector<16x512xf32> to vector<16x128xf32>
    %505 = arith.negf %504 : vector<16x128xf32>
    %506 = math.exp %505 : vector<16x128xf32>
    %cst_154 = arith.constant 1.000000e+00 : f32
    %507 = vector.broadcast %cst_154 : f32 to vector<16x128xf32>
    %508 = arith.addf %507, %506 : vector<16x128xf32>
    %509 = arith.divf %507, %508 : vector<16x128xf32>
    %510 = vector.extract_strided_slice %503 {offsets = [0, 128], sizes = [16, 128], strides = [1, 1]} : vector<16x512xf32> to vector<16x128xf32>
    %511 = arith.negf %510 : vector<16x128xf32>
    %512 = math.exp %511 : vector<16x128xf32>
    %cst_155 = arith.constant 1.000000e+00 : f32
    %513 = vector.broadcast %cst_155 : f32 to vector<16x128xf32>
    %514 = arith.addf %513, %512 : vector<16x128xf32>
    %515 = arith.divf %513, %514 : vector<16x128xf32>
    %516 = vector.extract_strided_slice %503 {offsets = [0, 256], sizes = [16, 128], strides = [1, 1]} : vector<16x512xf32> to vector<16x128xf32>
    %517 = math.tanh %516 : vector<16x128xf32>
    %518 = vector.extract_strided_slice %503 {offsets = [0, 384], sizes = [16, 128], strides = [1, 1]} : vector<16x512xf32> to vector<16x128xf32>
    %519 = arith.negf %518 : vector<16x128xf32>
    %520 = math.exp %519 : vector<16x128xf32>
    %cst_156 = arith.constant 1.000000e+00 : f32
    %521 = vector.broadcast %cst_156 : f32 to vector<16x128xf32>
    %522 = arith.addf %521, %520 : vector<16x128xf32>
    %523 = arith.divf %521, %522 : vector<16x128xf32>
    %524 = arith.mulf %515, %496 : vector<16x128xf32>
    %525 = arith.mulf %509, %517 : vector<16x128xf32>
    %526 = arith.addf %524, %525 : vector<16x128xf32>
    %527 = math.tanh %526 : vector<16x128xf32>
    %528 = arith.mulf %523, %527 : vector<16x128xf32>
    %529 = arith.truncf %528 : vector<16x128xf32> to vector<16x128xbf16>
    %c0_157 = arith.constant 0 : index
    %c0_158 = arith.constant 0 : index
    %530 = vector.load %arg9[%c0_157, %c0_158] : memref<128x256xbf16, #tpu.memory_space<vmem>>, vector<128x256xbf16>
    %cst_159 = arith.constant dense<0.000000e+00> : vector<16x256xf32>
    %531 = tpu.matmul %529, %530, %cst_159 {dimension_numbers = #tpu.dot_dimension_numbers<[1], [0], [0], [1], [0, 0, 1, 1], [], []>} : vector<16x128xbf16>, vector<128x256xbf16>, vector<16x256xf32> -> vector<16x256xf32>
    %c0_160 = arith.constant 0 : index
    %c0_161 = arith.constant 0 : index
    %532 = vector.load %arg10[%c0_160, %c0_161] : memref<1x256xf32, #tpu.memory_space<vmem>>, vector<1x256xf32>
    %533 = vector.broadcast %532 : vector<1x256xf32> to vector<16x256xf32>
    %534 = arith.addf %531, %533 : vector<16x256xf32>
    %535 = vector.extract_strided_slice %534 {offsets = [0, 0], sizes = [16, 128], strides = [1, 1]} : vector<16x256xf32> to vector<16x128xf32>
    %536 = vector.extract_strided_slice %534 {offsets = [0, 128], sizes = [16, 128], strides = [1, 1]} : vector<16x256xf32> to vector<16x128xf32>
    %c0_162 = arith.constant 0 : index
    %c0_163 = arith.constant 0 : index
    %537 = vector.load %arg2[%c0_162, %c0_163] : memref<16x128xf32, #tpu.memory_space<vmem>>, vector<16x128xf32>
    %cst_164 = arith.constant 5.000000e-01 : f32
    %538 = vector.broadcast %cst_164 : f32 to vector<16x128xf32>
    %539 = arith.mulf %538, %536 : vector<16x128xf32>
    %540 = math.exp %539 : vector<16x128xf32>
    %541 = arith.mulf %537, %540 : vector<16x128xf32>
    %542 = arith.addf %541, %535 : vector<16x128xf32>
    %c0_165 = arith.constant 0 : index
    %c0_166 = arith.constant 0 : index
    %543 = vector.load %arg19[%c0_165, %c0_166] : memref<16x128xf32, #tpu.memory_space<vmem>>, vector<16x128xf32>
    tpu.vector_store %arg19[%c0_165, %c0_166], %535 {strides = array<i32>} : memref<16x128xf32, #tpu.memory_space<vmem>>, vector<16x128xf32>,
    %c0_167 = arith.constant 0 : index
    %c0_168 = arith.constant 0 : index
    %544 = vector.load %arg20[%c0_167, %c0_168] : memref<16x128xf32, #tpu.memory_space<vmem>>, vector<16x128xf32>
    tpu.vector_store %arg20[%c0_167, %c0_168], %536 {strides = array<i32>} : memref<16x128xf32, #tpu.memory_space<vmem>>, vector<16x128xf32>,
    %c0_169 = arith.constant 0 : index
    %c0_170 = arith.constant 0 : index
    %545 = vector.load %arg21[%c0_169, %c0_170] : memref<16x128xf32, #tpu.memory_space<vmem>>, vector<16x128xf32>
    tpu.vector_store %arg21[%c0_169, %c0_170], %542 {strides = array<i32>} : memref<16x128xf32, #tpu.memory_space<vmem>>, vector<16x128xf32>,
    %546 = arith.truncf %542 : vector<16x128xf32> to vector<16x128xbf16>
    %c0_171 = arith.constant 0 : index
    %c0_172 = arith.constant 0 : index
    %547 = vector.load %arg11[%c0_171, %c0_172] : memref<128x512xbf16, #tpu.memory_space<vmem>>, vector<128x512xbf16>
    %cst_173 = arith.constant dense<0.000000e+00> : vector<16x512xf32>
    %548 = tpu.matmul %546, %547, %cst_173 {dimension_numbers = #tpu.dot_dimension_numbers<[1], [0], [0], [1], [0, 0, 1, 1], [], []>} : vector<16x128xbf16>, vector<128x512xbf16>, vector<16x512xf32> -> vector<16x512xf32>
    %c0_174 = arith.constant 0 : index
    %c0_175 = arith.constant 0 : index
    %549 = vector.load %arg13[%c0_174, %c0_175] : memref<1x512xf32, #tpu.memory_space<vmem>>, vector<1x512xf32>
    %550 = vector.broadcast %549 : vector<1x512xf32> to vector<16x512xf32>
    %551 = arith.addf %548, %550 : vector<16x512xf32>
    %c0_176 = arith.constant 0 : index
    %c0_177 = arith.constant 0 : index
    %552 = vector.load %arg12[%c0_176, %c0_177] : memref<128x512xbf16, #tpu.memory_space<vmem>>, vector<128x512xbf16>
    %cst_178 = arith.constant 0.000000e+00 : f32
    %553 = vector.broadcast %cst_178 : f32 to vector<16x128xf32>
    %cst_179 = arith.constant 0.000000e+00 : f32
    %554 = vector.broadcast %cst_179 : f32 to vector<16x128xf32>
    %555 = arith.truncf %553 : vector<16x128xf32> to vector<16x128xbf16>
    %cst_180 = arith.constant dense<0.000000e+00> : vector<16x512xf32>
    %556 = tpu.matmul %555, %552, %cst_180 {dimension_numbers = #tpu.dot_dimension_numbers<[1], [0], [0], [1], [0, 0, 1, 1], [], []>} : vector<16x128xbf16>, vector<128x512xbf16>, vector<16x512xf32> -> vector<16x512xf32>
    %557 = arith.addf %551, %556 : vector<16x512xf32>
    %558 = vector.extract_strided_slice %557 {offsets = [0, 0], sizes = [16, 128], strides = [1, 1]} : vector<16x512xf32> to vector<16x128xf32>
    %559 = arith.negf %558 : vector<16x128xf32>
    %560 = math.exp %559 : vector<16x128xf32>
    %cst_181 = arith.constant 1.000000e+00 : f32
    %561 = vector.broadcast %cst_181 : f32 to vector<16x128xf32>
    %562 = arith.addf %561, %560 : vector<16x128xf32>
    %563 = arith.divf %561, %562 : vector<16x128xf32>
    %564 = vector.extract_strided_slice %557 {offsets = [0, 128], sizes = [16, 128], strides = [1, 1]} : vector<16x512xf32> to vector<16x128xf32>
    %565 = arith.negf %564 : vector<16x128xf32>
    %566 = math.exp %565 : vector<16x128xf32>
    %cst_182 = arith.constant 1.000000e+00 : f32
    %567 = vector.broadcast %cst_182 : f32 to vector<16x128xf32>
    %568 = arith.addf %567, %566 : vector<16x128xf32>
    %569 = arith.divf %567, %568 : vector<16x128xf32>
    %570 = vector.extract_strided_slice %557 {offsets = [0, 256], sizes = [16, 128], strides = [1, 1]} : vector<16x512xf32> to vector<16x128xf32>
    %571 = math.tanh %570 : vector<16x128xf32>
    %572 = vector.extract_strided_slice %557 {offsets = [0, 384], sizes = [16, 128], strides = [1, 1]} : vector<16x512xf32> to vector<16x128xf32>
    %573 = arith.negf %572 : vector<16x128xf32>
    %574 = math.exp %573 : vector<16x128xf32>
    %cst_183 = arith.constant 1.000000e+00 : f32
    %575 = vector.broadcast %cst_183 : f32 to vector<16x128xf32>
    %576 = arith.addf %575, %574 : vector<16x128xf32>
    %577 = arith.divf %575, %576 : vector<16x128xf32>
    %578 = arith.mulf %569, %554 : vector<16x128xf32>
    %579 = arith.mulf %563, %571 : vector<16x128xf32>
    %580 = arith.addf %578, %579 : vector<16x128xf32>
    %581 = math.tanh %580 : vector<16x128xf32>
    %582 = arith.mulf %577, %581 : vector<16x128xf32>
    %c0_184 = arith.constant 0 : index
    %c0_185 = arith.constant 0 : index
    %c0_186 = arith.constant 0 : index
    %583 = vector.load %arg23[%c0_184, %c0_185, %c0_186] : memref<8x16x128xf32, #tpu.memory_space<vmem>>, vector<1x16x128xf32>
    %584 = vector.shape_cast %583 : vector<1x16x128xf32> to vector<16x128xf32>
    %585 = vector.shape_cast %582 : vector<16x128xf32> to vector<1x16x128xf32>
    tpu.vector_store %arg23[%c0_184, %c0_185, %c0_186], %585 {strides = array<i32>} : memref<8x16x128xf32, #tpu.memory_space<vmem>>, vector<1x16x128xf32>,
    %586 = arith.truncf %582 : vector<16x128xf32> to vector<16x128xbf16>
    %cst_187 = arith.constant dense<0.000000e+00> : vector<16x512xf32>
    %587 = tpu.matmul %586, %552, %cst_187 {dimension_numbers = #tpu.dot_dimension_numbers<[1], [0], [0], [1], [0, 0, 1, 1], [], []>} : vector<16x128xbf16>, vector<128x512xbf16>, vector<16x512xf32> -> vector<16x512xf32>
    %588 = arith.addf %551, %587 : vector<16x512xf32>
    %589 = vector.extract_strided_slice %588 {offsets = [0, 0], sizes = [16, 128], strides = [1, 1]} : vector<16x512xf32> to vector<16x128xf32>
    %590 = arith.negf %589 : vector<16x128xf32>
    %591 = math.exp %590 : vector<16x128xf32>
    %cst_188 = arith.constant 1.000000e+00 : f32
    %592 = vector.broadcast %cst_188 : f32 to vector<16x128xf32>
    %593 = arith.addf %592, %591 : vector<16x128xf32>
    %594 = arith.divf %592, %593 : vector<16x128xf32>
    %595 = vector.extract_strided_slice %588 {offsets = [0, 128], sizes = [16, 128], strides = [1, 1]} : vector<16x512xf32> to vector<16x128xf32>
    %596 = arith.negf %595 : vector<16x128xf32>
    %597 = math.exp %596 : vector<16x128xf32>
    %cst_189 = arith.constant 1.000000e+00 : f32
    %598 = vector.broadcast %cst_189 : f32 to vector<16x128xf32>
    %599 = arith.addf %598, %597 : vector<16x128xf32>
    %600 = arith.divf %598, %599 : vector<16x128xf32>
    %601 = vector.extract_strided_slice %588 {offsets = [0, 256], sizes = [16, 128], strides = [1, 1]} : vector<16x512xf32> to vector<16x128xf32>
    %602 = math.tanh %601 : vector<16x128xf32>
    %603 = vector.extract_strided_slice %588 {offsets = [0, 384], sizes = [16, 128], strides = [1, 1]} : vector<16x512xf32> to vector<16x128xf32>
    %604 = arith.negf %603 : vector<16x128xf32>
    %605 = math.exp %604 : vector<16x128xf32>
    %cst_190 = arith.constant 1.000000e+00 : f32
    %606 = vector.broadcast %cst_190 : f32 to vector<16x128xf32>
    %607 = arith.addf %606, %605 : vector<16x128xf32>
    %608 = arith.divf %606, %607 : vector<16x128xf32>
    %609 = arith.mulf %600, %580 : vector<16x128xf32>
    %610 = arith.mulf %594, %602 : vector<16x128xf32>
    %611 = arith.addf %609, %610 : vector<16x128xf32>
    %612 = math.tanh %611 : vector<16x128xf32>
    %613 = arith.mulf %608, %612 : vector<16x128xf32>
    %c1_191 = arith.constant 1 : index
    %c0_192 = arith.constant 0 : index
    %c0_193 = arith.constant 0 : index
    %614 = vector.load %arg23[%c1_191, %c0_192, %c0_193] : memref<8x16x128xf32, #tpu.memory_space<vmem>>, vector<1x16x128xf32>
    %615 = vector.shape_cast %614 : vector<1x16x128xf32> to vector<16x128xf32>
    %616 = vector.shape_cast %613 : vector<16x128xf32> to vector<1x16x128xf32>
    tpu.vector_store %arg23[%c1_191, %c0_192, %c0_193], %616 {strides = array<i32>} : memref<8x16x128xf32, #tpu.memory_space<vmem>>, vector<1x16x128xf32>,
    %617 = arith.truncf %613 : vector<16x128xf32> to vector<16x128xbf16>
    %cst_194 = arith.constant dense<0.000000e+00> : vector<16x512xf32>
    %618 = tpu.matmul %617, %552, %cst_194 {dimension_numbers = #tpu.dot_dimension_numbers<[1], [0], [0], [1], [0, 0, 1, 1], [], []>} : vector<16x128xbf16>, vector<128x512xbf16>, vector<16x512xf32> -> vector<16x512xf32>
    %619 = arith.addf %551, %618 : vector<16x512xf32>
    %620 = vector.extract_strided_slice %619 {offsets = [0, 0], sizes = [16, 128], strides = [1, 1]} : vector<16x512xf32> to vector<16x128xf32>
    %621 = arith.negf %620 : vector<16x128xf32>
    %622 = math.exp %621 : vector<16x128xf32>
    %cst_195 = arith.constant 1.000000e+00 : f32
    %623 = vector.broadcast %cst_195 : f32 to vector<16x128xf32>
    %624 = arith.addf %623, %622 : vector<16x128xf32>
    %625 = arith.divf %623, %624 : vector<16x128xf32>
    %626 = vector.extract_strided_slice %619 {offsets = [0, 128], sizes = [16, 128], strides = [1, 1]} : vector<16x512xf32> to vector<16x128xf32>
    %627 = arith.negf %626 : vector<16x128xf32>
    %628 = math.exp %627 : vector<16x128xf32>
    %cst_196 = arith.constant 1.000000e+00 : f32
    %629 = vector.broadcast %cst_196 : f32 to vector<16x128xf32>
    %630 = arith.addf %629, %628 : vector<16x128xf32>
    %631 = arith.divf %629, %630 : vector<16x128xf32>
    %632 = vector.extract_strided_slice %619 {offsets = [0, 256], sizes = [16, 128], strides = [1, 1]} : vector<16x512xf32> to vector<16x128xf32>
    %633 = math.tanh %632 : vector<16x128xf32>
    %634 = vector.extract_strided_slice %619 {offsets = [0, 384], sizes = [16, 128], strides = [1, 1]} : vector<16x512xf32> to vector<16x128xf32>
    %635 = arith.negf %634 : vector<16x128xf32>
    %636 = math.exp %635 : vector<16x128xf32>
    %cst_197 = arith.constant 1.000000e+00 : f32
    %637 = vector.broadcast %cst_197 : f32 to vector<16x128xf32>
    %638 = arith.addf %637, %636 : vector<16x128xf32>
    %639 = arith.divf %637, %638 : vector<16x128xf32>
    %640 = arith.mulf %631, %611 : vector<16x128xf32>
    %641 = arith.mulf %625, %633 : vector<16x128xf32>
    %642 = arith.addf %640, %641 : vector<16x128xf32>
    %643 = math.tanh %642 : vector<16x128xf32>
    %644 = arith.mulf %639, %643 : vector<16x128xf32>
    %c2_198 = arith.constant 2 : index
    %c0_199 = arith.constant 0 : index
    %c0_200 = arith.constant 0 : index
    %645 = vector.load %arg23[%c2_198, %c0_199, %c0_200] : memref<8x16x128xf32, #tpu.memory_space<vmem>>, vector<1x16x128xf32>
    %646 = vector.shape_cast %645 : vector<1x16x128xf32> to vector<16x128xf32>
    %647 = vector.shape_cast %644 : vector<16x128xf32> to vector<1x16x128xf32>
    tpu.vector_store %arg23[%c2_198, %c0_199, %c0_200], %647 {strides = array<i32>} : memref<8x16x128xf32, #tpu.memory_space<vmem>>, vector<1x16x128xf32>,
    %648 = arith.truncf %644 : vector<16x128xf32> to vector<16x128xbf16>
    %cst_201 = arith.constant dense<0.000000e+00> : vector<16x512xf32>
    %649 = tpu.matmul %648, %552, %cst_201 {dimension_numbers = #tpu.dot_dimension_numbers<[1], [0], [0], [1], [0, 0, 1, 1], [], []>} : vector<16x128xbf16>, vector<128x512xbf16>, vector<16x512xf32> -> vector<16x512xf32>
    %650 = arith.addf %551, %649 : vector<16x512xf32>
    %651 = vector.extract_strided_slice %650 {offsets = [0, 0], sizes = [16, 128], strides = [1, 1]} : vector<16x512xf32> to vector<16x128xf32>
    %652 = arith.negf %651 : vector<16x128xf32>
    %653 = math.exp %652 : vector<16x128xf32>
    %cst_202 = arith.constant 1.000000e+00 : f32
    %654 = vector.broadcast %cst_202 : f32 to vector<16x128xf32>
    %655 = arith.addf %654, %653 : vector<16x128xf32>
    %656 = arith.divf %654, %655 : vector<16x128xf32>
    %657 = vector.extract_strided_slice %650 {offsets = [0, 128], sizes = [16, 128], strides = [1, 1]} : vector<16x512xf32> to vector<16x128xf32>
    %658 = arith.negf %657 : vector<16x128xf32>
    %659 = math.exp %658 : vector<16x128xf32>
    %cst_203 = arith.constant 1.000000e+00 : f32
    %660 = vector.broadcast %cst_203 : f32 to vector<16x128xf32>
    %661 = arith.addf %660, %659 : vector<16x128xf32>
    %662 = arith.divf %660, %661 : vector<16x128xf32>
    %663 = vector.extract_strided_slice %650 {offsets = [0, 256], sizes = [16, 128], strides = [1, 1]} : vector<16x512xf32> to vector<16x128xf32>
    %664 = math.tanh %663 : vector<16x128xf32>
    %665 = vector.extract_strided_slice %650 {offsets = [0, 384], sizes = [16, 128], strides = [1, 1]} : vector<16x512xf32> to vector<16x128xf32>
    %666 = arith.negf %665 : vector<16x128xf32>
    %667 = math.exp %666 : vector<16x128xf32>
    %cst_204 = arith.constant 1.000000e+00 : f32
    %668 = vector.broadcast %cst_204 : f32 to vector<16x128xf32>
    %669 = arith.addf %668, %667 : vector<16x128xf32>
    %670 = arith.divf %668, %669 : vector<16x128xf32>
    %671 = arith.mulf %662, %642 : vector<16x128xf32>
    %672 = arith.mulf %656, %664 : vector<16x128xf32>
    %673 = arith.addf %671, %672 : vector<16x128xf32>
    %674 = math.tanh %673 : vector<16x128xf32>
    %675 = arith.mulf %670, %674 : vector<16x128xf32>
    %c3_205 = arith.constant 3 : index
    %c0_206 = arith.constant 0 : index
    %c0_207 = arith.constant 0 : index
    %676 = vector.load %arg23[%c3_205, %c0_206, %c0_207] : memref<8x16x128xf32, #tpu.memory_space<vmem>>, vector<1x16x128xf32>
    %677 = vector.shape_cast %676 : vector<1x16x128xf32> to vector<16x128xf32>
    %678 = vector.shape_cast %675 : vector<16x128xf32> to vector<1x16x128xf32>
    tpu.vector_store %arg23[%c3_205, %c0_206, %c0_207], %678 {strides = array<i32>} : memref<8x16x128xf32, #tpu.memory_space<vmem>>, vector<1x16x128xf32>,
    %679 = arith.truncf %675 : vector<16x128xf32> to vector<16x128xbf16>
    %cst_208 = arith.constant dense<0.000000e+00> : vector<16x512xf32>
    %680 = tpu.matmul %679, %552, %cst_208 {dimension_numbers = #tpu.dot_dimension_numbers<[1], [0], [0], [1], [0, 0, 1, 1], [], []>} : vector<16x128xbf16>, vector<128x512xbf16>, vector<16x512xf32> -> vector<16x512xf32>
    %681 = arith.addf %551, %680 : vector<16x512xf32>
    %682 = vector.extract_strided_slice %681 {offsets = [0, 0], sizes = [16, 128], strides = [1, 1]} : vector<16x512xf32> to vector<16x128xf32>
    %683 = arith.negf %682 : vector<16x128xf32>
    %684 = math.exp %683 : vector<16x128xf32>
    %cst_209 = arith.constant 1.000000e+00 : f32
    %685 = vector.broadcast %cst_209 : f32 to vector<16x128xf32>
    %686 = arith.addf %685, %684 : vector<16x128xf32>
    %687 = arith.divf %685, %686 : vector<16x128xf32>
    %688 = vector.extract_strided_slice %681 {offsets = [0, 128], sizes = [16, 128], strides = [1, 1]} : vector<16x512xf32> to vector<16x128xf32>
    %689 = arith.negf %688 : vector<16x128xf32>
    %690 = math.exp %689 : vector<16x128xf32>
    %cst_210 = arith.constant 1.000000e+00 : f32
    %691 = vector.broadcast %cst_210 : f32 to vector<16x128xf32>
    %692 = arith.addf %691, %690 : vector<16x128xf32>
    %693 = arith.divf %691, %692 : vector<16x128xf32>
    %694 = vector.extract_strided_slice %681 {offsets = [0, 256], sizes = [16, 128], strides = [1, 1]} : vector<16x512xf32> to vector<16x128xf32>
    %695 = math.tanh %694 : vector<16x128xf32>
    %696 = vector.extract_strided_slice %681 {offsets = [0, 384], sizes = [16, 128], strides = [1, 1]} : vector<16x512xf32> to vector<16x128xf32>
    %697 = arith.negf %696 : vector<16x128xf32>
    %698 = math.exp %697 : vector<16x128xf32>
    %cst_211 = arith.constant 1.000000e+00 : f32
    %699 = vector.broadcast %cst_211 : f32 to vector<16x128xf32>
    %700 = arith.addf %699, %698 : vector<16x128xf32>
    %701 = arith.divf %699, %700 : vector<16x128xf32>
    %702 = arith.mulf %693, %673 : vector<16x128xf32>
    %703 = arith.mulf %687, %695 : vector<16x128xf32>
    %704 = arith.addf %702, %703 : vector<16x128xf32>
    %705 = math.tanh %704 : vector<16x128xf32>
    %706 = arith.mulf %701, %705 : vector<16x128xf32>
    %c4_212 = arith.constant 4 : index
    %c0_213 = arith.constant 0 : index
    %c0_214 = arith.constant 0 : index
    %707 = vector.load %arg23[%c4_212, %c0_213, %c0_214] : memref<8x16x128xf32, #tpu.memory_space<vmem>>, vector<1x16x128xf32>
    %708 = vector.shape_cast %707 : vector<1x16x128xf32> to vector<16x128xf32>
    %709 = vector.shape_cast %706 : vector<16x128xf32> to vector<1x16x128xf32>
    tpu.vector_store %arg23[%c4_212, %c0_213, %c0_214], %709 {strides = array<i32>} : memref<8x16x128xf32, #tpu.memory_space<vmem>>, vector<1x16x128xf32>,
    %710 = arith.truncf %706 : vector<16x128xf32> to vector<16x128xbf16>
    %cst_215 = arith.constant dense<0.000000e+00> : vector<16x512xf32>
    %711 = tpu.matmul %710, %552, %cst_215 {dimension_numbers = #tpu.dot_dimension_numbers<[1], [0], [0], [1], [0, 0, 1, 1], [], []>} : vector<16x128xbf16>, vector<128x512xbf16>, vector<16x512xf32> -> vector<16x512xf32>
    %712 = arith.addf %551, %711 : vector<16x512xf32>
    %713 = vector.extract_strided_slice %712 {offsets = [0, 0], sizes = [16, 128], strides = [1, 1]} : vector<16x512xf32> to vector<16x128xf32>
    %714 = arith.negf %713 : vector<16x128xf32>
    %715 = math.exp %714 : vector<16x128xf32>
    %cst_216 = arith.constant 1.000000e+00 : f32
    %716 = vector.broadcast %cst_216 : f32 to vector<16x128xf32>
    %717 = arith.addf %716, %715 : vector<16x128xf32>
    %718 = arith.divf %716, %717 : vector<16x128xf32>
    %719 = vector.extract_strided_slice %712 {offsets = [0, 128], sizes = [16, 128], strides = [1, 1]} : vector<16x512xf32> to vector<16x128xf32>
    %720 = arith.negf %719 : vector<16x128xf32>
    %721 = math.exp %720 : vector<16x128xf32>
    %cst_217 = arith.constant 1.000000e+00 : f32
    %722 = vector.broadcast %cst_217 : f32 to vector<16x128xf32>
    %723 = arith.addf %722, %721 : vector<16x128xf32>
    %724 = arith.divf %722, %723 : vector<16x128xf32>
    %725 = vector.extract_strided_slice %712 {offsets = [0, 256], sizes = [16, 128], strides = [1, 1]} : vector<16x512xf32> to vector<16x128xf32>
    %726 = math.tanh %725 : vector<16x128xf32>
    %727 = vector.extract_strided_slice %712 {offsets = [0, 384], sizes = [16, 128], strides = [1, 1]} : vector<16x512xf32> to vector<16x128xf32>
    %728 = arith.negf %727 : vector<16x128xf32>
    %729 = math.exp %728 : vector<16x128xf32>
    %cst_218 = arith.constant 1.000000e+00 : f32
    %730 = vector.broadcast %cst_218 : f32 to vector<16x128xf32>
    %731 = arith.addf %730, %729 : vector<16x128xf32>
    %732 = arith.divf %730, %731 : vector<16x128xf32>
    %733 = arith.mulf %724, %704 : vector<16x128xf32>
    %734 = arith.mulf %718, %726 : vector<16x128xf32>
    %735 = arith.addf %733, %734 : vector<16x128xf32>
    %736 = math.tanh %735 : vector<16x128xf32>
    %737 = arith.mulf %732, %736 : vector<16x128xf32>
    %c5_219 = arith.constant 5 : index
    %c0_220 = arith.constant 0 : index
    %c0_221 = arith.constant 0 : index
    %738 = vector.load %arg23[%c5_219, %c0_220, %c0_221] : memref<8x16x128xf32, #tpu.memory_space<vmem>>, vector<1x16x128xf32>
    %739 = vector.shape_cast %738 : vector<1x16x128xf32> to vector<16x128xf32>
    %740 = vector.shape_cast %737 : vector<16x128xf32> to vector<1x16x128xf32>
    tpu.vector_store %arg23[%c5_219, %c0_220, %c0_221], %740 {strides = array<i32>} : memref<8x16x128xf32, #tpu.memory_space<vmem>>, vector<1x16x128xf32>,
    %741 = arith.truncf %737 : vector<16x128xf32> to vector<16x128xbf16>
    %cst_222 = arith.constant dense<0.000000e+00> : vector<16x512xf32>
    %742 = tpu.matmul %741, %552, %cst_222 {dimension_numbers = #tpu.dot_dimension_numbers<[1], [0], [0], [1], [0, 0, 1, 1], [], []>} : vector<16x128xbf16>, vector<128x512xbf16>, vector<16x512xf32> -> vector<16x512xf32>
    %743 = arith.addf %551, %742 : vector<16x512xf32>
    %744 = vector.extract_strided_slice %743 {offsets = [0, 0], sizes = [16, 128], strides = [1, 1]} : vector<16x512xf32> to vector<16x128xf32>
    %745 = arith.negf %744 : vector<16x128xf32>
    %746 = math.exp %745 : vector<16x128xf32>
    %cst_223 = arith.constant 1.000000e+00 : f32
    %747 = vector.broadcast %cst_223 : f32 to vector<16x128xf32>
    %748 = arith.addf %747, %746 : vector<16x128xf32>
    %749 = arith.divf %747, %748 : vector<16x128xf32>
    %750 = vector.extract_strided_slice %743 {offsets = [0, 128], sizes = [16, 128], strides = [1, 1]} : vector<16x512xf32> to vector<16x128xf32>
    %751 = arith.negf %750 : vector<16x128xf32>
    %752 = math.exp %751 : vector<16x128xf32>
    %cst_224 = arith.constant 1.000000e+00 : f32
    %753 = vector.broadcast %cst_224 : f32 to vector<16x128xf32>
    %754 = arith.addf %753, %752 : vector<16x128xf32>
    %755 = arith.divf %753, %754 : vector<16x128xf32>
    %756 = vector.extract_strided_slice %743 {offsets = [0, 256], sizes = [16, 128], strides = [1, 1]} : vector<16x512xf32> to vector<16x128xf32>
    %757 = math.tanh %756 : vector<16x128xf32>
    %758 = vector.extract_strided_slice %743 {offsets = [0, 384], sizes = [16, 128], strides = [1, 1]} : vector<16x512xf32> to vector<16x128xf32>
    %759 = arith.negf %758 : vector<16x128xf32>
    %760 = math.exp %759 : vector<16x128xf32>
    %cst_225 = arith.constant 1.000000e+00 : f32
    %761 = vector.broadcast %cst_225 : f32 to vector<16x128xf32>
    %762 = arith.addf %761, %760 : vector<16x128xf32>
    %763 = arith.divf %761, %762 : vector<16x128xf32>
    %764 = arith.mulf %755, %735 : vector<16x128xf32>
    %765 = arith.mulf %749, %757 : vector<16x128xf32>
    %766 = arith.addf %764, %765 : vector<16x128xf32>
    %767 = math.tanh %766 : vector<16x128xf32>
    %768 = arith.mulf %763, %767 : vector<16x128xf32>
    %c6_226 = arith.constant 6 : index
    %c0_227 = arith.constant 0 : index
    %c0_228 = arith.constant 0 : index
    %769 = vector.load %arg23[%c6_226, %c0_227, %c0_228] : memref<8x16x128xf32, #tpu.memory_space<vmem>>, vector<1x16x128xf32>
    %770 = vector.shape_cast %769 : vector<1x16x128xf32> to vector<16x128xf32>
    %771 = vector.shape_cast %768 : vector<16x128xf32> to vector<1x16x128xf32>
    tpu.vector_store %arg23[%c6_226, %c0_227, %c0_228], %771 {strides = array<i32>} : memref<8x16x128xf32, #tpu.memory_space<vmem>>, vector<1x16x128xf32>,
    %772 = arith.truncf %768 : vector<16x128xf32> to vector<16x128xbf16>
    %cst_229 = arith.constant dense<0.000000e+00> : vector<16x512xf32>
    %773 = tpu.matmul %772, %552, %cst_229 {dimension_numbers = #tpu.dot_dimension_numbers<[1], [0], [0], [1], [0, 0, 1, 1], [], []>} : vector<16x128xbf16>, vector<128x512xbf16>, vector<16x512xf32> -> vector<16x512xf32>
    %774 = arith.addf %551, %773 : vector<16x512xf32>
    %775 = vector.extract_strided_slice %774 {offsets = [0, 0], sizes = [16, 128], strides = [1, 1]} : vector<16x512xf32> to vector<16x128xf32>
    %776 = arith.negf %775 : vector<16x128xf32>
    %777 = math.exp %776 : vector<16x128xf32>
    %cst_230 = arith.constant 1.000000e+00 : f32
    %778 = vector.broadcast %cst_230 : f32 to vector<16x128xf32>
    %779 = arith.addf %778, %777 : vector<16x128xf32>
    %780 = arith.divf %778, %779 : vector<16x128xf32>
    %781 = vector.extract_strided_slice %774 {offsets = [0, 128], sizes = [16, 128], strides = [1, 1]} : vector<16x512xf32> to vector<16x128xf32>
    %782 = arith.negf %781 : vector<16x128xf32>
    %783 = math.exp %782 : vector<16x128xf32>
    %cst_231 = arith.constant 1.000000e+00 : f32
    %784 = vector.broadcast %cst_231 : f32 to vector<16x128xf32>
    %785 = arith.addf %784, %783 : vector<16x128xf32>
    %786 = arith.divf %784, %785 : vector<16x128xf32>
    %787 = vector.extract_strided_slice %774 {offsets = [0, 256], sizes = [16, 128], strides = [1, 1]} : vector<16x512xf32> to vector<16x128xf32>
    %788 = math.tanh %787 : vector<16x128xf32>
    %789 = vector.extract_strided_slice %774 {offsets = [0, 384], sizes = [16, 128], strides = [1, 1]} : vector<16x512xf32> to vector<16x128xf32>
    %790 = arith.negf %789 : vector<16x128xf32>
    %791 = math.exp %790 : vector<16x128xf32>
    %cst_232 = arith.constant 1.000000e+00 : f32
    %792 = vector.broadcast %cst_232 : f32 to vector<16x128xf32>
    %793 = arith.addf %792, %791 : vector<16x128xf32>
    %794 = arith.divf %792, %793 : vector<16x128xf32>
    %795 = arith.mulf %786, %766 : vector<16x128xf32>
    %796 = arith.mulf %780, %788 : vector<16x128xf32>
    %797 = arith.addf %795, %796 : vector<16x128xf32>
    %798 = math.tanh %797 : vector<16x128xf32>
    %799 = arith.mulf %794, %798 : vector<16x128xf32>
    %c7_233 = arith.constant 7 : index
    %c0_234 = arith.constant 0 : index
    %c0_235 = arith.constant 0 : index
    %800 = vector.load %arg23[%c7_233, %c0_234, %c0_235] : memref<8x16x128xf32, #tpu.memory_space<vmem>>, vector<1x16x128xf32>
    %801 = vector.shape_cast %800 : vector<1x16x128xf32> to vector<16x128xf32>
    %802 = vector.shape_cast %799 : vector<16x128xf32> to vector<1x16x128xf32>
    tpu.vector_store %arg23[%c7_233, %c0_234, %c0_235], %802 {strides = array<i32>} : memref<8x16x128xf32, #tpu.memory_space<vmem>>, vector<1x16x128xf32>,
    %c0_236 = arith.constant 0 : index
    %c0_237 = arith.constant 0 : index
    %c0_238 = arith.constant 0 : index
    %803 = vector.load %arg23[%c0_236, %c0_237, %c0_238] : memref<8x16x128xf32, #tpu.memory_space<vmem>>, vector<8x16x128xf32>
    %804 = vector.shape_cast %803 : vector<8x16x128xf32> to vector<128x128xf32>
    %805 = arith.truncf %804 : vector<128x128xf32> to vector<128x128xbf16>
    %c0_239 = arith.constant 0 : index
    %c0_240 = arith.constant 0 : index
    %806 = vector.load %arg14[%c0_239, %c0_240] : memref<128x512xbf16, #tpu.memory_space<vmem>>, vector<128x512xbf16>
    %cst_241 = arith.constant dense<0.000000e+00> : vector<128x512xf32>
    %807 = tpu.matmul %805, %806, %cst_241 {dimension_numbers = #tpu.dot_dimension_numbers<[1], [0], [0], [1], [0, 0, 1, 1], [], []>} : vector<128x128xbf16>, vector<128x512xbf16>, vector<128x512xf32> -> vector<128x512xf32>
    %c0_242 = arith.constant 0 : index
    %c0_243 = arith.constant 0 : index
    %808 = vector.load %arg16[%c0_242, %c0_243] : memref<1x512xf32, #tpu.memory_space<vmem>>, vector<1x512xf32>
    %809 = vector.broadcast %808 : vector<1x512xf32> to vector<128x512xf32>
    %810 = arith.addf %807, %809 : vector<128x512xf32>
    %811 = vector.shape_cast %810 : vector<128x512xf32> to vector<8x16x512xf32>
    %c0_244 = arith.constant 0 : index
    %c0_245 = arith.constant 0 : index
    %c0_246 = arith.constant 0 : index
    %812 = vector.load %arg24[%c0_244, %c0_245, %c0_246] : memref<8x16x512xf32, #tpu.memory_space<vmem>>, vector<8x16x512xf32>
    tpu.vector_store %arg24[%c0_244, %c0_245, %c0_246], %811 {strides = array<i32>} : memref<8x16x512xf32, #tpu.memory_space<vmem>>, vector<8x16x512xf32>,
    %c0_247 = arith.constant 0 : index
    %c0_248 = arith.constant 0 : index
    %813 = vector.load %arg15[%c0_247, %c0_248] : memref<128x512xbf16, #tpu.memory_space<vmem>>, vector<128x512xbf16>
    %cst_249 = arith.constant 0.000000e+00 : f32
    %814 = vector.broadcast %cst_249 : f32 to vector<16x128xf32>
    %cst_250 = arith.constant 0.000000e+00 : f32
    %815 = vector.broadcast %cst_250 : f32 to vector<16x128xf32>
    %c0_251 = arith.constant 0 : index
    %c0_252 = arith.constant 0 : index
    %c0_253 = arith.constant 0 : index
    %816 = vector.load %arg24[%c0_251, %c0_252, %c0_253] : memref<8x16x512xf32, #tpu.memory_space<vmem>>, vector<1x16x512xf32>
    %817 = vector.shape_cast %816 : vector<1x16x512xf32> to vector<16x512xf32>
    %818 = arith.truncf %814 : vector<16x128xf32> to vector<16x128xbf16>
    %cst_254 = arith.constant dense<0.000000e+00> : vector<16x512xf32>
    %819 = tpu.matmul %818, %813, %cst_254 {dimension_numbers = #tpu.dot_dimension_numbers<[1], [0], [0], [1], [0, 0, 1, 1], [], []>} : vector<16x128xbf16>, vector<128x512xbf16>, vector<16x512xf32> -> vector<16x512xf32>
    %820 = arith.addf %817, %819 : vector<16x512xf32>
    %821 = vector.extract_strided_slice %820 {offsets = [0, 0], sizes = [16, 128], strides = [1, 1]} : vector<16x512xf32> to vector<16x128xf32>
    %822 = arith.negf %821 : vector<16x128xf32>
    %823 = math.exp %822 : vector<16x128xf32>
    %cst_255 = arith.constant 1.000000e+00 : f32
    %824 = vector.broadcast %cst_255 : f32 to vector<16x128xf32>
    %825 = arith.addf %824, %823 : vector<16x128xf32>
    %826 = arith.divf %824, %825 : vector<16x128xf32>
    %827 = vector.extract_strided_slice %820 {offsets = [0, 128], sizes = [16, 128], strides = [1, 1]} : vector<16x512xf32> to vector<16x128xf32>
    %828 = arith.negf %827 : vector<16x128xf32>
    %829 = math.exp %828 : vector<16x128xf32>
    %cst_256 = arith.constant 1.000000e+00 : f32
    %830 = vector.broadcast %cst_256 : f32 to vector<16x128xf32>
    %831 = arith.addf %830, %829 : vector<16x128xf32>
    %832 = arith.divf %830, %831 : vector<16x128xf32>
    %833 = vector.extract_strided_slice %820 {offsets = [0, 256], sizes = [16, 128], strides = [1, 1]} : vector<16x512xf32> to vector<16x128xf32>
    %834 = math.tanh %833 : vector<16x128xf32>
    %835 = vector.extract_strided_slice %820 {offsets = [0, 384], sizes = [16, 128], strides = [1, 1]} : vector<16x512xf32> to vector<16x128xf32>
    %836 = arith.negf %835 : vector<16x128xf32>
    %837 = math.exp %836 : vector<16x128xf32>
    %cst_257 = arith.constant 1.000000e+00 : f32
    %838 = vector.broadcast %cst_257 : f32 to vector<16x128xf32>
    %839 = arith.addf %838, %837 : vector<16x128xf32>
    %840 = arith.divf %838, %839 : vector<16x128xf32>
    %841 = arith.mulf %832, %815 : vector<16x128xf32>
    %842 = arith.mulf %826, %834 : vector<16x128xf32>
    %843 = arith.addf %841, %842 : vector<16x128xf32>
    %844 = math.tanh %843 : vector<16x128xf32>
    %845 = arith.mulf %840, %844 : vector<16x128xf32>
    %c0_258 = arith.constant 0 : index
    %c0_259 = arith.constant 0 : index
    %c0_260 = arith.constant 0 : index
    %846 = vector.load %arg23[%c0_258, %c0_259, %c0_260] : memref<8x16x128xf32, #tpu.memory_space<vmem>>, vector<1x16x128xf32>
    %847 = vector.shape_cast %846 : vector<1x16x128xf32> to vector<16x128xf32>
    %848 = vector.shape_cast %845 : vector<16x128xf32> to vector<1x16x128xf32>
    tpu.vector_store %arg23[%c0_258, %c0_259, %c0_260], %848 {strides = array<i32>} : memref<8x16x128xf32, #tpu.memory_space<vmem>>, vector<1x16x128xf32>,
    %c1_261 = arith.constant 1 : index
    %c0_262 = arith.constant 0 : index
    %c0_263 = arith.constant 0 : index
    %849 = vector.load %arg24[%c1_261, %c0_262, %c0_263] : memref<8x16x512xf32, #tpu.memory_space<vmem>>, vector<1x16x512xf32>
    %850 = vector.shape_cast %849 : vector<1x16x512xf32> to vector<16x512xf32>
    %851 = arith.truncf %845 : vector<16x128xf32> to vector<16x128xbf16>
    %cst_264 = arith.constant dense<0.000000e+00> : vector<16x512xf32>
    %852 = tpu.matmul %851, %813, %cst_264 {dimension_numbers = #tpu.dot_dimension_numbers<[1], [0], [0], [1], [0, 0, 1, 1], [], []>} : vector<16x128xbf16>, vector<128x512xbf16>, vector<16x512xf32> -> vector<16x512xf32>
    %853 = arith.addf %850, %852 : vector<16x512xf32>
    %854 = vector.extract_strided_slice %853 {offsets = [0, 0], sizes = [16, 128], strides = [1, 1]} : vector<16x512xf32> to vector<16x128xf32>
    %855 = arith.negf %854 : vector<16x128xf32>
    %856 = math.exp %855 : vector<16x128xf32>
    %cst_265 = arith.constant 1.000000e+00 : f32
    %857 = vector.broadcast %cst_265 : f32 to vector<16x128xf32>
    %858 = arith.addf %857, %856 : vector<16x128xf32>
    %859 = arith.divf %857, %858 : vector<16x128xf32>
    %860 = vector.extract_strided_slice %853 {offsets = [0, 128], sizes = [16, 128], strides = [1, 1]} : vector<16x512xf32> to vector<16x128xf32>
    %861 = arith.negf %860 : vector<16x128xf32>
    %862 = math.exp %861 : vector<16x128xf32>
    %cst_266 = arith.constant 1.000000e+00 : f32
    %863 = vector.broadcast %cst_266 : f32 to vector<16x128xf32>
    %864 = arith.addf %863, %862 : vector<16x128xf32>
    %865 = arith.divf %863, %864 : vector<16x128xf32>
    %866 = vector.extract_strided_slice %853 {offsets = [0, 256], sizes = [16, 128], strides = [1, 1]} : vector<16x512xf32> to vector<16x128xf32>
    %867 = math.tanh %866 : vector<16x128xf32>
    %868 = vector.extract_strided_slice %853 {offsets = [0, 384], sizes = [16, 128], strides = [1, 1]} : vector<16x512xf32> to vector<16x128xf32>
    %869 = arith.negf %868 : vector<16x128xf32>
    %870 = math.exp %869 : vector<16x128xf32>
    %cst_267 = arith.constant 1.000000e+00 : f32
    %871 = vector.broadcast %cst_267 : f32 to vector<16x128xf32>
    %872 = arith.addf %871, %870 : vector<16x128xf32>
    %873 = arith.divf %871, %872 : vector<16x128xf32>
    %874 = arith.mulf %865, %843 : vector<16x128xf32>
    %875 = arith.mulf %859, %867 : vector<16x128xf32>
    %876 = arith.addf %874, %875 : vector<16x128xf32>
    %877 = math.tanh %876 : vector<16x128xf32>
    %878 = arith.mulf %873, %877 : vector<16x128xf32>
    %c1_268 = arith.constant 1 : index
    %c0_269 = arith.constant 0 : index
    %c0_270 = arith.constant 0 : index
    %879 = vector.load %arg23[%c1_268, %c0_269, %c0_270] : memref<8x16x128xf32, #tpu.memory_space<vmem>>, vector<1x16x128xf32>
    %880 = vector.shape_cast %879 : vector<1x16x128xf32> to vector<16x128xf32>
    %881 = vector.shape_cast %878 : vector<16x128xf32> to vector<1x16x128xf32>
    tpu.vector_store %arg23[%c1_268, %c0_269, %c0_270], %881 {strides = array<i32>} : memref<8x16x128xf32, #tpu.memory_space<vmem>>, vector<1x16x128xf32>,
    %c2_271 = arith.constant 2 : index
    %c0_272 = arith.constant 0 : index
    %c0_273 = arith.constant 0 : index
    %882 = vector.load %arg24[%c2_271, %c0_272, %c0_273] : memref<8x16x512xf32, #tpu.memory_space<vmem>>, vector<1x16x512xf32>
    %883 = vector.shape_cast %882 : vector<1x16x512xf32> to vector<16x512xf32>
    %884 = arith.truncf %878 : vector<16x128xf32> to vector<16x128xbf16>
    %cst_274 = arith.constant dense<0.000000e+00> : vector<16x512xf32>
    %885 = tpu.matmul %884, %813, %cst_274 {dimension_numbers = #tpu.dot_dimension_numbers<[1], [0], [0], [1], [0, 0, 1, 1], [], []>} : vector<16x128xbf16>, vector<128x512xbf16>, vector<16x512xf32> -> vector<16x512xf32>
    %886 = arith.addf %883, %885 : vector<16x512xf32>
    %887 = vector.extract_strided_slice %886 {offsets = [0, 0], sizes = [16, 128], strides = [1, 1]} : vector<16x512xf32> to vector<16x128xf32>
    %888 = arith.negf %887 : vector<16x128xf32>
    %889 = math.exp %888 : vector<16x128xf32>
    %cst_275 = arith.constant 1.000000e+00 : f32
    %890 = vector.broadcast %cst_275 : f32 to vector<16x128xf32>
    %891 = arith.addf %890, %889 : vector<16x128xf32>
    %892 = arith.divf %890, %891 : vector<16x128xf32>
    %893 = vector.extract_strided_slice %886 {offsets = [0, 128], sizes = [16, 128], strides = [1, 1]} : vector<16x512xf32> to vector<16x128xf32>
    %894 = arith.negf %893 : vector<16x128xf32>
    %895 = math.exp %894 : vector<16x128xf32>
    %cst_276 = arith.constant 1.000000e+00 : f32
    %896 = vector.broadcast %cst_276 : f32 to vector<16x128xf32>
    %897 = arith.addf %896, %895 : vector<16x128xf32>
    %898 = arith.divf %896, %897 : vector<16x128xf32>
    %899 = vector.extract_strided_slice %886 {offsets = [0, 256], sizes = [16, 128], strides = [1, 1]} : vector<16x512xf32> to vector<16x128xf32>
    %900 = math.tanh %899 : vector<16x128xf32>
    %901 = vector.extract_strided_slice %886 {offsets = [0, 384], sizes = [16, 128], strides = [1, 1]} : vector<16x512xf32> to vector<16x128xf32>
    %902 = arith.negf %901 : vector<16x128xf32>
    %903 = math.exp %902 : vector<16x128xf32>
    %cst_277 = arith.constant 1.000000e+00 : f32
    %904 = vector.broadcast %cst_277 : f32 to vector<16x128xf32>
    %905 = arith.addf %904, %903 : vector<16x128xf32>
    %906 = arith.divf %904, %905 : vector<16x128xf32>
    %907 = arith.mulf %898, %876 : vector<16x128xf32>
    %908 = arith.mulf %892, %900 : vector<16x128xf32>
    %909 = arith.addf %907, %908 : vector<16x128xf32>
    %910 = math.tanh %909 : vector<16x128xf32>
    %911 = arith.mulf %906, %910 : vector<16x128xf32>
    %c2_278 = arith.constant 2 : index
    %c0_279 = arith.constant 0 : index
    %c0_280 = arith.constant 0 : index
    %912 = vector.load %arg23[%c2_278, %c0_279, %c0_280] : memref<8x16x128xf32, #tpu.memory_space<vmem>>, vector<1x16x128xf32>
    %913 = vector.shape_cast %912 : vector<1x16x128xf32> to vector<16x128xf32>
    %914 = vector.shape_cast %911 : vector<16x128xf32> to vector<1x16x128xf32>
    tpu.vector_store %arg23[%c2_278, %c0_279, %c0_280], %914 {strides = array<i32>} : memref<8x16x128xf32, #tpu.memory_space<vmem>>, vector<1x16x128xf32>,
    %c3_281 = arith.constant 3 : index
    %c0_282 = arith.constant 0 : index
    %c0_283 = arith.constant 0 : index
    %915 = vector.load %arg24[%c3_281, %c0_282, %c0_283] : memref<8x16x512xf32, #tpu.memory_space<vmem>>, vector<1x16x512xf32>
    %916 = vector.shape_cast %915 : vector<1x16x512xf32> to vector<16x512xf32>
    %917 = arith.truncf %911 : vector<16x128xf32> to vector<16x128xbf16>
    %cst_284 = arith.constant dense<0.000000e+00> : vector<16x512xf32>
    %918 = tpu.matmul %917, %813, %cst_284 {dimension_numbers = #tpu.dot_dimension_numbers<[1], [0], [0], [1], [0, 0, 1, 1], [], []>} : vector<16x128xbf16>, vector<128x512xbf16>, vector<16x512xf32> -> vector<16x512xf32>
    %919 = arith.addf %916, %918 : vector<16x512xf32>
    %920 = vector.extract_strided_slice %919 {offsets = [0, 0], sizes = [16, 128], strides = [1, 1]} : vector<16x512xf32> to vector<16x128xf32>
    %921 = arith.negf %920 : vector<16x128xf32>
    %922 = math.exp %921 : vector<16x128xf32>
    %cst_285 = arith.constant 1.000000e+00 : f32
    %923 = vector.broadcast %cst_285 : f32 to vector<16x128xf32>
    %924 = arith.addf %923, %922 : vector<16x128xf32>
    %925 = arith.divf %923, %924 : vector<16x128xf32>
    %926 = vector.extract_strided_slice %919 {offsets = [0, 128], sizes = [16, 128], strides = [1, 1]} : vector<16x512xf32> to vector<16x128xf32>
    %927 = arith.negf %926 : vector<16x128xf32>
    %928 = math.exp %927 : vector<16x128xf32>
    %cst_286 = arith.constant 1.000000e+00 : f32
    %929 = vector.broadcast %cst_286 : f32 to vector<16x128xf32>
    %930 = arith.addf %929, %928 : vector<16x128xf32>
    %931 = arith.divf %929, %930 : vector<16x128xf32>
    %932 = vector.extract_strided_slice %919 {offsets = [0, 256], sizes = [16, 128], strides = [1, 1]} : vector<16x512xf32> to vector<16x128xf32>
    %933 = math.tanh %932 : vector<16x128xf32>
    %934 = vector.extract_strided_slice %919 {offsets = [0, 384], sizes = [16, 128], strides = [1, 1]} : vector<16x512xf32> to vector<16x128xf32>
    %935 = arith.negf %934 : vector<16x128xf32>
    %936 = math.exp %935 : vector<16x128xf32>
    %cst_287 = arith.constant 1.000000e+00 : f32
    %937 = vector.broadcast %cst_287 : f32 to vector<16x128xf32>
    %938 = arith.addf %937, %936 : vector<16x128xf32>
    %939 = arith.divf %937, %938 : vector<16x128xf32>
    %940 = arith.mulf %931, %909 : vector<16x128xf32>
    %941 = arith.mulf %925, %933 : vector<16x128xf32>
    %942 = arith.addf %940, %941 : vector<16x128xf32>
    %943 = math.tanh %942 : vector<16x128xf32>
    %944 = arith.mulf %939, %943 : vector<16x128xf32>
    %c3_288 = arith.constant 3 : index
    %c0_289 = arith.constant 0 : index
    %c0_290 = arith.constant 0 : index
    %945 = vector.load %arg23[%c3_288, %c0_289, %c0_290] : memref<8x16x128xf32, #tpu.memory_space<vmem>>, vector<1x16x128xf32>
    %946 = vector.shape_cast %945 : vector<1x16x128xf32> to vector<16x128xf32>
    %947 = vector.shape_cast %944 : vector<16x128xf32> to vector<1x16x128xf32>
    tpu.vector_store %arg23[%c3_288, %c0_289, %c0_290], %947 {strides = array<i32>} : memref<8x16x128xf32, #tpu.memory_space<vmem>>, vector<1x16x128xf32>,
    %c4_291 = arith.constant 4 : index
    %c0_292 = arith.constant 0 : index
    %c0_293 = arith.constant 0 : index
    %948 = vector.load %arg24[%c4_291, %c0_292, %c0_293] : memref<8x16x512xf32, #tpu.memory_space<vmem>>, vector<1x16x512xf32>
    %949 = vector.shape_cast %948 : vector<1x16x512xf32> to vector<16x512xf32>
    %950 = arith.truncf %944 : vector<16x128xf32> to vector<16x128xbf16>
    %cst_294 = arith.constant dense<0.000000e+00> : vector<16x512xf32>
    %951 = tpu.matmul %950, %813, %cst_294 {dimension_numbers = #tpu.dot_dimension_numbers<[1], [0], [0], [1], [0, 0, 1, 1], [], []>} : vector<16x128xbf16>, vector<128x512xbf16>, vector<16x512xf32> -> vector<16x512xf32>
    %952 = arith.addf %949, %951 : vector<16x512xf32>
    %953 = vector.extract_strided_slice %952 {offsets = [0, 0], sizes = [16, 128], strides = [1, 1]} : vector<16x512xf32> to vector<16x128xf32>
    %954 = arith.negf %953 : vector<16x128xf32>
    %955 = math.exp %954 : vector<16x128xf32>
    %cst_295 = arith.constant 1.000000e+00 : f32
    %956 = vector.broadcast %cst_295 : f32 to vector<16x128xf32>
    %957 = arith.addf %956, %955 : vector<16x128xf32>
    %958 = arith.divf %956, %957 : vector<16x128xf32>
    %959 = vector.extract_strided_slice %952 {offsets = [0, 128], sizes = [16, 128], strides = [1, 1]} : vector<16x512xf32> to vector<16x128xf32>
    %960 = arith.negf %959 : vector<16x128xf32>
    %961 = math.exp %960 : vector<16x128xf32>
    %cst_296 = arith.constant 1.000000e+00 : f32
    %962 = vector.broadcast %cst_296 : f32 to vector<16x128xf32>
    %963 = arith.addf %962, %961 : vector<16x128xf32>
    %964 = arith.divf %962, %963 : vector<16x128xf32>
    %965 = vector.extract_strided_slice %952 {offsets = [0, 256], sizes = [16, 128], strides = [1, 1]} : vector<16x512xf32> to vector<16x128xf32>
    %966 = math.tanh %965 : vector<16x128xf32>
    %967 = vector.extract_strided_slice %952 {offsets = [0, 384], sizes = [16, 128], strides = [1, 1]} : vector<16x512xf32> to vector<16x128xf32>
    %968 = arith.negf %967 : vector<16x128xf32>
    %969 = math.exp %968 : vector<16x128xf32>
    %cst_297 = arith.constant 1.000000e+00 : f32
    %970 = vector.broadcast %cst_297 : f32 to vector<16x128xf32>
    %971 = arith.addf %970, %969 : vector<16x128xf32>
    %972 = arith.divf %970, %971 : vector<16x128xf32>
    %973 = arith.mulf %964, %942 : vector<16x128xf32>
    %974 = arith.mulf %958, %966 : vector<16x128xf32>
    %975 = arith.addf %973, %974 : vector<16x128xf32>
    %976 = math.tanh %975 : vector<16x128xf32>
    %977 = arith.mulf %972, %976 : vector<16x128xf32>
    %c4_298 = arith.constant 4 : index
    %c0_299 = arith.constant 0 : index
    %c0_300 = arith.constant 0 : index
    %978 = vector.load %arg23[%c4_298, %c0_299, %c0_300] : memref<8x16x128xf32, #tpu.memory_space<vmem>>, vector<1x16x128xf32>
    %979 = vector.shape_cast %978 : vector<1x16x128xf32> to vector<16x128xf32>
    %980 = vector.shape_cast %977 : vector<16x128xf32> to vector<1x16x128xf32>
    tpu.vector_store %arg23[%c4_298, %c0_299, %c0_300], %980 {strides = array<i32>} : memref<8x16x128xf32, #tpu.memory_space<vmem>>, vector<1x16x128xf32>,
    %c5_301 = arith.constant 5 : index
    %c0_302 = arith.constant 0 : index
    %c0_303 = arith.constant 0 : index
    %981 = vector.load %arg24[%c5_301, %c0_302, %c0_303] : memref<8x16x512xf32, #tpu.memory_space<vmem>>, vector<1x16x512xf32>
    %982 = vector.shape_cast %981 : vector<1x16x512xf32> to vector<16x512xf32>
    %983 = arith.truncf %977 : vector<16x128xf32> to vector<16x128xbf16>
    %cst_304 = arith.constant dense<0.000000e+00> : vector<16x512xf32>
    %984 = tpu.matmul %983, %813, %cst_304 {dimension_numbers = #tpu.dot_dimension_numbers<[1], [0], [0], [1], [0, 0, 1, 1], [], []>} : vector<16x128xbf16>, vector<128x512xbf16>, vector<16x512xf32> -> vector<16x512xf32>
    %985 = arith.addf %982, %984 : vector<16x512xf32>
    %986 = vector.extract_strided_slice %985 {offsets = [0, 0], sizes = [16, 128], strides = [1, 1]} : vector<16x512xf32> to vector<16x128xf32>
    %987 = arith.negf %986 : vector<16x128xf32>
    %988 = math.exp %987 : vector<16x128xf32>
    %cst_305 = arith.constant 1.000000e+00 : f32
    %989 = vector.broadcast %cst_305 : f32 to vector<16x128xf32>
    %990 = arith.addf %989, %988 : vector<16x128xf32>
    %991 = arith.divf %989, %990 : vector<16x128xf32>
    %992 = vector.extract_strided_slice %985 {offsets = [0, 128], sizes = [16, 128], strides = [1, 1]} : vector<16x512xf32> to vector<16x128xf32>
    %993 = arith.negf %992 : vector<16x128xf32>
    %994 = math.exp %993 : vector<16x128xf32>
    %cst_306 = arith.constant 1.000000e+00 : f32
    %995 = vector.broadcast %cst_306 : f32 to vector<16x128xf32>
    %996 = arith.addf %995, %994 : vector<16x128xf32>
    %997 = arith.divf %995, %996 : vector<16x128xf32>
    %998 = vector.extract_strided_slice %985 {offsets = [0, 256], sizes = [16, 128], strides = [1, 1]} : vector<16x512xf32> to vector<16x128xf32>
    %999 = math.tanh %998 : vector<16x128xf32>
    %1000 = vector.extract_strided_slice %985 {offsets = [0, 384], sizes = [16, 128], strides = [1, 1]} : vector<16x512xf32> to vector<16x128xf32>
    %1001 = arith.negf %1000 : vector<16x128xf32>
    %1002 = math.exp %1001 : vector<16x128xf32>
    %cst_307 = arith.constant 1.000000e+00 : f32
    %1003 = vector.broadcast %cst_307 : f32 to vector<16x128xf32>
    %1004 = arith.addf %1003, %1002 : vector<16x128xf32>
    %1005 = arith.divf %1003, %1004 : vector<16x128xf32>
    %1006 = arith.mulf %997, %975 : vector<16x128xf32>
    %1007 = arith.mulf %991, %999 : vector<16x128xf32>
    %1008 = arith.addf %1006, %1007 : vector<16x128xf32>
    %1009 = math.tanh %1008 : vector<16x128xf32>
    %1010 = arith.mulf %1005, %1009 : vector<16x128xf32>
    %c5_308 = arith.constant 5 : index
    %c0_309 = arith.constant 0 : index
    %c0_310 = arith.constant 0 : index
    %1011 = vector.load %arg23[%c5_308, %c0_309, %c0_310] : memref<8x16x128xf32, #tpu.memory_space<vmem>>, vector<1x16x128xf32>
    %1012 = vector.shape_cast %1011 : vector<1x16x128xf32> to vector<16x128xf32>
    %1013 = vector.shape_cast %1010 : vector<16x128xf32> to vector<1x16x128xf32>
    tpu.vector_store %arg23[%c5_308, %c0_309, %c0_310], %1013 {strides = array<i32>} : memref<8x16x128xf32, #tpu.memory_space<vmem>>, vector<1x16x128xf32>,
    %c6_311 = arith.constant 6 : index
    %c0_312 = arith.constant 0 : index
    %c0_313 = arith.constant 0 : index
    %1014 = vector.load %arg24[%c6_311, %c0_312, %c0_313] : memref<8x16x512xf32, #tpu.memory_space<vmem>>, vector<1x16x512xf32>
    %1015 = vector.shape_cast %1014 : vector<1x16x512xf32> to vector<16x512xf32>
    %1016 = arith.truncf %1010 : vector<16x128xf32> to vector<16x128xbf16>
    %cst_314 = arith.constant dense<0.000000e+00> : vector<16x512xf32>
    %1017 = tpu.matmul %1016, %813, %cst_314 {dimension_numbers = #tpu.dot_dimension_numbers<[1], [0], [0], [1], [0, 0, 1, 1], [], []>} : vector<16x128xbf16>, vector<128x512xbf16>, vector<16x512xf32> -> vector<16x512xf32>
    %1018 = arith.addf %1015, %1017 : vector<16x512xf32>
    %1019 = vector.extract_strided_slice %1018 {offsets = [0, 0], sizes = [16, 128], strides = [1, 1]} : vector<16x512xf32> to vector<16x128xf32>
    %1020 = arith.negf %1019 : vector<16x128xf32>
    %1021 = math.exp %1020 : vector<16x128xf32>
    %cst_315 = arith.constant 1.000000e+00 : f32
    %1022 = vector.broadcast %cst_315 : f32 to vector<16x128xf32>
    %1023 = arith.addf %1022, %1021 : vector<16x128xf32>
    %1024 = arith.divf %1022, %1023 : vector<16x128xf32>
    %1025 = vector.extract_strided_slice %1018 {offsets = [0, 128], sizes = [16, 128], strides = [1, 1]} : vector<16x512xf32> to vector<16x128xf32>
    %1026 = arith.negf %1025 : vector<16x128xf32>
    %1027 = math.exp %1026 : vector<16x128xf32>
    %cst_316 = arith.constant 1.000000e+00 : f32
    %1028 = vector.broadcast %cst_316 : f32 to vector<16x128xf32>
    %1029 = arith.addf %1028, %1027 : vector<16x128xf32>
    %1030 = arith.divf %1028, %1029 : vector<16x128xf32>
    %1031 = vector.extract_strided_slice %1018 {offsets = [0, 256], sizes = [16, 128], strides = [1, 1]} : vector<16x512xf32> to vector<16x128xf32>
    %1032 = math.tanh %1031 : vector<16x128xf32>
    %1033 = vector.extract_strided_slice %1018 {offsets = [0, 384], sizes = [16, 128], strides = [1, 1]} : vector<16x512xf32> to vector<16x128xf32>
    %1034 = arith.negf %1033 : vector<16x128xf32>
    %1035 = math.exp %1034 : vector<16x128xf32>
    %cst_317 = arith.constant 1.000000e+00 : f32
    %1036 = vector.broadcast %cst_317 : f32 to vector<16x128xf32>
    %1037 = arith.addf %1036, %1035 : vector<16x128xf32>
    %1038 = arith.divf %1036, %1037 : vector<16x128xf32>
    %1039 = arith.mulf %1030, %1008 : vector<16x128xf32>
    %1040 = arith.mulf %1024, %1032 : vector<16x128xf32>
    %1041 = arith.addf %1039, %1040 : vector<16x128xf32>
    %1042 = math.tanh %1041 : vector<16x128xf32>
    %1043 = arith.mulf %1038, %1042 : vector<16x128xf32>
    %c6_318 = arith.constant 6 : index
    %c0_319 = arith.constant 0 : index
    %c0_320 = arith.constant 0 : index
    %1044 = vector.load %arg23[%c6_318, %c0_319, %c0_320] : memref<8x16x128xf32, #tpu.memory_space<vmem>>, vector<1x16x128xf32>
    %1045 = vector.shape_cast %1044 : vector<1x16x128xf32> to vector<16x128xf32>
    %1046 = vector.shape_cast %1043 : vector<16x128xf32> to vector<1x16x128xf32>
    tpu.vector_store %arg23[%c6_318, %c0_319, %c0_320], %1046 {strides = array<i32>} : memref<8x16x128xf32, #tpu.memory_space<vmem>>, vector<1x16x128xf32>,
    %c7_321 = arith.constant 7 : index
    %c0_322 = arith.constant 0 : index
    %c0_323 = arith.constant 0 : index
    %1047 = vector.load %arg24[%c7_321, %c0_322, %c0_323] : memref<8x16x512xf32, #tpu.memory_space<vmem>>, vector<1x16x512xf32>
    %1048 = vector.shape_cast %1047 : vector<1x16x512xf32> to vector<16x512xf32>
    %1049 = arith.truncf %1043 : vector<16x128xf32> to vector<16x128xbf16>
    %cst_324 = arith.constant dense<0.000000e+00> : vector<16x512xf32>
    %1050 = tpu.matmul %1049, %813, %cst_324 {dimension_numbers = #tpu.dot_dimension_numbers<[1], [0], [0], [1], [0, 0, 1, 1], [], []>} : vector<16x128xbf16>, vector<128x512xbf16>, vector<16x512xf32> -> vector<16x512xf32>
    %1051 = arith.addf %1048, %1050 : vector<16x512xf32>
    %1052 = vector.extract_strided_slice %1051 {offsets = [0, 0], sizes = [16, 128], strides = [1, 1]} : vector<16x512xf32> to vector<16x128xf32>
    %1053 = arith.negf %1052 : vector<16x128xf32>
    %1054 = math.exp %1053 : vector<16x128xf32>
    %cst_325 = arith.constant 1.000000e+00 : f32
    %1055 = vector.broadcast %cst_325 : f32 to vector<16x128xf32>
    %1056 = arith.addf %1055, %1054 : vector<16x128xf32>
    %1057 = arith.divf %1055, %1056 : vector<16x128xf32>
    %1058 = vector.extract_strided_slice %1051 {offsets = [0, 128], sizes = [16, 128], strides = [1, 1]} : vector<16x512xf32> to vector<16x128xf32>
    %1059 = arith.negf %1058 : vector<16x128xf32>
    %1060 = math.exp %1059 : vector<16x128xf32>
    %cst_326 = arith.constant 1.000000e+00 : f32
    %1061 = vector.broadcast %cst_326 : f32 to vector<16x128xf32>
    %1062 = arith.addf %1061, %1060 : vector<16x128xf32>
    %1063 = arith.divf %1061, %1062 : vector<16x128xf32>
    %1064 = vector.extract_strided_slice %1051 {offsets = [0, 256], sizes = [16, 128], strides = [1, 1]} : vector<16x512xf32> to vector<16x128xf32>
    %1065 = math.tanh %1064 : vector<16x128xf32>
    %1066 = vector.extract_strided_slice %1051 {offsets = [0, 384], sizes = [16, 128], strides = [1, 1]} : vector<16x512xf32> to vector<16x128xf32>
    %1067 = arith.negf %1066 : vector<16x128xf32>
    %1068 = math.exp %1067 : vector<16x128xf32>
    %cst_327 = arith.constant 1.000000e+00 : f32
    %1069 = vector.broadcast %cst_327 : f32 to vector<16x128xf32>
    %1070 = arith.addf %1069, %1068 : vector<16x128xf32>
    %1071 = arith.divf %1069, %1070 : vector<16x128xf32>
    %1072 = arith.mulf %1063, %1041 : vector<16x128xf32>
    %1073 = arith.mulf %1057, %1065 : vector<16x128xf32>
    %1074 = arith.addf %1072, %1073 : vector<16x128xf32>
    %1075 = math.tanh %1074 : vector<16x128xf32>
    %1076 = arith.mulf %1071, %1075 : vector<16x128xf32>
    %c7_328 = arith.constant 7 : index
    %c0_329 = arith.constant 0 : index
    %c0_330 = arith.constant 0 : index
    %1077 = vector.load %arg23[%c7_328, %c0_329, %c0_330] : memref<8x16x128xf32, #tpu.memory_space<vmem>>, vector<1x16x128xf32>
    %1078 = vector.shape_cast %1077 : vector<1x16x128xf32> to vector<16x128xf32>
    %1079 = vector.shape_cast %1076 : vector<16x128xf32> to vector<1x16x128xf32>
    tpu.vector_store %arg23[%c7_328, %c0_329, %c0_330], %1079 {strides = array<i32>} : memref<8x16x128xf32, #tpu.memory_space<vmem>>, vector<1x16x128xf32>,
    %c0_331 = arith.constant 0 : index
    %c0_332 = arith.constant 0 : index
    %c0_333 = arith.constant 0 : index
    %1080 = vector.load %arg23[%c0_331, %c0_332, %c0_333] : memref<8x16x128xf32, #tpu.memory_space<vmem>>, vector<8x16x128xf32>
    %1081 = vector.shape_cast %1080 : vector<8x16x128xf32> to vector<128x128xf32>
    %1082 = arith.truncf %1081 : vector<128x128xf32> to vector<128x128xbf16>
    %c0_334 = arith.constant 0 : index
    %c0_335 = arith.constant 0 : index
    %1083 = vector.load %arg17[%c0_334, %c0_335] : memref<128x128xbf16, #tpu.memory_space<vmem>>, vector<128x128xbf16>
    %cst_336 = arith.constant dense<0.000000e+00> : vector<128x128xf32>
    %1084 = tpu.matmul %1082, %1083, %cst_336 {dimension_numbers = #tpu.dot_dimension_numbers<[1], [0], [0], [1], [0, 0, 1, 1], [], []>} : vector<128x128xbf16>, vector<128x128xbf16>, vector<128x128xf32> -> vector<128x128xf32>
    %c0_337 = arith.constant 0 : index
    %c0_338 = arith.constant 0 : index
    %1085 = vector.load %arg18[%c0_337, %c0_338] : memref<1x128xf32, #tpu.memory_space<vmem>>, vector<1x128xf32>
    %1086 = vector.broadcast %1085 : vector<1x128xf32> to vector<128x128xf32>
    %1087 = arith.addf %1084, %1086 : vector<128x128xf32>
    %1088 = vector.shape_cast %1087 : vector<128x128xf32> to vector<8x16x128xf32>
    %1089 = arith.truncf %1088 : vector<8x16x128xf32> to vector<8x16x128xbf16>
    %c0_339 = arith.constant 0 : index
    %c0_340 = arith.constant 0 : index
    %c0_341 = arith.constant 0 : index
    %1090 = vector.load %arg22[%c0_339, %c0_340, %c0_341] : memref<8x16x128xbf16, #tpu.memory_space<vmem>>, vector<8x16x128xbf16>
    tpu.vector_store %arg22[%c0_339, %c0_340, %c0_341], %1089 {strides = array<i32>} : memref<8x16x128xbf16, #tpu.memory_space<vmem>>, vector<8x16x128xbf16>,
    return
  }
  func.func @transform_0(%arg0: i32) -> (i32, i32, i32) {
    %c0_i32 = arith.constant 0 : i32
    %c0_i32_0 = arith.constant 0 : i32
    %c0_i32_1 = arith.constant 0 : i32
    return %c0_i32, %arg0, %c0_i32_0 : i32, i32, i32
  }
  func.func @transform_1(%arg0: i32) -> (i32, i32) {
    %c0_i32 = arith.constant 0 : i32
    %c0_i32_0 = arith.constant 0 : i32
    return %arg0, %c0_i32 : i32, i32
  }
  func.func @transform_2(%arg0: i32) -> (i32, i32) {
    %c0_i32 = arith.constant 0 : i32
    %c0_i32_0 = arith.constant 0 : i32
    %c0_i32_1 = arith.constant 0 : i32
    return %c0_i32, %c0_i32_0 : i32, i32
  }
  func.func @transform_3(%arg0: i32) -> (i32, i32) {
    %c0_i32 = arith.constant 0 : i32
    %c0_i32_0 = arith.constant 0 : i32
    %c0_i32_1 = arith.constant 0 : i32
    return %c0_i32, %c0_i32_0 : i32, i32
  }
  func.func @transform_4(%arg0: i32) -> (i32, i32) {
    %c0_i32 = arith.constant 0 : i32
    %c0_i32_0 = arith.constant 0 : i32
    %c0_i32_1 = arith.constant 0 : i32
    return %c0_i32, %c0_i32_0 : i32, i32
  }
  func.func @transform_5(%arg0: i32) -> (i32, i32) {
    %c0_i32 = arith.constant 0 : i32
    %c0_i32_0 = arith.constant 0 : i32
    %c0_i32_1 = arith.constant 0 : i32
    return %c0_i32, %c0_i32_0 : i32, i32
  }
  func.func @transform_6(%arg0: i32) -> (i32, i32) {
    %c0_i32 = arith.constant 0 : i32
    %c0_i32_0 = arith.constant 0 : i32
    %c0_i32_1 = arith.constant 0 : i32
    return %c0_i32, %c0_i32_0 : i32, i32
  }
  func.func @transform_7(%arg0: i32) -> (i32, i32) {
    %c0_i32 = arith.constant 0 : i32
    %c0_i32_0 = arith.constant 0 : i32
    %c0_i32_1 = arith.constant 0 : i32
    return %c0_i32, %c0_i32_0 : i32, i32
  }
  func.func @transform_8(%arg0: i32) -> (i32, i32) {
    %c0_i32 = arith.constant 0 : i32
    %c0_i32_0 = arith.constant 0 : i32
    %c0_i32_1 = arith.constant 0 : i32
    return %c0_i32, %c0_i32_0 : i32, i32
  }
  func.func @transform_9(%arg0: i32) -> (i32, i32) {
    %c0_i32 = arith.constant 0 : i32
    %c0_i32_0 = arith.constant 0 : i32
    %c0_i32_1 = arith.constant 0 : i32
    return %c0_i32, %c0_i32_0 : i32, i32
  }
  func.func @transform_10(%arg0: i32) -> (i32, i32) {
    %c0_i32 = arith.constant 0 : i32
    %c0_i32_0 = arith.constant 0 : i32
    %c0_i32_1 = arith.constant 0 : i32
    return %c0_i32, %c0_i32_0 : i32, i32
  }
  func.func @transform_11(%arg0: i32) -> (i32, i32) {
    %c0_i32 = arith.constant 0 : i32
    %c0_i32_0 = arith.constant 0 : i32
    %c0_i32_1 = arith.constant 0 : i32
    return %c0_i32, %c0_i32_0 : i32, i32
  }
  func.func @transform_12(%arg0: i32) -> (i32, i32) {
    %c0_i32 = arith.constant 0 : i32
    %c0_i32_0 = arith.constant 0 : i32
    %c0_i32_1 = arith.constant 0 : i32
    return %c0_i32, %c0_i32_0 : i32, i32
  }
  func.func @transform_13(%arg0: i32) -> (i32, i32) {
    %c0_i32 = arith.constant 0 : i32
    %c0_i32_0 = arith.constant 0 : i32
    %c0_i32_1 = arith.constant 0 : i32
    return %c0_i32, %c0_i32_0 : i32, i32
  }
  func.func @transform_14(%arg0: i32) -> (i32, i32) {
    %c0_i32 = arith.constant 0 : i32
    %c0_i32_0 = arith.constant 0 : i32
    %c0_i32_1 = arith.constant 0 : i32
    return %c0_i32, %c0_i32_0 : i32, i32
  }
  func.func @transform_15(%arg0: i32) -> (i32, i32) {
    %c0_i32 = arith.constant 0 : i32
    %c0_i32_0 = arith.constant 0 : i32
    %c0_i32_1 = arith.constant 0 : i32
    return %c0_i32, %c0_i32_0 : i32, i32
  }
  func.func @transform_16(%arg0: i32) -> (i32, i32) {
    %c0_i32 = arith.constant 0 : i32
    %c0_i32_0 = arith.constant 0 : i32
    %c0_i32_1 = arith.constant 0 : i32
    return %c0_i32, %c0_i32_0 : i32, i32
  }
  func.func @transform_17(%arg0: i32) -> (i32, i32) {
    %c0_i32 = arith.constant 0 : i32
    %c0_i32_0 = arith.constant 0 : i32
    %c0_i32_1 = arith.constant 0 : i32
    return %c0_i32, %c0_i32_0 : i32, i32
  }
  func.func @transform_18(%arg0: i32) -> (i32, i32) {
    %c0_i32 = arith.constant 0 : i32
    %c0_i32_0 = arith.constant 0 : i32
    return %arg0, %c0_i32 : i32, i32
  }
  func.func @transform_19(%arg0: i32) -> (i32, i32) {
    %c0_i32 = arith.constant 0 : i32
    %c0_i32_0 = arith.constant 0 : i32
    return %arg0, %c0_i32 : i32, i32
  }
  func.func @transform_20(%arg0: i32) -> (i32, i32) {
    %c0_i32 = arith.constant 0 : i32
    %c0_i32_0 = arith.constant 0 : i32
    return %arg0, %c0_i32 : i32, i32
  }
  func.func @transform_21(%arg0: i32) -> (i32, i32, i32) {
    %c0_i32 = arith.constant 0 : i32
    %c0_i32_0 = arith.constant 0 : i32
    %c0_i32_1 = arith.constant 0 : i32
    return %c0_i32, %arg0, %c0_i32_0 : i32, i32, i32
  }
}

</mosaic_0001>

<bundles_post_ra>
// kernel: tpu_custom_call.1
= control target key start
LH: loop header
LB: loop body
LE: loop exit
PB: predicated region body
PF: predicated region fallthrough
CT: control target
= control target key end

     0   :  { %s14009_s0 = inlined_call_operand.hbm [shape: bf16[8,16,128], index: 0, kind: input, shape index: {}]   ;;  %s14010_s1 = inlined_call_operand.hbm [shape: f32[16,128], index: 1, kind: input, shape index: {}]   ;;  %s14011_s2 = inlined_call_operand.hbm [shape: bf16[128,512], index: 2, kind: input, shape index: {}]   ;;  %s14012_s3 = inlined_call_operand.hbm [shape: bf16[128,512], index: 3, kind: input, shape index: {}]   ;;  %s14013_s4 = inlined_call_operand.vmem [shape: f32[1,512], index: 4, kind: input, shape index: {}]   ;;  %s14014_s5 = inlined_call_operand.hbm [shape: bf16[128,512], index: 5, kind: input, shape index: {}]   ;;  %s14015_s6 = inlined_call_operand.hbm [shape: bf16[128,512], index: 6, kind: input, shape index: {}]   ;;  %s14016_s7 = inlined_call_operand.vmem [shape: f32[1,512], index: 7, kind: input, shape index: {}]   ;;  %s14017_s8 = inlined_call_operand.hbm [shape: bf16[128,256], index: 8, kind: input, shape index: {}]   ;;  %s14018_s9 = inlined_call_operand.hbm [shape: f32[1,256], index: 9, kind: input, shape index: {}]   ;;  %s14019_s10 = inlined_call_operand.hbm [shape: bf16[128,512], index: 10, kind: input, shape index: {}]   ;;  %s14020_s11 = inlined_call_operand.hbm [shape: bf16[128,512], index: 11, kind: input, shape index: {}]   ;;  %s14021_s12 = inlined_call_operand.vmem [shape: f32[1,512], index: 12, kind: input, shape index: {}]   ;;  %s14022_s13 = inlined_call_operand.hbm [shape: bf16[128,512], index: 13, kind: input, shape index: {}]   ;;  %s14023_s14 = inlined_call_operand.hbm [shape: bf16[128,512], index: 14, kind: input, shape index: {}]   ;;  %s14024_s15 = inlined_call_operand.vmem [shape: f32[1,512], index: 15, kind: input, shape index: {}]   ;;  %s14025_s16 = inlined_call_operand.hbm [shape: bf16[128,128], index: 16, kind: input, shape index: {}]   ;;  %s14026_s17 = inlined_call_operand.vmem [shape: f32[1,128], index: 17, kind: input, shape index: {}]   ;;  %s14027_s18 = inlined_call_operand.hbm [shape: f32[16,128], index: 18, kind: output, shape index: {0}]   ;;  %s14028_s19 = inlined_call_operand.hbm [shape: f32[16,128], index: 19, kind: output, shape index: {1}]   ;;  %s14029_s20 = inlined_call_operand.hbm [shape: f32[16,128], index: 20, kind: output, shape index: {2}]   ;;  %s14030_s21 = inlined_call_operand.hbm [shape: bf16[8,16,128], index: 21, kind: output, shape index: {3}]  }
   0x1   :  { %14047 = sst [smem:[#allocation98_spill]] %s14009_s0 }
   0x2   :  { %14048 = sst [smem:[#allocation99_spill]] %s14010_s1 }
   0x3   :  { %14049 = sst [smem:[#allocation100_spill]] %s14011_s2 }
   0x4   :  { %14050 = sst [smem:[#allocation101_spill]] %s14012_s3 }
   0x5   :  { %14051 = sst [smem:[#allocation102_spill]] %s14013_s4 }
   0x6   :  { %14052 = sst [smem:[#allocation103_spill]] %s14014_s5 }
   0x7   :  { %27 = vsyncpa [#allocation5], 0 }
   0x8   :  { %28 = vsyncpa [#allocation8], 0 }
   0x9   :  { %29 = vsyncpa [#allocation11], 0 }
   0xa   :  { %30 = vsyncpa [#allocation14], 0 }
   0xb   :  { %31 = vsyncpa [#allocation17], 0 }
   0xc   :  { %32 = vsyncpa [#allocation20], 0 }
   0xd   :  { %33 = vsyncpa [#allocation23], 0 }
   0xe   :  { %34 = vsyncpa [#allocation6], 0 }
   0xf   :  { %35 = vsyncpa [#allocation27], 0 }
  0x10   :  { %36 = vsyncpa [#allocation30], 0  ;;  %s10868_s2 = smov [#allocation7]  }
  0x11   :  { %s54_s25 = sshll.u32 %s10868_s2, 4  ;;  %s55_s25 = int_to_ptr.vmem [resolvable:$true] %s54_s25 }
  0x12   :  { %s10516_s26 = scalar_lea.vmem %s55_s25, 256  ;;  %p10521_p1 = scmp.lt.s32.totalorder %s55_s25, %s55_s25 }
  0x13   :  { %p10517_p0 = scmp.ne.s32.totalorder %s55_s25, %s10516_s26  ;;  %p10522_p2 = scmp.lt.s32.totalorder %s10516_s26, %s10516_s26 }
  0x15   :  { %p10523_p3 = por %p10522_p2, %p10521_p1 }
  0x17   :  { %p10524_p4 = pnand %p10523_p3, %p10517_p0 }
  0x19   :  { %10527 = shalt.err (!%p10524_p4)
}
  0x1a   :  { %s10869_s27 = smov 128   ;;  %s10870_s3 = smov 8  }
  0x1b   :  { %s14053_s0 = sld [smem:[#allocation99_spill]]  ;;  %s10871_s4 = smov [#allocation10]  }
  0x1c   :  { %s78_s30 = sshll.u32 %s10871_s4, 4  ;;  %s10872_s5 = smov [#allocation13]   ;;  %s79_s30 = int_to_ptr.vmem [resolvable:$true] %s78_s30 }
  0x1d   :  { %s104_s22 = sshll.u32 %s10872_s5, 4  ;;  %s10536_s23 = scalar_lea.vmem %s79_s30, 4096  ;;  %s105_s22 = int_to_ptr.vmem [resolvable:$true] %s104_s22 }
  0x1e   :  { %p10537_p5 = scmp.ne.s32.totalorder %s79_s30, %s10536_s23  ;;  %p10541_p6 = scmp.lt.s32.totalorder %s79_s30, %s79_s30 }
  0x1f   :  { %p10542_p7 = scmp.lt.s32.totalorder %s10536_s23, %s10536_s23 }
  0x21   :  { %60 = dma.hbm_to_vmem [thread:$0]  %s14053_s0, 256, %s55_s25, [#allocation8], %s10869_s27, %s10869_s27, %s10870_s3  }
  0x22   :  { %p10543_p8 = por %p10542_p7, %p10541_p6 }
  0x24   :  { %p10544_p9 = pnand %p10543_p8, %p10537_p5 }
  0x26   :  { %10547 = shalt.err (!%p10544_p9)
}
  0x27   :  { %s10873_s1 = smov 256   ;;  %s10874_s24 = smov 16  }
  0x28   :  { %s14054_s25 = sld [smem:[#allocation101_spill]]  ;;  %s10556_s28 = scalar_lea.vmem %s105_s22, 4096 }
  0x29   :  { %p10557_p10 = scmp.ne.s32.totalorder %s105_s22, %s10556_s28  ;;  %p10561_p11 = scmp.lt.s32.totalorder %s105_s22, %s105_s22 }
  0x2a   :  { %p10562_p12 = scmp.lt.s32.totalorder %s10556_s28, %s10556_s28 }
  0x2c   :  { %p10563_p13 = por %p10562_p12, %p10561_p11 }
  0x2e   :  { %84 = dma.hbm_to_vmem [thread:$0]  %s14054_s25, 4096, %s79_s30, [#allocation11], %s10873_s1, %s10873_s1, %s10874_s24  }
  0x2f   :  { %p10564_p0 = pnand %p10563_p13, %p10557_p10 }
  0x31   :  { %10567 = shalt.err (!%p10564_p0)
}
  0x32   :  { %110 = dma.hbm_to_vmem [thread:$0]  %s14015_s6, 4096, %s105_s22, [#allocation14], %s10873_s1, %s10873_s1, %s10874_s24  }
  0x33   :  { %s10875_s4 = smov [#allocation16]   ;;  %s10876_s23 = smov [#allocation19]  }
  0x34   :  { %s131_s5 = sshll.u32 %s10875_s4, 4  ;;  %s152_s30 = sshll.u32 %s10876_s23, 4  ;;  %s132_s5 = int_to_ptr.vmem [resolvable:$true] %s131_s5  ;;  %s153_s30 = int_to_ptr.vmem [resolvable:$true] %s152_s30 }
  0x35   :  { %s10576_s2 = scalar_lea.vmem %s132_s5, 32  ;;  %p10581_p2 = scmp.lt.s32.totalorder %s132_s5, %s132_s5 }
  0x36   :  { %p10577_p1 = scmp.ne.s32.totalorder %s132_s5, %s10576_s2  ;;  %p10582_p3 = scmp.lt.s32.totalorder %s10576_s2, %s10576_s2 }
  0x38   :  { %p10583_p4 = por %p10582_p3, %p10581_p2 }
  0x3a   :  { %p10584_p5 = pnand %p10583_p4, %p10577_p1 }
  0x3c   :  { %10587 = shalt.err (!%p10584_p5)
}
  0x3d   :  { %134 = dma.hbm_to_vmem [thread:$0]  %s14018_s9, 32, %s132_s5, [#allocation17]  }
  0x3e   :  { %s10596_s28 = scalar_lea.vmem %s153_s30, 4096  ;;  %p10601_p7 = scmp.lt.s32.totalorder %s153_s30, %s153_s30 }
  0x3f   :  { %p10597_p6 = scmp.ne.s32.totalorder %s153_s30, %s10596_s28  ;;  %p10602_p8 = scmp.lt.s32.totalorder %s10596_s28, %s10596_s28 }
  0x41   :  { %p10603_p9 = por %p10602_p8, %p10601_p7 }
  0x43   :  { %p10604_p10 = pnand %p10603_p9, %p10597_p6 }
  0x45   :  { %10607 = shalt.err (!%p10604_p10)
}
  0x46   :  { %158 = dma.hbm_to_vmem [thread:$0]  %s14020_s11, 4096, %s153_s30, [#allocation20], %s10873_s1, %s10873_s1, %s10874_s24  }
  0x47   :  { %s10877_s29 = smov [#allocation22]   ;;  %s10878_s4 = smov [#allocation4]  }
  0x48   :  { %s178_s0 = sshll.u32 %s10877_s29, 4  ;;  %s42_s9 = sshll.u32 %s10878_s4, 4  ;;  %s179_s0 = int_to_ptr.vmem [resolvable:$true] %s178_s0  ;;  %s43_s9 = int_to_ptr.vmem [resolvable:$true] %s42_s9 }
  0x49   :  { %s10616_s5 = scalar_lea.vmem %s179_s0, 4096  ;;  %p10621_p12 = scmp.lt.s32.totalorder %s179_s0, %s179_s0 }
  0x4a   :  { %p10617_p11 = scmp.ne.s32.totalorder %s179_s0, %s10616_s5  ;;  %p10622_p13 = scmp.lt.s32.totalorder %s10616_s5, %s10616_s5 }
  0x4c   :  { %p10623_p0 = por %p10622_p13, %p10621_p12 }
  0x4e   :  { %p10624_p1 = pnand %p10623_p0, %p10617_p11 }
  0x50   :  { %10627 = shalt.err (!%p10624_p1)
}
  0x51   :  { %184 = dma.hbm_to_vmem [thread:$0]  %s14023_s14, 4096, %s179_s0, [#allocation23], %s10873_s1, %s10873_s1, %s10874_s24  }
  0x52   :  { %s10636_s11 = scalar_lea.vmem %s43_s9, 1024  ;;  %p10641_p3 = scmp.lt.s32.totalorder %s43_s9, %s43_s9 }
  0x53   :  { %p10637_p2 = scmp.ne.s32.totalorder %s43_s9, %s10636_s11  ;;  %p10642_p4 = scmp.lt.s32.totalorder %s10636_s11, %s10636_s11 }
  0x55   :  { %p10643_p5 = por %p10642_p4, %p10641_p3 }
  0x57   :  { %p10644_p6 = pnand %p10643_p5, %p10637_p2 }
  0x59   :  { %10647 = shalt.err (!%p10644_p6)
}
  0x5a   :  { %s10879_s30 = smov 64   ;;  %s10880_s26 = smov 4  }
  0x5b   :  { %s14055_s6 = sld [smem:[#allocation98_spill]]  ;;  %s10881_s22 = smov [#allocation9]  }
  0x5c   :  { %s66_s29 = sshll.u32 %s10881_s22, 4  ;;  %s10882_s14 = smov [#allocation12]   ;;  %s67_s29 = int_to_ptr.vmem [resolvable:$true] %s66_s29 }
  0x5d   :  { %s92_s0 = sshll.u32 %s10882_s14, 4  ;;  %s10656_s4 = scalar_lea.vmem %s67_s29, 4096  ;;  %s93_s0 = int_to_ptr.vmem [resolvable:$true] %s92_s0 }
  0x5e   :  { %p10657_p7 = scmp.ne.s32.totalorder %s67_s29, %s10656_s4  ;;  %p10661_p8 = scmp.lt.s32.totalorder %s67_s29, %s67_s29 }
  0x5f   :  { %p10662_p9 = scmp.lt.s32.totalorder %s10656_s4, %s10656_s4 }
  0x61   :  { %48 = dma.hbm_to_vmem [thread:$0]  %s14055_s6, 1024, %s43_s9, [#allocation5], %s10879_s30, %s10879_s30, %s10880_s26  }
  0x62   :  { %p10663_p10 = por %p10662_p9, %p10661_p8 }
  0x64   :  { %p10664_p11 = pnand %p10663_p10, %p10657_p7 }
  0x66   :  { %10667 = shalt.err (!%p10664_p11)
}
  0x67   :  { %s14056_s2 = sld [smem:[#allocation100_spill]]  ;;  %s10676_s9 = scalar_lea.vmem %s93_s0, 4096 }
  0x68   :  { %p10677_p12 = scmp.ne.s32.totalorder %s93_s0, %s10676_s9  ;;  %p10681_p13 = scmp.lt.s32.totalorder %s93_s0, %s93_s0 }
  0x69   :  { %p10682_p0 = scmp.lt.s32.totalorder %s10676_s9, %s10676_s9 }
  0x6b   :  { %p10683_p1 = por %p10682_p0, %p10681_p13 }
  0x6d   :  { %72 = dma.hbm_to_vmem [thread:$0]  %s14056_s2, 4096, %s67_s29, [#allocation8], %s10873_s1, %s10873_s1, %s10874_s24  }
  0x6e   :  { %p10684_p2 = pnand %p10683_p1, %p10677_p12 }
  0x70   :  { %10687 = shalt.err (!%p10684_p2)
}
  0x71   :  { %s14057_s28 = sld [smem:[#allocation103_spill]]  ;;  %s10883_s6 = smov [#allocation15]  }
  0x72   :  { %s118_s22 = sshll.u32 %s10883_s6, 4  ;;  %s10884_s14 = smov [#allocation18]   ;;  %s119_s22 = int_to_ptr.vmem [resolvable:$true] %s118_s22 }
  0x73   :  { %s140_s29 = sshll.u32 %s10884_s14, 4  ;;  %s10696_s4 = scalar_lea.vmem %s119_s22, 2048  ;;  %s141_s29 = int_to_ptr.vmem [resolvable:$true] %s140_s29 }
  0x74   :  { %p10697_p3 = scmp.ne.s32.totalorder %s119_s22, %s10696_s4  ;;  %p10701_p4 = scmp.lt.s32.totalorder %s119_s22, %s119_s22 }
  0x75   :  { %p10702_p5 = scmp.lt.s32.totalorder %s10696_s4, %s10696_s4 }
  0x77   :  { %98 = dma.hbm_to_vmem [thread:$0]  %s14057_s28, 4096, %s93_s0, [#allocation11], %s10873_s1, %s10873_s1, %s10874_s24  }
  0x78   :  { %p10703_p6 = por %p10702_p5, %p10701_p4 }
  0x7a   :  { %p10704_p7 = pnand %p10703_p6, %p10697_p3 }
  0x7c   :  { %10707 = shalt.err (!%p10704_p7)
}
  0x7d   :  { %124 = dma.hbm_to_vmem [thread:$0]  %s14017_s8, 2048, %s119_s22, [#allocation14], %s10869_s27, %s10869_s27, %s10870_s3  }
  0x7e   :  { %s10716_s0 = scalar_lea.vmem %s141_s29, 4096  ;;  %p10721_p9 = scmp.lt.s32.totalorder %s141_s29, %s141_s29 }
  0x7f   :  { %p10717_p8 = scmp.ne.s32.totalorder %s141_s29, %s10716_s0  ;;  %p10722_p10 = scmp.lt.s32.totalorder %s10716_s0, %s10716_s0 }
  0x81   :  { %p10723_p11 = por %p10722_p10, %p10721_p9 }
  0x83   :  { %p10724_p12 = pnand %p10723_p11, %p10717_p8 }
  0x85   :  { %10727 = shalt.err (!%p10724_p12)
}
  0x86   :  { %146 = dma.hbm_to_vmem [thread:$0]  %s14019_s10, 4096, %s141_s29, [#allocation17], %s10873_s1, %s10873_s1, %s10874_s24  }
  0x87   :  { %s10885_s11 = smov [#allocation21]   ;;  %s10886_s28 = smov [#allocation24]  }
  0x88   :  { %s166_s25 = sshll.u32 %s10885_s11, 4  ;;  %s192_s8 = sshll.u32 %s10886_s28, 4  ;;  %s167_s25 = int_to_ptr.vmem [resolvable:$true] %s166_s25  ;;  %s193_s8 = int_to_ptr.vmem [resolvable:$true] %s192_s8 }
  0x89   :  { %s10736_s6 = scalar_lea.vmem %s167_s25, 4096  ;;  %p10741_p0 = scmp.lt.s32.totalorder %s167_s25, %s167_s25 }
  0x8a   :  { %p10737_p13 = scmp.ne.s32.totalorder %s167_s25, %s10736_s6  ;;  %p10742_p1 = scmp.lt.s32.totalorder %s10736_s6, %s10736_s6 }
  0x8c   :  { %p10743_p2 = por %p10742_p1, %p10741_p0 }
  0x8e   :  { %p10744_p3 = pnand %p10743_p2, %p10737_p13 }
  0x90   :  { %10747 = shalt.err (!%p10744_p3)
}
  0x91   :  { %172 = dma.hbm_to_vmem [thread:$0]  %s14022_s13, 4096, %s167_s25, [#allocation20], %s10873_s1, %s10873_s1, %s10874_s24  }
  0x92   :  { %s10756_s10 = scalar_lea.vmem %s193_s8, 1024  ;;  %p10761_p5 = scmp.lt.s32.totalorder %s193_s8, %s193_s8 }
  0x93   :  { %p10757_p4 = scmp.ne.s32.totalorder %s193_s8, %s10756_s10  ;;  %p10762_p6 = scmp.lt.s32.totalorder %s10756_s10, %s10756_s10 }
  0x95   :  { %p10763_p7 = por %p10762_p6, %p10761_p5 }
  0x97   :  { %p10764_p8 = pnand %p10763_p7, %p10757_p4 }
  0x99   :  { %10767 = shalt.err (!%p10764_p8)
}
  0x9a   :  { %198 = dma.hbm_to_vmem [thread:$0]  %s14025_s16, 1024, %s193_s8, [#allocation23], %s10879_s30, %s10879_s30, %s10880_s26  }
  0x9b   :  { %10848 = dma.done.wait [#allocation5], 1024  }
  0x9c   :  { %10849 = vsyncadd [#allocation5], 4294966272 }
  0x9d   :  { %10850 = dma.done.wait [#allocation8], 4352  }
  0x9e   :  { %10851 = vsyncadd [#allocation8], 4294962944 }
  0x9f   :  { %10852 = dma.done.wait [#allocation11], 8192  }
  0xa0   :  { %10853 = vsyncadd [#allocation11], 4294959104 }
  0xa1   :  { %10854 = dma.done.wait [#allocation14], 6144  }
  0xa2   :  { %10855 = vsyncadd [#allocation14], 4294961152 }
  0xa3   :  { %10856 = dma.done.wait [#allocation17], 4128  }
  0xa4   :  { %10857 = vsyncadd [#allocation17], 4294963168 }
  0xa5   :  { %10858 = dma.done.wait [#allocation20], 8192  }
  0xa6   :  { %10859 = vsyncadd [#allocation20], 4294959104 }
  0xa7   :  { %10860 = dma.done.wait [#allocation23], 5120  }
  0xa8   :  { %10861 = vsyncadd [#allocation23], 4294962176  ;;  %v14031_v0 = vmov 0   ;;  %v8904_v1 = vld [vmem:[#allocation9 + $0xe4] ss:$16 sps:$4 sm:$0xff]   ;;  %v8956_v43 = vld [vmem:[#allocation4 + $0x8] sm:$0xff]  }
  0xa9   :  { %551 = vmatprep.mubr.bf16.mxu0 %v14031_v0  ;;  %664 = vmatprep.mubr.bf16.mxu1 %v14031_v0  ;;  %v8906_v2 = vld [vmem:[#allocation9 + $0xec] ss:$16 sps:$4 sm:$0xff]   ;;  %v8908_v3 = vld [vmem:[#allocation9 + $0xe0] ss:$16 sps:$4 sm:$0xff]   ;;  %v8909_v4 = vld [vmem:[#allocation9 + $0xe8] ss:$16 sps:$4 sm:$0xff]  }
  0xaa   :  { %519 = vmatprep.subr.bf16.mxu0 %v8904_v1  ;;  %632 = vmatprep.subr.bf16.mxu1 %v8906_v2  ;;  %v8910_v5 = vld [vmem:[#allocation9 + $0xc4] ss:$16 sps:$4 sm:$0xff]   ;;  %v8912_v6 = vld [vmem:[#allocation9 + $0xcc] ss:$16 sps:$4 sm:$0xff]   ;;  %v8914_v7 = vld [vmem:[#allocation9 + $0xc0] ss:$16 sps:$4 sm:$0xff]  }
  0xab   :  { %520 = vmatpush1.bf16.msra.mxu0 %v8908_v3  ;;  %633 = vmatpush1.bf16.msra.mxu1 %v8909_v4  ;;  %v8915_v8 = vld [vmem:[#allocation9 + $0xc8] ss:$16 sps:$4 sm:$0xff]   ;;  %v8916_v9 = vld [vmem:[#allocation9 + $0xa4] ss:$16 sps:$4 sm:$0xff]   ;;  %v8918_v10 = vld [vmem:[#allocation9 + $0xac] ss:$16 sps:$4 sm:$0xff]  }
  0xac   :  { %521 = vmatprep.subr.bf16.mxu0 %v8910_v5  ;;  %634 = vmatprep.subr.bf16.mxu1 %v8912_v6  ;;  %v8920_v11 = vld [vmem:[#allocation9 + $0xa0] ss:$16 sps:$4 sm:$0xff]   ;;  %v8921_v12 = vld [vmem:[#allocation9 + $0xa8] ss:$16 sps:$4 sm:$0xff]   ;;  %v8922_v13 = vld [vmem:[#allocation9 + $0x84] ss:$16 sps:$4 sm:$0xff]  }
  0xad   :  { %v8924_v14 = vld [vmem:[#allocation9 + $0x8c] ss:$16 sps:$4 sm:$0xff]   ;;  %v8926_v15 = vld [vmem:[#allocation9 + $0x80] ss:$16 sps:$4 sm:$0xff]   ;;  %v8927_v16 = vld [vmem:[#allocation9 + $0x88] ss:$16 sps:$4 sm:$0xff]  }
  0xae   :  { %v8928_v17 = vld [vmem:[#allocation9 + $0x64] ss:$16 sps:$4 sm:$0xff]   ;;  %v8930_v18 = vld [vmem:[#allocation9 + $0x6c] ss:$16 sps:$4 sm:$0xff]   ;;  %v8932_v19 = vld [vmem:[#allocation9 + $0x60] ss:$16 sps:$4 sm:$0xff]  }
  0xaf   :  { %522 = vmatpush1.bf16.msra.mxu0 %v8914_v7  ;;  %635 = vmatpush1.bf16.msra.mxu1 %v8915_v8  ;;  %v8933_v20 = vld [vmem:[#allocation9 + $0x68] ss:$16 sps:$4 sm:$0xff]   ;;  %v8934_v21 = vld [vmem:[#allocation9 + $0x44] ss:$16 sps:$4 sm:$0xff]   ;;  %v8936_v22 = vld [vmem:[#allocation9 + $0x4c] ss:$16 sps:$4 sm:$0xff]  }
  0xb0   :  { %523 = vmatprep.subr.bf16.mxu0 %v8916_v9  ;;  %636 = vmatprep.subr.bf16.mxu1 %v8918_v10  ;;  %v8938_v23 = vld [vmem:[#allocation9 + $0x40] ss:$16 sps:$4 sm:$0xff]   ;;  %v8939_v24 = vld [vmem:[#allocation9 + $0x48] ss:$16 sps:$4 sm:$0xff]   ;;  %v8940_v25 = vld [vmem:[#allocation9 + $0x24] ss:$16 sps:$4 sm:$0xff]   ;;  %v291_v10 = vlaneseq }
  0xb1   :  { %v8942_v26 = vld [vmem:[#allocation9 + $0x2c] ss:$16 sps:$4 sm:$0xff]   ;;  %v8944_v27 = vld [vmem:[#allocation9 + $0x20] ss:$16 sps:$4 sm:$0xff]   ;;  %v8945_v28 = vld [vmem:[#allocation9 + $0x28] ss:$16 sps:$4 sm:$0xff]  }
  0xb2   :  { %v8946_v29 = vld [vmem:[#allocation9 + $0x4] ss:$16 sps:$4 sm:$0xff]   ;;  %v8948_v30 = vld [vmem:[#allocation9 + $0xc] ss:$16 sps:$4 sm:$0xff]   ;;  %v8950_v31 = vld [vmem:[#allocation9] ss:$16 sps:$4 sm:$0xff]  }
  0xb3   :  { %524 = vmatpush1.bf16.msra.mxu0 %v8920_v11  ;;  %637 = vmatpush1.bf16.msra.mxu1 %v8921_v12  ;;  %v8951_v32 = vld [vmem:[#allocation9 + $0x8] ss:$16 sps:$4 sm:$0xff]   ;;  %v11079_v33 = vld [vmem:[#allocation10 + $0xe4] ss:$16 sps:$4 sm:$0xff]   ;;  %v11081_v34 = vld [vmem:[#allocation10 + $0xec] ss:$16 sps:$4 sm:$0xff]  }
  0xb4   :  { %525 = vmatprep.subr.bf16.mxu0 %v8922_v13  ;;  %638 = vmatprep.subr.bf16.mxu1 %v8924_v14  ;;  %v8952_v35 = vld [vmem:[#allocation4] sm:$0xff]   ;;  %v11089_v38 = vld [vmem:[#allocation10 + $0xe8] ss:$16 sps:$4 sm:$0xff]   ;;  %v11091_v39 = vld [vmem:[#allocation10 + $0xcc] ss:$16 sps:$4 sm:$0xff]   ;;  %v292_v11 = vshrl.u32 %v291_v10, 7 }
  0xb5   :  { %v11083_v36 = vld [vmem:[#allocation10 + $0xe0] ss:$16 sps:$4 sm:$0xff]   ;;  %v11086_v37 = vld [vmem:[#allocation10 + $0xc4] ss:$16 sps:$4 sm:$0xff]   ;;  %v11102_v42 = vld [vmem:[#allocation10 + $0xc8] ss:$16 sps:$4 sm:$0xff]  }
  0xb6   :  { %v11095_v40 = vld [vmem:[#allocation10 + $0xc0] ss:$16 sps:$4 sm:$0xff]   ;;  %v11099_v41 = vld [vmem:[#allocation10 + $0xa4] ss:$16 sps:$4 sm:$0xff]   ;;  %v11111_v46 = vld [vmem:[#allocation10 + $0xac] ss:$16 sps:$4 sm:$0xff]  }
  0xb7   :  { %526 = vmatpush1.bf16.msra.mxu0 %v8926_v15  ;;  %639 = vmatpush1.bf16.msra.mxu1 %v8927_v16  ;;  %v11106_v44 = vld [vmem:[#allocation10 + $0xa0] ss:$16 sps:$4 sm:$0xff]   ;;  %v11108_v45 = vld [vmem:[#allocation10 + $0x84] ss:$16 sps:$4 sm:$0xff]   ;;  %v11114_v47 = vld [vmem:[#allocation10 + $0xa8] ss:$16 sps:$4 sm:$0xff]  }
  0xb8   :  { %527 = vmatprep.subr.bf16.mxu0 %v8928_v17  ;;  %640 = vmatprep.subr.bf16.mxu1 %v8930_v18  ;;  %v11116_v48 = vld [vmem:[#allocation10 + $0x8c] ss:$16 sps:$4 sm:$0xff]   ;;  %v11121_v49 = vld [vmem:[#allocation10 + $0x80] ss:$16 sps:$4 sm:$0xff]   ;;  %v11123_v50 = vld [vmem:[#allocation10 + $0x64] ss:$16 sps:$4 sm:$0xff]  }
  0xb9   :  { %v11128_v51 = vld [vmem:[#allocation10 + $0x88] ss:$16 sps:$4 sm:$0xff]   ;;  %v8960_v52 = vld [vmem:[#allocation4 + $0x10] sm:$0xff]   ;;  %v11134_v54 = vld [vmem:[#allocation10 + $0x6c] ss:$16 sps:$4 sm:$0xff]   ;;  %v11237_v16 = vsub.s32 0, %v292_v11 }
  0xba   :  { %v11131_v53 = vld [vmem:[#allocation10 + $0x60] ss:$16 sps:$4 sm:$0xff]   ;;  %v11137_v55 = vld [vmem:[#allocation10 + $0x44] ss:$16 sps:$4 sm:$0xff]   ;;  %v11140_v56 = vld [vmem:[#allocation10 + $0x68] ss:$16 sps:$4 sm:$0xff]  }
  0xbb   :  { %528 = vmatpush1.bf16.msra.mxu0 %v8932_v19  ;;  %641 = vmatpush1.bf16.msra.mxu1 %v8933_v20  ;;  %v11142_v57 = vld [vmem:[#allocation10 + $0x4c] ss:$16 sps:$4 sm:$0xff]   ;;  %v11144_v58 = vld [vmem:[#allocation10 + $0x40] ss:$16 sps:$4 sm:$0xff]   ;;  %v11148_v59 = vld [vmem:[#allocation10 + $0x24] ss:$16 sps:$4 sm:$0xff]  }
  0xbc   :  { %529 = vmatprep.subr.bf16.mxu0 %v8934_v21  ;;  %642 = vmatprep.subr.bf16.mxu1 %v8936_v22  ;;  %v11150_v60 = vld [vmem:[#allocation10 + $0x48] ss:$16 sps:$4 sm:$0xff]   ;;  %v11156_v62 = vld [vmem:[#allocation10 + $0x20] ss:$16 sps:$4 sm:$0xff]   ;;  %v11159_v63 = vld [vmem:[#allocation10 + $0x2c] ss:$16 sps:$4 sm:$0xff]  }
  0xbd   :  { %v8967_v61 = vld [vmem:[#allocation4 + $0x18] sm:$0xff]   ;;  %v11161_v1 = vld [vmem:[#allocation10 + $0x4] ss:$16 sps:$4 sm:$0xff]   ;;  %v11170_v4 = vld [vmem:[#allocation10] ss:$16 sps:$4 sm:$0xff]   ;;  %14058 = vst [vmem:[#allocation41_spill] sm:$0xff] %v11237_v16 }
  0xbe   :  { %v11163_v2 = vld [vmem:[#allocation10 + $0x28] ss:$16 sps:$4 sm:$0xff]   ;;  %v11166_v3 = vld [vmem:[#allocation10 + $0xc] ss:$16 sps:$4 sm:$0xff]   ;;  %v8974_v6 = vld [vmem:[#allocation4 + $0x20] sm:$0xff]   ;;  %v11239_v17 = vsub.s32 2, %v292_v11 }
  0xbf   :  { %530 = vmatpush1.bf16.msra.mxu0 %v8938_v23  ;;  %643 = vmatpush1.bf16.msra.mxu1 %v8939_v24  ;;  %v11174_v5 = vld [vmem:[#allocation10 + $0x8] ss:$16 sps:$4 sm:$0xff]   ;;  %v8988_v8 = vld [vmem:[#allocation4 + $0x30] sm:$0xff]   ;;  %s14060_s1 = sld [smem:[#allocation102_spill]]  ;;  %v11248_v21 = vsub.s32 1, %v292_v11  ;;  %v11250_v22 = vsub.s32 3, %v292_v11 }
  0xc0   :  { %531 = vmatprep.subr.bf16.mxu0 %v8940_v25  ;;  %644 = vmatprep.subr.bf16.mxu1 %v8942_v26  ;;  %v8981_v7 = vld [vmem:[#allocation4 + $0x28] sm:$0xff]   ;;  %v8998_v9 = vld [vmem:[#allocation4 + $0x38] sm:$0xff]   ;;  %14059 = vst [vmem:[#allocation42_spill] sm:$0xff] %v11239_v17  ;;  %s10889_s11 = smov [#allocation25]  }
  0xc1   :  { %14061 = vst [vmem:[#allocation43_spill] sm:$0xff] %v11248_v21  ;;  %14062 = vst [vmem:[#allocation44_spill] sm:$0xff] %v11250_v22  ;;  %s8207_s25 = sshll.u32 %s10889_s11, 4  ;;  %s8208_s25 = int_to_ptr.vmem [resolvable:$true] %s8207_s25 }
  0xc3   :  { %532 = vmatpush1.bf16.msra.mxu0 %v8944_v27  ;;  %645 = vmatpush1.bf16.msra.mxu1 %v8945_v28 }
  0xc4   :  { %533 = vmatprep.subr.bf16.mxu0 %v8946_v29  ;;  %646 = vmatprep.subr.bf16.mxu1 %v8948_v30 }
  0xc5   :  { %v289_v18 = vld [vmem:[%s14060_s1] sm:$0xf] }
  0xc6   :  { %v11257_v25 = vrot.slane %v289_v18, %v11237_v16  ;;  %v11260_v26 = vrot.slane %v289_v18, %v11239_v17  ;;  %v11263_v29 = vrot.slane %v289_v18, %v11248_v21  ;;  %v11266_v30 = vrot.slane %v289_v18, %v11250_v22 }
  0xc7   :  { %534 = vmatpush1.bf16.msra.mxu0 %v8950_v31  ;;  %647 = vmatpush1.bf16.msra.mxu1 %v8951_v32 }
  0xc8   :  { %1009 = vmatprep.subr.bf16.mxu0 %v11079_v33  ;;  %1052 = vmatprep.subr.bf16.mxu1 %v11081_v34 }
  0xca   :  { %552 = vmatmul.mubr.bf16.vlgmr.msra.gmra.mxu0 %v8952_v35  ;;  %665 = vmatmul.mubr.bf16.vlgmr.msra.gmra.mxu1 %v8952_v35 }
  0xcb   :  { %1010 = vmatpush1.bf16.msra.mxu0 %v11083_v36  ;;  %561 = vmatprep.mubr.bf16.mxu0 %v14031_v0 }
  0xcc   :  { %674 = vmatprep.mubr.bf16.mxu1 %v14031_v0  ;;  %1011 = vmatprep.subr.bf16.mxu0 %v11086_v37 }
  0xcd   :  { %1053 = vmatpush1.bf16.msra.mxu1 %v11089_v38 }
  0xce   :  { %1054 = vmatprep.subr.bf16.mxu1 %v11091_v39 }
  0xcf   :  { %1012 = vmatpush1.bf16.msra.mxu0 %v11095_v40 }
  0xd0   :  { %1013 = vmatprep.subr.bf16.mxu0 %v11099_v41 }
  0xd1   :  { %1055 = vmatpush1.bf16.msra.mxu1 %v11102_v42 }
  0xd2   :  { %562 = vmatmul.mubr.bf16.gmra.mxu0 %v8956_v43  ;;  %675 = vmatmul.mubr.bf16.gmra.mxu1 %v8956_v43 }
  0xd3   :  { %571 = vmatprep.mubr.bf16.mxu0 %v14031_v0  ;;  %684 = vmatprep.mubr.bf16.mxu1 %v14031_v0 }
  0xd4   :  { %1014 = vmatpush1.bf16.msra.mxu0 %v11106_v44  ;;  %1056 = vmatprep.subr.bf16.mxu1 %v11111_v46 }
  0xd5   :  { %1015 = vmatprep.subr.bf16.mxu0 %v11108_v45  ;;  %1057 = vmatpush1.bf16.msra.mxu1 %v11114_v47 }
  0xd6   :  { %1058 = vmatprep.subr.bf16.mxu1 %v11116_v48 }
  0xd8   :  { %1016 = vmatpush1.bf16.msra.mxu0 %v11121_v49 }
  0xd9   :  { %1017 = vmatprep.subr.bf16.mxu0 %v11123_v50  ;;  %1059 = vmatpush1.bf16.msra.mxu1 %v11128_v51 }
  0xda   :  { %572 = vmatmul.mubr.bf16.gmra.mxu0 %v8960_v52  ;;  %685 = vmatmul.mubr.bf16.gmra.mxu1 %v8960_v52 }
  0xdb   :  { %581 = vmatprep.mubr.bf16.mxu0 %v14031_v0  ;;  %694 = vmatprep.mubr.bf16.mxu1 %v14031_v0 }
  0xdc   :  { %1018 = vmatpush1.bf16.msra.mxu0 %v11131_v53  ;;  %1060 = vmatprep.subr.bf16.mxu1 %v11134_v54 }
  0xdd   :  { %1019 = vmatprep.subr.bf16.mxu0 %v11137_v55  ;;  %1061 = vmatpush1.bf16.msra.mxu1 %v11140_v56 }
  0xde   :  { %1062 = vmatprep.subr.bf16.mxu1 %v11142_v57 }
  0xe0   :  { %1020 = vmatpush1.bf16.msra.mxu0 %v11144_v58 }
  0xe1   :  { %1021 = vmatprep.subr.bf16.mxu0 %v11148_v59  ;;  %1063 = vmatpush1.bf16.msra.mxu1 %v11150_v60 }
  0xe2   :  { %582 = vmatmul.mubr.bf16.gmra.mxu0 %v8967_v61  ;;  %695 = vmatmul.mubr.bf16.gmra.mxu1 %v8967_v61 }
  0xe3   :  { %591 = vmatprep.mubr.bf16.mxu0 %v14031_v0  ;;  %704 = vmatprep.mubr.bf16.mxu1 %v14031_v0 }
  0xe4   :  { %1022 = vmatpush1.bf16.msra.mxu0 %v11156_v62  ;;  %1064 = vmatprep.subr.bf16.mxu1 %v11159_v63 }
  0xe5   :  { %1023 = vmatprep.subr.bf16.mxu0 %v11161_v1  ;;  %1065 = vmatpush1.bf16.msra.mxu1 %v11163_v2 }
  0xe6   :  { %1066 = vmatprep.subr.bf16.mxu1 %v11166_v3 }
  0xe8   :  { %1024 = vmatpush1.bf16.msra.mxu0 %v11170_v4 }
  0xe9   :  { %1067 = vmatpush1.bf16.msra.mxu1 %v11174_v5  ;;  %1163 = vmatprep.subr.bf16.mxu0 %v11079_v33 }
  0xea   :  { %592 = vmatmul.mubr.bf16.gmra.mxu0 %v8974_v6  ;;  %705 = vmatmul.mubr.bf16.gmra.mxu1 %v8974_v6 }
  0xeb   :  { %601 = vmatprep.mubr.bf16.mxu0 %v14031_v0  ;;  %714 = vmatprep.mubr.bf16.mxu1 %v14031_v0 }
  0xec   :  { %1206 = vmatprep.subr.bf16.mxu1 %v11081_v34 }
  0xf2   :  { %602 = vmatmul.mubr.bf16.gmra.mxu0 %v8981_v7  ;;  %715 = vmatmul.mubr.bf16.gmra.mxu1 %v8981_v7 }
  0xf3   :  { %611 = vmatprep.mubr.bf16.mxu0 %v14031_v0  ;;  %724 = vmatprep.mubr.bf16.mxu1 %v14031_v0 }
  0xfa   :  { %612 = vmatmul.mubr.bf16.gmra.mxu0 %v8988_v8  ;;  %725 = vmatmul.mubr.bf16.gmra.mxu1 %v8988_v8 }
  0xfb   :  { %621 = vmatprep.mubr.bf16.mxu0 %v14031_v0  ;;  %734 = vmatprep.mubr.bf16.mxu1 %v14031_v0 }
 0x102   :  { %622 = vmatmul.mubr.bf16.gmra.mxu0 %v8998_v9  ;;  %735 = vmatmul.mubr.bf16.gmra.mxu1 %v8998_v9 }
 0x103   :  { %1041 = vmatprep.mubr.bf16.mxu0 %v14031_v0  ;;  %1084 = vmatprep.mubr.bf16.mxu1 %v14031_v0 }
 0x10a   :  { %1042 = vmatmul.mubr.bf16.vlgmr.msra.gmra.mxu0 %v14031_v0  ;;  %1085 = vmatmul.mubr.bf16.vlgmr.msra.gmra.mxu1 %v14031_v0 }
 0x10b   :  { %1164 = vmatpush1.bf16.msra.mxu0 %v11083_v36  ;;  %1207 = vmatpush1.bf16.msra.mxu1 %v11089_v38 }
 0x10c   :  { %1165 = vmatprep.subr.bf16.mxu0 %v11086_v37  ;;  %1208 = vmatprep.subr.bf16.mxu1 %v11091_v39 }
 0x10d   :  { %1195 = vmatprep.mubr.bf16.mxu0 %v14031_v0  ;;  %1238 = vmatprep.mubr.bf16.mxu1 %v14031_v0 }
 0x10f   :  { %1166 = vmatpush1.bf16.msra.mxu0 %v11095_v40  ;;  %1209 = vmatpush1.bf16.msra.mxu1 %v11102_v42 }
 0x110   :  { %1167 = vmatprep.subr.bf16.mxu0 %v11099_v41  ;;  %1210 = vmatprep.subr.bf16.mxu1 %v11111_v46 }
 0x113   :  { %1168 = vmatpush1.bf16.msra.mxu0 %v11106_v44  ;;  %1211 = vmatpush1.bf16.msra.mxu1 %v11114_v47 }
 0x114   :  { %1169 = vmatprep.subr.bf16.mxu0 %v11108_v45  ;;  %1212 = vmatprep.subr.bf16.mxu1 %v11116_v48 }
 0x117   :  { %1170 = vmatpush1.bf16.msra.mxu0 %v11121_v49  ;;  %1213 = vmatpush1.bf16.msra.mxu1 %v11128_v51 }
 0x118   :  { %1171 = vmatprep.subr.bf16.mxu0 %v11123_v50  ;;  %1214 = vmatprep.subr.bf16.mxu1 %v11134_v54 }
 0x11b   :  { %1172 = vmatpush1.bf16.msra.mxu0 %v11131_v53  ;;  %1215 = vmatpush1.bf16.msra.mxu1 %v11140_v56 }
 0x11c   :  { %1173 = vmatprep.subr.bf16.mxu0 %v11137_v55  ;;  %1216 = vmatprep.subr.bf16.mxu1 %v11142_v57 }
 0x11f   :  { %1174 = vmatpush1.bf16.msra.mxu0 %v11144_v58  ;;  %1217 = vmatpush1.bf16.msra.mxu1 %v11150_v60 }
 0x120   :  { %1175 = vmatprep.subr.bf16.mxu0 %v11148_v59  ;;  %1218 = vmatprep.subr.bf16.mxu1 %v11159_v63 }
 0x123   :  { %1176 = vmatpush1.bf16.msra.mxu0 %v11156_v62  ;;  %1219 = vmatpush1.bf16.msra.mxu1 %v11163_v2 }
 0x124   :  { %1177 = vmatprep.subr.bf16.mxu0 %v11161_v1  ;;  %1220 = vmatprep.subr.bf16.mxu1 %v11166_v3 }
 0x127   :  { %1178 = vmatpush1.bf16.msra.mxu0 %v11170_v4  ;;  %1221 = vmatpush1.bf16.msra.mxu1 %v11174_v5 }
 0x128   :  { %1318 = vmatprep.subr.bf16.mxu0 %v11079_v33  ;;  %1361 = vmatprep.subr.bf16.mxu1 %v11081_v34 }
 0x18a   :  { %v11229_v12 = vpop.f32.mrf.mxu0  ;;  %v11231_v13 = vpop.f32.mrf.mxu1 }
 0x18c   :  { %v11233_v14 = vpop.f32.mrf.mxu0  ;;  %v11235_v15 = vpop.f32.mrf.mxu1 }
 0x18e   :  { %v11244_v19 = vpop.f32.mrf.mxu0  ;;  %v11246_v20 = vpop.f32.mrf.mxu1 }
 0x190   :  { %v11252_v23 = vpop.f32.mrf.mxu0  ;;  %v11254_v24 = vpop.f32.mrf.mxu1 }
 0x192   :  { %v563_v27 = vpop.f32.mrf.mxu0  ;;  %v676_v28 = vpop.f32.mrf.mxu1 }
 0x193   :  { %v11269_v31 = vadd.f32 %v563_v27, %v11257_v25  ;;  %v11272_v32 = vadd.f32 %v676_v28, %v11260_v26 }
 0x194   :  { %v565_v33 = vpop.f32.mrf.mxu0  ;;  %v678_v34 = vpop.f32.mrf.mxu1 }
 0x195   :  { %v11275_v35 = vadd.f32 %v565_v33, %v11263_v29  ;;  %v11278_v36 = vadd.f32 %v678_v34, %v11266_v30 }
 0x196   :  { %v567_v37 = vpop.f32.mrf.mxu0  ;;  %v680_v38 = vpop.f32.mrf.mxu1 }
 0x197   :  { %v11281_v39 = vadd.f32 %v567_v37, %v11257_v25  ;;  %v11284_v40 = vadd.f32 %v680_v38, %v11260_v26 }
 0x198   :  { %v11286_v41 = vpop.f32.mrf.mxu0  ;;  %v11288_v42 = vpop.f32.mrf.mxu1 }
 0x19a   :  { %v573_v43 = vpop.f32.mrf.mxu0  ;;  %v686_v44 = vpop.f32.mrf.mxu1 }
 0x19b   :  { %v11291_v45 = vadd.f32 %v573_v43, %v11257_v25  ;;  %v11294_v46 = vadd.f32 %v686_v44, %v11260_v26 }
 0x19c   :  { %v575_v47 = vpop.f32.mrf.mxu0  ;;  %v688_v48 = vpop.f32.mrf.mxu1 }
 0x19d   :  { %v11297_v49 = vadd.f32 %v575_v47, %v11263_v29  ;;  %v11300_v50 = vadd.f32 %v688_v48, %v11266_v30 }
 0x19e   :  { %v577_v51 = vpop.f32.mrf.mxu0  ;;  %v690_v52 = vpop.f32.mrf.mxu1 }
 0x19f   :  { %v11303_v53 = vadd.f32 %v577_v51, %v11257_v25  ;;  %v11306_v54 = vadd.f32 %v690_v52, %v11260_v26 }
 0x1a0   :  { %v11308_v55 = vpop.f32.mrf.mxu0  ;;  %v11310_v56 = vpop.f32.mrf.mxu1 }
 0x1a2   :  { %v583_v57 = vpop.f32.mrf.mxu0  ;;  %v696_v58 = vpop.f32.mrf.mxu1 }
 0x1a3   :  { %v11313_v59 = vadd.f32 %v583_v57, %v11257_v25  ;;  %v11316_v60 = vadd.f32 %v696_v58, %v11260_v26 }
 0x1a4   :  { %v585_v61 = vpop.f32.mrf.mxu0  ;;  %v698_v62 = vpop.f32.mrf.mxu1 }
 0x1a5   :  { %14063 = vst [vmem:[#allocation45_spill] sm:$0xff] %v11316_v60  ;;  %v11319_v6 = vadd.f32 %v585_v61, %v11263_v29  ;;  %v11322_v7 = vadd.f32 %v698_v62, %v11266_v30 }
 0x1a6   :  { %v587_v8 = vpop.f32.mrf.mxu0  ;;  %v700_v9 = vpop.f32.mrf.mxu1 }
 0x1a7   :  { %14064 = vst [vmem:[#allocation46_spill] sm:$0xff] %v11322_v7  ;;  %v11325_v10 = vadd.f32 %v587_v8, %v11257_v25  ;;  %v11328_v11 = vadd.f32 %v700_v9, %v11260_v26 }
 0x1a8   :  { %v11330_v18 = vpop.f32.mrf.mxu0  ;;  %v11332_v27 = vpop.f32.mrf.mxu1 }
 0x1a9   :  { %14065 = vst [vmem:[#allocation47_spill] sm:$0xff] %v11325_v10  ;;  %14066 = vst [vmem:[#allocation48_spill] sm:$0xff] %v11328_v11 }
 0x1aa   :  { %14067 = vst [vmem:[#allocation49_spill] sm:$0xff] %v11330_v18  ;;  %14068 = vst [vmem:[#allocation50_spill] sm:$0xff] %v11332_v27  ;;  %v593_v28 = vpop.f32.mrf.mxu0  ;;  %v706_v33 = vpop.f32.mrf.mxu1 }
 0x1ab   :  { %v11335_v34 = vadd.f32 %v593_v28, %v11257_v25  ;;  %v11338_v37 = vadd.f32 %v706_v33, %v11260_v26 }
 0x1ac   :  { %v595_v38 = vpop.f32.mrf.mxu0  ;;  %v708_v43 = vpop.f32.mrf.mxu1 }
 0x1ad   :  { %14069 = vst [vmem:[#allocation51_spill] sm:$0xff] %v11335_v34  ;;  %14070 = vst [vmem:[#allocation52_spill] sm:$0xff] %v11338_v37  ;;  %v11341_v44 = vadd.f32 %v595_v38, %v11263_v29  ;;  %v11344_v47 = vadd.f32 %v708_v43, %v11266_v30  ;;  %v11516_v37 = vld [vmem:[#allocation10 + $0x24] ss:$16 sps:$4 sm:$0xff]  }
 0x1ae   :  { %v597_v48 = vpop.f32.mrf.mxu0  ;;  %v710_v51 = vpop.f32.mrf.mxu1 }
 0x1af   :  { %14071 = vst [vmem:[#allocation53_spill] sm:$0xff] %v11341_v44  ;;  %14072 = vst [vmem:[#allocation54_spill] sm:$0xff] %v11344_v47  ;;  %v11347_v52 = vadd.f32 %v597_v48, %v11257_v25  ;;  %v11350_v57 = vadd.f32 %v710_v51, %v11260_v26  ;;  %v11528_v47 = vld [vmem:[#allocation10 + $0xe4] ss:$16 sps:$4 sm:$0xff]  }
 0x1b0   :  { %v11352_v58 = vpop.f32.mrf.mxu0  ;;  %v11354_v61 = vpop.f32.mrf.mxu1 }
 0x1b1   :  { %14073 = vst [vmem:[#allocation55_spill] sm:$0xff] %v11347_v52  ;;  %14074 = vst [vmem:[#allocation56_spill] sm:$0xff] %v11350_v57  ;;  %v11531_v52 = vld [vmem:[#allocation10 + $0xec] ss:$16 sps:$4 sm:$0xff]  }
 0x1b2   :  { %14075 = vst [vmem:[#allocation57_spill] sm:$0xff] %v11352_v58  ;;  %14076 = vst [vmem:[#allocation58_spill] sm:$0xff] %v11354_v61  ;;  %v603_v62 = vpop.f32.mrf.mxu0  ;;  %v716_v8 = vpop.f32.mrf.mxu1  ;;  %v11520_v61 = vld [vmem:[#allocation10 + $0x20] ss:$16 sps:$4 sm:$0xff]  }
 0x1b3   :  { %v11357_v9 = vadd.f32 %v603_v62, %v11257_v25  ;;  %v11360_v28 = vadd.f32 %v716_v8, %v11260_v26 }
 0x1b4   :  { %v605_v33 = vpop.f32.mrf.mxu0  ;;  %v718_v38 = vpop.f32.mrf.mxu1 }
 0x1b5   :  { %14077 = vst [vmem:[#allocation59_spill] sm:$0xff] %v11357_v9  ;;  %14078 = vst [vmem:[#allocation60_spill] sm:$0xff] %v11360_v28  ;;  %v11363_v43 = vadd.f32 %v605_v33, %v11263_v29  ;;  %v11366_v48 = vadd.f32 %v718_v38, %v11266_v30 }
 0x1b6   :  { %v607_v51 = vpop.f32.mrf.mxu0  ;;  %v720_v0 = vpop.f32.mrf.mxu1 }
 0x1b7   :  { %14079 = vst [vmem:[#allocation61_spill] sm:$0xff] %v11363_v43  ;;  %14080 = vst [vmem:[#allocation62_spill] sm:$0xff] %v11366_v48  ;;  %v11369_v17 = vadd.f32 %v607_v51, %v11257_v25  ;;  %v11372_v22 = vadd.f32 %v720_v0, %v11260_v26 }
 0x1b8   :  { %v11374_v62 = vpop.f32.mrf.mxu0  ;;  %v11376_v8 = vpop.f32.mrf.mxu1 }
 0x1b9   :  { %14081 = vst [vmem:[#allocation63_spill] sm:$0xff] %v11369_v17  ;;  %14082 = vst [vmem:[#allocation64_spill] sm:$0xff] %v11372_v22 }
 0x1ba   :  { %14083 = vst [vmem:[#allocation65_spill] sm:$0xff] %v11374_v62  ;;  %14084 = vst [vmem:[#allocation66_spill] sm:$0xff] %v11376_v8  ;;  %v613_v21 = vpop.f32.mrf.mxu0  ;;  %v726_v16 = vpop.f32.mrf.mxu1 }
 0x1bb   :  { %v11379_v33 = vadd.f32 %v613_v21, %v11257_v25  ;;  %v11382_v38 = vadd.f32 %v726_v16, %v11260_v26 }
 0x1bc   :  { %v615_v28 = vpop.f32.mrf.mxu0  ;;  %v728_v48 = vpop.f32.mrf.mxu1 }
 0x1bd   :  { %14085 = vst [vmem:[#allocation67_spill] sm:$0xff] %v11379_v33  ;;  %14086 = vst [vmem:[#allocation68_spill] sm:$0xff] %v11382_v38  ;;  %v11385_v51 = vadd.f32 %v615_v28, %v11263_v29  ;;  %v11388_v0 = vadd.f32 %v728_v48, %v11266_v30 }
 0x1be   :  { %v617_v22 = vpop.f32.mrf.mxu0  ;;  %v730_v17 = vpop.f32.mrf.mxu1 }
 0x1bf   :  { %14087 = vst [vmem:[#allocation69_spill] sm:$0xff] %v11385_v51  ;;  %14088 = vst [vmem:[#allocation70_spill] sm:$0xff] %v11388_v0  ;;  %v11391_v8 = vadd.f32 %v617_v22, %v11257_v25  ;;  %v11394_v62 = vadd.f32 %v730_v17, %v11260_v26 }
 0x1c0   :  { %v11396_v21 = vpop.f32.mrf.mxu0  ;;  %v11398_v16 = vpop.f32.mrf.mxu1 }
 0x1c1   :  { %14089 = vst [vmem:[#allocation71_spill] sm:$0xff] %v11391_v8  ;;  %14090 = vst [vmem:[#allocation72_spill] sm:$0xff] %v11394_v62 }
 0x1c2   :  { %14091 = vst [vmem:[#allocation73_spill] sm:$0xff] %v11396_v21  ;;  %14092 = vst [vmem:[#allocation74_spill] sm:$0xff] %v11398_v16  ;;  %v623_v38 = vpop.f32.mrf.mxu0  ;;  %v736_v33 = vpop.f32.mrf.mxu1 }
 0x1c3   :  { %v11401_v28 = vadd.f32 %v623_v38, %v11257_v25  ;;  %v11404_v48 = vadd.f32 %v736_v33, %v11260_v26 }
 0x1c4   :  { %v625_v0 = vpop.f32.mrf.mxu0  ;;  %v738_v51 = vpop.f32.mrf.mxu1 }
 0x1c5   :  { %14093 = vst [vmem:[#allocation75_spill] sm:$0xff] %v11401_v28  ;;  %14094 = vst [vmem:[#allocation76_spill] sm:$0xff] %v11404_v48  ;;  %v11407_v22 = vadd.f32 %v625_v0, %v11263_v29  ;;  %v11410_v17 = vadd.f32 %v738_v51, %v11266_v30  ;;  %v554_v48 = vadd.f32 %v11229_v12, %v11257_v25 }
 0x1c6   :  { %v627_v62 = vpop.f32.mrf.mxu0  ;;  %v740_v8 = vpop.f32.mrf.mxu1  ;;  %v556_v51 = vadd.f32 %v11233_v14, %v11263_v29 }
 0x1c7   :  { %14095 = vst [vmem:[#allocation77_spill] sm:$0xff] %v11407_v22  ;;  %14096 = vst [vmem:[#allocation78_spill] sm:$0xff] %v11410_v17  ;;  %v11413_v16 = vadd.f32 %v627_v62, %v11257_v25  ;;  %v11416_v21 = vadd.f32 %v740_v8, %v11260_v26  ;;  %v558_v62 = vadd.f32 %v11244_v19, %v11257_v25 }
 0x1c8   :  { %v11418_v38 = vpop.f32.mrf.mxu0  ;;  %v11420_v33 = vpop.f32.mrf.mxu1  ;;  %v669_v19 = vadd.f32 %v11235_v15, %v11266_v30 }
 0x1c9   :  { %14097 = vst [vmem:[#allocation79_spill] sm:$0xff] %v11413_v16  ;;  %14098 = vst [vmem:[#allocation80_spill] sm:$0xff] %v11416_v21 }
 0x1ca   :  { %14099 = vst [vmem:[#allocation81_spill] sm:$0xff] %v11418_v38  ;;  %14100 = vst [vmem:[#allocation82_spill] sm:$0xff] %v11420_v33  ;;  %v1043_v0 = vpop.f32.mrf.mxu0  ;;  %v1086_v22 = vpop.f32.mrf.mxu1  ;;  %v560_v38 = vadd.f32 %v11252_v23, %v11263_v29 }
 0x1cb   :  { %v1095_v17 = vadd.f32 %v1043_v0, %v554_v48 }
 0x1cc   :  { %v1045_v28 = vpop.f32.mrf.mxu0  ;;  %v1088_v43 = vpop.f32.mrf.mxu1 }
 0x1cd   :  { %v8344_v16 = vmul.f32 -1.442695, %v1095_v17  ;;  %v1096_v8 = vadd.f32 %v1045_v28, %v556_v51  ;;  %v1098_v25 = vadd.f32 %v1088_v43, %v669_v19  ;;  %v667_v28 = vadd.f32 %v11231_v13, %v11260_v26 }
 0x1ce   :  { %v1047_v21 = vpop.f32.mrf.mxu0  ;;  %v1090_v48 = vpop.f32.mrf.mxu1  ;;  %v671_v17 = vadd.f32 %v11246_v20, %v11260_v26 }
 0x1cf   :  { %9328 = vpow2.f32 %v8344_v16  ;;  %v8346_v33 = vmul.f32 -1.442695, %v1096_v8  ;;  %v1099_v12 = vadd.f32 %v1047_v21, %v558_v62  ;;  %v673_v16 = vadd.f32 %v11254_v24, %v11266_v30 }
 0x1d0   :  { %v1049_v9 = vpop.f32.mrf.mxu0  ;;  %v1092_v23 = vpop.f32.mrf.mxu1  ;;  %v1097_v21 = vadd.f32 %v1086_v22, %v667_v28 }
 0x1d1   :  { %9330 = vpow2.f32 %v8346_v33  ;;  %v8345_v57 = vmul.f32 -1.442695, %v1099_v12  ;;  %v1100_v14 = vadd.f32 %v1049_v9, %v560_v38  ;;  %v8348_v9 = vmul.f32 -1.442695, %v1098_v25 }
 0x1d2   :  { %v1101_v33 = vadd.f32 %v1090_v48, %v671_v17 }
 0x1d3   :  { %9332 = vpow2.f32 %v8345_v57  ;;  %v8347_v0 = vmul.f32 -1.442695, %v1100_v14  ;;  %v1102_v57 = vadd.f32 %v1092_v23, %v673_v16 }
 0x1d5   :  { %9334 = vpow2.f32 %v8347_v0  ;;  %v8349_v43 = vmul.f32 -1.442695, %v1102_v57 }
 0x1d6   :  { %9336 = vtanh.f32 %v1097_v21 }
 0x1d7   :  { %9338 = vpow2.f32 %v8348_v9 }
 0x1dc   :  { %v9329_v38 = vpop.eup %9328 }
 0x1dd   :  { %v1109_v51 = vadd.f32 1.0, %v9329_v38 }
 0x1de   :  { %v9331_v15 = vpop.eup %9330 }
 0x1df   :  { %9340 = vrcp.f32 %v1109_v51  ;;  %v1121_v62 = vadd.f32 1.0, %v9331_v15 }
 0x1e0   :  { %v9333_v13 = vpop.eup %9332  ;;  %9342 = vtanh.f32 %v1101_v33 }
 0x1e1   :  { %9344 = vrcp.f32 %v1121_v62  ;;  %v1110_v8 = vadd.f32 1.0, %v9333_v13 }
 0x1e2   :  { %v9335_v24 = vpop.eup %9334  ;;  %9346 = vpow2.f32 %v8349_v43 }
 0x1e3   :  { %9348 = vrcp.f32 %v1110_v8  ;;  %v1122_v22 = vadd.f32 1.0, %v9335_v24  ;;  %v9337_v20 = vpop.eup %9336  ;;  %v11448_v24 = vld [vmem:[#allocation10 + $0xe0] ss:$16 sps:$4 sm:$0xff]  }
 0x1e4   :  { %v9339_v26 = vpop.eup %9338 }
 0x1e5   :  { %9350 = vrcp.f32 %v1122_v22  ;;  %v1135_v23 = vadd.f32 1.0, %v9339_v26  ;;  %v11451_v22 = vld [vmem:[#allocation10 + $0xe8] ss:$16 sps:$4 sm:$0xff]   ;;  %v11457_v26 = vld [vmem:[#allocation10 + $0xcc] ss:$16 sps:$4 sm:$0xff]  }
 0x1e7   :  { %9352 = vrcp.f32 %v1135_v23  ;;  %v11480_v23 = vld [vmem:[#allocation10 + $0x84] ss:$16 sps:$4 sm:$0xff]  }
 0x1ec   :  { %v9341_v12 = vpop.eup %9340 }
 0x1ed   :  { %v9343_v14 = vpop.eup %9342  ;;  %v1143_v48 = vmul.f32 %v9341_v12, %v9337_v20  ;;  %v11454_v20 = vld [vmem:[#allocation10 + $0xc4] ss:$16 sps:$4 sm:$0xff]   ;;  %v14102_v12 = vmov 0  }
 0x1ee   :  { %v9345_v0 = vpop.eup %9344 }
 0x1ef   :  { %v9347_v19 = vpop.eup %9346  ;;  %v1141_v25 = vmul.f32 0.0, %v9345_v0  ;;  %v11468_v0 = vld [vmem:[#allocation10 + $0xa4] ss:$16 sps:$4 sm:$0xff]  }
 0x1f0   :  { %v9349_v28 = vpop.eup %9348  ;;  %v1136_v9 = vadd.f32 1.0, %v9347_v19  ;;  %v11471_v19 = vld [vmem:[#allocation10 + $0xac] ss:$16 sps:$4 sm:$0xff]  }
 0x1f1   :  { %v11438_v16 = vadd.f32 %v1143_v48, %v1141_v25  ;;  %v1144_v21 = vmul.f32 %v9349_v28, %v9343_v14  ;;  %v11462_v14 = vld [vmem:[#allocation10 + $0xc0] ss:$16 sps:$4 sm:$0xff]   ;;  %v11465_v48 = vld [vmem:[#allocation10 + $0xc8] ss:$16 sps:$4 sm:$0xff]  }
 0x1f2   :  { %v9351_v17 = vpop.eup %9350  ;;  %v11474_v25 = vld [vmem:[#allocation10 + $0xa0] ss:$16 sps:$4 sm:$0xff]   ;;  %v11477_v28 = vld [vmem:[#allocation10 + $0xa8] ss:$16 sps:$4 sm:$0xff]  }
 0x1f3   :  { %v1142_v57 = vmul.f32 0.0, %v9351_v17  ;;  %9354 = vtanh.f32 %v11438_v16  ;;  %v11486_v17 = vld [vmem:[#allocation10 + $0x80] ss:$16 sps:$4 sm:$0xff]  }
 0x1f4   :  { %9356 = vrcp.f32 %v1136_v9  ;;  %v9353_v33 = vpop.eup %9352  ;;  %v11489_v9 = vld [vmem:[#allocation10 + $0x88] ss:$16 sps:$4 sm:$0xff]  }
 0x1f5   :  { %v11441_v38 = vadd.f32 %v1144_v21, %v1142_v57  ;;  %v11483_v21 = vld [vmem:[#allocation10 + $0x8c] ss:$16 sps:$4 sm:$0xff]   ;;  %v11492_v57 = vld [vmem:[#allocation10 + $0x64] ss:$16 sps:$4 sm:$0xff]  }
 0x1f7   :  { %9358 = vtanh.f32 %v11441_v38 }
 0x200   :  { %v9355_v51 = vpop.eup %9354 }
 0x201   :  { %v9357_v15 = vpop.eup %9356  ;;  %v1149_v62 = vmul.f32 %v9355_v51, %v9353_v33  ;;  %v11495_v33 = vld [vmem:[#allocation10 + $0x6c] ss:$16 sps:$4 sm:$0xff]   ;;  %v11498_v51 = vld [vmem:[#allocation10 + $0x60] ss:$16 sps:$4 sm:$0xff]  }
 0x204   :  { %v9359_v43 = vpop.eup %9358 }
 0x205   :  { %v1150_v13 = vmul.f32 %v9359_v43, %v9357_v15  ;;  %v11501_v15 = vld [vmem:[#allocation10 + $0x68] ss:$16 sps:$4 sm:$0xff]   ;;  %v11504_v43 = vld [vmem:[#allocation10 + $0x44] ss:$16 sps:$4 sm:$0xff]  }
 0x207   :  { %v11444_v8 = vpack.c.bf16 %v1150_v13, %v1149_v62  ;;  %v11507_v62 = vld [vmem:[#allocation10 + $0x4c] ss:$16 sps:$4 sm:$0xff]   ;;  %v11510_v13 = vld [vmem:[#allocation10 + $0x40] ss:$16 sps:$4 sm:$0xff]  }
 0x209   :  { %14101 = vst [vmem:[#allocation83_spill] sm:$0xff] %v11444_v8  ;;  %1196 = vmatmul.mubr.bf16.vlgmr.msra.gmra.mxu0 %v11444_v8  ;;  %1239 = vmatmul.mubr.bf16.vlgmr.msra.gmra.mxu1 %v11444_v8  ;;  %v11513_v8 = vld [vmem:[#allocation10 + $0x48] ss:$16 sps:$4 sm:$0xff]  }
 0x20a   :  { %1319 = vmatpush1.bf16.msra.mxu0 %v11448_v24  ;;  %1362 = vmatpush1.bf16.msra.mxu1 %v11451_v22 }
 0x20b   :  { %1320 = vmatprep.subr.bf16.mxu0 %v11454_v20  ;;  %1363 = vmatprep.subr.bf16.mxu1 %v11457_v26 }
 0x20c   :  { %1350 = vmatprep.mubr.bf16.mxu0 %v14102_v12  ;;  %1393 = vmatprep.mubr.bf16.mxu1 %v14102_v12 }
 0x20e   :  { %1321 = vmatpush1.bf16.msra.mxu0 %v11462_v14  ;;  %1364 = vmatpush1.bf16.msra.mxu1 %v11465_v48 }
 0x20f   :  { %1322 = vmatprep.subr.bf16.mxu0 %v11468_v0  ;;  %1365 = vmatprep.subr.bf16.mxu1 %v11471_v19 }
 0x212   :  { %1323 = vmatpush1.bf16.msra.mxu0 %v11474_v25  ;;  %1366 = vmatpush1.bf16.msra.mxu1 %v11477_v28 }
 0x213   :  { %1324 = vmatprep.subr.bf16.mxu0 %v11480_v23  ;;  %1367 = vmatprep.subr.bf16.mxu1 %v11483_v21 }
 0x216   :  { %1325 = vmatpush1.bf16.msra.mxu0 %v11486_v17  ;;  %1368 = vmatpush1.bf16.msra.mxu1 %v11489_v9 }
 0x217   :  { %1326 = vmatprep.subr.bf16.mxu0 %v11492_v57  ;;  %1369 = vmatprep.subr.bf16.mxu1 %v11495_v33 }
 0x21a   :  { %1327 = vmatpush1.bf16.msra.mxu0 %v11498_v51  ;;  %1370 = vmatpush1.bf16.msra.mxu1 %v11501_v15 }
 0x21b   :  { %1328 = vmatprep.subr.bf16.mxu0 %v11504_v43  ;;  %1371 = vmatprep.subr.bf16.mxu1 %v11507_v62 }
 0x21e   :  { %1329 = vmatpush1.bf16.msra.mxu0 %v11510_v13  ;;  %1372 = vmatpush1.bf16.msra.mxu1 %v11513_v8 }
 0x21f   :  { %1330 = vmatprep.subr.bf16.mxu0 %v11516_v37  ;;  %1373 = vmatprep.subr.bf16.mxu1 %v11159_v63 }
 0x222   :  { %1331 = vmatpush1.bf16.msra.mxu0 %v11520_v61  ;;  %1374 = vmatpush1.bf16.msra.mxu1 %v11163_v2 }
 0x223   :  { %1332 = vmatprep.subr.bf16.mxu0 %v11161_v1  ;;  %1375 = vmatprep.subr.bf16.mxu1 %v11166_v3 }
 0x226   :  { %1333 = vmatpush1.bf16.msra.mxu0 %v11170_v4  ;;  %1376 = vmatpush1.bf16.msra.mxu1 %v11174_v5  ;;  %v570_v4 = vadd.f32 %v11286_v41, %v11263_v29 }
 0x227   :  { %1473 = vmatprep.subr.bf16.mxu0 %v11528_v47  ;;  %1516 = vmatprep.subr.bf16.mxu1 %v11531_v52 }
 0x2c9   :  { %v1197_v63 = vpop.f32.mrf.mxu0  ;;  %v1240_v2 = vpop.f32.mrf.mxu1 }
 0x2ca   :  { %v1249_v58 = vadd.f32 %v1197_v63, %v11269_v31  ;;  %v1251_v41 = vadd.f32 %v1240_v2, %v11272_v32 }
 0x2cb   :  { %v1199_v44 = vpop.f32.mrf.mxu0  ;;  %v1242_v11 = vpop.f32.mrf.mxu1 }
 0x2cc   :  { %v8350_v1 = vmul.f32 -1.442695, %v1249_v58  ;;  %v1250_v3 = vadd.f32 %v1199_v44, %v11275_v35  ;;  %v1252_v58 = vadd.f32 %v1242_v11, %v11278_v36  ;;  %v683_v44 = vadd.f32 %v11288_v42, %v11266_v30 }
 0x2cd   :  { %v1201_v34 = vpop.f32.mrf.mxu0  ;;  %v1244_v31 = vpop.f32.mrf.mxu1 }
 0x2ce   :  { %9360 = vpow2.f32 %v8350_v1  ;;  %v8352_v5 = vmul.f32 -1.442695, %v1250_v3  ;;  %v1253_v60 = vadd.f32 %v1201_v34, %v11281_v39  ;;  %v8354_v1 = vmul.f32 -1.442695, %v1252_v58 }
 0x2cf   :  { %v1203_v27 = vpop.f32.mrf.mxu0  ;;  %v1246_v35 = vpop.f32.mrf.mxu1  ;;  %v1255_v39 = vadd.f32 %v1244_v31, %v11284_v40 }
 0x2d0   :  { %9362 = vpow2.f32 %v8352_v5  ;;  %v8351_v7 = vmul.f32 -1.442695, %v1253_v60  ;;  %v1254_v10 = vadd.f32 %v1203_v27, %v570_v4  ;;  %v1256_v3 = vadd.f32 %v1246_v35, %v683_v44 }
 0x2d2   :  { %9364 = vpow2.f32 %v8351_v7  ;;  %v8353_v63 = vmul.f32 -1.442695, %v1254_v10  ;;  %v8355_v7 = vmul.f32 -1.442695, %v1256_v3 }
 0x2d4   :  { %9366 = vpow2.f32 %v8353_v63 }
 0x2d5   :  { %9368 = vtanh.f32 %v1251_v41 }
 0x2d6   :  { %9370 = vpow2.f32 %v8354_v1 }
 0x2db   :  { %v9361_v18 = vpop.eup %9360 }
 0x2dc   :  { %v1263_v34 = vadd.f32 1.0, %v9361_v18 }
 0x2dd   :  { %v9363_v60 = vpop.eup %9362 }
 0x2de   :  { %9372 = vrcp.f32 %v1263_v34  ;;  %v1275_v10 = vadd.f32 1.0, %v9363_v60 }
 0x2df   :  { %v9365_v27 = vpop.eup %9364  ;;  %9374 = vtanh.f32 %v1255_v39 }
 0x2e0   :  { %9376 = vrcp.f32 %v1275_v10  ;;  %v1264_v36 = vadd.f32 1.0, %v9365_v27 }
 0x2e1   :  { %v9367_v11 = vpop.eup %9366  ;;  %9378 = vpow2.f32 %v8355_v7 }
 0x2e2   :  { %9380 = vrcp.f32 %v1264_v36  ;;  %v1276_v32 = vadd.f32 1.0, %v9367_v11  ;;  %v9369_v42 = vpop.eup %9368 }
 0x2e3   :  { %v9371_v2 = vpop.eup %9370 }
 0x2e4   :  { %9382 = vrcp.f32 %v1276_v32  ;;  %v1289_v35 = vadd.f32 1.0, %v9371_v2  ;;  %v11585_v32 = vld [vmem:[#allocation10 + $0x28] ss:$16 sps:$4 sm:$0xff]   ;;  %v11591_v2 = vld [vmem:[#allocation10 + $0xc] ss:$16 sps:$4 sm:$0xff]  }
 0x2e6   :  { %9384 = vrcp.f32 %v1289_v35 }
 0x2eb   :  { %v9373_v4 = vpop.eup %9372 }
 0x2ec   :  { %v9375_v40 = vpop.eup %9374  ;;  %v1297_v18 = vmul.f32 %v9373_v4, %v9369_v42  ;;  %v11588_v42 = vld [vmem:[#allocation10 + $0x4] ss:$16 sps:$4 sm:$0xff]   ;;  %v11594_v4 = vld [vmem:[#allocation10] ss:$16 sps:$4 sm:$0xff]  }
 0x2ed   :  { %v9377_v5 = vpop.eup %9376 }
 0x2ee   :  { %v9379_v31 = vpop.eup %9378  ;;  %v1295_v63 = vmul.f32 %v9377_v5, %v11438_v16 }
 0x2ef   :  { %v9381_v58 = vpop.eup %9380  ;;  %v1290_v3 = vadd.f32 1.0, %v9379_v31 }
 0x2f0   :  { %v11545_v44 = vadd.f32 %v1297_v18, %v1295_v63  ;;  %v1298_v41 = vmul.f32 %v9381_v58, %v9375_v40  ;;  %v11597_v40 = vld [vmem:[#allocation10 + $0x8] ss:$16 sps:$4 sm:$0xff]  }
 0x2f1   :  { %v9383_v1 = vpop.eup %9382 }
 0x2f2   :  { %v1296_v39 = vmul.f32 %v9383_v1, %v11441_v38  ;;  %9386 = vtanh.f32 %v11545_v44  ;;  %v11581_v38 = vld [vmem:[#allocation10 + $0x2c] ss:$16 sps:$4 sm:$0xff]   ;;  %v580_v1 = vadd.f32 %v11308_v55, %v11263_v29 }
 0x2f3   :  { %9388 = vrcp.f32 %v1290_v3  ;;  %v9385_v60 = vpop.eup %9384 }
 0x2f4   :  { %v11548_v34 = vadd.f32 %v1298_v41, %v1296_v39 }
 0x2f6   :  { %9390 = vtanh.f32 %v11548_v34 }
 0x2ff   :  { %v9387_v7 = vpop.eup %9386 }
 0x300   :  { %v9389_v16 = vpop.eup %9388  ;;  %v1303_v27 = vmul.f32 %v9387_v7, %v9385_v60 }
 0x303   :  { %v9391_v10 = vpop.eup %9390 }
 0x304   :  { %v1304_v36 = vmul.f32 %v9391_v10, %v9389_v16 }
 0x306   :  { %v11552_v11 = vpack.c.bf16 %v1304_v36, %v1303_v27 }
 0x308   :  { %1351 = vmatmul.mubr.bf16.vlgmr.msra.gmra.mxu0 %v11552_v11  ;;  %1394 = vmatmul.mubr.bf16.vlgmr.msra.gmra.mxu1 %v11552_v11 }
 0x309   :  { %1474 = vmatpush1.bf16.msra.mxu0 %v11448_v24  ;;  %1517 = vmatpush1.bf16.msra.mxu1 %v11451_v22 }
 0x30a   :  { %1475 = vmatprep.subr.bf16.mxu0 %v11454_v20  ;;  %1518 = vmatprep.subr.bf16.mxu1 %v11457_v26 }
 0x30b   :  { %1505 = vmatprep.mubr.bf16.mxu0 %v14102_v12  ;;  %1548 = vmatprep.mubr.bf16.mxu1 %v14102_v12 }
 0x30d   :  { %1476 = vmatpush1.bf16.msra.mxu0 %v11462_v14  ;;  %1519 = vmatpush1.bf16.msra.mxu1 %v11465_v48 }
 0x30e   :  { %1477 = vmatprep.subr.bf16.mxu0 %v11468_v0  ;;  %1520 = vmatprep.subr.bf16.mxu1 %v11471_v19 }
 0x311   :  { %1478 = vmatpush1.bf16.msra.mxu0 %v11474_v25  ;;  %1521 = vmatpush1.bf16.msra.mxu1 %v11477_v28 }
 0x312   :  { %1479 = vmatprep.subr.bf16.mxu0 %v11480_v23  ;;  %1522 = vmatprep.subr.bf16.mxu1 %v11483_v21 }
 0x315   :  { %1480 = vmatpush1.bf16.msra.mxu0 %v11486_v17  ;;  %1523 = vmatpush1.bf16.msra.mxu1 %v11489_v9 }
 0x316   :  { %1481 = vmatprep.subr.bf16.mxu0 %v11492_v57  ;;  %1524 = vmatprep.subr.bf16.mxu1 %v11495_v33 }
 0x319   :  { %1482 = vmatpush1.bf16.msra.mxu0 %v11498_v51  ;;  %1525 = vmatpush1.bf16.msra.mxu1 %v11501_v15 }
 0x31a   :  { %1483 = vmatprep.subr.bf16.mxu0 %v11504_v43  ;;  %1526 = vmatprep.subr.bf16.mxu1 %v11507_v62 }
 0x31d   :  { %1484 = vmatpush1.bf16.msra.mxu0 %v11510_v13  ;;  %1527 = vmatpush1.bf16.msra.mxu1 %v11513_v8 }
 0x31e   :  { %1485 = vmatprep.subr.bf16.mxu0 %v11516_v37  ;;  %1528 = vmatprep.subr.bf16.mxu1 %v11581_v38 }
 0x321   :  { %1486 = vmatpush1.bf16.msra.mxu0 %v11520_v61  ;;  %1529 = vmatpush1.bf16.msra.mxu1 %v11585_v32 }
 0x322   :  { %1487 = vmatprep.subr.bf16.mxu0 %v11588_v42  ;;  %1530 = vmatprep.subr.bf16.mxu1 %v11591_v2 }
 0x325   :  { %1488 = vmatpush1.bf16.msra.mxu0 %v11594_v4  ;;  %1531 = vmatpush1.bf16.msra.mxu1 %v11597_v40 }
 0x326   :  { %1628 = vmatprep.subr.bf16.mxu0 %v11528_v47  ;;  %1671 = vmatprep.subr.bf16.mxu1 %v11531_v52 }
 0x3c8   :  { %v1352_v18 = vpop.f32.mrf.mxu0  ;;  %v1395_v31 = vpop.f32.mrf.mxu1 }
 0x3c9   :  { %v1404_v5 = vadd.f32 %v1352_v18, %v11291_v45  ;;  %v693_v18 = vadd.f32 %v11310_v56, %v11266_v30  ;;  %v1406_v55 = vadd.f32 %v1395_v31, %v11294_v46 }
 0x3ca   :  { %v1354_v63 = vpop.f32.mrf.mxu0  ;;  %v1397_v39 = vpop.f32.mrf.mxu1 }
 0x3cb   :  { %v8356_v58 = vmul.f32 -1.442695, %v1404_v5  ;;  %v1405_v35 = vadd.f32 %v1354_v63, %v11297_v49  ;;  %v1407_v36 = vadd.f32 %v1397_v39, %v11300_v50 }
 0x3cc   :  { %v1356_v41 = vpop.f32.mrf.mxu0  ;;  %v1399_v45 = vpop.f32.mrf.mxu1 }
 0x3cd   :  { %9392 = vpow2.f32 %v8356_v58  ;;  %v8358_v3 = vmul.f32 -1.442695, %v1405_v35  ;;  %v1408_v60 = vadd.f32 %v1356_v41, %v11303_v53  ;;  %v8360_v5 = vmul.f32 -1.442695, %v1407_v36 }
 0x3ce   :  { %v1358_v7 = vpop.f32.mrf.mxu0  ;;  %v1401_v49 = vpop.f32.mrf.mxu1  ;;  %v1410_v53 = vadd.f32 %v1399_v45, %v11306_v54 }
 0x3cf   :  { %9394 = vpow2.f32 %v8358_v3  ;;  %v8357_v16 = vmul.f32 -1.442695, %v1408_v60  ;;  %v1409_v10 = vadd.f32 %v1358_v7, %v580_v1  ;;  %v1411_v63 = vadd.f32 %v1401_v49, %v693_v18 }
 0x3d1   :  { %9396 = vpow2.f32 %v8357_v16  ;;  %v8359_v27 = vmul.f32 -1.442695, %v1409_v10  ;;  %v8361_v1 = vmul.f32 -1.442695, %v1411_v63 }
 0x3d3   :  { %9398 = vpow2.f32 %v8359_v27 }
 0x3d4   :  { %9400 = vtanh.f32 %v1406_v55 }
 0x3d5   :  { %9402 = vpow2.f32 %v8360_v5 }
 0x3da   :  { %v9393_v58 = vpop.eup %9392 }
 0x3db   :  { %v1418_v35 = vadd.f32 1.0, %v9393_v58 }
 0x3dc   :  { %v9395_v41 = vpop.eup %9394 }
 0x3dd   :  { %9404 = vrcp.f32 %v1418_v35  ;;  %v1430_v3 = vadd.f32 1.0, %v9395_v41 }
 0x3de   :  { %v9397_v60 = vpop.eup %9396  ;;  %9406 = vtanh.f32 %v1410_v53 }
 0x3df   :  { %9408 = vrcp.f32 %v1430_v3  ;;  %v1419_v50 = vadd.f32 1.0, %v9397_v60 }
 0x3e0   :  { %v9399_v39 = vpop.eup %9398  ;;  %9410 = vpow2.f32 %v8361_v1 }
 0x3e1   :  { %9412 = vrcp.f32 %v1419_v50  ;;  %v1431_v46 = vadd.f32 1.0, %v9399_v39  ;;  %v9401_v56 = vpop.eup %9400 }
 0x3e2   :  { %v9403_v31 = vpop.eup %9402 }
 0x3e3   :  { %9414 = vrcp.f32 %v1431_v46  ;;  %v1444_v49 = vadd.f32 1.0, %v9403_v31 }
 0x3e5   :  { %9416 = vrcp.f32 %v1444_v49 }
 0x3ea   :  { %v9405_v7 = vpop.eup %9404 }
 0x3eb   :  { %v9407_v54 = vpop.eup %9406  ;;  %v1452_v16 = vmul.f32 %v9405_v7, %v9401_v56 }
 0x3ec   :  { %v9409_v10 = vpop.eup %9408 }
 0x3ed   :  { %v9411_v45 = vpop.eup %9410  ;;  %v1450_v27 = vmul.f32 %v9409_v10, %v11545_v44 }
 0x3ee   :  { %v9413_v36 = vpop.eup %9412  ;;  %v1445_v63 = vadd.f32 1.0, %v9411_v45 }
 0x3ef   :  { %v11613_v18 = vadd.f32 %v1452_v16, %v1450_v27  ;;  %v1453_v55 = vmul.f32 %v9413_v36, %v9407_v54  ;;  %v14103_v16 = vld [vmem:[#allocation49_spill] sm:$0xff]  ;;  %v14104_v36 = vld [vmem:[#allocation47_spill] sm:$0xff] }
 0x3f0   :  { %v9415_v5 = vpop.eup %9414  ;;  %v590_v10 = vadd.f32 %v14103_v16, %v11263_v29 }
 0x3f1   :  { %v1451_v58 = vmul.f32 %v9415_v5, %v11548_v34  ;;  %9418 = vtanh.f32 %v11613_v18 }
 0x3f2   :  { %9420 = vrcp.f32 %v1445_v63  ;;  %v9417_v35 = vpop.eup %9416 }
 0x3f3   :  { %v11616_v53 = vadd.f32 %v1453_v55, %v1451_v58 }
 0x3f5   :  { %9422 = vtanh.f32 %v11616_v53 }
 0x3fe   :  { %v9419_v41 = vpop.eup %9418 }
 0x3ff   :  { %v9421_v44 = vpop.eup %9420  ;;  %v1458_v3 = vmul.f32 %v9419_v41, %v9417_v35  ;;  %v14105_v35 = vld [vmem:[#allocation46_spill] sm:$0xff] }
 0x402   :  { %v9423_v1 = vpop.eup %9422 }
 0x403   :  { %v1459_v60 = vmul.f32 %v9423_v1, %v9421_v44  ;;  %v14106_v44 = vld [vmem:[#allocation50_spill] sm:$0xff] }
 0x404   :  { %v703_v1 = vadd.f32 %v14106_v44, %v11266_v30 }
 0x405   :  { %v11620_v50 = vpack.c.bf16 %v1459_v60, %v1458_v3  ;;  %v14107_v3 = vld [vmem:[#allocation45_spill] sm:$0xff] }
 0x407   :  { %1506 = vmatmul.mubr.bf16.vlgmr.msra.gmra.mxu0 %v11620_v50  ;;  %1549 = vmatmul.mubr.bf16.vlgmr.msra.gmra.mxu1 %v11620_v50 }
 0x408   :  { %1629 = vmatpush1.bf16.msra.mxu0 %v11448_v24  ;;  %1672 = vmatpush1.bf16.msra.mxu1 %v11451_v22 }
 0x409   :  { %1630 = vmatprep.subr.bf16.mxu0 %v11454_v20  ;;  %1673 = vmatprep.subr.bf16.mxu1 %v11457_v26 }
 0x40a   :  { %1660 = vmatprep.mubr.bf16.mxu0 %v14102_v12  ;;  %1703 = vmatprep.mubr.bf16.mxu1 %v14102_v12 }
 0x40c   :  { %1631 = vmatpush1.bf16.msra.mxu0 %v11462_v14  ;;  %1674 = vmatpush1.bf16.msra.mxu1 %v11465_v48 }
 0x40d   :  { %1632 = vmatprep.subr.bf16.mxu0 %v11468_v0  ;;  %1675 = vmatprep.subr.bf16.mxu1 %v11471_v19 }
 0x410   :  { %1633 = vmatpush1.bf16.msra.mxu0 %v11474_v25  ;;  %1676 = vmatpush1.bf16.msra.mxu1 %v11477_v28 }
 0x411   :  { %1634 = vmatprep.subr.bf16.mxu0 %v11480_v23  ;;  %1677 = vmatprep.subr.bf16.mxu1 %v11483_v21 }
 0x414   :  { %1635 = vmatpush1.bf16.msra.mxu0 %v11486_v17  ;;  %1678 = vmatpush1.bf16.msra.mxu1 %v11489_v9 }
 0x415   :  { %1636 = vmatprep.subr.bf16.mxu0 %v11492_v57  ;;  %1679 = vmatprep.subr.bf16.mxu1 %v11495_v33 }
 0x418   :  { %1637 = vmatpush1.bf16.msra.mxu0 %v11498_v51  ;;  %1680 = vmatpush1.bf16.msra.mxu1 %v11501_v15 }
 0x419   :  { %1638 = vmatprep.subr.bf16.mxu0 %v11504_v43  ;;  %1681 = vmatprep.subr.bf16.mxu1 %v11507_v62 }
 0x41c   :  { %1639 = vmatpush1.bf16.msra.mxu0 %v11510_v13  ;;  %1682 = vmatpush1.bf16.msra.mxu1 %v11513_v8 }
 0x41d   :  { %1640 = vmatprep.subr.bf16.mxu0 %v11516_v37  ;;  %1683 = vmatprep.subr.bf16.mxu1 %v11581_v38 }
 0x420   :  { %1641 = vmatpush1.bf16.msra.mxu0 %v11520_v61  ;;  %1684 = vmatpush1.bf16.msra.mxu1 %v11585_v32 }
 0x421   :  { %1642 = vmatprep.subr.bf16.mxu0 %v11588_v42  ;;  %1685 = vmatprep.subr.bf16.mxu1 %v11591_v2 }
 0x424   :  { %1643 = vmatpush1.bf16.msra.mxu0 %v11594_v4  ;;  %1686 = vmatpush1.bf16.msra.mxu1 %v11597_v40 }
 0x425   :  { %1783 = vmatprep.subr.bf16.mxu0 %v11528_v47  ;;  %1826 = vmatprep.subr.bf16.mxu1 %v11531_v52 }
 0x4c7   :  { %v1507_v34 = vpop.f32.mrf.mxu0  ;;  %v1550_v46 = vpop.f32.mrf.mxu1 }
 0x4c8   :  { %v1559_v39 = vadd.f32 %v1507_v34, %v11313_v59  ;;  %v1561_v60 = vadd.f32 %v1550_v46, %v14107_v3 }
 0x4c9   :  { %v1509_v56 = vpop.f32.mrf.mxu0  ;;  %v1552_v27 = vpop.f32.mrf.mxu1 }
 0x4ca   :  { %v8362_v31 = vmul.f32 -1.442695, %v1559_v39  ;;  %v1560_v7 = vadd.f32 %v1509_v56, %v11319_v6  ;;  %v1562_v41 = vadd.f32 %v1552_v27, %v14105_v35 }
 0x4cb   :  { %v1511_v54 = vpop.f32.mrf.mxu0  ;;  %v1554_v59 = vpop.f32.mrf.mxu1 }
 0x4cc   :  { %9424 = vpow2.f32 %v8362_v31  ;;  %v8364_v45 = vmul.f32 -1.442695, %v1560_v7  ;;  %v1563_v49 = vadd.f32 %v1511_v54, %v14104_v36  ;;  %v8366_v34 = vmul.f32 -1.442695, %v1562_v41  ;;  %v14108_v31 = vld [vmem:[#allocation48_spill] sm:$0xff] }
 0x4cd   :  { %v1513_v55 = vpop.f32.mrf.mxu0  ;;  %v1556_v6 = vpop.f32.mrf.mxu1  ;;  %v1565_v7 = vadd.f32 %v1554_v59, %v14108_v31 }
 0x4ce   :  { %9426 = vpow2.f32 %v8364_v45  ;;  %v8363_v5 = vmul.f32 -1.442695, %v1563_v49  ;;  %v1564_v63 = vadd.f32 %v1513_v55, %v590_v10  ;;  %v1566_v39 = vadd.f32 %v1556_v6, %v703_v1 }
 0x4d0   :  { %9428 = vpow2.f32 %v8363_v5  ;;  %v8365_v58 = vmul.f32 -1.442695, %v1564_v63  ;;  %v8367_v10 = vmul.f32 -1.442695, %v1566_v39 }
 0x4d2   :  { %9430 = vpow2.f32 %v8365_v58 }
 0x4d3   :  { %9432 = vtanh.f32 %v1561_v60 }
 0x4d4   :  { %9434 = vpow2.f32 %v8366_v34 }
 0x4d9   :  { %v9425_v56 = vpop.eup %9424 }
 0x4da   :  { %v1573_v54 = vadd.f32 1.0, %v9425_v56 }
 0x4db   :  { %v9427_v16 = vpop.eup %9426 }
 0x4dc   :  { %9436 = vrcp.f32 %v1573_v54  ;;  %v1585_v45 = vadd.f32 1.0, %v9427_v16 }
 0x4dd   :  { %v9429_v36 = vpop.eup %9428  ;;  %9438 = vtanh.f32 %v1565_v7 }
 0x4de   :  { %9440 = vrcp.f32 %v1585_v45  ;;  %v1574_v27 = vadd.f32 1.0, %v9429_v36 }
 0x4df   :  { %v9431_v49 = vpop.eup %9430  ;;  %9442 = vpow2.f32 %v8367_v10 }
 0x4e0   :  { %9444 = vrcp.f32 %v1574_v27  ;;  %v1586_v46 = vadd.f32 1.0, %v9431_v49  ;;  %v9433_v55 = vpop.eup %9432  ;;  %v14109_v27 = vld [vmem:[#allocation51_spill] sm:$0xff] }
 0x4e1   :  { %v9435_v5 = vpop.eup %9434 }
 0x4e2   :  { %9446 = vrcp.f32 %v1586_v46  ;;  %v1599_v1 = vadd.f32 1.0, %v9435_v5 }
 0x4e4   :  { %9448 = vrcp.f32 %v1599_v1  ;;  %v14112_v1 = vld [vmem:[#allocation55_spill] sm:$0xff] }
 0x4e9   :  { %v9437_v63 = vpop.eup %9436 }
 0x4ea   :  { %v9439_v59 = vpop.eup %9438  ;;  %v1607_v58 = vmul.f32 %v9437_v63, %v9433_v55  ;;  %v14110_v63 = vld [vmem:[#allocation53_spill] sm:$0xff] }
 0x4eb   :  { %v9441_v35 = vpop.eup %9440 }
 0x4ec   :  { %v9443_v41 = vpop.eup %9442  ;;  %v1605_v6 = vmul.f32 %v9441_v35, %v11613_v18  ;;  %v14111_v35 = vld [vmem:[#allocation57_spill] sm:$0xff] }
 0x4ed   :  { %v9445_v44 = vpop.eup %9444  ;;  %v1600_v39 = vadd.f32 1.0, %v9443_v41  ;;  %v600_v41 = vadd.f32 %v14111_v35, %v11263_v29 }
 0x4ee   :  { %v11669_v3 = vadd.f32 %v1607_v58, %v1605_v6  ;;  %v1608_v60 = vmul.f32 %v9445_v44, %v9439_v59 }
 0x4ef   :  { %v9447_v34 = vpop.eup %9446 }
 0x4f0   :  { %v1606_v56 = vmul.f32 %v9447_v34, %v11616_v53  ;;  %9450 = vtanh.f32 %v11669_v3 }
 0x4f1   :  { %9452 = vrcp.f32 %v1600_v39  ;;  %v9449_v7 = vpop.eup %9448 }
 0x4f2   :  { %v11672_v31 = vadd.f32 %v1608_v60, %v1606_v56 }
 0x4f4   :  { %9454 = vtanh.f32 %v11672_v31 }
 0x4fd   :  { %v9451_v54 = vpop.eup %9450 }
 0x4fe   :  { %v9453_v18 = vpop.eup %9452  ;;  %v1613_v10 = vmul.f32 %v9451_v54, %v9449_v7 }
 0x501   :  { %v9455_v16 = vpop.eup %9454 }
 0x502   :  { %v1614_v45 = vmul.f32 %v9455_v16, %v9453_v18  ;;  %v14113_v18 = vld [vmem:[#allocation54_spill] sm:$0xff] }
 0x504   :  { %v11676_v36 = vpack.c.bf16 %v1614_v45, %v1613_v10  ;;  %v14114_v45 = vld [vmem:[#allocation58_spill] sm:$0xff] }
 0x506   :  { %1661 = vmatmul.mubr.bf16.vlgmr.msra.gmra.mxu0 %v11676_v36  ;;  %1704 = vmatmul.mubr.bf16.vlgmr.msra.gmra.mxu1 %v11676_v36 }
 0x507   :  { %1784 = vmatpush1.bf16.msra.mxu0 %v11448_v24  ;;  %1827 = vmatpush1.bf16.msra.mxu1 %v11451_v22 }
 0x508   :  { %1785 = vmatprep.subr.bf16.mxu0 %v11454_v20  ;;  %1828 = vmatprep.subr.bf16.mxu1 %v11457_v26 }
 0x509   :  { %1815 = vmatprep.mubr.bf16.mxu0 %v14102_v12  ;;  %1858 = vmatprep.mubr.bf16.mxu1 %v14102_v12 }
 0x50b   :  { %1786 = vmatpush1.bf16.msra.mxu0 %v11462_v14  ;;  %1829 = vmatpush1.bf16.msra.mxu1 %v11465_v48 }
 0x50c   :  { %1787 = vmatprep.subr.bf16.mxu0 %v11468_v0  ;;  %1830 = vmatprep.subr.bf16.mxu1 %v11471_v19 }
 0x50f   :  { %1788 = vmatpush1.bf16.msra.mxu0 %v11474_v25  ;;  %1831 = vmatpush1.bf16.msra.mxu1 %v11477_v28 }
 0x510   :  { %1789 = vmatprep.subr.bf16.mxu0 %v11480_v23  ;;  %1832 = vmatprep.subr.bf16.mxu1 %v11483_v21 }
 0x513   :  { %1790 = vmatpush1.bf16.msra.mxu0 %v11486_v17  ;;  %1833 = vmatpush1.bf16.msra.mxu1 %v11489_v9 }
 0x514   :  { %1791 = vmatprep.subr.bf16.mxu0 %v11492_v57  ;;  %1834 = vmatprep.subr.bf16.mxu1 %v11495_v33 }
 0x517   :  { %1792 = vmatpush1.bf16.msra.mxu0 %v11498_v51  ;;  %1835 = vmatpush1.bf16.msra.mxu1 %v11501_v15 }
 0x518   :  { %1793 = vmatprep.subr.bf16.mxu0 %v11504_v43  ;;  %1836 = vmatprep.subr.bf16.mxu1 %v11507_v62 }
 0x51b   :  { %1794 = vmatpush1.bf16.msra.mxu0 %v11510_v13  ;;  %1837 = vmatpush1.bf16.msra.mxu1 %v11513_v8 }
 0x51c   :  { %1795 = vmatprep.subr.bf16.mxu0 %v11516_v37  ;;  %1838 = vmatprep.subr.bf16.mxu1 %v11581_v38 }
 0x51f   :  { %1796 = vmatpush1.bf16.msra.mxu0 %v11520_v61  ;;  %1839 = vmatpush1.bf16.msra.mxu1 %v11585_v32 }
 0x520   :  { %1797 = vmatprep.subr.bf16.mxu0 %v11588_v42  ;;  %1840 = vmatprep.subr.bf16.mxu1 %v11591_v2 }
 0x523   :  { %1798 = vmatpush1.bf16.msra.mxu0 %v11594_v4  ;;  %1841 = vmatpush1.bf16.msra.mxu1 %v11597_v40 }
 0x524   :  { %1938 = vmatprep.subr.bf16.mxu0 %v11528_v47  ;;  %1981 = vmatprep.subr.bf16.mxu1 %v11531_v52 }
 0x5c6   :  { %v1662_v53 = vpop.f32.mrf.mxu0  ;;  %v1705_v46 = vpop.f32.mrf.mxu1 }
 0x5c7   :  { %v1714_v49 = vadd.f32 %v1662_v53, %v14109_v27  ;;  %v713_v53 = vadd.f32 %v14114_v45, %v11266_v30  ;;  %v14115_v27 = vld [vmem:[#allocation52_spill] sm:$0xff] }
 0x5c8   :  { %v1664_v55 = vpop.f32.mrf.mxu0  ;;  %v1707_v44 = vpop.f32.mrf.mxu1 }
 0x5c9   :  { %v8368_v5 = vmul.f32 -1.442695, %v1714_v49  ;;  %v1715_v59 = vadd.f32 %v1664_v55, %v14110_v63  ;;  %v1717_v16 = vadd.f32 %v1707_v44, %v14113_v18  ;;  %v1716_v49 = vadd.f32 %v1705_v46, %v14115_v27 }
 0x5ca   :  { %v1666_v58 = vpop.f32.mrf.mxu0  ;;  %v1709_v7 = vpop.f32.mrf.mxu1 }
 0x5cb   :  { %9456 = vpow2.f32 %v8368_v5  ;;  %v8370_v6 = vmul.f32 -1.442695, %v1715_v59  ;;  %v1718_v60 = vadd.f32 %v1666_v58, %v14112_v1  ;;  %v8372_v55 = vmul.f32 -1.442695, %v1717_v16  ;;  %v14116_v59 = vld [vmem:[#allocation56_spill] sm:$0xff] }
 0x5cc   :  { %v1668_v34 = vpop.f32.mrf.mxu0  ;;  %v1711_v10 = vpop.f32.mrf.mxu1  ;;  %v1720_v58 = vadd.f32 %v1709_v7, %v14116_v59 }
 0x5cd   :  { %9458 = vpow2.f32 %v8370_v6  ;;  %v8369_v39 = vmul.f32 -1.442695, %v1718_v60  ;;  %v1719_v56 = vadd.f32 %v1668_v34, %v600_v41  ;;  %v1721_v5 = vadd.f32 %v1711_v10, %v713_v53 }
 0x5cf   :  { %9460 = vpow2.f32 %v8369_v39  ;;  %v8371_v54 = vmul.f32 -1.442695, %v1719_v56  ;;  %v8373_v6 = vmul.f32 -1.442695, %v1721_v5 }
 0x5d1   :  { %9462 = vpow2.f32 %v8371_v54 }
 0x5d2   :  { %9464 = vtanh.f32 %v1716_v49 }
 0x5d3   :  { %9466 = vpow2.f32 %v8372_v55 }
 0x5d8   :  { %v9457_v63 = vpop.eup %9456 }
 0x5d9   :  { %v1728_v35 = vadd.f32 1.0, %v9457_v63 }
 0x5da   :  { %v9459_v41 = vpop.eup %9458 }
 0x5db   :  { %9468 = vrcp.f32 %v1728_v35  ;;  %v1740_v1 = vadd.f32 1.0, %v9459_v41 }
 0x5dc   :  { %v9461_v60 = vpop.eup %9460  ;;  %9470 = vtanh.f32 %v1720_v58 }
 0x5dd   :  { %9472 = vrcp.f32 %v1740_v1  ;;  %v1729_v44 = vadd.f32 1.0, %v9461_v60 }
 0x5de   :  { %v9463_v34 = vpop.eup %9462  ;;  %9474 = vpow2.f32 %v8373_v6 }
 0x5df   :  { %9476 = vrcp.f32 %v1729_v44  ;;  %v1741_v46 = vadd.f32 1.0, %v9463_v34  ;;  %v9465_v39 = vpop.eup %9464 }
 0x5e0   :  { %v9467_v56 = vpop.eup %9466 }
 0x5e1   :  { %9478 = vrcp.f32 %v1741_v46  ;;  %v1754_v27 = vadd.f32 1.0, %v9467_v56  ;;  %v14124_v56 = vld [vmem:[#allocation64_spill] sm:$0xff] }
 0x5e3   :  { %9480 = vrcp.f32 %v1754_v27 }
 0x5e8   :  { %v9469_v54 = vpop.eup %9468 }
 0x5e9   :  { %v9471_v7 = vpop.eup %9470  ;;  %v1762_v18 = vmul.f32 %v9469_v54, %v9465_v39 }
 0x5ea   :  { %v9473_v16 = vpop.eup %9472 }
 0x5eb   :  { %v9475_v10 = vpop.eup %9474  ;;  %v1760_v45 = vmul.f32 %v9473_v16, %v11669_v3 }
 0x5ec   :  { %v9477_v53 = vpop.eup %9476  ;;  %v1755_v63 = vadd.f32 1.0, %v9475_v10 }
 0x5ed   :  { %v11725_v49 = vadd.f32 %v1762_v18, %v1760_v45  ;;  %v1763_v55 = vmul.f32 %v9477_v53, %v9471_v7 }
 0x5ee   :  { %v9479_v5 = vpop.eup %9478 }
 0x5ef   :  { %v1761_v59 = vmul.f32 %v9479_v5, %v11672_v31  ;;  %9482 = vtanh.f32 %v11725_v49 }
 0x5f0   :  { %9484 = vrcp.f32 %v1755_v63  ;;  %v9481_v35 = vpop.eup %9480 }
 0x5f1   :  { %v11728_v58 = vadd.f32 %v1763_v55, %v1761_v59 }
 0x5f3   :  { %9486 = vtanh.f32 %v11728_v58 }
 0x5fc   :  { %v9483_v41 = vpop.eup %9482 }
 0x5fd   :  { %v9485_v3 = vpop.eup %9484  ;;  %v1768_v1 = vmul.f32 %v9483_v41, %v9481_v35 }
 0x600   :  { %v9487_v6 = vpop.eup %9486 }
 0x601   :  { %v1769_v60 = vmul.f32 %v9487_v6, %v9485_v3 }
 0x603   :  { %v11732_v44 = vpack.c.bf16 %v1769_v60, %v1768_v1 }
 0x605   :  { %1816 = vmatmul.mubr.bf16.vlgmr.msra.gmra.mxu0 %v11732_v44  ;;  %1859 = vmatmul.mubr.bf16.vlgmr.msra.gmra.mxu1 %v11732_v44 }
 0x606   :  { %1939 = vmatpush1.bf16.msra.mxu0 %v11448_v24  ;;  %1982 = vmatpush1.bf16.msra.mxu1 %v11451_v22 }
 0x607   :  { %1940 = vmatprep.subr.bf16.mxu0 %v11454_v20  ;;  %1983 = vmatprep.subr.bf16.mxu1 %v11457_v26  ;;  %v14118_v26 = vld [vmem:[#allocation61_spill] sm:$0xff] }
 0x608   :  { %1970 = vmatprep.mubr.bf16.mxu0 %v14102_v12  ;;  %2013 = vmatprep.mubr.bf16.mxu1 %v14102_v12 }
 0x60a   :  { %1941 = vmatpush1.bf16.msra.mxu0 %v11462_v14  ;;  %1984 = vmatpush1.bf16.msra.mxu1 %v11465_v48 }
 0x60b   :  { %1942 = vmatprep.subr.bf16.mxu0 %v11468_v0  ;;  %1985 = vmatprep.subr.bf16.mxu1 %v11471_v19  ;;  %v14119_v0 = vld [vmem:[#allocation65_spill] sm:$0xff] }
 0x60c   :  { %v610_v19 = vadd.f32 %v14119_v0, %v11263_v29 }
 0x60e   :  { %1943 = vmatpush1.bf16.msra.mxu0 %v11474_v25  ;;  %1986 = vmatpush1.bf16.msra.mxu1 %v11477_v28 }
 0x60f   :  { %1944 = vmatprep.subr.bf16.mxu0 %v11480_v23  ;;  %1987 = vmatprep.subr.bf16.mxu1 %v11483_v21  ;;  %v14120_v23 = vld [vmem:[#allocation63_spill] sm:$0xff] }
 0x612   :  { %1945 = vmatpush1.bf16.msra.mxu0 %v11486_v17  ;;  %1988 = vmatpush1.bf16.msra.mxu1 %v11489_v9 }
 0x613   :  { %1946 = vmatprep.subr.bf16.mxu0 %v11492_v57  ;;  %1989 = vmatprep.subr.bf16.mxu1 %v11495_v33  ;;  %v14121_v33 = vld [vmem:[#allocation62_spill] sm:$0xff] }
 0x616   :  { %1947 = vmatpush1.bf16.msra.mxu0 %v11498_v51  ;;  %1990 = vmatpush1.bf16.msra.mxu1 %v11501_v15 }
 0x617   :  { %1948 = vmatprep.subr.bf16.mxu0 %v11504_v43  ;;  %1991 = vmatprep.subr.bf16.mxu1 %v11507_v62  ;;  %v14122_v43 = vld [vmem:[#allocation66_spill] sm:$0xff] }
 0x618   :  { %v723_v62 = vadd.f32 %v14122_v43, %v11266_v30  ;;  %v10399_v43 = vld [vmem:[#allocation10 + $0x8c] ss:$16 sps:$4 sm:$0xff]  }
 0x61a   :  { %1949 = vmatpush1.bf16.msra.mxu0 %v11510_v13  ;;  %1992 = vmatpush1.bf16.msra.mxu1 %v11513_v8  ;;  %v14123_v13 = vld [vmem:[#allocation60_spill] sm:$0xff] }
 0x61b   :  { %1950 = vmatprep.subr.bf16.mxu0 %v11516_v37  ;;  %1993 = vmatprep.subr.bf16.mxu1 %v11581_v38  ;;  %v14117_v37 = vld [vmem:[#allocation59_spill] sm:$0xff] }
 0x61e   :  { %1951 = vmatpush1.bf16.msra.mxu0 %v11520_v61  ;;  %1994 = vmatpush1.bf16.msra.mxu1 %v11585_v32 }
 0x61f   :  { %1952 = vmatprep.subr.bf16.mxu0 %v11588_v42  ;;  %1995 = vmatprep.subr.bf16.mxu1 %v11591_v2 }
 0x622   :  { %1953 = vmatpush1.bf16.msra.mxu0 %v11594_v4  ;;  %1996 = vmatpush1.bf16.msra.mxu1 %v11597_v40 }
 0x623   :  { %2093 = vmatprep.subr.bf16.mxu0 %v11528_v47  ;;  %2136 = vmatprep.subr.bf16.mxu1 %v11531_v52 }
 0x6c5   :  { %v1817_v8 = vpop.f32.mrf.mxu0  ;;  %v1860_v22 = vpop.f32.mrf.mxu1 }
 0x6c6   :  { %v1869_v24 = vadd.f32 %v1817_v8, %v14117_v37  ;;  %v1871_v31 = vadd.f32 %v1860_v22, %v14123_v13  ;;  %v10401_v13 = vld [vmem:[#allocation10 + $0x88] ss:$16 sps:$4 sm:$0xff]  }
 0x6c7   :  { %v1819_v20 = vpop.f32.mrf.mxu0  ;;  %v1862_v28 = vpop.f32.mrf.mxu1 }
 0x6c8   :  { %v8374_v61 = vmul.f32 -1.442695, %v1869_v24  ;;  %v1870_v14 = vadd.f32 %v1819_v20, %v14118_v26  ;;  %v1872_v51 = vadd.f32 %v1862_v28, %v14121_v33  ;;  %v10396_v33 = vld [vmem:[#allocation10 + $0xa0] ss:$16 sps:$4 sm:$0xff]  }
 0x6c9   :  { %v1821_v48 = vpop.f32.mrf.mxu0  ;;  %v1864_v9 = vpop.f32.mrf.mxu1 }
 0x6ca   :  { %9488 = vpow2.f32 %v8374_v61  ;;  %v8376_v25 = vmul.f32 -1.442695, %v1870_v14  ;;  %v1873_v21 = vadd.f32 %v1821_v48, %v14120_v23  ;;  %v8378_v34 = vmul.f32 -1.442695, %v1872_v51  ;;  %v10389_v23 = vld [vmem:[#allocation10 + $0xe8] ss:$16 sps:$4 sm:$0xff]  }
 0x6cb   :  { %v1823_v47 = vpop.f32.mrf.mxu0  ;;  %v1866_v15 = vpop.f32.mrf.mxu1  ;;  %v1875_v54 = vadd.f32 %v1864_v9, %v14124_v56  ;;  %v10394_v9 = vld [vmem:[#allocation10 + $0xa4] ss:$16 sps:$4 sm:$0xff]   ;;  %v10397_v51 = vld [vmem:[#allocation10 + $0xa8] ss:$16 sps:$4 sm:$0xff]  }
 0x6cc   :  { %9490 = vpow2.f32 %v8376_v25  ;;  %v8375_v52 = vmul.f32 -1.442695, %v1873_v21  ;;  %v1874_v17 = vadd.f32 %v1823_v47, %v610_v19  ;;  %v1876_v46 = vadd.f32 %v1866_v15, %v723_v62  ;;  %v10390_v21 = vld [vmem:[#allocation10 + $0xc4] ss:$16 sps:$4 sm:$0xff]   ;;  %v10391_v47 = vld [vmem:[#allocation10 + $0xcc] ss:$16 sps:$4 sm:$0xff]  }
 0x6cd   :  { %v10398_v15 = vld [vmem:[#allocation10 + $0x84] ss:$16 sps:$4 sm:$0xff]   ;;  %v10400_v62 = vld [vmem:[#allocation10 + $0x80] ss:$16 sps:$4 sm:$0xff]  }
 0x6ce   :  { %9492 = vpow2.f32 %v8375_v52  ;;  %v8377_v57 = vmul.f32 -1.442695, %v1874_v17  ;;  %v8379_v16 = vmul.f32 -1.442695, %v1876_v46  ;;  %v10392_v52 = vld [vmem:[#allocation10 + $0xc0] ss:$16 sps:$4 sm:$0xff]  }
 0x6cf   :  { %v10393_v17 = vld [vmem:[#allocation10 + $0xc8] ss:$16 sps:$4 sm:$0xff]   ;;  %v10404_v46 = vld [vmem:[#allocation10 + $0x60] ss:$16 sps:$4 sm:$0xff]   ;;  %v10406_v56 = vld [vmem:[#allocation10 + $0x44] ss:$16 sps:$4 sm:$0xff]  }
 0x6d0   :  { %9494 = vpow2.f32 %v8377_v57  ;;  %v10395_v57 = vld [vmem:[#allocation10 + $0xac] ss:$16 sps:$4 sm:$0xff]  }
 0x6d1   :  { %9496 = vtanh.f32 %v1871_v31  ;;  %v10402_v31 = vld [vmem:[#allocation10 + $0x64] ss:$16 sps:$4 sm:$0xff]  }
 0x6d2   :  { %9498 = vpow2.f32 %v8378_v34  ;;  %v10403_v34 = vld [vmem:[#allocation10 + $0x6c] ss:$16 sps:$4 sm:$0xff]  }
 0x6d7   :  { %v9489_v39 = vpop.eup %9488 }
 0x6d8   :  { %v1883_v7 = vadd.f32 1.0, %v9489_v39  ;;  %v10405_v39 = vld [vmem:[#allocation10 + $0x68] ss:$16 sps:$4 sm:$0xff]  }
 0x6d9   :  { %v9491_v18 = vpop.eup %9490 }
 0x6da   :  { %9500 = vrcp.f32 %v1883_v7  ;;  %v1895_v10 = vadd.f32 1.0, %v9491_v18  ;;  %v10408_v7 = vld [vmem:[#allocation10 + $0x40] ss:$16 sps:$4 sm:$0xff]   ;;  %v10409_v18 = vld [vmem:[#allocation10 + $0x48] ss:$16 sps:$4 sm:$0xff]  }
 0x6db   :  { %v9493_v45 = vpop.eup %9492  ;;  %9502 = vtanh.f32 %v1875_v54  ;;  %v10407_v54 = vld [vmem:[#allocation10 + $0x4c] ss:$16 sps:$4 sm:$0xff]  }
 0x6dc   :  { %9504 = vrcp.f32 %v1895_v10  ;;  %v1884_v53 = vadd.f32 1.0, %v9493_v45  ;;  %v10411_v10 = vld [vmem:[#allocation10 + $0x20] ss:$16 sps:$4 sm:$0xff]   ;;  %v9010_v45 = vld [vmem:[#allocation12 + $0xe4] ss:$16 sps:$4 sm:$0xff]  }
 0x6dd   :  { %v9495_v27 = vpop.eup %9494  ;;  %9506 = vpow2.f32 %v8379_v16  ;;  %v10410_v16 = vld [vmem:[#allocation10 + $0x24] ss:$16 sps:$4 sm:$0xff]  }
 0x6de   :  { %9508 = vrcp.f32 %v1884_v53  ;;  %v1896_v55 = vadd.f32 1.0, %v9495_v27  ;;  %v9497_v5 = vpop.eup %9496  ;;  %v9013_v53 = vld [vmem:[#allocation12 + $0xec] ss:$16 sps:$4 sm:$0xff]  }
 0x6df   :  { %v9499_v63 = vpop.eup %9498 }
 0x6e0   :  { %9510 = vrcp.f32 %v1896_v55  ;;  %v1909_v8 = vadd.f32 1.0, %v9499_v63  ;;  %v14125_v55 = vld [vmem:[#allocation67_spill] sm:$0xff] }
 0x6e2   :  { %9512 = vrcp.f32 %v1909_v8 }
 0x6e7   :  { %v9501_v59 = vpop.eup %9500 }
 0x6e8   :  { %v9503_v35 = vpop.eup %9502  ;;  %v1917_v41 = vmul.f32 %v9501_v59, %v9497_v5 }
 0x6e9   :  { %v9505_v3 = vpop.eup %9504 }
 0x6ea   :  { %v9507_v6 = vpop.eup %9506  ;;  %v1915_v1 = vmul.f32 %v9505_v3, %v11725_v49 }
 0x6eb   :  { %v9509_v60 = vpop.eup %9508  ;;  %v1910_v20 = vadd.f32 1.0, %v9507_v6 }
 0x6ec   :  { %v11781_v37 = vadd.f32 %v1917_v41, %v1915_v1  ;;  %v1918_v24 = vmul.f32 %v9509_v60, %v9503_v35  ;;  %v14126_v35 = vld [vmem:[#allocation69_spill] sm:$0xff] }
 0x6ed   :  { %v9511_v22 = vpop.eup %9510 }
 0x6ee   :  { %v1916_v61 = vmul.f32 %v9511_v22, %v11728_v58  ;;  %9514 = vtanh.f32 %v11781_v37  ;;  %v10388_v58 = vld [vmem:[#allocation10 + $0xe0] ss:$16 sps:$4 sm:$0xff]  }
 0x6ef   :  { %9516 = vrcp.f32 %v1910_v20  ;;  %v9513_v14 = vpop.eup %9512  ;;  %v14129_v20 = vld [vmem:[#allocation70_spill] sm:$0xff] }
 0x6f0   :  { %v11784_v26 = vadd.f32 %v1918_v24, %v1916_v61 }
 0x6f2   :  { %9518 = vtanh.f32 %v11784_v26 }
 0x6fb   :  { %v9515_v48 = vpop.eup %9514 }
 0x6fc   :  { %v9517_v49 = vpop.eup %9516  ;;  %v1923_v19 = vmul.f32 %v9515_v48, %v9513_v14  ;;  %v14130_v48 = vld [vmem:[#allocation74_spill] sm:$0xff] }
 0x6ff   :  { %v9519_v0 = vpop.eup %9518 }
 0x700   :  { %v1924_v25 = vmul.f32 %v9519_v0, %v9517_v49  ;;  %v733_v49 = vadd.f32 %v14130_v48, %v11266_v30  ;;  %v14131_v0 = vld [vmem:[#allocation68_spill] sm:$0xff] }
 0x701   :  { %v9032_v48 = vld [vmem:[#allocation12 + $0x60] ss:$16 sps:$4 sm:$0xff]  }
 0x702   :  { %v11788_v28 = vpack.c.bf16 %v1924_v25, %v1923_v19 }
 0x704   :  { %1971 = vmatmul.mubr.bf16.vlgmr.msra.gmra.mxu0 %v11788_v28  ;;  %2014 = vmatmul.mubr.bf16.vlgmr.msra.gmra.mxu1 %v11788_v28 }
 0x705   :  { %2094 = vmatpush1.bf16.msra.mxu0 %v10388_v58  ;;  %2137 = vmatpush1.bf16.msra.mxu1 %v10389_v23 }
 0x706   :  { %2095 = vmatprep.subr.bf16.mxu0 %v10390_v21  ;;  %2138 = vmatprep.subr.bf16.mxu1 %v10391_v47  ;;  %v14132_v21 = vld [vmem:[#allocation72_spill] sm:$0xff] }
 0x707   :  { %2125 = vmatprep.mubr.bf16.mxu0 %v14102_v12  ;;  %2168 = vmatprep.mubr.bf16.mxu1 %v14102_v12 }
 0x709   :  { %2096 = vmatpush1.bf16.msra.mxu0 %v10392_v52  ;;  %2139 = vmatpush1.bf16.msra.mxu1 %v10393_v17 }
 0x70a   :  { %2097 = vmatprep.subr.bf16.mxu0 %v10394_v9  ;;  %2140 = vmatprep.subr.bf16.mxu1 %v10395_v57 }
 0x70d   :  { %2098 = vmatpush1.bf16.msra.mxu0 %v10396_v33  ;;  %2141 = vmatpush1.bf16.msra.mxu1 %v10397_v51 }
 0x70e   :  { %2099 = vmatprep.subr.bf16.mxu0 %v10398_v15  ;;  %2142 = vmatprep.subr.bf16.mxu1 %v10399_v43 }
 0x711   :  { %2100 = vmatpush1.bf16.msra.mxu0 %v10400_v62  ;;  %2143 = vmatpush1.bf16.msra.mxu1 %v10401_v13 }
 0x712   :  { %2101 = vmatprep.subr.bf16.mxu0 %v10402_v31  ;;  %2144 = vmatprep.subr.bf16.mxu1 %v10403_v34 }
 0x715   :  { %2102 = vmatpush1.bf16.msra.mxu0 %v10404_v46  ;;  %2145 = vmatpush1.bf16.msra.mxu1 %v10405_v39 }
 0x716   :  { %2103 = vmatprep.subr.bf16.mxu0 %v10406_v56  ;;  %2146 = vmatprep.subr.bf16.mxu1 %v10407_v54 }
 0x719   :  { %2104 = vmatpush1.bf16.msra.mxu0 %v10408_v7  ;;  %2147 = vmatpush1.bf16.msra.mxu1 %v10409_v18 }
 0x71a   :  { %2105 = vmatprep.subr.bf16.mxu0 %v10410_v16  ;;  %2148 = vmatprep.subr.bf16.mxu1 %v11581_v38 }
 0x71d   :  { %2106 = vmatpush1.bf16.msra.mxu0 %v10411_v10  ;;  %2149 = vmatpush1.bf16.msra.mxu1 %v11585_v32 }
 0x71e   :  { %2107 = vmatprep.subr.bf16.mxu0 %v11588_v42  ;;  %2150 = vmatprep.subr.bf16.mxu1 %v11591_v2  ;;  %v14127_v42 = vld [vmem:[#allocation73_spill] sm:$0xff] }
 0x71f   :  { %v620_v2 = vadd.f32 %v14127_v42, %v11263_v29 }
 0x721   :  { %2108 = vmatpush1.bf16.msra.mxu0 %v11594_v4  ;;  %2151 = vmatpush1.bf16.msra.mxu1 %v11597_v40  ;;  %v14128_v40 = vld [vmem:[#allocation71_spill] sm:$0xff] }
 0x722   :  { %2476 = vmatprep.subr.bf16.mxu0 %v9010_v45  ;;  %2589 = vmatprep.subr.bf16.mxu1 %v9013_v53 }
 0x7c4   :  { %v1972_v27 = vpop.f32.mrf.mxu0  ;;  %v2015_v38 = vpop.f32.mrf.mxu1 }
 0x7c5   :  { %v2024_v5 = vadd.f32 %v1972_v27, %v14125_v55  ;;  %v2026_v19 = vadd.f32 %v2015_v38, %v14131_v0  ;;  %v9040_v0 = vld [vmem:[#allocation12 + $0x44] ss:$16 sps:$4 sm:$0xff]  }
 0x7c6   :  { %v1974_v63 = vpop.f32.mrf.mxu0  ;;  %v2017_v3 = vpop.f32.mrf.mxu1 }
 0x7c7   :  { %v8380_v59 = vmul.f32 -1.442695, %v2024_v5  ;;  %v2025_v32 = vadd.f32 %v1974_v63, %v14126_v35  ;;  %v2027_v61 = vadd.f32 %v2017_v3, %v14129_v20  ;;  %v9017_v3 = vld [vmem:[#allocation12 + $0xc8] ss:$16 sps:$4 sm:$0xff]  }
 0x7c8   :  { %v1976_v41 = vpop.f32.mrf.mxu0  ;;  %v2019_v24 = vpop.f32.mrf.mxu1  ;;  %v9029_v20 = vld [vmem:[#allocation12 + $0x88] ss:$16 sps:$4 sm:$0xff]  }
 0x7c9   :  { %9520 = vpow2.f32 %v8380_v59  ;;  %v8382_v4 = vmul.f32 -1.442695, %v2025_v32  ;;  %v2028_v6 = vadd.f32 %v1976_v41, %v14128_v40  ;;  %v8384_v25 = vmul.f32 -1.442695, %v2027_v61  ;;  %v9008_v32 = vld [vmem:[#allocation12 + $0xe0] ss:$16 sps:$4 sm:$0xff]  }
 0x7ca   :  { %v1978_v1 = vpop.f32.mrf.mxu0  ;;  %v2021_v14 = vpop.f32.mrf.mxu1  ;;  %v2030_v47 = vadd.f32 %v2019_v24, %v14132_v21  ;;  %v9011_v41 = vld [vmem:[#allocation12 + $0xe8] ss:$16 sps:$4 sm:$0xff]   ;;  %v9022_v40 = vld [vmem:[#allocation12 + $0xa4] ss:$16 sps:$4 sm:$0xff]   ;;  %v9031_v24 = vld [vmem:[#allocation12 + $0x8c] ss:$16 sps:$4 sm:$0xff]  }
 0x7cb   :  { %9522 = vpow2.f32 %v8382_v4  ;;  %v8381_v60 = vmul.f32 -1.442695, %v2028_v6  ;;  %v2029_v8 = vadd.f32 %v1978_v1, %v620_v2  ;;  %v2031_v58 = vadd.f32 %v2021_v14, %v733_v49  ;;  %v9016_v2 = vld [vmem:[#allocation12 + $0xc4] ss:$16 sps:$4 sm:$0xff]   ;;  %v9014_v4 = vld [vmem:[#allocation12 + $0xc0] ss:$16 sps:$4 sm:$0xff]  }
 0x7cc   :  { %v9025_v6 = vld [vmem:[#allocation12 + $0xac] ss:$16 sps:$4 sm:$0xff]   ;;  %v9020_v1 = vld [vmem:[#allocation12 + $0xa0] ss:$16 sps:$4 sm:$0xff]   ;;  %v9034_v61 = vld [vmem:[#allocation12 + $0x64] ss:$16 sps:$4 sm:$0xff]  }
 0x7cd   :  { %9524 = vpow2.f32 %v8381_v60  ;;  %v8383_v22 = vmul.f32 -1.442695, %v2029_v8  ;;  %v8385_v9 = vmul.f32 -1.442695, %v2031_v58  ;;  %v9023_v60 = vld [vmem:[#allocation12 + $0xa8] ss:$16 sps:$4 sm:$0xff]  }
 0x7ce   :  { %v9028_v8 = vld [vmem:[#allocation12 + $0x84] ss:$16 sps:$4 sm:$0xff]   ;;  %v9037_v14 = vld [vmem:[#allocation12 + $0x6c] ss:$16 sps:$4 sm:$0xff]   ;;  %v9035_v49 = vld [vmem:[#allocation12 + $0x68] ss:$16 sps:$4 sm:$0xff]  }
 0x7cf   :  { %9526 = vpow2.f32 %v8383_v22  ;;  %v9026_v22 = vld [vmem:[#allocation12 + $0x80] ss:$16 sps:$4 sm:$0xff]   ;;  %v9041_v58 = vld [vmem:[#allocation12 + $0x48] ss:$16 sps:$4 sm:$0xff]   ;;  %v9049_v21 = vld [vmem:[#allocation12 + $0x2c] ss:$16 sps:$4 sm:$0xff]  }
 0x7d0   :  { %9528 = vtanh.f32 %v2026_v19  ;;  %v9043_v19 = vld [vmem:[#allocation12 + $0x4c] ss:$16 sps:$4 sm:$0xff]  }
 0x7d1   :  { %9530 = vpow2.f32 %v8384_v25  ;;  %v9038_v25 = vld [vmem:[#allocation12 + $0x40] ss:$16 sps:$4 sm:$0xff]  }
 0x7d6   :  { %v9521_v23 = vpop.eup %9520 }
 0x7d7   :  { %v2038_v52 = vadd.f32 1.0, %v9521_v23  ;;  %v9046_v23 = vld [vmem:[#allocation12 + $0x24] ss:$16 sps:$4 sm:$0xff]  }
 0x7d8   :  { %v9523_v17 = vpop.eup %9522 }
 0x7d9   :  { %9532 = vrcp.f32 %v2038_v52  ;;  %v2050_v57 = vadd.f32 1.0, %v9523_v17  ;;  %v9047_v52 = vld [vmem:[#allocation12 + $0x28] ss:$16 sps:$4 sm:$0xff]   ;;  %v9052_v17 = vld [vmem:[#allocation12 + $0x4] ss:$16 sps:$4 sm:$0xff]  }
 0x7da   :  { %v9525_v33 = vpop.eup %9524  ;;  %9534 = vtanh.f32 %v2030_v47  ;;  %v9044_v47 = vld [vmem:[#allocation12 + $0x20] ss:$16 sps:$4 sm:$0xff]  }
 0x7db   :  { %9536 = vrcp.f32 %v2050_v57  ;;  %v2039_v51 = vadd.f32 1.0, %v9525_v33  ;;  %v9050_v57 = vld [vmem:[#allocation12] ss:$16 sps:$4 sm:$0xff]   ;;  %v9053_v33 = vld [vmem:[#allocation12 + $0x8] ss:$16 sps:$4 sm:$0xff]  }
 0x7dc   :  { %v9527_v15 = vpop.eup %9526  ;;  %9538 = vpow2.f32 %v8385_v9  ;;  %v9055_v9 = vld [vmem:[#allocation12 + $0xc] ss:$16 sps:$4 sm:$0xff]  }
 0x7dd   :  { %9540 = vrcp.f32 %v2039_v51  ;;  %v2051_v43 = vadd.f32 1.0, %v9527_v15  ;;  %v9529_v62 = vpop.eup %9528  ;;  %v14133_v51 = vld [vmem:[#allocation83_spill] sm:$0xff] }
 0x7de   :  { %v9531_v13 = vpop.eup %9530  ;;  %v11865_v15 = vld [vmem:[#allocation13 + $0xc0] ss:$16 sps:$4 sm:$0xff]  }
 0x7df   :  { %9542 = vrcp.f32 %v2051_v43  ;;  %v2064_v18 = vadd.f32 1.0, %v9531_v13  ;;  %v11867_v43 = vld [vmem:[#allocation13 + $0xcc] ss:$16 sps:$4 sm:$0xff]   ;;  %v11873_v13 = vld [vmem:[#allocation13 + $0xc8] ss:$16 sps:$4 sm:$0xff]  }
 0x7e1   :  { %9544 = vrcp.f32 %v2064_v18  ;;  %v11897_v18 = vld [vmem:[#allocation13 + $0x88] ss:$16 sps:$4 sm:$0xff]  }
 0x7e6   :  { %v9533_v31 = vpop.eup %9532 }
 0x7e7   :  { %v9535_v34 = vpop.eup %9534  ;;  %v2072_v46 = vmul.f32 %v9533_v31, %v9529_v62  ;;  %v11870_v62 = vld [vmem:[#allocation13 + $0xa4] ss:$16 sps:$4 sm:$0xff]   ;;  %v11876_v31 = vld [vmem:[#allocation13 + $0xac] ss:$16 sps:$4 sm:$0xff]  }
 0x7e8   :  { %v9537_v39 = vpop.eup %9536 }
 0x7e9   :  { %v9539_v56 = vpop.eup %9538  ;;  %v2070_v54 = vmul.f32 %v9537_v39, %v11781_v37  ;;  %v11885_v39 = vld [vmem:[#allocation13 + $0xa8] ss:$16 sps:$4 sm:$0xff]  }
 0x7ea   :  { %v9541_v7 = vpop.eup %9540  ;;  %v2065_v53 = vadd.f32 1.0, %v9539_v56  ;;  %v11889_v56 = vld [vmem:[#allocation13 + $0x80] ss:$16 sps:$4 sm:$0xff]  }
 0x7eb   :  { %v11811_v16 = vadd.f32 %v2072_v46, %v2070_v54  ;;  %v2073_v10 = vmul.f32 %v9541_v7, %v9535_v34  ;;  %v11879_v34 = vld [vmem:[#allocation13 + $0xa0] ss:$16 sps:$4 sm:$0xff]   ;;  %v11882_v46 = vld [vmem:[#allocation13 + $0x84] ss:$16 sps:$4 sm:$0xff]   ;;  %v11891_v54 = vld [vmem:[#allocation13 + $0x8c] ss:$16 sps:$4 sm:$0xff]  }
 0x7ec   :  { %v9543_v45 = vpop.eup %9542  ;;  %v11894_v7 = vld [vmem:[#allocation13 + $0x64] ss:$16 sps:$4 sm:$0xff]  }
 0x7ed   :  { %v2071_v27 = vmul.f32 %v9543_v45, %v11784_v26  ;;  %9546 = vtanh.f32 %v11811_v16  ;;  %v9019_v26 = vld [vmem:[#allocation12 + $0xcc] ss:$16 sps:$4 sm:$0xff]   ;;  %v11904_v45 = vld [vmem:[#allocation13 + $0x44] ss:$16 sps:$4 sm:$0xff]  }
 0x7ee   :  { %9548 = vrcp.f32 %v2065_v53  ;;  %v9545_v5 = vpop.eup %9544  ;;  %v11907_v53 = vld [vmem:[#allocation13 + $0x6c] ss:$16 sps:$4 sm:$0xff]  }
 0x7ef   :  { %v11814_v55 = vadd.f32 %v2073_v10, %v2071_v27  ;;  %v11901_v10 = vld [vmem:[#allocation13 + $0x60] ss:$16 sps:$4 sm:$0xff]   ;;  %v11909_v27 = vld [vmem:[#allocation13 + $0x68] ss:$16 sps:$4 sm:$0xff]  }
 0x7f1   :  { %9550 = vtanh.f32 %v11814_v55 }
 0x7fa   :  { %v9547_v38 = vpop.eup %9546 }
 0x7fb   :  { %v9549_v37 = vpop.eup %9548  ;;  %v2078_v59 = vmul.f32 %v9547_v38, %v9545_v5  ;;  %v11913_v5 = vld [vmem:[#allocation13 + $0x40] ss:$16 sps:$4 sm:$0xff]   ;;  %v11916_v38 = vld [vmem:[#allocation13 + $0x24] ss:$16 sps:$4 sm:$0xff]  }
 0x7fe   :  { %v9551_v63 = vpop.eup %9550 }
 0x7ff   :  { %v2079_v35 = vmul.f32 %v9551_v63, %v9549_v37  ;;  %v11919_v37 = vld [vmem:[#allocation13 + $0x4c] ss:$16 sps:$4 sm:$0xff]   ;;  %v11921_v63 = vld [vmem:[#allocation13 + $0x48] ss:$16 sps:$4 sm:$0xff]  }
 0x801   :  { %v11818_v42 = vpack.c.bf16 %v2079_v35, %v2078_v59  ;;  %v11925_v59 = vld [vmem:[#allocation13 + $0x20] ss:$16 sps:$4 sm:$0xff]   ;;  %v11929_v35 = vld [vmem:[#allocation13 + $0x2c] ss:$16 sps:$4 sm:$0xff]  }
 0x803   :  { %2126 = vmatmul.mubr.bf16.vlgmr.msra.gmra.mxu0 %v11818_v42  ;;  %2169 = vmatmul.mubr.bf16.vlgmr.msra.gmra.mxu1 %v11818_v42 }
 0x804   :  { %2477 = vmatpush1.bf16.msra.mxu0 %v9008_v32  ;;  %2590 = vmatpush1.bf16.msra.mxu1 %v9011_v41  ;;  %v11931_v32 = vld [vmem:[#allocation13 + $0x4] ss:$16 sps:$4 sm:$0xff]   ;;  %v11933_v41 = vld [vmem:[#allocation13 + $0x28] ss:$16 sps:$4 sm:$0xff]  }
 0x805   :  { %2478 = vmatprep.subr.bf16.mxu0 %v9016_v2  ;;  %2591 = vmatprep.subr.bf16.mxu1 %v9019_v26  ;;  %v11941_v2 = vld [vmem:[#allocation13 + $0xc] ss:$16 sps:$4 sm:$0xff]   ;;  %v11943_v26 = vld [vmem:[#allocation13 + $0x8] ss:$16 sps:$4 sm:$0xff]  }
 0x806   :  { %2508 = vmatprep.mubr.bf16.mxu0 %v14102_v12  ;;  %2621 = vmatprep.mubr.bf16.mxu1 %v14102_v12 }
 0x808   :  { %2479 = vmatpush1.bf16.msra.mxu0 %v9014_v4  ;;  %2592 = vmatpush1.bf16.msra.mxu1 %v9017_v3  ;;  %v14134_v3 = vld [vmem:[#allocation75_spill] sm:$0xff] }
 0x809   :  { %2480 = vmatprep.subr.bf16.mxu0 %v9022_v40  ;;  %2593 = vmatprep.subr.bf16.mxu1 %v9025_v6 }
 0x80c   :  { %2481 = vmatpush1.bf16.msra.mxu0 %v9020_v1  ;;  %2594 = vmatpush1.bf16.msra.mxu1 %v9023_v60 }
 0x80d   :  { %2482 = vmatprep.subr.bf16.mxu0 %v9028_v8  ;;  %2595 = vmatprep.subr.bf16.mxu1 %v9031_v24  ;;  %v14135_v8 = vld [vmem:[#allocation77_spill] sm:$0xff] }
 0x810   :  { %2483 = vmatpush1.bf16.msra.mxu0 %v9026_v22  ;;  %2596 = vmatpush1.bf16.msra.mxu1 %v9029_v20  ;;  %v14136_v20 = vld [vmem:[#allocation81_spill] sm:$0xff] }
 0x811   :  { %2484 = vmatprep.subr.bf16.mxu0 %v9034_v61  ;;  %2597 = vmatprep.subr.bf16.mxu1 %v9037_v14  ;;  %v630_v61 = vadd.f32 %v14136_v20, %v11263_v29  ;;  %v14140_v29 = vld [vmem:[#allocation76_spill] sm:$0xff] }
 0x814   :  { %2485 = vmatpush1.bf16.msra.mxu0 %v9032_v48  ;;  %2598 = vmatpush1.bf16.msra.mxu1 %v9035_v49  ;;  %v14137_v49 = vld [vmem:[#allocation79_spill] sm:$0xff] }
 0x815   :  { %2486 = vmatprep.subr.bf16.mxu0 %v9040_v0  ;;  %2599 = vmatprep.subr.bf16.mxu1 %v9043_v19 }
 0x818   :  { %2487 = vmatpush1.bf16.msra.mxu0 %v9038_v25  ;;  %2600 = vmatpush1.bf16.msra.mxu1 %v9041_v58 }
 0x819   :  { %2488 = vmatprep.subr.bf16.mxu0 %v9046_v23  ;;  %2601 = vmatprep.subr.bf16.mxu1 %v9049_v21 }
 0x81c   :  { %2489 = vmatpush1.bf16.msra.mxu0 %v9044_v47  ;;  %2602 = vmatpush1.bf16.msra.mxu1 %v9047_v52  ;;  %v14138_v47 = vld [vmem:[#allocation78_spill] sm:$0xff] }
 0x81d   :  { %2490 = vmatprep.subr.bf16.mxu0 %v9052_v17  ;;  %2603 = vmatprep.subr.bf16.mxu1 %v9055_v9  ;;  %v14139_v9 = vld [vmem:[#allocation82_spill] sm:$0xff] }
 0x820   :  { %2491 = vmatpush1.bf16.msra.mxu0 %v9050_v57  ;;  %2604 = vmatpush1.bf16.msra.mxu1 %v9053_v33  ;;  %v743_v57 = vadd.f32 %v14139_v9, %v11266_v30 }
 0x823   :  { %2509 = vmatmul.mubr.bf16.vlgmr.msra.gmra.mxu0 %v14133_v51  ;;  %2622 = vmatmul.mubr.bf16.vlgmr.msra.gmra.mxu1 %v14133_v51 }
 0x824   :  { %2518 = vmatprep.mubr.bf16.mxu0 %v14102_v12  ;;  %2631 = vmatprep.mubr.bf16.mxu1 %v14102_v12 }
 0x82b   :  { %2519 = vmatmul.mubr.bf16.gmra.mxu0 %v11552_v11  ;;  %2632 = vmatmul.mubr.bf16.gmra.mxu1 %v11552_v11  ;;  %v11852_v11 = vld [vmem:[#allocation13 + $0xe4] ss:$16 sps:$4 sm:$0xff]  }
 0x82c   :  { %2528 = vmatprep.mubr.bf16.mxu0 %v14102_v12  ;;  %2641 = vmatprep.mubr.bf16.mxu1 %v14102_v12 }
 0x82d   :  { %2966 = vmatprep.subr.bf16.mxu0 %v11852_v11 }
 0x833   :  { %2529 = vmatmul.mubr.bf16.gmra.mxu0 %v11620_v50  ;;  %2642 = vmatmul.mubr.bf16.gmra.mxu1 %v11620_v50  ;;  %v11854_v50 = vld [vmem:[#allocation13 + $0xec] ss:$16 sps:$4 sm:$0xff]  }
 0x834   :  { %2538 = vmatprep.mubr.bf16.mxu0 %v14102_v12  ;;  %2651 = vmatprep.mubr.bf16.mxu1 %v14102_v12 }
 0x835   :  { %3009 = vmatprep.subr.bf16.mxu1 %v11854_v50 }
 0x83b   :  { %2539 = vmatmul.mubr.bf16.gmra.mxu0 %v11676_v36  ;;  %2652 = vmatmul.mubr.bf16.gmra.mxu1 %v11676_v36  ;;  %v11856_v36 = vld [vmem:[#allocation13 + $0xe0] ss:$16 sps:$4 sm:$0xff]  }
 0x83c   :  { %2548 = vmatprep.mubr.bf16.mxu0 %v14102_v12  ;;  %2661 = vmatprep.mubr.bf16.mxu1 %v14102_v12 }
 0x83d   :  { %2967 = vmatpush1.bf16.msra.mxu0 %v11856_v36 }
 0x843   :  { %2549 = vmatmul.mubr.bf16.gmra.mxu0 %v11732_v44  ;;  %2662 = vmatmul.mubr.bf16.gmra.mxu1 %v11732_v44  ;;  %v11858_v44 = vld [vmem:[#allocation13 + $0xc4] ss:$16 sps:$4 sm:$0xff]  }
 0x844   :  { %2558 = vmatprep.mubr.bf16.mxu0 %v14102_v12  ;;  %2671 = vmatprep.mubr.bf16.mxu1 %v14102_v12 }
 0x845   :  { %2968 = vmatprep.subr.bf16.mxu0 %v11858_v44 }
 0x846   :  { %2969 = vmatpush1.bf16.msra.mxu0 %v11865_v15 }
 0x847   :  { %2970 = vmatprep.subr.bf16.mxu0 %v11870_v62 }
 0x84a   :  { %2971 = vmatpush1.bf16.msra.mxu0 %v11879_v34 }
 0x84b   :  { %2559 = vmatmul.mubr.bf16.gmra.mxu0 %v11788_v28  ;;  %2672 = vmatmul.mubr.bf16.gmra.mxu1 %v11788_v28  ;;  %v11862_v28 = vld [vmem:[#allocation13 + $0xe8] ss:$16 sps:$4 sm:$0xff]  }
 0x84c   :  { %2568 = vmatprep.mubr.bf16.mxu0 %v14102_v12  ;;  %2681 = vmatprep.mubr.bf16.mxu1 %v14102_v12 }
 0x84d   :  { %3010 = vmatpush1.bf16.msra.mxu1 %v11862_v28  ;;  %2972 = vmatprep.subr.bf16.mxu0 %v11882_v46 }
 0x84e   :  { %3011 = vmatprep.subr.bf16.mxu1 %v11867_v43  ;;  %2973 = vmatpush1.bf16.msra.mxu0 %v11889_v56 }
 0x84f   :  { %2974 = vmatprep.subr.bf16.mxu0 %v11894_v7 }
 0x851   :  { %3012 = vmatpush1.bf16.msra.mxu1 %v11873_v13 }
 0x852   :  { %3013 = vmatprep.subr.bf16.mxu1 %v11876_v31  ;;  %2975 = vmatpush1.bf16.msra.mxu0 %v11901_v10 }
 0x853   :  { %2569 = vmatmul.mubr.bf16.gmra.mxu0 %v11818_v42  ;;  %2682 = vmatmul.mubr.bf16.gmra.mxu1 %v11818_v42  ;;  %v11937_v42 = vld [vmem:[#allocation13] ss:$16 sps:$4 sm:$0xff]  }
 0x854   :  { %2578 = vmatprep.mubr.bf16.mxu0 %v14102_v12  ;;  %2691 = vmatprep.mubr.bf16.mxu1 %v14102_v12 }
 0x855   :  { %3014 = vmatpush1.bf16.msra.mxu1 %v11885_v39  ;;  %2976 = vmatprep.subr.bf16.mxu0 %v11904_v45 }
 0x856   :  { %3015 = vmatprep.subr.bf16.mxu1 %v11891_v54  ;;  %2977 = vmatpush1.bf16.msra.mxu0 %v11913_v5 }
 0x857   :  { %2978 = vmatprep.subr.bf16.mxu0 %v11916_v38 }
 0x859   :  { %3016 = vmatpush1.bf16.msra.mxu1 %v11897_v18 }
 0x85a   :  { %3017 = vmatprep.subr.bf16.mxu1 %v11907_v53  ;;  %2979 = vmatpush1.bf16.msra.mxu0 %v11925_v59 }
 0x85b   :  { %2980 = vmatprep.subr.bf16.mxu0 %v11931_v32 }
 0x85d   :  { %3018 = vmatpush1.bf16.msra.mxu1 %v11909_v27 }
 0x85e   :  { %3019 = vmatprep.subr.bf16.mxu1 %v11919_v37  ;;  %2981 = vmatpush1.bf16.msra.mxu0 %v11937_v42 }
 0x85f   :  { %3117 = vmatprep.subr.bf16.mxu0 %v11852_v11 }
 0x861   :  { %3020 = vmatpush1.bf16.msra.mxu1 %v11921_v63 }
 0x862   :  { %3021 = vmatprep.subr.bf16.mxu1 %v11929_v35 }
 0x865   :  { %3022 = vmatpush1.bf16.msra.mxu1 %v11933_v41 }
 0x866   :  { %3023 = vmatprep.subr.bf16.mxu1 %v11941_v2 }
 0x869   :  { %3024 = vmatpush1.bf16.msra.mxu1 %v11943_v26 }
 0x86a   :  { %3160 = vmatprep.subr.bf16.mxu1 %v11854_v50 }
 0x8c3   :  { %v2127_v4 = vpop.f32.mrf.mxu0  ;;  %v2170_v6 = vpop.f32.mrf.mxu1 }
 0x8c4   :  { %v2179_v40 = vadd.f32 %v2127_v4, %v14134_v3  ;;  %v2181_v33 = vadd.f32 %v2170_v6, %v14140_v29 }
 0x8c5   :  { %v2129_v1 = vpop.f32.mrf.mxu0  ;;  %v2172_v48 = vpop.f32.mrf.mxu1 }
 0x8c6   :  { %v8386_v60 = vmul.f32 -1.442695, %v2179_v40  ;;  %v2180_v24 = vadd.f32 %v2129_v1, %v14135_v8  ;;  %v2182_v52 = vadd.f32 %v2172_v48, %v14138_v47  ;;  %v14141_v40 = vld [vmem:[#allocation80_spill] sm:$0xff] }
 0x8c7   :  { %v2131_v22 = vpop.f32.mrf.mxu0  ;;  %v2174_v23 = vpop.f32.mrf.mxu1 }
 0x8c8   :  { %9552 = vpow2.f32 %v8386_v60  ;;  %v8388_v14 = vmul.f32 -1.442695, %v2180_v24  ;;  %v2183_v0 = vadd.f32 %v2131_v22, %v14137_v49  ;;  %v8390_v51 = vmul.f32 -1.442695, %v2182_v52 }
 0x8c9   :  { %v2133_v19 = vpop.f32.mrf.mxu0  ;;  %v2176_v17 = vpop.f32.mrf.mxu1  ;;  %v2185_v1 = vadd.f32 %v2174_v23, %v14141_v40 }
 0x8ca   :  { %9554 = vpow2.f32 %v8388_v14  ;;  %v8387_v25 = vmul.f32 -1.442695, %v2183_v0  ;;  %v2184_v58 = vadd.f32 %v2133_v19, %v630_v61  ;;  %v2186_v4 = vadd.f32 %v2176_v17, %v743_v57 }
 0x8cc   :  { %9556 = vpow2.f32 %v8387_v25  ;;  %v8389_v21 = vmul.f32 -1.442695, %v2184_v58  ;;  %v8391_v24 = vmul.f32 -1.442695, %v2186_v4 }
 0x8ce   :  { %9558 = vpow2.f32 %v8389_v21 }
 0x8cf   :  { %9560 = vtanh.f32 %v2181_v33 }
 0x8d0   :  { %9562 = vpow2.f32 %v8390_v51 }
 0x8d5   :  { %v9553_v3 = vpop.eup %9552 }
 0x8d6   :  { %v2193_v60 = vadd.f32 1.0, %v9553_v3 }
 0x8d7   :  { %v9555_v8 = vpop.eup %9554 }
 0x8d8   :  { %9564 = vrcp.f32 %v2193_v60  ;;  %v2205_v22 = vadd.f32 1.0, %v9555_v8 }
 0x8d9   :  { %v9557_v20 = vpop.eup %9556  ;;  %9566 = vtanh.f32 %v2185_v1 }
 0x8da   :  { %9568 = vrcp.f32 %v2205_v22  ;;  %v2194_v61 = vadd.f32 1.0, %v9557_v20 }
 0x8db   :  { %v9559_v14 = vpop.eup %9558  ;;  %9570 = vpow2.f32 %v8391_v24 }
 0x8dc   :  { %9572 = vrcp.f32 %v2194_v61  ;;  %v2206_v30 = vadd.f32 1.0, %v9559_v14  ;;  %v9561_v6 = vpop.eup %9560 }
 0x8dd   :  { %v9563_v48 = vpop.eup %9562 }
 0x8de   :  { %9574 = vrcp.f32 %v2206_v30  ;;  %v2219_v58 = vadd.f32 1.0, %v9563_v48 }
 0x8e0   :  { %9576 = vrcp.f32 %v2219_v58 }
 0x8e5   :  { %v9565_v49 = vpop.eup %9564 }
 0x8e6   :  { %v9567_v0 = vpop.eup %9566  ;;  %v2227_v19 = vmul.f32 %v9565_v49, %v9561_v6 }
 0x8e7   :  { %v9569_v25 = vpop.eup %9568 }
 0x8e8   :  { %v9571_v23 = vpop.eup %9570  ;;  %v2225_v21 = vmul.f32 %v9569_v25, %v11811_v16  ;;  %v12000_v16 = vpop.f32.mrf.mxu0 }
 0x8e9   :  { %v9573_v47 = vpop.eup %9572  ;;  %v2220_v57 = vadd.f32 1.0, %v9571_v23 }
 0x8ea   :  { %v2228_v52 = vmul.f32 %v9573_v47, %v9567_v0  ;;  %v2229_v17 = vadd.f32 %v2227_v19, %v2225_v21  ;;  %v12004_v24 = vpop.f32.mrf.mxu0 }
 0x8eb   :  { %v9575_v9 = vpop.eup %9574 }
 0x8ec   :  { %v2226_v29 = vmul.f32 %v9575_v9, %v11814_v55  ;;  %9578 = vtanh.f32 %v2229_v17  ;;  %v12002_v55 = vpop.f32.mrf.mxu1  ;;  %v12008_v20 = vpop.f32.mrf.mxu0 }
 0x8ed   :  { %9580 = vrcp.f32 %v2220_v57  ;;  %v9577_v51 = vpop.eup %9576 }
 0x8ee   :  { %v2230_v33 = vadd.f32 %v2228_v52, %v2226_v29  ;;  %v12006_v22 = vpop.f32.mrf.mxu1  ;;  %v12012_v14 = vpop.f32.mrf.mxu0 }
 0x8f0   :  { %9582 = vtanh.f32 %v2230_v33  ;;  %v12010_v61 = vpop.f32.mrf.mxu1  ;;  %v12016_v6 = vpop.f32.mrf.mxu0 }
 0x8f2   :  { %v12014_v30 = vpop.f32.mrf.mxu1  ;;  %v12020_v49 = vpop.f32.mrf.mxu0 }
 0x8f4   :  { %v12018_v48 = vpop.f32.mrf.mxu1  ;;  %v12024_v19 = vpop.f32.mrf.mxu0 }
 0x8f5   :  { %14142 = vst [vmem:[#allocation49_spill] sm:$0xff] %v12018_v48 }
 0x8f6   :  { %v12022_v0 = vpop.f32.mrf.mxu1  ;;  %v12028_v58 = vpop.f32.mrf.mxu0 }
 0x8f7   :  { %14143 = vst [vmem:[#allocation47_spill] sm:$0xff] %v12022_v0  ;;  %14145 = vst [vmem:[#allocation50_spill] sm:$0xff] %v12028_v58  ;;  %v14198_v0 = vld [vmem:[#allocation42_spill] sm:$0xff] }
 0x8f8   :  { %v12026_v25 = vpop.f32.mrf.mxu1  ;;  %v12032_v21 = vpop.f32.mrf.mxu0 }
 0x8f9   :  { %v9579_v4 = vpop.eup %9578  ;;  %14144 = vst [vmem:[#allocation46_spill] sm:$0xff] %v12026_v25  ;;  %14147 = vst [vmem:[#allocation48_spill] sm:$0xff] %v12032_v21 }
 0x8fa   :  { %v2233_v3 = vmul.f32 %v9579_v4, %v9577_v51  ;;  %v9581_v40 = vpop.eup %9580  ;;  %v12030_v23 = vpop.f32.mrf.mxu1 }
 0x8fb   :  { %14146 = vst [vmem:[#allocation45_spill] sm:$0xff] %v12030_v23  ;;  %v12036_v52 = vpop.f32.mrf.mxu0  ;;  %v14197_v23 = vld [vmem:[#allocation44_spill] sm:$0xff] }
 0x8fc   :  { %v12034_v47 = vpop.f32.mrf.mxu1  ;;  %14149 = vst [vmem:[#allocation53_spill] sm:$0xff] %v12036_v52 }
 0x8fd   :  { %v9583_v1 = vpop.eup %9582  ;;  %14148 = vst [vmem:[#allocation51_spill] sm:$0xff] %v12034_v47  ;;  %v12040_v9 = vpop.f32.mrf.mxu0 }
 0x8fe   :  { %v2234_v60 = vmul.f32 %v9583_v1, %v9581_v40  ;;  %v12038_v17 = vpop.f32.mrf.mxu1  ;;  %14151 = vst [vmem:[#allocation55_spill] sm:$0xff] %v12040_v9 }
 0x8ff   :  { %14150 = vst [vmem:[#allocation57_spill] sm:$0xff] %v12038_v17  ;;  %v12044_v29 = vpop.f32.mrf.mxu0 }
 0x900   :  { %v2261_v8 = vpack.c.bf16 %v2234_v60, %v2233_v3  ;;  %v12042_v57 = vpop.f32.mrf.mxu1  ;;  %14153 = vst [vmem:[#allocation58_spill] sm:$0xff] %v12044_v29 }
 0x901   :  { %14152 = vst [vmem:[#allocation54_spill] sm:$0xff] %v12042_v57  ;;  %v12048_v51 = vpop.f32.mrf.mxu0 }
 0x902   :  { %2579 = vmatmul.mubr.bf16.gmra.mxu0 %v2261_v8  ;;  %2692 = vmatmul.mubr.bf16.gmra.mxu1 %v2261_v8  ;;  %v12046_v33 = vpop.f32.mrf.mxu1  ;;  %14155 = vst [vmem:[#allocation56_spill] sm:$0xff] %v12048_v51 }
 0x903   :  { %2998 = vmatprep.mubr.bf16.mxu0 %v14102_v12  ;;  %3041 = vmatprep.mubr.bf16.mxu1 %v14102_v12  ;;  %14154 = vst [vmem:[#allocation52_spill] sm:$0xff] %v12046_v33  ;;  %v12052_v3 = vpop.f32.mrf.mxu0 }
 0x904   :  { %v12050_v4 = vpop.f32.mrf.mxu1  ;;  %14157 = vst [vmem:[#allocation61_spill] sm:$0xff] %v12052_v3 }
 0x905   :  { %14156 = vst [vmem:[#allocation59_spill] sm:$0xff] %v12050_v4  ;;  %v12056_v1 = vpop.f32.mrf.mxu0 }
 0x906   :  { %v12054_v40 = vpop.f32.mrf.mxu1  ;;  %14159 = vst [vmem:[#allocation63_spill] sm:$0xff] %v12056_v1 }
 0x907   :  { %14158 = vst [vmem:[#allocation65_spill] sm:$0xff] %v12054_v40  ;;  %v12060_v8 = vpop.f32.mrf.mxu0 }
 0x908   :  { %v12058_v60 = vpop.f32.mrf.mxu1  ;;  %14161 = vst [vmem:[#allocation66_spill] sm:$0xff] %v12060_v8 }
 0x909   :  { %14160 = vst [vmem:[#allocation62_spill] sm:$0xff] %v12058_v60  ;;  %v12064_v57 = vpop.f32.mrf.mxu0 }
 0x90a   :  { %2999 = vmatmul.mubr.bf16.vlgmr.msra.gmra.mxu0 %v14102_v12  ;;  %3042 = vmatmul.mubr.bf16.vlgmr.msra.gmra.mxu1 %v14102_v12  ;;  %v12062_v47 = vpop.f32.mrf.mxu1  ;;  %14163 = vst [vmem:[#allocation64_spill] sm:$0xff] %v12064_v57 }
 0x90b   :  { %3118 = vmatpush1.bf16.msra.mxu0 %v11856_v36  ;;  %3161 = vmatpush1.bf16.msra.mxu1 %v11862_v28  ;;  %14162 = vst [vmem:[#allocation60_spill] sm:$0xff] %v12062_v47  ;;  %v12068_v33 = vpop.f32.mrf.mxu0 }
 0x90c   :  { %3119 = vmatprep.subr.bf16.mxu0 %v11858_v44  ;;  %3162 = vmatprep.subr.bf16.mxu1 %v11867_v43  ;;  %v12066_v17 = vpop.f32.mrf.mxu1  ;;  %14165 = vst [vmem:[#allocation69_spill] sm:$0xff] %v12068_v33 }
 0x90d   :  { %3149 = vmatprep.mubr.bf16.mxu0 %v14102_v12  ;;  %3192 = vmatprep.mubr.bf16.mxu1 %v14102_v12  ;;  %14164 = vst [vmem:[#allocation67_spill] sm:$0xff] %v12066_v17  ;;  %v12072_v4 = vpop.f32.mrf.mxu0 }
 0x90e   :  { %v12070_v51 = vpop.f32.mrf.mxu1  ;;  %14167 = vst [vmem:[#allocation71_spill] sm:$0xff] %v12072_v4 }
 0x90f   :  { %3120 = vmatpush1.bf16.msra.mxu0 %v11865_v15  ;;  %3163 = vmatpush1.bf16.msra.mxu1 %v11873_v13  ;;  %14166 = vst [vmem:[#allocation73_spill] sm:$0xff] %v12070_v51  ;;  %v12076_v40 = vpop.f32.mrf.mxu0 }
 0x910   :  { %3121 = vmatprep.subr.bf16.mxu0 %v11870_v62  ;;  %3164 = vmatprep.subr.bf16.mxu1 %v11876_v31  ;;  %v12074_v3 = vpop.f32.mrf.mxu1  ;;  %14169 = vst [vmem:[#allocation74_spill] sm:$0xff] %v12076_v40 }
 0x911   :  { %14168 = vst [vmem:[#allocation70_spill] sm:$0xff] %v12074_v3  ;;  %v12080_v60 = vpop.f32.mrf.mxu0 }
 0x912   :  { %v12078_v1 = vpop.f32.mrf.mxu1  ;;  %14171 = vst [vmem:[#allocation72_spill] sm:$0xff] %v12080_v60 }
 0x913   :  { %3122 = vmatpush1.bf16.msra.mxu0 %v11879_v34  ;;  %3165 = vmatpush1.bf16.msra.mxu1 %v11885_v39  ;;  %14170 = vst [vmem:[#allocation68_spill] sm:$0xff] %v12078_v1  ;;  %v12084_v47 = vpop.f32.mrf.mxu0 }
 0x914   :  { %3123 = vmatprep.subr.bf16.mxu0 %v11882_v46  ;;  %3166 = vmatprep.subr.bf16.mxu1 %v11891_v54  ;;  %v12082_v8 = vpop.f32.mrf.mxu1  ;;  %14173 = vst [vmem:[#allocation75_spill] sm:$0xff] %v12084_v47 }
 0x915   :  { %14172 = vst [vmem:[#allocation83_spill] sm:$0xff] %v12082_v8  ;;  %v12088_v17 = vpop.f32.mrf.mxu0 }
 0x916   :  { %v12086_v57 = vpop.f32.mrf.mxu1  ;;  %14175 = vst [vmem:[#allocation81_spill] sm:$0xff] %v12088_v17 }
 0x917   :  { %3124 = vmatpush1.bf16.msra.mxu0 %v11889_v56  ;;  %3167 = vmatpush1.bf16.msra.mxu1 %v11897_v18  ;;  %14174 = vst [vmem:[#allocation77_spill] sm:$0xff] %v12086_v57  ;;  %v12092_v51 = vpop.f32.mrf.mxu0 }
 0x918   :  { %3125 = vmatprep.subr.bf16.mxu0 %v11894_v7  ;;  %3168 = vmatprep.subr.bf16.mxu1 %v11907_v53  ;;  %v12090_v33 = vpop.f32.mrf.mxu1  ;;  %14177 = vst [vmem:[#allocation78_spill] sm:$0xff] %v12092_v51 }
 0x919   :  { %14176 = vst [vmem:[#allocation79_spill] sm:$0xff] %v12090_v33  ;;  %v12096_v3 = vpop.f32.mrf.mxu0  ;;  %v2294_v33 = vld [vmem:[%s14016_s7] sm:$0xf] }
 0x91a   :  { %v12094_v4 = vpop.f32.mrf.mxu1  ;;  %14179 = vst [vmem:[#allocation76_spill] sm:$0xff] %v12096_v3  ;;  %v12146_v48 = vrot.slane %v2294_v33, %v14197_v23  ;;  %v12149_v58 = vrot.slane %v2294_v33, %v14198_v0 }
 0x91b   :  { %3126 = vmatpush1.bf16.msra.mxu0 %v11901_v10  ;;  %3169 = vmatpush1.bf16.msra.mxu1 %v11909_v27  ;;  %14178 = vst [vmem:[#allocation82_spill] sm:$0xff] %v12094_v4  ;;  %v12100_v1 = vpop.f32.mrf.mxu0 }
 0x91c   :  { %3127 = vmatprep.subr.bf16.mxu0 %v11904_v45  ;;  %3170 = vmatprep.subr.bf16.mxu1 %v11919_v37  ;;  %v12098_v40 = vpop.f32.mrf.mxu1  ;;  %14181 = vst [vmem:[#allocation84_spill] sm:$0xff] %v12100_v1 }
 0x91d   :  { %14180 = vst [vmem:[#allocation80_spill] sm:$0xff] %v12098_v40  ;;  %v12104_v8 = vpop.f32.mrf.mxu0 }
 0x91e   :  { %v12102_v60 = vpop.f32.mrf.mxu1  ;;  %14183 = vst [vmem:[#allocation86_spill] sm:$0xff] %v12104_v8 }
 0x91f   :  { %3128 = vmatpush1.bf16.msra.mxu0 %v11913_v5  ;;  %3171 = vmatpush1.bf16.msra.mxu1 %v11921_v63  ;;  %14182 = vst [vmem:[#allocation85_spill] sm:$0xff] %v12102_v60  ;;  %v12108_v57 = vpop.f32.mrf.mxu0  ;;  %v14191_v60 = vld [vmem:[#allocation41_spill] sm:$0xff] }
 0x920   :  { %3129 = vmatprep.subr.bf16.mxu0 %v11916_v38  ;;  %3172 = vmatprep.subr.bf16.mxu1 %v11929_v35  ;;  %v12106_v47 = vpop.f32.mrf.mxu1  ;;  %14185 = vst [vmem:[#allocation88_spill] sm:$0xff] %v12108_v57  ;;  %v12124_v8 = vrot.slane %v2294_v33, %v14191_v60 }
 0x921   :  { %14184 = vst [vmem:[#allocation87_spill] sm:$0xff] %v12106_v47 }
 0x922   :  { %v12110_v17 = vpop.f32.mrf.mxu1 }
 0x923   :  { %3130 = vmatpush1.bf16.msra.mxu0 %v11925_v59  ;;  %3173 = vmatpush1.bf16.msra.mxu1 %v11933_v41  ;;  %14186 = vst [vmem:[#allocation89_spill] sm:$0xff] %v12110_v17  ;;  %v14194_v17 = vld [vmem:[#allocation43_spill] sm:$0xff] }
 0x924   :  { %3131 = vmatprep.subr.bf16.mxu0 %v11931_v32  ;;  %3174 = vmatprep.subr.bf16.mxu1 %v11941_v2  ;;  %v12131_v51 = vrot.slane %v2294_v33, %v14194_v17 }
 0x927   :  { %3132 = vmatpush1.bf16.msra.mxu0 %v11937_v42  ;;  %3175 = vmatpush1.bf16.msra.mxu1 %v11943_v26 }
 0x928   :  { %3268 = vmatprep.subr.bf16.mxu0 %v11852_v11  ;;  %3311 = vmatprep.subr.bf16.mxu1 %v11854_v50 }
 0x9c2   :  { %v12115_v4 = vpop.f32.mrf.mxu0  ;;  %v12117_v3 = vpop.f32.mrf.mxu1 }
 0x9c3   :  { %14187 = vst [vmem:[#allocation90_spill] sm:$0xff] %v12115_v4  ;;  %14188 = vst [vmem:[#allocation91_spill] sm:$0xff] %v12117_v3  ;;  %v2511_v3 = vadd.f32 %v12000_v16, %v12124_v8 }
 0x9c4   :  { %v12119_v40 = vpop.f32.mrf.mxu0  ;;  %v12121_v1 = vpop.f32.mrf.mxu1 }
 0x9c5   :  { %14189 = vst [vmem:[#allocation92_spill] sm:$0xff] %v12119_v40  ;;  %14190 = vst [vmem:[#allocation93_spill] sm:$0xff] %v12121_v1  ;;  %v2513_v1 = vadd.f32 %v12004_v24, %v12131_v51 }
 0x9c6   :  { %v12126_v47 = vpop.f32.mrf.mxu0  ;;  %v12128_v57 = vpop.f32.mrf.mxu1 }
 0x9c7   :  { %14192 = vst [vmem:[#allocation94_spill] sm:$0xff] %v12126_v47  ;;  %14193 = vst [vmem:[#allocation95_spill] sm:$0xff] %v12128_v57  ;;  %v2515_v57 = vadd.f32 %v12008_v20, %v12124_v8 }
 0x9c8   :  { %v12133_v29 = vpop.f32.mrf.mxu0  ;;  %v12135_v9 = vpop.f32.mrf.mxu1 }
 0x9c9   :  { %14195 = vst [vmem:[#allocation96_spill] sm:$0xff] %v12133_v29  ;;  %14196 = vst [vmem:[#allocation97_spill] sm:$0xff] %v12135_v9  ;;  %v2517_v29 = vadd.f32 %v12012_v14, %v12131_v51  ;;  %v2626_v14 = vadd.f32 %v12006_v22, %v12146_v48 }
 0x9ca   :  { %v3000_v40 = vpop.f32.mrf.mxu0  ;;  %v3043_v4 = vpop.f32.mrf.mxu1 }
 0x9cb   :  { %v3052_v60 = vadd.f32 %v3000_v40, %v2511_v3 }
 0x9cc   :  { %v3002_v52 = vpop.f32.mrf.mxu0  ;;  %v3045_v25 = vpop.f32.mrf.mxu1 }
 0x9cd   :  { %v8456_v47 = vmul.f32 -1.442695, %v3052_v60  ;;  %v3053_v17 = vadd.f32 %v3002_v52, %v2513_v1 }
 0x9ce   :  { %v3004_v21 = vpop.f32.mrf.mxu0  ;;  %v3047_v20 = vpop.f32.mrf.mxu1 }
 0x9cf   :  { %9584 = vpow2.f32 %v8456_v47  ;;  %v8458_v9 = vmul.f32 -1.442695, %v3053_v17  ;;  %v3056_v16 = vadd.f32 %v3004_v21, %v2515_v57  ;;  %v3055_v47 = vadd.f32 %v3045_v25, %v2626_v14 }
 0x9d0   :  { %v3006_v24 = vpop.f32.mrf.mxu0  ;;  %v2624_v21 = vadd.f32 %v12002_v55, %v12149_v58  ;;  %v3049_v17 = vpop.f32.mrf.mxu1 }
 0x9d1   :  { %9586 = vpow2.f32 %v8458_v9  ;;  %v8457_v3 = vmul.f32 -1.442695, %v3056_v16  ;;  %v3057_v40 = vadd.f32 %v3006_v24, %v2517_v29  ;;  %v2630_v9 = vadd.f32 %v12014_v30, %v12146_v48 }
 0x9d2   :  { %v3054_v57 = vadd.f32 %v3043_v4, %v2624_v21  ;;  %v2628_v29 = vadd.f32 %v12010_v61, %v12149_v58  ;;  %v8460_v33 = vmul.f32 -1.442695, %v3055_v47 }
 0x9d3   :  { %9588 = vpow2.f32 %v8457_v3  ;;  %v8459_v52 = vmul.f32 -1.442695, %v3057_v40  ;;  %v3059_v1 = vadd.f32 %v3049_v17, %v2630_v9 }
 0x9d4   :  { %v3058_v16 = vadd.f32 %v3047_v20, %v2628_v29 }
 0x9d5   :  { %9590 = vpow2.f32 %v8459_v52  ;;  %v8461_v25 = vmul.f32 -1.442695, %v3059_v1 }
 0x9d6   :  { %9592 = vtanh.f32 %v3054_v57 }
 0x9d7   :  { %9594 = vpow2.f32 %v8460_v33 }
 0x9dc   :  { %v9585_v60 = vpop.eup %9584 }
 0x9dd   :  { %v3066_v24 = vadd.f32 1.0, %v9585_v60 }
 0x9de   :  { %v9587_v22 = vpop.eup %9586 }
 0x9df   :  { %9596 = vrcp.f32 %v3066_v24  ;;  %v3078_v3 = vadd.f32 1.0, %v9587_v22 }
 0x9e0   :  { %v9589_v55 = vpop.eup %9588  ;;  %9598 = vtanh.f32 %v3058_v16 }
 0x9e1   :  { %9600 = vrcp.f32 %v3078_v3  ;;  %v3067_v40 = vadd.f32 1.0, %v9589_v55 }
 0x9e2   :  { %v9591_v30 = vpop.eup %9590  ;;  %9602 = vpow2.f32 %v8461_v25 }
 0x9e3   :  { %9604 = vrcp.f32 %v3067_v40  ;;  %v3079_v4 = vadd.f32 1.0, %v9591_v30  ;;  %v9593_v61 = vpop.eup %9592 }
 0x9e4   :  { %v9595_v52 = vpop.eup %9594 }
 0x9e5   :  { %9606 = vrcp.f32 %v3079_v4  ;;  %v3092_v29 = vadd.f32 1.0, %v9595_v52  ;;  %v2521_v52 = vadd.f32 %v12016_v6, %v12124_v8 }
 0x9e7   :  { %9608 = vrcp.f32 %v3092_v29 }
 0x9ec   :  { %v9597_v14 = vpop.eup %9596 }
 0x9ed   :  { %v9599_v20 = vpop.eup %9598  ;;  %v3100_v47 = vmul.f32 %v9597_v14, %v9593_v61 }
 0x9ee   :  { %v9601_v21 = vpop.eup %9600 }
 0x9ef   :  { %v9603_v17 = vpop.eup %9602  ;;  %v3098_v9 = vmul.f32 0.0, %v9601_v21 }
 0x9f0   :  { %v9605_v57 = vpop.eup %9604  ;;  %v3093_v16 = vadd.f32 1.0, %v9603_v17 }
 0x9f1   :  { %v12159_v33 = vadd.f32 %v3100_v47, %v3098_v9  ;;  %v3101_v1 = vmul.f32 %v9605_v57, %v9599_v20  ;;  %v2523_v20 = vadd.f32 %v12020_v49, %v12131_v51  ;;  %v2525_v9 = vadd.f32 %v12024_v19, %v12124_v8 }
 0x9f2   :  { %v9607_v60 = vpop.eup %9606 }
 0x9f3   :  { %v3099_v24 = vmul.f32 0.0, %v9607_v60  ;;  %9610 = vtanh.f32 %v12159_v33  ;;  %v14199_v60 = vld [vmem:[#allocation50_spill] sm:$0xff] }
 0x9f4   :  { %9612 = vrcp.f32 %v3093_v16  ;;  %v9609_v25 = vpop.eup %9608  ;;  %v2527_v16 = vadd.f32 %v14199_v60, %v12131_v51 }
 0x9f5   :  { %v12162_v22 = vadd.f32 %v3101_v1, %v3099_v24 }
 0x9f7   :  { %9614 = vtanh.f32 %v12162_v22 }
 0xa00   :  { %v9611_v3 = vpop.eup %9610 }
 0xa01   :  { %v9613_v55 = vpop.eup %9612  ;;  %v3106_v30 = vmul.f32 %v9611_v3, %v9609_v25 }
 0xa04   :  { %v9615_v40 = vpop.eup %9614 }
 0xa05   :  { %v3107_v4 = vmul.f32 %v9615_v40, %v9613_v55 }
 0xa07   :  { %v3116_v61 = vpack.c.bf16 %v3107_v4, %v3106_v30  ;;  %v14200_v4 = vld [vmem:[#allocation47_spill] sm:$0xff] }
 0xa08   :  { %v2636_v19 = vadd.f32 %v14200_v4, %v12146_v48 }
 0xa09   :  { %3150 = vmatmul.mubr.bf16.vlgmr.msra.gmra.mxu0 %v3116_v61  ;;  %3193 = vmatmul.mubr.bf16.vlgmr.msra.gmra.mxu1 %v3116_v61 }
 0xa0a   :  { %3269 = vmatpush1.bf16.msra.mxu0 %v11856_v36  ;;  %3312 = vmatpush1.bf16.msra.mxu1 %v11862_v28 }
 0xa0b   :  { %3270 = vmatprep.subr.bf16.mxu0 %v11858_v44  ;;  %3313 = vmatprep.subr.bf16.mxu1 %v11867_v43 }
 0xa0c   :  { %3300 = vmatprep.mubr.bf16.mxu0 %v14102_v12  ;;  %3343 = vmatprep.mubr.bf16.mxu1 %v14102_v12 }
 0xa0e   :  { %3271 = vmatpush1.bf16.msra.mxu0 %v11865_v15  ;;  %3314 = vmatpush1.bf16.msra.mxu1 %v11873_v13 }
 0xa0f   :  { %3272 = vmatprep.subr.bf16.mxu0 %v11870_v62  ;;  %3315 = vmatprep.subr.bf16.mxu1 %v11876_v31 }
 0xa12   :  { %3273 = vmatpush1.bf16.msra.mxu0 %v11879_v34  ;;  %3316 = vmatpush1.bf16.msra.mxu1 %v11885_v39 }
 0xa13   :  { %3274 = vmatprep.subr.bf16.mxu0 %v11882_v46  ;;  %3317 = vmatprep.subr.bf16.mxu1 %v11891_v54 }
 0xa16   :  { %3275 = vmatpush1.bf16.msra.mxu0 %v11889_v56  ;;  %3318 = vmatpush1.bf16.msra.mxu1 %v11897_v18 }
 0xa17   :  { %3276 = vmatprep.subr.bf16.mxu0 %v11894_v7  ;;  %3319 = vmatprep.subr.bf16.mxu1 %v11907_v53 }
 0xa1a   :  { %3277 = vmatpush1.bf16.msra.mxu0 %v11901_v10  ;;  %3320 = vmatpush1.bf16.msra.mxu1 %v11909_v27 }
 0xa1b   :  { %3278 = vmatprep.subr.bf16.mxu0 %v11904_v45  ;;  %3321 = vmatprep.subr.bf16.mxu1 %v11919_v37 }
 0xa1e   :  { %3279 = vmatpush1.bf16.msra.mxu0 %v11913_v5  ;;  %3322 = vmatpush1.bf16.msra.mxu1 %v11921_v63 }
 0xa1f   :  { %3280 = vmatprep.subr.bf16.mxu0 %v11916_v38  ;;  %3323 = vmatprep.subr.bf16.mxu1 %v11929_v35 }
 0xa22   :  { %3281 = vmatpush1.bf16.msra.mxu0 %v11925_v59  ;;  %3324 = vmatpush1.bf16.msra.mxu1 %v11933_v41 }
 0xa23   :  { %3282 = vmatprep.subr.bf16.mxu0 %v11931_v32  ;;  %3325 = vmatprep.subr.bf16.mxu1 %v11941_v2 }
 0xa26   :  { %3283 = vmatpush1.bf16.msra.mxu0 %v11937_v42  ;;  %3326 = vmatpush1.bf16.msra.mxu1 %v11943_v26 }
 0xa27   :  { %3419 = vmatprep.subr.bf16.mxu0 %v11852_v11  ;;  %3462 = vmatprep.subr.bf16.mxu1 %v11854_v50 }
 0xac9   :  { %v3151_v14 = vpop.f32.mrf.mxu0  ;;  %v3194_v21 = vpop.f32.mrf.mxu1 }
 0xaca   :  { %v3203_v47 = vadd.f32 %v3151_v14, %v2521_v52  ;;  %v14201_v52 = vld [vmem:[#allocation49_spill] sm:$0xff] }
 0xacb   :  { %v3153_v17 = vpop.f32.mrf.mxu0  ;;  %v3196_v25 = vpop.f32.mrf.mxu1  ;;  %v2634_v14 = vadd.f32 %v14201_v52, %v12149_v58 }
 0xacc   :  { %v8462_v57 = vmul.f32 -1.442695, %v3203_v47  ;;  %v3204_v29 = vadd.f32 %v3153_v17, %v2523_v20  ;;  %v3206_v61 = vadd.f32 %v3196_v25, %v2636_v19  ;;  %v14202_v47 = vld [vmem:[#allocation45_spill] sm:$0xff] }
 0xacd   :  { %v3155_v1 = vpop.f32.mrf.mxu0  ;;  %v3198_v40 = vpop.f32.mrf.mxu1  ;;  %v2640_v17 = vadd.f32 %v14202_v47, %v12146_v48 }
 0xace   :  { %9616 = vpow2.f32 %v8462_v57  ;;  %v8464_v24 = vmul.f32 -1.442695, %v3204_v29  ;;  %v3207_v6 = vadd.f32 %v3155_v1, %v2525_v9  ;;  %v3205_v9 = vadd.f32 %v3194_v21, %v2634_v14  ;;  %v14203_v57 = vld [vmem:[#allocation46_spill] sm:$0xff] }
 0xacf   :  { %v3157_v3 = vpop.f32.mrf.mxu0  ;;  %v3200_v20 = vpop.f32.mrf.mxu1  ;;  %v2638_v29 = vadd.f32 %v14203_v57, %v12149_v58  ;;  %v8466_v1 = vmul.f32 -1.442695, %v3206_v61 }
 0xad0   :  { %9618 = vpow2.f32 %v8464_v24  ;;  %v8463_v55 = vmul.f32 -1.442695, %v3207_v6  ;;  %v3208_v49 = vadd.f32 %v3157_v3, %v2527_v16  ;;  %v3210_v60 = vadd.f32 %v3200_v20, %v2640_v17 }
 0xad1   :  { %v3209_v24 = vadd.f32 %v3198_v40, %v2638_v29 }
 0xad2   :  { %9620 = vpow2.f32 %v8463_v55  ;;  %v8465_v30 = vmul.f32 -1.442695, %v3208_v49  ;;  %v8467_v25 = vmul.f32 -1.442695, %v3210_v60 }
 0xad4   :  { %9622 = vpow2.f32 %v8465_v30 }
 0xad5   :  { %9624 = vtanh.f32 %v3205_v9 }
 0xad6   :  { %9626 = vpow2.f32 %v8466_v1 }
 0xadb   :  { %v9617_v16 = vpop.eup %9616 }
 0xadc   :  { %v3217_v6 = vadd.f32 1.0, %v9617_v16 }
 0xadd   :  { %v9619_v3 = vpop.eup %9618 }
 0xade   :  { %9628 = vrcp.f32 %v3217_v6  ;;  %v3229_v55 = vadd.f32 1.0, %v9619_v3 }
 0xadf   :  { %v9621_v49 = vpop.eup %9620  ;;  %9630 = vtanh.f32 %v3209_v24 }
 0xae0   :  { %9632 = vrcp.f32 %v3229_v55  ;;  %v3218_v30 = vadd.f32 1.0, %v9621_v49 }
 0xae1   :  { %v9623_v4 = vpop.eup %9622  ;;  %9634 = vpow2.f32 %v8467_v25 }
 0xae2   :  { %9636 = vrcp.f32 %v3218_v30  ;;  %v3230_v21 = vadd.f32 1.0, %v9623_v4  ;;  %v9625_v19 = vpop.eup %9624 }
 0xae3   :  { %v9627_v61 = vpop.eup %9626 }
 0xae4   :  { %9638 = vrcp.f32 %v3230_v21  ;;  %v3243_v57 = vadd.f32 1.0, %v9627_v61 }
 0xae6   :  { %9640 = vrcp.f32 %v3243_v57 }
 0xaeb   :  { %v9629_v52 = vpop.eup %9628 }
 0xaec   :  { %v9631_v40 = vpop.eup %9630  ;;  %v3251_v14 = vmul.f32 %v9629_v52, %v9625_v19 }
 0xaed   :  { %v9633_v20 = vpop.eup %9632 }
 0xaee   :  { %v9635_v47 = vpop.eup %9634  ;;  %v3249_v17 = vmul.f32 %v9633_v20, %v12159_v33 }
 0xaef   :  { %v9637_v9 = vpop.eup %9636  ;;  %v3244_v16 = vadd.f32 1.0, %v9635_v47 }
 0xaf0   :  { %v12216_v29 = vadd.f32 %v3251_v14, %v3249_v17  ;;  %v3252_v1 = vmul.f32 %v9637_v9, %v9631_v40 }
 0xaf1   :  { %v9639_v60 = vpop.eup %9638 }
 0xaf2   :  { %v3250_v24 = vmul.f32 %v9639_v60, %v12162_v22  ;;  %9642 = vtanh.f32 %v12216_v29  ;;  %v14211_v22 = vld [vmem:[#allocation54_spill] sm:$0xff] }
 0xaf3   :  { %9644 = vrcp.f32 %v3244_v16  ;;  %v9641_v3 = vpop.eup %9640  ;;  %v2648_v21 = vadd.f32 %v14211_v22, %v12149_v58  ;;  %v12343_v22 = vld [vmem:[#allocation13 + $0x40] ss:$16 sps:$4 sm:$0xff]  }
 0xaf4   :  { %v12219_v6 = vadd.f32 %v3252_v1, %v3250_v24 }
 0xaf6   :  { %9646 = vtanh.f32 %v12219_v6 }
 0xaff   :  { %v9643_v25 = vpop.eup %9642 }
 0xb00   :  { %v9645_v33 = vpop.eup %9644  ;;  %v3257_v49 = vmul.f32 %v9643_v25, %v9641_v3 }
 0xb03   :  { %v9647_v55 = vpop.eup %9646 }
 0xb04   :  { %v3258_v30 = vmul.f32 %v9647_v55, %v9645_v33 }
 0xb06   :  { %v3267_v4 = vpack.c.bf16 %v3258_v30, %v3257_v49 }
 0xb08   :  { %3301 = vmatmul.mubr.bf16.vlgmr.msra.gmra.mxu0 %v3267_v4  ;;  %3344 = vmatmul.mubr.bf16.vlgmr.msra.gmra.mxu1 %v3267_v4 }
 0xb09   :  { %3420 = vmatpush1.bf16.msra.mxu0 %v11856_v36  ;;  %3463 = vmatpush1.bf16.msra.mxu1 %v11862_v28  ;;  %v14204_v36 = vld [vmem:[#allocation48_spill] sm:$0xff] }
 0xb0a   :  { %3421 = vmatprep.subr.bf16.mxu0 %v11858_v44  ;;  %3464 = vmatprep.subr.bf16.mxu1 %v11867_v43  ;;  %v2531_v44 = vadd.f32 %v14204_v36, %v12124_v8 }
 0xb0b   :  { %3451 = vmatprep.mubr.bf16.mxu0 %v14102_v12  ;;  %3494 = vmatprep.mubr.bf16.mxu1 %v14102_v12 }
 0xb0d   :  { %3422 = vmatpush1.bf16.msra.mxu0 %v11865_v15  ;;  %3465 = vmatpush1.bf16.msra.mxu1 %v11873_v13  ;;  %v14205_v15 = vld [vmem:[#allocation53_spill] sm:$0xff] }
 0xb0e   :  { %3423 = vmatprep.subr.bf16.mxu0 %v11870_v62  ;;  %3466 = vmatprep.subr.bf16.mxu1 %v11876_v31  ;;  %v2533_v43 = vadd.f32 %v14205_v15, %v12131_v51 }
 0xb11   :  { %3424 = vmatpush1.bf16.msra.mxu0 %v11879_v34  ;;  %3467 = vmatpush1.bf16.msra.mxu1 %v11885_v39  ;;  %v14206_v34 = vld [vmem:[#allocation55_spill] sm:$0xff] }
 0xb12   :  { %3425 = vmatprep.subr.bf16.mxu0 %v11882_v46  ;;  %3468 = vmatprep.subr.bf16.mxu1 %v11891_v54  ;;  %v2535_v46 = vadd.f32 %v14206_v34, %v12124_v8 }
 0xb15   :  { %3426 = vmatpush1.bf16.msra.mxu0 %v11889_v56  ;;  %3469 = vmatpush1.bf16.msra.mxu1 %v11897_v18 }
 0xb16   :  { %3427 = vmatprep.subr.bf16.mxu0 %v11894_v7  ;;  %3470 = vmatprep.subr.bf16.mxu1 %v11907_v53 }
 0xb19   :  { %3428 = vmatpush1.bf16.msra.mxu0 %v11901_v10  ;;  %3471 = vmatpush1.bf16.msra.mxu1 %v11909_v27 }
 0xb1a   :  { %3429 = vmatprep.subr.bf16.mxu0 %v11904_v45  ;;  %3472 = vmatprep.subr.bf16.mxu1 %v11919_v37  ;;  %v14208_v37 = vld [vmem:[#allocation57_spill] sm:$0xff] }
 0xb1d   :  { %3430 = vmatpush1.bf16.msra.mxu0 %v11913_v5  ;;  %3473 = vmatpush1.bf16.msra.mxu1 %v11921_v63  ;;  %v2646_v63 = vadd.f32 %v14208_v37, %v12146_v48  ;;  %v12316_v37 = vld [vmem:[#allocation13 + $0x8c] ss:$16 sps:$4 sm:$0xff]  }
 0xb1e   :  { %3431 = vmatprep.subr.bf16.mxu0 %v11916_v38  ;;  %3474 = vmatprep.subr.bf16.mxu1 %v11929_v35  ;;  %v14209_v35 = vld [vmem:[#allocation51_spill] sm:$0xff] }
 0xb21   :  { %3432 = vmatpush1.bf16.msra.mxu0 %v11925_v59  ;;  %3475 = vmatpush1.bf16.msra.mxu1 %v11933_v41 }
 0xb22   :  { %3433 = vmatprep.subr.bf16.mxu0 %v11931_v32  ;;  %3476 = vmatprep.subr.bf16.mxu1 %v11941_v2  ;;  %v2644_v32 = vadd.f32 %v14209_v35, %v12149_v58  ;;  %v12325_v35 = vld [vmem:[#allocation13 + $0x64] ss:$16 sps:$4 sm:$0xff]  }
 0xb25   :  { %3434 = vmatpush1.bf16.msra.mxu0 %v11937_v42  ;;  %3477 = vmatpush1.bf16.msra.mxu1 %v11943_v26  ;;  %v14210_v42 = vld [vmem:[#allocation52_spill] sm:$0xff] }
 0xb26   :  { %3570 = vmatprep.subr.bf16.mxu0 %v11852_v11  ;;  %3613 = vmatprep.subr.bf16.mxu1 %v11854_v50  ;;  %v14207_v11 = vld [vmem:[#allocation58_spill] sm:$0xff]  ;;  %v2650_v2 = vadd.f32 %v14210_v42, %v12146_v48 }
 0xb27   :  { %v2537_v7 = vadd.f32 %v14207_v11, %v12131_v51  ;;  %v12281_v11 = vld [vmem:[#allocation13 + $0xe0] ss:$16 sps:$4 sm:$0xff]   ;;  %v12334_v42 = vld [vmem:[#allocation13 + $0x68] ss:$16 sps:$4 sm:$0xff]  }
 0xbc8   :  { %v3302_v28 = vpop.f32.mrf.mxu0  ;;  %v3345_v13 = vpop.f32.mrf.mxu1 }
 0xbc9   :  { %v3354_v62 = vadd.f32 %v3302_v28, %v2531_v44  ;;  %v3356_v26 = vadd.f32 %v3345_v13, %v2644_v32  ;;  %v12328_v32 = vld [vmem:[#allocation13 + $0x6c] ss:$16 sps:$4 sm:$0xff]  }
 0xbca   :  { %v3304_v31 = vpop.f32.mrf.mxu0  ;;  %v3347_v18 = vpop.f32.mrf.mxu1 }
 0xbcb   :  { %v8468_v39 = vmul.f32 -1.442695, %v3354_v62  ;;  %v3355_v56 = vadd.f32 %v3304_v31, %v2533_v43  ;;  %v3357_v59 = vadd.f32 %v3347_v18, %v2646_v63  ;;  %v12295_v18 = vld [vmem:[#allocation13 + $0xc0] ss:$16 sps:$4 sm:$0xff]  }
 0xbcc   :  { %v3306_v54 = vpop.f32.mrf.mxu0  ;;  %v3349_v5 = vpop.f32.mrf.mxu1  ;;  %v12319_v63 = vld [vmem:[#allocation13 + $0x80] ss:$16 sps:$4 sm:$0xff]  }
 0xbcd   :  { %9648 = vpow2.f32 %v8468_v39  ;;  %v8470_v50 = vmul.f32 -1.442695, %v3355_v56  ;;  %v3358_v10 = vadd.f32 %v3306_v54, %v2535_v46  ;;  %v8472_v19 = vmul.f32 -1.442695, %v3357_v59  ;;  %v12322_v59 = vld [vmem:[#allocation13 + $0x88] ss:$16 sps:$4 sm:$0xff]  }
 0xbce   :  { %v3308_v45 = vpop.f32.mrf.mxu0  ;;  %v3351_v41 = vpop.f32.mrf.mxu1  ;;  %v3360_v40 = vadd.f32 %v3349_v5, %v2648_v21  ;;  %v12310_v5 = vld [vmem:[#allocation13 + $0xa8] ss:$16 sps:$4 sm:$0xff]  }
 0xbcf   :  { %9650 = vpow2.f32 %v8470_v50  ;;  %v8469_v53 = vmul.f32 -1.442695, %v3358_v10  ;;  %v3359_v27 = vadd.f32 %v3308_v45, %v2537_v7  ;;  %v3361_v61 = vadd.f32 %v3351_v41, %v2650_v2  ;;  %v12287_v7 = vld [vmem:[#allocation13 + $0xc4] ss:$16 sps:$4 sm:$0xff]   ;;  %v12290_v50 = vld [vmem:[#allocation13 + $0xcc] ss:$16 sps:$4 sm:$0xff]  }
 0xbd0   :  { %v12298_v10 = vld [vmem:[#allocation13 + $0xc8] ss:$16 sps:$4 sm:$0xff]   ;;  %v12301_v45 = vld [vmem:[#allocation13 + $0xa4] ss:$16 sps:$4 sm:$0xff]   ;;  %v12331_v41 = vld [vmem:[#allocation13 + $0x60] ss:$16 sps:$4 sm:$0xff]  }
 0xbd1   :  { %9652 = vpow2.f32 %v8469_v53  ;;  %v8471_v38 = vmul.f32 -1.442695, %v3359_v27  ;;  %v8473_v47 = vmul.f32 -1.442695, %v3361_v61  ;;  %v12304_v53 = vld [vmem:[#allocation13 + $0xac] ss:$16 sps:$4 sm:$0xff]  }
 0xbd2   :  { %v12307_v27 = vld [vmem:[#allocation13 + $0xa0] ss:$16 sps:$4 sm:$0xff]   ;;  %v12337_v2 = vld [vmem:[#allocation13 + $0x44] ss:$16 sps:$4 sm:$0xff]   ;;  %v12346_v21 = vld [vmem:[#allocation13 + $0x48] ss:$16 sps:$4 sm:$0xff]  }
 0xbd3   :  { %9654 = vpow2.f32 %v8471_v38  ;;  %v12313_v38 = vld [vmem:[#allocation13 + $0x84] ss:$16 sps:$4 sm:$0xff]   ;;  %v12352_v61 = vld [vmem:[#allocation13 + $0x2c] ss:$16 sps:$4 sm:$0xff]  }
 0xbd4   :  { %9656 = vtanh.f32 %v3356_v26  ;;  %v12340_v26 = vld [vmem:[#allocation13 + $0x4c] ss:$16 sps:$4 sm:$0xff]  }
 0xbd5   :  { %9658 = vpow2.f32 %v8472_v19  ;;  %v12349_v19 = vld [vmem:[#allocation13 + $0x24] ss:$16 sps:$4 sm:$0xff]  }
 0xbda   :  { %v9649_v52 = vpop.eup %9648 }
 0xbdb   :  { %v3368_v14 = vadd.f32 1.0, %v9649_v52  ;;  %v12355_v52 = vld [vmem:[#allocation13 + $0x20] ss:$16 sps:$4 sm:$0xff]  }
 0xbdc   :  { %v9651_v20 = vpop.eup %9650 }
 0xbdd   :  { %9660 = vrcp.f32 %v3368_v14  ;;  %v3380_v17 = vadd.f32 1.0, %v9651_v20  ;;  %v12361_v14 = vld [vmem:[#allocation13 + $0x4] ss:$16 sps:$4 sm:$0xff]   ;;  %v12364_v20 = vld [vmem:[#allocation13 + $0xc] ss:$16 sps:$4 sm:$0xff]  }
 0xbde   :  { %v9653_v9 = vpop.eup %9652  ;;  %9662 = vtanh.f32 %v3360_v40  ;;  %v12358_v40 = vld [vmem:[#allocation13 + $0x28] ss:$16 sps:$4 sm:$0xff]  }
 0xbdf   :  { %9664 = vrcp.f32 %v3380_v17  ;;  %v3369_v57 = vadd.f32 1.0, %v9653_v9  ;;  %v12370_v17 = vld [vmem:[#allocation13 + $0x8] ss:$16 sps:$4 sm:$0xff]   ;;  %v12373_v9 = vld [vmem:[#allocation13 + $0xe4] ss:$16 sps:$4 sm:$0xff]  }
 0xbe0   :  { %v9655_v1 = vpop.eup %9654  ;;  %9666 = vpow2.f32 %v8473_v47  ;;  %v12367_v47 = vld [vmem:[#allocation13] ss:$16 sps:$4 sm:$0xff]  }
 0xbe1   :  { %9668 = vrcp.f32 %v3369_v57  ;;  %v3381_v60 = vadd.f32 1.0, %v9655_v1  ;;  %v9657_v16 = vpop.eup %9656  ;;  %v12376_v57 = vld [vmem:[#allocation13 + $0xec] ss:$16 sps:$4 sm:$0xff]  }
 0xbe2   :  { %v9659_v24 = vpop.eup %9658  ;;  %v14212_v1 = vld [vmem:[#allocation56_spill] sm:$0xff] }
 0xbe3   :  { %9670 = vrcp.f32 %v3381_v60  ;;  %v3394_v36 = vadd.f32 1.0, %v9659_v24  ;;  %v2541_v60 = vadd.f32 %v14212_v1, %v12124_v8  ;;  %v14213_v24 = vld [vmem:[#allocation61_spill] sm:$0xff] }
 0xbe4   :  { %v14216_v1 = vld [vmem:[#allocation65_spill] sm:$0xff] }
 0xbe5   :  { %9672 = vrcp.f32 %v3394_v36 }
 0xbea   :  { %v9661_v3 = vpop.eup %9660 }
 0xbeb   :  { %v9663_v25 = vpop.eup %9662  ;;  %v3402_v33 = vmul.f32 %v9661_v3, %v9657_v16  ;;  %v2543_v3 = vadd.f32 %v14213_v24, %v12131_v51  ;;  %v14217_v24 = vld [vmem:[#allocation59_spill] sm:$0xff] }
 0xbec   :  { %v9665_v55 = vpop.eup %9664 }
 0xbed   :  { %v9667_v49 = vpop.eup %9666  ;;  %v3400_v30 = vmul.f32 %v9665_v55, %v12216_v29 }
 0xbee   :  { %v9669_v4 = vpop.eup %9668  ;;  %v3395_v43 = vadd.f32 1.0, %v9667_v49  ;;  %v14214_v49 = vld [vmem:[#allocation63_spill] sm:$0xff] }
 0xbef   :  { %v12274_v44 = vadd.f32 %v3402_v33, %v3400_v30  ;;  %v3403_v28 = vmul.f32 %v9669_v4, %v9663_v25  ;;  %v2545_v30 = vadd.f32 %v14214_v49, %v12124_v8 }
 0xbf0   :  { %v9671_v15 = vpop.eup %9670 }
 0xbf1   :  { %v3401_v62 = vmul.f32 %v9671_v15, %v12219_v6  ;;  %9674 = vtanh.f32 %v12274_v44  ;;  %v12284_v6 = vld [vmem:[#allocation13 + $0xe8] ss:$16 sps:$4 sm:$0xff]  }
 0xbf2   :  { %9676 = vrcp.f32 %v3395_v43  ;;  %v9673_v31 = vpop.eup %9672  ;;  %v14215_v15 = vld [vmem:[#allocation66_spill] sm:$0xff] }
 0xbf3   :  { %v12277_v13 = vadd.f32 %v3403_v28, %v3401_v62  ;;  %v2547_v43 = vadd.f32 %v14215_v15, %v12131_v51 }
 0xbf5   :  { %9678 = vtanh.f32 %v12277_v13 }
 0xbfe   :  { %v9675_v34 = vpop.eup %9674 }
 0xbff   :  { %v9677_v29 = vpop.eup %9676  ;;  %v3408_v39 = vmul.f32 %v9675_v34, %v9673_v31 }
 0xc02   :  { %v9679_v46 = vpop.eup %9678 }
 0xc03   :  { %v3409_v56 = vmul.f32 %v9679_v46, %v9677_v29 }
 0xc05   :  { %v3418_v54 = vpack.c.bf16 %v3409_v56, %v3408_v39 }
 0xc07   :  { %3452 = vmatmul.mubr.bf16.vlgmr.msra.gmra.mxu0 %v3418_v54  ;;  %3495 = vmatmul.mubr.bf16.vlgmr.msra.gmra.mxu1 %v3418_v54 }
 0xc08   :  { %3571 = vmatpush1.bf16.msra.mxu0 %v12281_v11  ;;  %3614 = vmatpush1.bf16.msra.mxu1 %v12284_v6 }
 0xc09   :  { %3572 = vmatprep.subr.bf16.mxu0 %v12287_v7  ;;  %3615 = vmatprep.subr.bf16.mxu1 %v12290_v50 }
 0xc0a   :  { %3602 = vmatprep.mubr.bf16.mxu0 %v14102_v12  ;;  %3645 = vmatprep.mubr.bf16.mxu1 %v14102_v12 }
 0xc0c   :  { %3573 = vmatpush1.bf16.msra.mxu0 %v12295_v18  ;;  %3616 = vmatpush1.bf16.msra.mxu1 %v12298_v10 }
 0xc0d   :  { %3574 = vmatprep.subr.bf16.mxu0 %v12301_v45  ;;  %3617 = vmatprep.subr.bf16.mxu1 %v12304_v53 }
 0xc10   :  { %3575 = vmatpush1.bf16.msra.mxu0 %v12307_v27  ;;  %3618 = vmatpush1.bf16.msra.mxu1 %v12310_v5 }
 0xc11   :  { %3576 = vmatprep.subr.bf16.mxu0 %v12313_v38  ;;  %3619 = vmatprep.subr.bf16.mxu1 %v12316_v37 }
 0xc14   :  { %3577 = vmatpush1.bf16.msra.mxu0 %v12319_v63  ;;  %3620 = vmatpush1.bf16.msra.mxu1 %v12322_v59 }
 0xc15   :  { %3578 = vmatprep.subr.bf16.mxu0 %v12325_v35  ;;  %3621 = vmatprep.subr.bf16.mxu1 %v12328_v32 }
 0xc18   :  { %3579 = vmatpush1.bf16.msra.mxu0 %v12331_v41  ;;  %3622 = vmatpush1.bf16.msra.mxu1 %v12334_v42 }
 0xc19   :  { %3580 = vmatprep.subr.bf16.mxu0 %v12337_v2  ;;  %3623 = vmatprep.subr.bf16.mxu1 %v12340_v26 }
 0xc1c   :  { %3581 = vmatpush1.bf16.msra.mxu0 %v12343_v22  ;;  %3624 = vmatpush1.bf16.msra.mxu1 %v12346_v21 }
 0xc1d   :  { %3582 = vmatprep.subr.bf16.mxu0 %v12349_v19  ;;  %3625 = vmatprep.subr.bf16.mxu1 %v12352_v61 }
 0xc20   :  { %3583 = vmatpush1.bf16.msra.mxu0 %v12355_v52  ;;  %3626 = vmatpush1.bf16.msra.mxu1 %v12358_v40 }
 0xc21   :  { %3584 = vmatprep.subr.bf16.mxu0 %v12361_v14  ;;  %3627 = vmatprep.subr.bf16.mxu1 %v12364_v20 }
 0xc24   :  { %3585 = vmatpush1.bf16.msra.mxu0 %v12367_v47  ;;  %3628 = vmatpush1.bf16.msra.mxu1 %v12370_v17 }
 0xc25   :  { %3721 = vmatprep.subr.bf16.mxu0 %v12373_v9  ;;  %3764 = vmatprep.subr.bf16.mxu1 %v12376_v57 }
 0xcc7   :  { %v3453_v16 = vpop.f32.mrf.mxu0  ;;  %v3496_v33 = vpop.f32.mrf.mxu1 }
 0xcc8   :  { %v3505_v25 = vadd.f32 %v3453_v16, %v2541_v60  ;;  %v2656_v60 = vadd.f32 %v14216_v1, %v12146_v48 }
 0xcc9   :  { %v3455_v55 = vpop.f32.mrf.mxu0  ;;  %v3498_v31 = vpop.f32.mrf.mxu1 }
 0xcca   :  { %v8474_v4 = vmul.f32 -1.442695, %v3505_v25  ;;  %v3506_v36 = vadd.f32 %v3455_v55, %v2543_v3  ;;  %v3508_v16 = vadd.f32 %v3498_v31, %v2656_v60  ;;  %v2654_v3 = vadd.f32 %v14217_v24, %v12149_v58  ;;  %v14218_v55 = vld [vmem:[#allocation60_spill] sm:$0xff] }
 0xccb   :  { %v3457_v28 = vpop.f32.mrf.mxu0  ;;  %v3500_v56 = vpop.f32.mrf.mxu1  ;;  %v2660_v49 = vadd.f32 %v14218_v55, %v12146_v48 }
 0xccc   :  { %9680 = vpow2.f32 %v8474_v4  ;;  %v8476_v62 = vmul.f32 -1.442695, %v3506_v36  ;;  %v3509_v34 = vadd.f32 %v3457_v28, %v2545_v30  ;;  %v3507_v30 = vadd.f32 %v3496_v33, %v2654_v3  ;;  %v14219_v4 = vld [vmem:[#allocation62_spill] sm:$0xff] }
 0xccd   :  { %v3459_v29 = vpop.f32.mrf.mxu0  ;;  %v3502_v25 = vpop.f32.mrf.mxu1  ;;  %v2658_v36 = vadd.f32 %v14219_v4, %v12149_v58  ;;  %v8478_v28 = vmul.f32 -1.442695, %v3508_v16 }
 0xcce   :  { %9682 = vpow2.f32 %v8476_v62  ;;  %v8475_v46 = vmul.f32 -1.442695, %v3509_v34  ;;  %v3510_v39 = vadd.f32 %v3459_v29, %v2547_v43  ;;  %v3512_v15 = vadd.f32 %v3502_v25, %v2660_v49 }
 0xccf   :  { %v3511_v62 = vadd.f32 %v3500_v56, %v2658_v36 }
 0xcd0   :  { %9684 = vpow2.f32 %v8475_v46  ;;  %v8477_v54 = vmul.f32 -1.442695, %v3510_v39  ;;  %v8479_v31 = vmul.f32 -1.442695, %v3512_v15 }
 0xcd2   :  { %9686 = vpow2.f32 %v8477_v54 }
 0xcd3   :  { %9688 = vtanh.f32 %v3507_v30 }
 0xcd4   :  { %9690 = vpow2.f32 %v8478_v28 }
 0xcd9   :  { %v9681_v43 = vpop.eup %9680 }
 0xcda   :  { %v3519_v34 = vadd.f32 1.0, %v9681_v43 }
 0xcdb   :  { %v9683_v29 = vpop.eup %9682 }
 0xcdc   :  { %9692 = vrcp.f32 %v3519_v34  ;;  %v3531_v46 = vadd.f32 1.0, %v9683_v29 }
 0xcdd   :  { %v9685_v39 = vpop.eup %9684  ;;  %9694 = vtanh.f32 %v3511_v62 }
 0xcde   :  { %9696 = vrcp.f32 %v3531_v46  ;;  %v3520_v54 = vadd.f32 1.0, %v9685_v39 }
 0xcdf   :  { %v9687_v1 = vpop.eup %9686  ;;  %9698 = vpow2.f32 %v8479_v31 }
 0xce0   :  { %9700 = vrcp.f32 %v3520_v54  ;;  %v3532_v33 = vadd.f32 1.0, %v9687_v1  ;;  %v9689_v60 = vpop.eup %9688 }
 0xce1   :  { %v9691_v16 = vpop.eup %9690 }
 0xce2   :  { %9702 = vrcp.f32 %v3532_v33  ;;  %v3545_v4 = vadd.f32 1.0, %v9691_v16  ;;  %v14221_v16 = vld [vmem:[#allocation69_spill] sm:$0xff] }
 0xce4   :  { %9704 = vrcp.f32 %v3545_v4 }
 0xce9   :  { %v9693_v24 = vpop.eup %9692 }
 0xcea   :  { %v9695_v56 = vpop.eup %9694  ;;  %v3553_v3 = vmul.f32 %v9693_v24, %v9689_v60  ;;  %v2553_v24 = vadd.f32 %v14221_v16, %v12131_v51  ;;  %v14225_v16 = vld [vmem:[#allocation67_spill] sm:$0xff] }
 0xceb   :  { %v9697_v25 = vpop.eup %9696 }
 0xcec   :  { %v9699_v55 = vpop.eup %9698  ;;  %v3551_v49 = vmul.f32 %v9697_v25, %v12274_v44 }
 0xced   :  { %v9701_v30 = vpop.eup %9700  ;;  %v3546_v43 = vadd.f32 1.0, %v9699_v55  ;;  %v14222_v55 = vld [vmem:[#allocation71_spill] sm:$0xff] }
 0xcee   :  { %v12396_v36 = vadd.f32 %v3553_v3, %v3551_v49  ;;  %v3554_v28 = vmul.f32 %v9701_v30, %v9695_v56  ;;  %v2555_v49 = vadd.f32 %v14222_v55, %v12124_v8 }
 0xcef   :  { %v9703_v15 = vpop.eup %9702 }
 0xcf0   :  { %v3552_v62 = vmul.f32 %v9703_v15, %v12277_v13  ;;  %9706 = vtanh.f32 %v12396_v36  ;;  %v14220_v13 = vld [vmem:[#allocation64_spill] sm:$0xff]  ;;  %v14223_v15 = vld [vmem:[#allocation74_spill] sm:$0xff] }
 0xcf1   :  { %9708 = vrcp.f32 %v3546_v43  ;;  %v9705_v29 = vpop.eup %9704  ;;  %v2551_v33 = vadd.f32 %v14220_v13, %v12124_v8  ;;  %v2557_v43 = vadd.f32 %v14223_v15, %v12131_v51  ;;  %v14224_v13 = vld [vmem:[#allocation73_spill] sm:$0xff] }
 0xcf2   :  { %v12400_v34 = vadd.f32 %v3554_v28, %v3552_v62 }
 0xcf4   :  { %9710 = vtanh.f32 %v12400_v34 }
 0xcfd   :  { %v9707_v31 = vpop.eup %9706 }
 0xcfe   :  { %v9709_v44 = vpop.eup %9708  ;;  %v3559_v39 = vmul.f32 %v9707_v31, %v9705_v29 }
 0xd01   :  { %v9711_v46 = vpop.eup %9710 }
 0xd02   :  { %v3560_v54 = vmul.f32 %v9711_v46, %v9709_v44 }
 0xd04   :  { %v3569_v1 = vpack.c.bf16 %v3560_v54, %v3559_v39 }
 0xd06   :  { %3603 = vmatmul.mubr.bf16.vlgmr.msra.gmra.mxu0 %v3569_v1  ;;  %3646 = vmatmul.mubr.bf16.vlgmr.msra.gmra.mxu1 %v3569_v1 }
 0xd07   :  { %3722 = vmatpush1.bf16.msra.mxu0 %v12281_v11  ;;  %3765 = vmatpush1.bf16.msra.mxu1 %v12284_v6 }
 0xd08   :  { %3723 = vmatprep.subr.bf16.mxu0 %v12287_v7  ;;  %3766 = vmatprep.subr.bf16.mxu1 %v12290_v50 }
 0xd09   :  { %3753 = vmatprep.mubr.bf16.mxu0 %v14102_v12  ;;  %3796 = vmatprep.mubr.bf16.mxu1 %v14102_v12 }
 0xd0b   :  { %3724 = vmatpush1.bf16.msra.mxu0 %v12295_v18  ;;  %3767 = vmatpush1.bf16.msra.mxu1 %v12298_v10 }
 0xd0c   :  { %3725 = vmatprep.subr.bf16.mxu0 %v12301_v45  ;;  %3768 = vmatprep.subr.bf16.mxu1 %v12304_v53 }
 0xd0f   :  { %3726 = vmatpush1.bf16.msra.mxu0 %v12307_v27  ;;  %3769 = vmatpush1.bf16.msra.mxu1 %v12310_v5 }
 0xd10   :  { %3727 = vmatprep.subr.bf16.mxu0 %v12313_v38  ;;  %3770 = vmatprep.subr.bf16.mxu1 %v12316_v37 }
 0xd13   :  { %3728 = vmatpush1.bf16.msra.mxu0 %v12319_v63  ;;  %3771 = vmatpush1.bf16.msra.mxu1 %v12322_v59 }
 0xd14   :  { %3729 = vmatprep.subr.bf16.mxu0 %v12325_v35  ;;  %3772 = vmatprep.subr.bf16.mxu1 %v12328_v32 }
 0xd17   :  { %3730 = vmatpush1.bf16.msra.mxu0 %v12331_v41  ;;  %3773 = vmatpush1.bf16.msra.mxu1 %v12334_v42 }
 0xd18   :  { %3731 = vmatprep.subr.bf16.mxu0 %v12337_v2  ;;  %3774 = vmatprep.subr.bf16.mxu1 %v12340_v26 }
 0xd1b   :  { %3732 = vmatpush1.bf16.msra.mxu0 %v12343_v22  ;;  %3775 = vmatpush1.bf16.msra.mxu1 %v12346_v21 }
 0xd1c   :  { %3733 = vmatprep.subr.bf16.mxu0 %v12349_v19  ;;  %3776 = vmatprep.subr.bf16.mxu1 %v12352_v61 }
 0xd1f   :  { %3734 = vmatpush1.bf16.msra.mxu0 %v12355_v52  ;;  %3777 = vmatpush1.bf16.msra.mxu1 %v12358_v40 }
 0xd20   :  { %3735 = vmatprep.subr.bf16.mxu0 %v12361_v14  ;;  %3778 = vmatprep.subr.bf16.mxu1 %v12364_v20 }
 0xd23   :  { %3736 = vmatpush1.bf16.msra.mxu0 %v12367_v47  ;;  %3779 = vmatpush1.bf16.msra.mxu1 %v12370_v17 }
 0xd24   :  { %3872 = vmatprep.subr.bf16.mxu0 %v12373_v9  ;;  %3915 = vmatprep.subr.bf16.mxu1 %v12376_v57 }
 0xdc6   :  { %v3604_v60 = vpop.f32.mrf.mxu0  ;;  %v3647_v3 = vpop.f32.mrf.mxu1 }
 0xdc7   :  { %v3656_v56 = vadd.f32 %v3604_v60, %v2551_v33  ;;  %v2666_v33 = vadd.f32 %v14224_v13, %v12146_v48 }
 0xdc8   :  { %v3606_v25 = vpop.f32.mrf.mxu0  ;;  %v3649_v29 = vpop.f32.mrf.mxu1 }
 0xdc9   :  { %v8480_v30 = vmul.f32 -1.442695, %v3656_v56  ;;  %v3657_v4 = vadd.f32 %v3606_v25, %v2553_v24  ;;  %v3659_v60 = vadd.f32 %v3649_v29, %v2666_v33  ;;  %v2664_v24 = vadd.f32 %v14225_v16, %v12149_v58  ;;  %v14226_v25 = vld [vmem:[#allocation68_spill] sm:$0xff] }
 0xdca   :  { %v3608_v28 = vpop.f32.mrf.mxu0  ;;  %v3651_v54 = vpop.f32.mrf.mxu1  ;;  %v2670_v55 = vadd.f32 %v14226_v25, %v12146_v48 }
 0xdcb   :  { %9712 = vpow2.f32 %v8480_v30  ;;  %v8482_v62 = vmul.f32 -1.442695, %v3657_v4  ;;  %v3660_v31 = vadd.f32 %v3608_v28, %v2555_v49  ;;  %v3658_v49 = vadd.f32 %v3647_v3, %v2664_v24  ;;  %v14227_v30 = vld [vmem:[#allocation70_spill] sm:$0xff] }
 0xdcc   :  { %v3610_v44 = vpop.f32.mrf.mxu0  ;;  %v3653_v56 = vpop.f32.mrf.mxu1  ;;  %v2668_v4 = vadd.f32 %v14227_v30, %v12149_v58  ;;  %v8484_v28 = vmul.f32 -1.442695, %v3659_v60 }
 0xdcd   :  { %9714 = vpow2.f32 %v8482_v62  ;;  %v8481_v46 = vmul.f32 -1.442695, %v3660_v31  ;;  %v3661_v39 = vadd.f32 %v3610_v44, %v2557_v43  ;;  %v3663_v15 = vadd.f32 %v3653_v56, %v2670_v55 }
 0xdce   :  { %v3662_v62 = vadd.f32 %v3651_v54, %v2668_v4 }
 0xdcf   :  { %9716 = vpow2.f32 %v8481_v46  ;;  %v8483_v1 = vmul.f32 -1.442695, %v3661_v39  ;;  %v8485_v29 = vmul.f32 -1.442695, %v3663_v15 }
 0xdd1   :  { %9718 = vpow2.f32 %v8483_v1 }
 0xdd2   :  { %9720 = vtanh.f32 %v3658_v49 }
 0xdd3   :  { %9722 = vpow2.f32 %v8484_v28 }
 0xdd8   :  { %v9713_v43 = vpop.eup %9712 }
 0xdd9   :  { %v3670_v31 = vadd.f32 1.0, %v9713_v43 }
 0xdda   :  { %v9715_v44 = vpop.eup %9714 }
 0xddb   :  { %9724 = vrcp.f32 %v3670_v31  ;;  %v3682_v46 = vadd.f32 1.0, %v9715_v44 }
 0xddc   :  { %v9717_v39 = vpop.eup %9716  ;;  %9726 = vtanh.f32 %v3662_v62 }
 0xddd   :  { %9728 = vrcp.f32 %v3682_v46  ;;  %v3671_v1 = vadd.f32 1.0, %v9717_v39 }
 0xdde   :  { %v9719_v13 = vpop.eup %9718  ;;  %9730 = vpow2.f32 %v8485_v29 }
 0xddf   :  { %9732 = vrcp.f32 %v3671_v1  ;;  %v3683_v3 = vadd.f32 1.0, %v9719_v13  ;;  %v9721_v33 = vpop.eup %9720 }
 0xde0   :  { %v9723_v60 = vpop.eup %9722 }
 0xde1   :  { %9734 = vrcp.f32 %v3683_v3  ;;  %v3696_v30 = vadd.f32 1.0, %v9723_v60  ;;  %v14229_v60 = vld [vmem:[#allocation75_spill] sm:$0xff] }
 0xde3   :  { %9736 = vrcp.f32 %v3696_v30 }
 0xde8   :  { %v9725_v16 = vpop.eup %9724 }
 0xde9   :  { %v9727_v54 = vpop.eup %9726  ;;  %v3704_v24 = vmul.f32 %v9725_v16, %v9721_v33  ;;  %v2563_v16 = vadd.f32 %v14229_v60, %v12131_v51 }
 0xdea   :  { %v9729_v56 = vpop.eup %9728 }
 0xdeb   :  { %v9731_v25 = vpop.eup %9730  ;;  %v3702_v55 = vmul.f32 %v9729_v56, %v12396_v36 }
 0xdec   :  { %v9733_v49 = vpop.eup %9732  ;;  %v3697_v43 = vadd.f32 1.0, %v9731_v25  ;;  %v14230_v25 = vld [vmem:[#allocation81_spill] sm:$0xff] }
 0xded   :  { %v12454_v4 = vadd.f32 %v3704_v24, %v3702_v55  ;;  %v3705_v28 = vmul.f32 %v9733_v49, %v9727_v54  ;;  %v2565_v55 = vadd.f32 %v14230_v25, %v12124_v8  ;;  %v14235_v25 = vld [vmem:[#allocation79_spill] sm:$0xff] }
 0xdee   :  { %v9735_v15 = vpop.eup %9734 }
 0xdef   :  { %v3703_v62 = vmul.f32 %v9735_v15, %v12400_v34  ;;  %9738 = vtanh.f32 %v12454_v4  ;;  %v14228_v34 = vld [vmem:[#allocation72_spill] sm:$0xff] }
 0xdf0   :  { %9740 = vrcp.f32 %v3697_v43  ;;  %v9737_v44 = vpop.eup %9736  ;;  %v2561_v3 = vadd.f32 %v14228_v34, %v12124_v8 }
 0xdf1   :  { %v12458_v31 = vadd.f32 %v3705_v28, %v3703_v62 }
 0xdf3   :  { %9742 = vtanh.f32 %v12458_v31 }
 0xdfc   :  { %v9739_v29 = vpop.eup %9738 }
 0xdfd   :  { %v9741_v36 = vpop.eup %9740  ;;  %v3710_v39 = vmul.f32 %v9739_v29, %v9737_v44 }
 0xe00   :  { %v9743_v46 = vpop.eup %9742 }
 0xe01   :  { %v3711_v1 = vmul.f32 %v9743_v46, %v9741_v36 }
 0xe03   :  { %v3720_v13 = vpack.c.bf16 %v3711_v1, %v3710_v39  ;;  %v14232_v1 = vld [vmem:[#allocation77_spill] sm:$0xff] }
 0xe05   :  { %3754 = vmatmul.mubr.bf16.vlgmr.msra.gmra.mxu0 %v3720_v13  ;;  %3797 = vmatmul.mubr.bf16.vlgmr.msra.gmra.mxu1 %v3720_v13  ;;  %v2676_v13 = vadd.f32 %v14232_v1, %v12146_v48 }
 0xe06   :  { %3873 = vmatpush1.bf16.msra.mxu0 %v12281_v11  ;;  %3916 = vmatpush1.bf16.msra.mxu1 %v12284_v6 }
 0xe07   :  { %3874 = vmatprep.subr.bf16.mxu0 %v12287_v7  ;;  %3917 = vmatprep.subr.bf16.mxu1 %v12290_v50 }
 0xe08   :  { %3904 = vmatprep.mubr.bf16.mxu0 %v14102_v12  ;;  %3947 = vmatprep.mubr.bf16.mxu1 %v14102_v12 }
 0xe0a   :  { %3875 = vmatpush1.bf16.msra.mxu0 %v12295_v18  ;;  %3918 = vmatpush1.bf16.msra.mxu1 %v12298_v10 }
 0xe0b   :  { %3876 = vmatprep.subr.bf16.mxu0 %v12301_v45  ;;  %3919 = vmatprep.subr.bf16.mxu1 %v12304_v53 }
 0xe0e   :  { %3877 = vmatpush1.bf16.msra.mxu0 %v12307_v27  ;;  %3920 = vmatpush1.bf16.msra.mxu1 %v12310_v5 }
 0xe0f   :  { %3878 = vmatprep.subr.bf16.mxu0 %v12313_v38  ;;  %3921 = vmatprep.subr.bf16.mxu1 %v12316_v37 }
 0xe12   :  { %3879 = vmatpush1.bf16.msra.mxu0 %v12319_v63  ;;  %3922 = vmatpush1.bf16.msra.mxu1 %v12322_v59 }
 0xe13   :  { %3880 = vmatprep.subr.bf16.mxu0 %v12325_v35  ;;  %3923 = vmatprep.subr.bf16.mxu1 %v12328_v32 }
 0xe16   :  { %3881 = vmatpush1.bf16.msra.mxu0 %v12331_v41  ;;  %3924 = vmatpush1.bf16.msra.mxu1 %v12334_v42 }
 0xe17   :  { %3882 = vmatprep.subr.bf16.mxu0 %v12337_v2  ;;  %3925 = vmatprep.subr.bf16.mxu1 %v12340_v26 }
 0xe1a   :  { %3883 = vmatpush1.bf16.msra.mxu0 %v12343_v22  ;;  %3926 = vmatpush1.bf16.msra.mxu1 %v12346_v21 }
 0xe1b   :  { %3884 = vmatprep.subr.bf16.mxu0 %v12349_v19  ;;  %3927 = vmatprep.subr.bf16.mxu1 %v12352_v61 }
 0xe1e   :  { %3885 = vmatpush1.bf16.msra.mxu0 %v12355_v52  ;;  %3928 = vmatpush1.bf16.msra.mxu1 %v12358_v40 }
 0xe1f   :  { %3886 = vmatprep.subr.bf16.mxu0 %v12361_v14  ;;  %3929 = vmatprep.subr.bf16.mxu1 %v12364_v20 }
 0xe22   :  { %3887 = vmatpush1.bf16.msra.mxu0 %v12367_v47  ;;  %3930 = vmatpush1.bf16.msra.mxu1 %v12370_v17 }
 0xe23   :  { %4023 = vmatprep.subr.bf16.mxu0 %v12373_v9  ;;  %4066 = vmatprep.subr.bf16.mxu1 %v12376_v57  ;;  %v14231_v9 = vld [vmem:[#allocation78_spill] sm:$0xff] }
 0xe24   :  { %v2567_v15 = vadd.f32 %v14231_v9, %v12131_v51 }
 0xec5   :  { %v3755_v33 = vpop.f32.mrf.mxu0  ;;  %v3798_v24 = vpop.f32.mrf.mxu1 }
 0xec6   :  { %v3807_v54 = vadd.f32 %v3755_v33, %v2561_v3  ;;  %v14233_v3 = vld [vmem:[#allocation83_spill] sm:$0xff] }
 0xec7   :  { %v3757_v56 = vpop.f32.mrf.mxu0  ;;  %v3800_v43 = vpop.f32.mrf.mxu1  ;;  %v2674_v33 = vadd.f32 %v14233_v3, %v12149_v58 }
 0xec8   :  { %v8486_v49 = vmul.f32 -1.442695, %v3807_v54  ;;  %v3808_v30 = vadd.f32 %v3757_v56, %v2563_v16  ;;  %v3810_v34 = vadd.f32 %v3800_v43, %v2676_v13  ;;  %v14234_v16 = vld [vmem:[#allocation82_spill] sm:$0xff] }
 0xec9   :  { %v3759_v28 = vpop.f32.mrf.mxu0  ;;  %v3802_v46 = vpop.f32.mrf.mxu1  ;;  %v2680_v54 = vadd.f32 %v14234_v16, %v12146_v48  ;;  %v3809_v56 = vadd.f32 %v3798_v24, %v2674_v33 }
 0xeca   :  { %9744 = vpow2.f32 %v8486_v49  ;;  %v8488_v57 = vmul.f32 -1.442695, %v3808_v30  ;;  %v3811_v62 = vadd.f32 %v3759_v28, %v2565_v55  ;;  %v2678_v55 = vadd.f32 %v14235_v25, %v12149_v58 }
 0xecb   :  { %v3761_v44 = vpop.f32.mrf.mxu0  ;;  %v3804_v60 = vpop.f32.mrf.mxu1  ;;  %v8490_v49 = vmul.f32 -1.442695, %v3810_v34 }
 0xecc   :  { %9746 = vpow2.f32 %v8488_v57  ;;  %v8487_v29 = vmul.f32 -1.442695, %v3811_v62  ;;  %v3812_v36 = vadd.f32 %v3761_v44, %v2567_v15  ;;  %v3814_v30 = vadd.f32 %v3804_v60, %v2680_v54 }
 0xecd   :  { %v3813_v9 = vadd.f32 %v3802_v46, %v2678_v55 }
 0xece   :  { %9748 = vpow2.f32 %v8487_v29  ;;  %v8489_v39 = vmul.f32 -1.442695, %v3812_v36  ;;  %v8491_v43 = vmul.f32 -1.442695, %v3814_v30 }
 0xed0   :  { %9750 = vpow2.f32 %v8489_v39 }
 0xed1   :  { %9752 = vtanh.f32 %v3809_v56 }
 0xed2   :  { %9754 = vpow2.f32 %v8490_v49 }
 0xed7   :  { %v9745_v28 = vpop.eup %9744 }
 0xed8   :  { %v3821_v15 = vadd.f32 1.0, %v9745_v28 }
 0xed9   :  { %v9747_v57 = vpop.eup %9746 }
 0xeda   :  { %9756 = vrcp.f32 %v3821_v15  ;;  %v3833_v62 = vadd.f32 1.0, %v9747_v57 }
 0xedb   :  { %v9749_v44 = vpop.eup %9748  ;;  %9758 = vtanh.f32 %v3813_v9 }
 0xedc   :  { %9760 = vrcp.f32 %v3833_v62  ;;  %v3822_v29 = vadd.f32 1.0, %v9749_v44 }
 0xedd   :  { %v9751_v36 = vpop.eup %9750  ;;  %9762 = vpow2.f32 %v8491_v43 }
 0xede   :  { %9764 = vrcp.f32 %v3822_v29  ;;  %v3834_v24 = vadd.f32 1.0, %v9751_v36  ;;  %v9753_v39 = vpop.eup %9752  ;;  %v14243_v36 = vld [vmem:[#allocation87_spill] sm:$0xff] }
 0xedf   :  { %v9755_v1 = vpop.eup %9754 }
 0xee0   :  { %9766 = vrcp.f32 %v3834_v24  ;;  %v3847_v54 = vadd.f32 1.0, %v9755_v1  ;;  %v2688_v24 = vadd.f32 %v14243_v36, %v12149_v58 }
 0xee2   :  { %9768 = vrcp.f32 %v3847_v54 }
 0xee7   :  { %v9757_v13 = vpop.eup %9756 }
 0xee8   :  { %v9759_v46 = vpop.eup %9758  ;;  %v3855_v34 = vmul.f32 %v9757_v13, %v9753_v39 }
 0xee9   :  { %v9761_v3 = vpop.eup %9760 }
 0xeea   :  { %v9763_v33 = vpop.eup %9762  ;;  %v3853_v60 = vmul.f32 %v9761_v3, %v12454_v4 }
 0xeeb   :  { %v9765_v16 = vpop.eup %9764  ;;  %v3848_v49 = vadd.f32 1.0, %v9763_v33 }
 0xeec   :  { %v12512_v56 = vadd.f32 %v3855_v34, %v3853_v60  ;;  %v3856_v25 = vmul.f32 %v9765_v16, %v9759_v46 }
 0xeed   :  { %v9767_v55 = vpop.eup %9766 }
 0xeee   :  { %v3854_v30 = vmul.f32 %v9767_v55, %v12458_v31  ;;  %9770 = vtanh.f32 %v12512_v56 }
 0xeef   :  { %9772 = vrcp.f32 %v3848_v49  ;;  %v9769_v9 = vpop.eup %9768 }
 0xef0   :  { %v12516_v28 = vadd.f32 %v3856_v25, %v3854_v30 }
 0xef2   :  { %9774 = vtanh.f32 %v12516_v28 }
 0xefb   :  { %v9771_v15 = vpop.eup %9770 }
 0xefc   :  { %v9773_v4 = vpop.eup %9772  ;;  %v3861_v43 = vmul.f32 %v9771_v15, %v9769_v9 }
 0xeff   :  { %v9775_v57 = vpop.eup %9774 }
 0xf00   :  { %v3862_v62 = vmul.f32 %v9775_v57, %v9773_v4 }
 0xf02   :  { %v3871_v44 = vpack.c.bf16 %v3862_v62, %v3861_v43 }
 0xf04   :  { %3905 = vmatmul.mubr.bf16.vlgmr.msra.gmra.mxu0 %v3871_v44  ;;  %3948 = vmatmul.mubr.bf16.vlgmr.msra.gmra.mxu1 %v3871_v44 }
 0xf05   :  { %4024 = vmatpush1.bf16.msra.mxu0 %v12281_v11  ;;  %4067 = vmatpush1.bf16.msra.mxu1 %v12284_v6  ;;  %v14236_v11 = vld [vmem:[#allocation76_spill] sm:$0xff] }
 0xf06   :  { %4025 = vmatprep.subr.bf16.mxu0 %v12287_v7  ;;  %4068 = vmatprep.subr.bf16.mxu1 %v12290_v50  ;;  %v2571_v6 = vadd.f32 %v14236_v11, %v12124_v8  ;;  %v14237_v50 = vld [vmem:[#allocation84_spill] sm:$0xff] }
 0xf07   :  { %4055 = vmatprep.mubr.bf16.mxu0 %v14102_v12  ;;  %4098 = vmatprep.mubr.bf16.mxu1 %v14102_v12 }
 0xf09   :  { %4026 = vmatpush1.bf16.msra.mxu0 %v12295_v18  ;;  %4069 = vmatpush1.bf16.msra.mxu1 %v12298_v10  ;;  %v2573_v18 = vadd.f32 %v14237_v50, %v12131_v51 }
 0xf0a   :  { %4027 = vmatprep.subr.bf16.mxu0 %v12301_v45  ;;  %4070 = vmatprep.subr.bf16.mxu1 %v12304_v53 }
 0xf0d   :  { %4028 = vmatpush1.bf16.msra.mxu0 %v12307_v27  ;;  %4071 = vmatpush1.bf16.msra.mxu1 %v12310_v5  ;;  %v14238_v27 = vld [vmem:[#allocation86_spill] sm:$0xff] }
 0xf0e   :  { %4029 = vmatprep.subr.bf16.mxu0 %v12313_v38  ;;  %4072 = vmatprep.subr.bf16.mxu1 %v12316_v37  ;;  %v2575_v5 = vadd.f32 %v14238_v27, %v12124_v8 }
 0xf11   :  { %4030 = vmatpush1.bf16.msra.mxu0 %v12319_v63  ;;  %4073 = vmatpush1.bf16.msra.mxu1 %v12322_v59  ;;  %v14239_v59 = vld [vmem:[#allocation88_spill] sm:$0xff] }
 0xf12   :  { %4031 = vmatprep.subr.bf16.mxu0 %v12325_v35  ;;  %4074 = vmatprep.subr.bf16.mxu1 %v12328_v32  ;;  %v2577_v35 = vadd.f32 %v14239_v59, %v12131_v51  ;;  %v9104_v59 = vld [vmem:[#allocation15 + $0x70] ss:$8 sps:$4 sm:$0xff]  }
 0xf15   :  { %4032 = vmatpush1.bf16.msra.mxu0 %v12331_v41  ;;  %4075 = vmatpush1.bf16.msra.mxu1 %v12334_v42 }
 0xf16   :  { %4033 = vmatprep.subr.bf16.mxu0 %v12337_v2  ;;  %4076 = vmatprep.subr.bf16.mxu1 %v12340_v26 }
 0xf19   :  { %4034 = vmatpush1.bf16.msra.mxu0 %v12343_v22  ;;  %4077 = vmatpush1.bf16.msra.mxu1 %v12346_v21 }
 0xf1a   :  { %4035 = vmatprep.subr.bf16.mxu0 %v12349_v19  ;;  %4078 = vmatprep.subr.bf16.mxu1 %v12352_v61  ;;  %v14240_v61 = vld [vmem:[#allocation85_spill] sm:$0xff] }
 0xf1d   :  { %4036 = vmatpush1.bf16.msra.mxu0 %v12355_v52  ;;  %4079 = vmatpush1.bf16.msra.mxu1 %v12358_v40  ;;  %v2686_v52 = vadd.f32 %v14240_v61, %v12146_v48  ;;  %v9119_v61 = vld [vmem:[#allocation15 + $0x20] ss:$8 sps:$4 sm:$0xff]  }
 0xf1e   :  { %4037 = vmatprep.subr.bf16.mxu0 %v12361_v14  ;;  %4080 = vmatprep.subr.bf16.mxu1 %v12364_v20  ;;  %v14241_v14 = vld [vmem:[#allocation80_spill] sm:$0xff] }
 0xf1f   :  { %v2684_v20 = vadd.f32 %v14241_v14, %v12149_v58  ;;  %v9127_v14 = vld [vmem:[#allocation15 + $0x4] ss:$8 sps:$4 sm:$0xff]  }
 0xf21   :  { %4038 = vmatpush1.bf16.msra.mxu0 %v12367_v47  ;;  %4081 = vmatpush1.bf16.msra.mxu1 %v12370_v17  ;;  %v14242_v17 = vld [vmem:[#allocation89_spill] sm:$0xff] }
 0xf22   :  { %v2690_v31 = vadd.f32 %v14242_v17, %v12146_v48 }
 0xfc4   :  { %v3906_v7 = vpop.f32.mrf.mxu0  ;;  %v3949_v45 = vpop.f32.mrf.mxu1 }
 0xfc5   :  { %v3958_v10 = vadd.f32 %v3906_v7, %v2571_v6  ;;  %v3960_v29 = vadd.f32 %v3949_v45, %v2684_v20  ;;  %v9125_v20 = vld [vmem:[#allocation15] ss:$8 sps:$4 sm:$0xff]  }
 0xfc6   :  { %v3908_v53 = vpop.f32.mrf.mxu0  ;;  %v3951_v41 = vpop.f32.mrf.mxu1 }
 0xfc7   :  { %v8492_v38 = vmul.f32 -1.442695, %v3958_v10  ;;  %v3959_v37 = vadd.f32 %v3908_v53, %v2573_v18  ;;  %v3961_v40 = vadd.f32 %v3951_v41, %v2686_v52  ;;  %v9112_v41 = vld [vmem:[#allocation15 + $0x54] ss:$8 sps:$4 sm:$0xff]  }
 0xfc8   :  { %v3910_v63 = vpop.f32.mrf.mxu0  ;;  %v3953_v21 = vpop.f32.mrf.mxu1  ;;  %v9124_v52 = vld [vmem:[#allocation15 + $0x14] ss:$8 sps:$4 sm:$0xff]  }
 0xfc9   :  { %9776 = vpow2.f32 %v8492_v38  ;;  %v8494_v32 = vmul.f32 -1.442695, %v3959_v37  ;;  %v3962_v42 = vadd.f32 %v3910_v63, %v2575_v5  ;;  %v8496_v39 = vmul.f32 -1.442695, %v3961_v40  ;;  %v9122_v40 = vld [vmem:[#allocation15 + $0x10] ss:$8 sps:$4 sm:$0xff]  }
 0xfca   :  { %v3912_v2 = vpop.f32.mrf.mxu0  ;;  %v3955_v47 = vpop.f32.mrf.mxu1  ;;  %v3964_v46 = vadd.f32 %v3953_v21, %v2688_v24  ;;  %v9116_v21 = vld [vmem:[#allocation15 + $0x30] ss:$8 sps:$4 sm:$0xff]  }
 0xfcb   :  { %9778 = vpow2.f32 %v8494_v32  ;;  %v8493_v26 = vmul.f32 -1.442695, %v3962_v42  ;;  %v3963_v22 = vadd.f32 %v3912_v2, %v2577_v35  ;;  %v3965_v1 = vadd.f32 %v3955_v47, %v2690_v31  ;;  %v9109_v35 = vld [vmem:[#allocation15 + $0x64] ss:$8 sps:$4 sm:$0xff]   ;;  %v9107_v32 = vld [vmem:[#allocation15 + $0x60] ss:$8 sps:$4 sm:$0xff]  }
 0xfcc   :  { %v9110_v42 = vld [vmem:[#allocation15 + $0x50] ss:$8 sps:$4 sm:$0xff]   ;;  %v9115_v2 = vld [vmem:[#allocation15 + $0x44] ss:$8 sps:$4 sm:$0xff]  }
 0xfcd   :  { %9780 = vpow2.f32 %v8493_v26  ;;  %v8495_v19 = vmul.f32 -1.442695, %v3963_v22  ;;  %v8497_v33 = vmul.f32 -1.442695, %v3965_v1  ;;  %v9113_v26 = vld [vmem:[#allocation15 + $0x40] ss:$8 sps:$4 sm:$0xff]  }
 0xfce   :  { %v9118_v22 = vld [vmem:[#allocation15 + $0x34] ss:$8 sps:$4 sm:$0xff]  }
 0xfcf   :  { %9782 = vpow2.f32 %v8495_v19  ;;  %v9121_v19 = vld [vmem:[#allocation15 + $0x24] ss:$8 sps:$4 sm:$0xff]   ;;  %v14244_v47 = vld [vmem:[#allocation90_spill] sm:$0xff] }
 0xfd0   :  { %9784 = vtanh.f32 %v3960_v29  ;;  %v2581_v17 = vadd.f32 %v14244_v47, %v12124_v8  ;;  %v14245_v29 = vld [vmem:[#allocation92_spill] sm:$0xff] }
 0xfd1   :  { %9786 = vpow2.f32 %v8496_v39  ;;  %v2583_v36 = vadd.f32 %v14245_v29, %v12131_v51 }
 0xfd6   :  { %v9777_v13 = vpop.eup %9776 }
 0xfd7   :  { %v3972_v34 = vadd.f32 1.0, %v9777_v13  ;;  %v14246_v13 = vld [vmem:[#allocation94_spill] sm:$0xff] }
 0xfd8   :  { %v9779_v3 = vpop.eup %9778 }
 0xfd9   :  { %9788 = vrcp.f32 %v3972_v34  ;;  %v3984_v60 = vadd.f32 1.0, %v9779_v3 }
 0xfda   :  { %v9781_v16 = vpop.eup %9780  ;;  %9790 = vtanh.f32 %v3964_v46  ;;  %v2585_v46 = vadd.f32 %v14246_v13, %v12124_v8 }
 0xfdb   :  { %9792 = vrcp.f32 %v3984_v60  ;;  %v3973_v54 = vadd.f32 1.0, %v9781_v16  ;;  %v14247_v60 = vld [vmem:[#allocation96_spill] sm:$0xff] }
 0xfdc   :  { %v9783_v25 = vpop.eup %9782  ;;  %9794 = vpow2.f32 %v8497_v33  ;;  %v2587_v16 = vadd.f32 %v14247_v60, %v12131_v51  ;;  %v9139_v60 = vld [vmem:[#allocation18 + $0xcc] ss:$16 sps:$4 sm:$0xff]  }
 0xfdd   :  { %9796 = vrcp.f32 %v3973_v54  ;;  %v3985_v55 = vadd.f32 1.0, %v9783_v25  ;;  %v9785_v49 = vpop.eup %9784 }
 0xfde   :  { %v9787_v30 = vpop.eup %9786 }
 0xfdf   :  { %9798 = vrcp.f32 %v3985_v55  ;;  %v3998_v11 = vadd.f32 1.0, %v9787_v30 }
 0xfe1   :  { %9800 = vrcp.f32 %v3998_v11  ;;  %v14250_v11 = vld [vmem:[#allocation97_spill] sm:$0xff] }
 0xfe6   :  { %v9789_v9 = vpop.eup %9788 }
 0xfe7   :  { %v9791_v15 = vpop.eup %9790  ;;  %v4006_v4 = vmul.f32 %v9789_v9, %v9785_v49 }
 0xfe8   :  { %v9793_v57 = vpop.eup %9792 }
 0xfe9   :  { %v9795_v43 = vpop.eup %9794  ;;  %v4004_v62 = vmul.f32 %v9793_v57, %v12512_v56  ;;  %v14248_v57 = vld [vmem:[#allocation93_spill] sm:$0xff] }
 0xfea   :  { %v9797_v44 = vpop.eup %9796  ;;  %v3999_v18 = vadd.f32 1.0, %v9795_v43  ;;  %v2696_v8 = vadd.f32 %v14248_v57, %v12146_v48  ;;  %v9151_v57 = vld [vmem:[#allocation18 + $0x8c] ss:$16 sps:$4 sm:$0xff]  }
 0xfeb   :  { %v12568_v6 = vadd.f32 %v4006_v4, %v4004_v62  ;;  %v4007_v7 = vmul.f32 %v9797_v44, %v9791_v15  ;;  %v14249_v62 = vld [vmem:[#allocation91_spill] sm:$0xff] }
 0xfec   :  { %v9799_v50 = vpop.eup %9798  ;;  %v2694_v44 = vadd.f32 %v14249_v62, %v12149_v58  ;;  %v9152_v62 = vld [vmem:[#allocation18 + $0x60] ss:$16 sps:$4 sm:$0xff]  }
 0xfed   :  { %v4005_v10 = vmul.f32 %v9799_v50, %v12516_v28  ;;  %9802 = vtanh.f32 %v12568_v6  ;;  %v9106_v28 = vld [vmem:[#allocation15 + $0x74] ss:$8 sps:$4 sm:$0xff]  }
 0xfee   :  { %9804 = vrcp.f32 %v3999_v18  ;;  %v9801_v53 = vpop.eup %9800  ;;  %4274 = vmatprep.subr.bf16.mxu0 %v9106_v28  ;;  %v14251_v18 = vld [vmem:[#allocation95_spill] sm:$0xff] }
 0xfef   :  { %v12572_v45 = vadd.f32 %v4007_v7, %v4005_v10  ;;  %v2700_v7 = vadd.f32 %v14250_v11, %v12146_v48  ;;  %v2698_v10 = vadd.f32 %v14251_v18, %v12149_v58  ;;  %v9163_v11 = vld [vmem:[#allocation18 + $0x4c] ss:$16 sps:$4 sm:$0xff]   ;;  %v9166_v18 = vld [vmem:[#allocation18 + $0x24] ss:$16 sps:$4 sm:$0xff]  }
 0xff1   :  { %9806 = vtanh.f32 %v12572_v45 }
 0xffa   :  { %v9803_v27 = vpop.eup %9802 }
 0xffb   :  { %v9805_v56 = vpop.eup %9804  ;;  %v4012_v38 = vmul.f32 %v9803_v27, %v9801_v53 }
 0xffe   :  { %v9807_v5 = vpop.eup %9806 }
 0xfff   :  { %v4013_v37 = vmul.f32 %v9807_v5, %v9805_v56 }
0x1001   :  { %v4022_v63 = vpack.c.bf16 %v4013_v37, %v4012_v38 }
0x1003   :  { %4056 = vmatmul.mubr.bf16.vlgmr.msra.gmra.mxu0 %v4022_v63  ;;  %4099 = vmatmul.mubr.bf16.vlgmr.msra.gmra.mxu1 %v4022_v63 }
0x1004   :  { %4306 = vmatprep.mubr.bf16.mxu0 %v14102_v12  ;;  %4582 = vmatprep.mubr.bf16.mxu1 %v14102_v12 }
0x1005   :  { %4275 = vmatpush1.bf16.msra.mxu0 %v9104_v59 }
0x1006   :  { %4276 = vmatprep.subr.bf16.mxu0 %v9109_v35 }
0x1009   :  { %4277 = vmatpush1.bf16.msra.mxu0 %v9107_v32 }
0x100a   :  { %4278 = vmatprep.subr.bf16.mxu0 %v9112_v41 }
0x100d   :  { %4279 = vmatpush1.bf16.msra.mxu0 %v9110_v42 }
0x100e   :  { %4280 = vmatprep.subr.bf16.mxu0 %v9115_v2 }
0x1011   :  { %4281 = vmatpush1.bf16.msra.mxu0 %v9113_v26 }
0x1012   :  { %4282 = vmatprep.subr.bf16.mxu0 %v9118_v22 }
0x1015   :  { %4283 = vmatpush1.bf16.msra.mxu0 %v9116_v21 }
0x1016   :  { %4284 = vmatprep.subr.bf16.mxu0 %v9121_v19 }
0x1019   :  { %4285 = vmatpush1.bf16.msra.mxu0 %v9119_v61 }
0x101a   :  { %4286 = vmatprep.subr.bf16.mxu0 %v9124_v52 }
0x101d   :  { %4287 = vmatpush1.bf16.msra.mxu0 %v9122_v40 }
0x101e   :  { %4288 = vmatprep.subr.bf16.mxu0 %v9127_v14 }
0x1021   :  { %4289 = vmatpush1.bf16.msra.mxu0 %v9125_v20 }
0x10c3   :  { %v4057_v31 = vpop.f32.mrf.mxu0  ;;  %v4100_v39 = vpop.f32.mrf.mxu1 }
0x10c4   :  { %v4109_v24 = vadd.f32 %v4057_v31, %v2581_v17  ;;  %v4111_v50 = vadd.f32 %v4100_v39, %v2694_v44  ;;  %v9155_v44 = vld [vmem:[#allocation18 + $0x68] ss:$16 sps:$4 sm:$0xff]  }
0x10c5   :  { %v4059_v1 = vpop.f32.mrf.mxu0  ;;  %v4102_v25 = vpop.f32.mrf.mxu1 }
0x10c6   :  { %v8498_v34 = vmul.f32 -1.442695, %v4109_v24  ;;  %v4110_v3 = vadd.f32 %v4059_v1, %v2583_v36  ;;  %v4112_v43 = vadd.f32 %v4102_v25, %v2696_v8  ;;  %v9142_v25 = vld [vmem:[#allocation18 + $0xa4] ss:$16 sps:$4 sm:$0xff]  }
0x10c7   :  { %v4061_v33 = vpop.f32.mrf.mxu0  ;;  %v4104_v15 = vpop.f32.mrf.mxu1  ;;  %v9154_v8 = vld [vmem:[#allocation18 + $0x64] ss:$16 sps:$4 sm:$0xff]  }
0x10c8   :  { %9808 = vpow2.f32 %v8498_v34  ;;  %v8500_v54 = vmul.f32 -1.442695, %v4110_v3  ;;  %v4113_v55 = vadd.f32 %v4061_v33, %v2585_v46  ;;  %v8502_v53 = vmul.f32 -1.442695, %v4112_v43  ;;  %v9133_v34 = vld [vmem:[#allocation18 + $0xec] ss:$16 sps:$4 sm:$0xff]  }
0x10c9   :  { %v4063_v49 = vpop.f32.mrf.mxu0  ;;  %v4106_v51 = vpop.f32.mrf.mxu1  ;;  %v4115_v5 = vadd.f32 %v4104_v15, %v2698_v10  ;;  %v9128_v3 = vld [vmem:[#allocation18 + $0xe0] ss:$16 sps:$4 sm:$0xff]   ;;  %v9131_v33 = vld [vmem:[#allocation18 + $0xe8] ss:$16 sps:$4 sm:$0xff]   ;;  %4593 = vmatprep.subr.bf16.mxu0 %v9133_v34  ;;  %v9148_v15 = vld [vmem:[#allocation18 + $0x84] ss:$16 sps:$4 sm:$0xff]  }
0x10ca   :  { %9810 = vpow2.f32 %v8500_v54  ;;  %v8499_v30 = vmul.f32 -1.442695, %v4113_v55  ;;  %v4114_v9 = vadd.f32 %v4063_v49, %v2587_v16  ;;  %v4116_v27 = vadd.f32 %v4106_v51, %v2700_v7  ;;  %v9134_v16 = vld [vmem:[#allocation18 + $0xc0] ss:$16 sps:$4 sm:$0xff]   ;;  %v9137_v54 = vld [vmem:[#allocation18 + $0xc8] ss:$16 sps:$4 sm:$0xff]  }
0x10cb   :  { %v9145_v55 = vld [vmem:[#allocation18 + $0xac] ss:$16 sps:$4 sm:$0xff]   ;;  %v9140_v49 = vld [vmem:[#allocation18 + $0xa0] ss:$16 sps:$4 sm:$0xff]   ;;  %v9160_v51 = vld [vmem:[#allocation18 + $0x44] ss:$16 sps:$4 sm:$0xff]  }
0x10cc   :  { %9812 = vpow2.f32 %v8499_v30  ;;  %v8501_v4 = vmul.f32 -1.442695, %v4114_v9  ;;  %v8503_v63 = vmul.f32 -1.442695, %v4116_v27  ;;  %v9143_v30 = vld [vmem:[#allocation18 + $0xa8] ss:$16 sps:$4 sm:$0xff]  }
0x10cd   :  { %v9146_v9 = vld [vmem:[#allocation18 + $0x80] ss:$16 sps:$4 sm:$0xff]   ;;  %v9157_v43 = vld [vmem:[#allocation18 + $0x6c] ss:$16 sps:$4 sm:$0xff]   ;;  %v9167_v27 = vld [vmem:[#allocation18 + $0x28] ss:$16 sps:$4 sm:$0xff]  }
0x10ce   :  { %9814 = vpow2.f32 %v8501_v4  ;;  %v9149_v4 = vld [vmem:[#allocation18 + $0x88] ss:$16 sps:$4 sm:$0xff]   ;;  %v9158_v7 = vld [vmem:[#allocation18 + $0x40] ss:$16 sps:$4 sm:$0xff]   ;;  %v9169_v10 = vld [vmem:[#allocation18 + $0x2c] ss:$16 sps:$4 sm:$0xff]  }
0x10cf   :  { %9816 = vtanh.f32 %v4111_v50  ;;  %v9161_v50 = vld [vmem:[#allocation18 + $0x48] ss:$16 sps:$4 sm:$0xff]   ;;  %v12608_v34 = vld [vmem:[#allocation19 + $0xc4] ss:$16 sps:$4 sm:$0xff]  }
0x10d0   :  { %9818 = vpow2.f32 %v8502_v53  ;;  %v9164_v53 = vld [vmem:[#allocation18 + $0x20] ss:$16 sps:$4 sm:$0xff]  }
0x10d5   :  { %v9809_v56 = vpop.eup %9808 }
0x10d6   :  { %v4123_v38 = vadd.f32 1.0, %v9809_v56  ;;  %v9172_v56 = vld [vmem:[#allocation18 + $0x4] ss:$16 sps:$4 sm:$0xff]  }
0x10d7   :  { %v9811_v37 = vpop.eup %9810 }
0x10d8   :  { %9820 = vrcp.f32 %v4123_v38  ;;  %v4135_v28 = vadd.f32 1.0, %v9811_v37  ;;  %v9170_v38 = vld [vmem:[#allocation18] ss:$16 sps:$4 sm:$0xff]   ;;  %v9173_v37 = vld [vmem:[#allocation18 + $0x8] ss:$16 sps:$4 sm:$0xff]  }
0x10d9   :  { %v9813_v59 = vpop.eup %9812  ;;  %9822 = vtanh.f32 %v4115_v5  ;;  %v9175_v5 = vld [vmem:[#allocation18 + $0xc] ss:$16 sps:$4 sm:$0xff]  }
0x10da   :  { %9824 = vrcp.f32 %v4135_v28  ;;  %v4124_v35 = vadd.f32 1.0, %v9813_v59  ;;  %v12598_v28 = vld [vmem:[#allocation19 + $0xec] ss:$16 sps:$4 sm:$0xff]  }
0x10db   :  { %v9815_v48 = vpop.eup %9814  ;;  %9826 = vpow2.f32 %v8503_v63  ;;  %v12596_v63 = vld [vmem:[#allocation19 + $0xe4] ss:$16 sps:$4 sm:$0xff]   ;;  %v4182_v59 = vld [vmem:[#allocation16] sm:$0x3] }
0x10dc   :  { %9828 = vrcp.f32 %v4124_v35  ;;  %v4136_v32 = vadd.f32 1.0, %v9815_v48  ;;  %v9817_v58 = vpop.eup %9816  ;;  %v14252_v35 = vld [vmem:[#allocation41_spill] sm:$0xff] }
0x10dd   :  { %v9819_v41 = vpop.eup %9818  ;;  %v4187_v48 = vrot.slane %v4182_v59, %v14252_v35 }
0x10de   :  { %9830 = vrcp.f32 %v4136_v32  ;;  %v4149_v21 = vadd.f32 1.0, %v9819_v41  ;;  %v14253_v32 = vld [vmem:[#allocation43_spill] sm:$0xff] }
0x10e0   :  { %9832 = vrcp.f32 %v4149_v21 }
0x10e5   :  { %v9821_v42 = vpop.eup %9820 }
0x10e6   :  { %v9823_v2 = vpop.eup %9822  ;;  %v4157_v26 = vmul.f32 %v9821_v42, %v9817_v58  ;;  %v4191_v58 = vrot.slane %v4182_v59, %v14253_v32 }
0x10e7   :  { %v9825_v22 = vpop.eup %9824 }
0x10e8   :  { %v9827_v19 = vpop.eup %9826  ;;  %v4155_v61 = vmul.f32 %v9825_v22, %v12568_v6  ;;  %v9130_v6 = vld [vmem:[#allocation18 + $0xe4] ss:$16 sps:$4 sm:$0xff]  }
0x10e9   :  { %v9829_v52 = vpop.eup %9828  ;;  %v4150_v47 = vadd.f32 1.0, %v9827_v19  ;;  %4550 = vmatprep.subr.bf16.mxu1 %v9130_v6 }
0x10ea   :  { %v4159_v40 = vadd.f32 %v4157_v26, %v4155_v61  ;;  %v4158_v14 = vmul.f32 %v9829_v52, %v9823_v2  ;;  %4551 = vmatpush1.bf16.msra.mxu1 %v9128_v3  ;;  %v12610_v3 = vld [vmem:[#allocation19 + $0xcc] ss:$16 sps:$4 sm:$0xff]  }
0x10eb   :  { %v9831_v20 = vpop.eup %9830 }
0x10ec   :  { %9834 = vtanh.f32 %v4159_v40  ;;  %v4156_v17 = vmul.f32 %v9831_v20, %v12572_v45  ;;  %v9136_v45 = vld [vmem:[#allocation18 + $0xc4] ss:$16 sps:$4 sm:$0xff]  }
0x10ed   :  { %9836 = vrcp.f32 %v4150_v47  ;;  %v9833_v29 = vpop.eup %9832  ;;  %4552 = vmatprep.subr.bf16.mxu1 %v9136_v45  ;;  %v4317_v47 = vld [vmem:[#allocation7] sm:$0xff]  ;;  %v12616_v45 = vld [vmem:[#allocation19 + $0xc8] ss:$16 sps:$4 sm:$0xff]  }
0x10ee   :  { %v4160_v31 = vadd.f32 %v4158_v14, %v4156_v17  ;;  %4553 = vmatpush1.bf16.msra.mxu1 %v9134_v16  ;;  %v12622_v16 = vld [vmem:[#allocation19 + $0xac] ss:$16 sps:$4 sm:$0xff]  }
0x10ef   :  { %4554 = vmatprep.subr.bf16.mxu1 %v9142_v25  ;;  %v12630_v25 = vld [vmem:[#allocation19 + $0xa8] ss:$16 sps:$4 sm:$0xff]  }
0x10f0   :  { %9838 = vtanh.f32 %v4160_v31 }
0x10f2   :  { %4555 = vmatpush1.bf16.msra.mxu1 %v9140_v49  ;;  %v12636_v49 = vld [vmem:[#allocation19 + $0x8c] ss:$16 sps:$4 sm:$0xff]  }
0x10f3   :  { %4556 = vmatprep.subr.bf16.mxu1 %v9148_v15  ;;  %v12646_v15 = vld [vmem:[#allocation19 + $0x64] ss:$16 sps:$4 sm:$0xff]  }
0x10f6   :  { %4557 = vmatpush1.bf16.msra.mxu1 %v9146_v9  ;;  %v12642_v9 = vld [vmem:[#allocation19 + $0x88] ss:$16 sps:$4 sm:$0xff]  }
0x10f7   :  { %4558 = vmatprep.subr.bf16.mxu1 %v9154_v8  ;;  %v12654_v8 = vld [vmem:[#allocation19 + $0x68] ss:$16 sps:$4 sm:$0xff]  }
0x10f9   :  { %v9835_v36 = vpop.eup %9834 }
0x10fa   :  { %v4163_v24 = vmul.f32 %v9835_v36, %v9833_v29  ;;  %v9837_v39 = vpop.eup %9836  ;;  %4559 = vmatpush1.bf16.msra.mxu1 %v9152_v62  ;;  %v4318_v29 = vld [vmem:[#allocation7 + $0x8] sm:$0xff] }
0x10fb   :  { %4560 = vmatprep.subr.bf16.mxu1 %v9160_v51  ;;  %v12660_v62 = vld [vmem:[#allocation19 + $0x4c] ss:$16 sps:$4 sm:$0xff]   ;;  %v12666_v51 = vld [vmem:[#allocation19 + $0x48] ss:$16 sps:$4 sm:$0xff]  }
0x10fd   :  { %v9839_v1 = vpop.eup %9838 }
0x10fe   :  { %v4164_v13 = vmul.f32 %v9839_v1, %v9837_v39  ;;  %4561 = vmatpush1.bf16.msra.mxu1 %v9158_v7  ;;  %v12672_v7 = vld [vmem:[#allocation19 + $0x2c] ss:$16 sps:$4 sm:$0xff]  }
0x10ff   :  { %4562 = vmatprep.subr.bf16.mxu1 %v9166_v18  ;;  %v12678_v18 = vld [vmem:[#allocation19 + $0x28] ss:$16 sps:$4 sm:$0xff]  }
0x1100   :  { %v4165_v46 = vpack.c.bf16 %v4164_v13, %v4163_v24  ;;  %v12604_v13 = vld [vmem:[#allocation19 + $0xe0] ss:$16 sps:$4 sm:$0xff]  }
0x1102   :  { %4307 = vmatmul.mubr.bf16.vlgmr.msra.gmra.mxu0 %v4165_v46  ;;  %4563 = vmatpush1.bf16.msra.mxu1 %v9164_v53  ;;  %v12606_v46 = vld [vmem:[#allocation19 + $0xe8] ss:$16 sps:$4 sm:$0xff]   ;;  %v12684_v53 = vld [vmem:[#allocation19 + $0xc] ss:$16 sps:$4 sm:$0xff]  }
0x1103   :  { %4625 = vmatprep.mubr.bf16.mxu0 %v14102_v12  ;;  %4594 = vmatpush1.bf16.msra.mxu0 %v9131_v33  ;;  %v12614_v33 = vld [vmem:[#allocation19 + $0xc0] ss:$16 sps:$4 sm:$0xff]  }
0x1104   :  { %4595 = vmatprep.subr.bf16.mxu0 %v9139_v60  ;;  %4564 = vmatprep.subr.bf16.mxu1 %v9172_v56  ;;  %v12620_v60 = vld [vmem:[#allocation19 + $0xa4] ss:$16 sps:$4 sm:$0xff]   ;;  %v12690_v56 = vld [vmem:[#allocation19 + $0x8] ss:$16 sps:$4 sm:$0xff]  }
0x1106   :  { %4565 = vmatpush1.bf16.msra.mxu1 %v9170_v38 }
0x1107   :  { %4596 = vmatpush1.bf16.msra.mxu0 %v9137_v54  ;;  %4828 = vmatprep.subr.bf16.mxu1 %v12596_v63  ;;  %v12628_v54 = vld [vmem:[#allocation19 + $0xa0] ss:$16 sps:$4 sm:$0xff]  }
0x1108   :  { %4597 = vmatprep.subr.bf16.mxu0 %v9145_v55  ;;  %v12634_v55 = vld [vmem:[#allocation19 + $0x84] ss:$16 sps:$4 sm:$0xff]  }
0x110b   :  { %4598 = vmatpush1.bf16.msra.mxu0 %v9143_v30  ;;  %v12640_v30 = vld [vmem:[#allocation19 + $0x80] ss:$16 sps:$4 sm:$0xff]  }
0x110c   :  { %4599 = vmatprep.subr.bf16.mxu0 %v9151_v57  ;;  %v12652_v57 = vld [vmem:[#allocation19 + $0x60] ss:$16 sps:$4 sm:$0xff]  }
0x110f   :  { %4600 = vmatpush1.bf16.msra.mxu0 %v9149_v4  ;;  %v12648_v4 = vld [vmem:[#allocation19 + $0x6c] ss:$16 sps:$4 sm:$0xff]  }
0x1110   :  { %4601 = vmatprep.subr.bf16.mxu0 %v9157_v43  ;;  %v12658_v43 = vld [vmem:[#allocation19 + $0x44] ss:$16 sps:$4 sm:$0xff]  }
0x1113   :  { %4602 = vmatpush1.bf16.msra.mxu0 %v9155_v44  ;;  %v12664_v44 = vld [vmem:[#allocation19 + $0x40] ss:$16 sps:$4 sm:$0xff]  }
0x1114   :  { %4603 = vmatprep.subr.bf16.mxu0 %v9163_v11  ;;  %v12670_v11 = vld [vmem:[#allocation19 + $0x24] ss:$16 sps:$4 sm:$0xff]  }
0x1117   :  { %4604 = vmatpush1.bf16.msra.mxu0 %v9161_v50  ;;  %v12676_v50 = vld [vmem:[#allocation19 + $0x20] ss:$16 sps:$4 sm:$0xff]  }
0x1118   :  { %4605 = vmatprep.subr.bf16.mxu0 %v9169_v10  ;;  %v12682_v10 = vld [vmem:[#allocation19 + $0x4] ss:$16 sps:$4 sm:$0xff]  }
0x111b   :  { %4606 = vmatpush1.bf16.msra.mxu0 %v9167_v27  ;;  %v12688_v27 = vld [vmem:[#allocation19] ss:$16 sps:$4 sm:$0xff]  }
0x111c   :  { %4607 = vmatprep.subr.bf16.mxu0 %v9175_v5 }
0x111f   :  { %4608 = vmatpush1.bf16.msra.mxu0 %v9173_v37 }
0x1120   :  { %4871 = vmatprep.subr.bf16.mxu0 %v12598_v28 }
0x11c2   :  { %v4308_v41 = vpop.f32.mrf.mxu0 }
0x11c3   :  { %v4309_v42 = vadd.f32 %v4308_v41, %v4187_v48 }
0x11c4   :  { %v4310_v2 = vpop.f32.mrf.mxu0 }
0x11c5   :  { %4329 = vst [vmem:[#allocation25] sm:$0xff] %v4309_v42  ;;  %v4311_v26 = vadd.f32 %v4310_v2, %v4191_v58 }
0x11c6   :  { %v4312_v22 = vpop.f32.mrf.mxu0 }
0x11c7   :  { %v4319_v21 = vmul.f32 0.5, %v4311_v26  ;;  %4331 = vst [vmem:[#allocation26] sm:$0xff] %v4311_v26  ;;  %v4313_v19 = vadd.f32 %v4312_v22, %v4187_v48  ;;  %v4368_v48 = vld [vmem:[%s14021_s12] sm:$0xf] }
0x11c8   :  { %v4314_v61 = vpop.f32.mrf.mxu0  ;;  %v4373_v41 = vrot.slane %v4368_v48, %v14252_v35  ;;  %v4377_v2 = vrot.slane %v4368_v48, %v14253_v32 }
0x11c9   :  { %v4321_v52 = vmul.f32 1.442695, %v4319_v21  ;;  %4330 = vst [vmem:[#allocation25 + $0x8] sm:$0xff] %v4313_v19  ;;  %v4315_v40 = vadd.f32 %v4314_v61, %v4191_v58 }
0x11cb   :  { %9840 = vpow2.f32 %v4321_v52  ;;  %v4320_v14 = vmul.f32 0.5, %v4315_v40  ;;  %4332 = vst [vmem:[#allocation26 + $0x8] sm:$0xff] %v4315_v40 }
0x11cd   :  { %v4323_v20 = vmul.f32 1.442695, %v4320_v14 }
0x11cf   :  { %9842 = vpow2.f32 %v4323_v20 }
0x11d8   :  { %v9841_v17 = vpop.eup %9840 }
0x11d9   :  { %v4325_v31 = vmul.f32 %v9841_v17, %v4317_v47 }
0x11db   :  { %v4327_v36 = vadd.f32 %v4325_v31, %v4309_v42 }
0x11dc   :  { %v9843_v24 = vpop.eup %9842 }
0x11dd   :  { %v4326_v39 = vmul.f32 %v9843_v24, %v4318_v29  ;;  %4333 = vst [vmem:[#allocation28] sm:$0xff] %v4327_v36 }
0x11df   :  { %v4328_v1 = vadd.f32 %v4326_v39, %v4313_v19 }
0x11e1   :  { %v4335_v6 = vpack.c.bf16 %v4328_v1, %v4327_v36  ;;  %4334 = vst [vmem:[#allocation28 + $0x8] sm:$0xff] %v4328_v1 }
0x11e3   :  { %4583 = vmatmul.mubr.bf16.vlgmr.msra.gmra.mxu1 %v4335_v6  ;;  %4626 = vmatmul.mubr.bf16.vlgmr.msra.gmra.mxu0 %v4335_v6 }
0x11e4   :  { %4829 = vmatpush1.bf16.msra.mxu1 %v12604_v13  ;;  %4872 = vmatpush1.bf16.msra.mxu0 %v12606_v46 }
0x11e5   :  { %4830 = vmatprep.subr.bf16.mxu1 %v12608_v34  ;;  %4873 = vmatprep.subr.bf16.mxu0 %v12610_v3 }
0x11e6   :  { %4860 = vmatprep.mubr.bf16.mxu1 %v14102_v12  ;;  %4903 = vmatprep.mubr.bf16.mxu0 %v14102_v12 }
0x11e8   :  { %4831 = vmatpush1.bf16.msra.mxu1 %v12614_v33  ;;  %4874 = vmatpush1.bf16.msra.mxu0 %v12616_v45 }
0x11e9   :  { %4832 = vmatprep.subr.bf16.mxu1 %v12620_v60  ;;  %4875 = vmatprep.subr.bf16.mxu0 %v12622_v16 }
0x11ec   :  { %4833 = vmatpush1.bf16.msra.mxu1 %v12628_v54  ;;  %4876 = vmatpush1.bf16.msra.mxu0 %v12630_v25 }
0x11ed   :  { %4834 = vmatprep.subr.bf16.mxu1 %v12634_v55  ;;  %4877 = vmatprep.subr.bf16.mxu0 %v12636_v49 }
0x11f0   :  { %4835 = vmatpush1.bf16.msra.mxu1 %v12640_v30  ;;  %4878 = vmatpush1.bf16.msra.mxu0 %v12642_v9 }
0x11f1   :  { %4836 = vmatprep.subr.bf16.mxu1 %v12646_v15  ;;  %4879 = vmatprep.subr.bf16.mxu0 %v12648_v4 }
0x11f4   :  { %4837 = vmatpush1.bf16.msra.mxu1 %v12652_v57  ;;  %4880 = vmatpush1.bf16.msra.mxu0 %v12654_v8 }
0x11f5   :  { %4838 = vmatprep.subr.bf16.mxu1 %v12658_v43  ;;  %4881 = vmatprep.subr.bf16.mxu0 %v12660_v62 }
0x11f8   :  { %4839 = vmatpush1.bf16.msra.mxu1 %v12664_v44  ;;  %4882 = vmatpush1.bf16.msra.mxu0 %v12666_v51 }
0x11f9   :  { %4840 = vmatprep.subr.bf16.mxu1 %v12670_v11  ;;  %4883 = vmatprep.subr.bf16.mxu0 %v12672_v7 }
0x11fc   :  { %4841 = vmatpush1.bf16.msra.mxu1 %v12676_v50  ;;  %4884 = vmatpush1.bf16.msra.mxu0 %v12678_v18 }
0x11fd   :  { %4842 = vmatprep.subr.bf16.mxu1 %v12682_v10  ;;  %4885 = vmatprep.subr.bf16.mxu0 %v12684_v53 }
0x1200   :  { %4843 = vmatpush1.bf16.msra.mxu1 %v12688_v27  ;;  %4886 = vmatpush1.bf16.msra.mxu0 %v12690_v56 }
0x1201   :  { %4973 = vmatprep.subr.bf16.mxu1 %v12596_v63  ;;  %5016 = vmatprep.subr.bf16.mxu0 %v12598_v28 }
0x1203   :  { %4861 = vmatmul.mubr.bf16.vlgmr.msra.gmra.mxu1 %v14102_v12  ;;  %4904 = vmatmul.mubr.bf16.vlgmr.msra.gmra.mxu0 %v14102_v12 }
0x1204   :  { %4974 = vmatpush1.bf16.msra.mxu1 %v12604_v13  ;;  %5017 = vmatpush1.bf16.msra.mxu0 %v12606_v46 }
0x1205   :  { %4975 = vmatprep.subr.bf16.mxu1 %v12608_v34  ;;  %5018 = vmatprep.subr.bf16.mxu0 %v12610_v3 }
0x1206   :  { %5005 = vmatprep.mubr.bf16.mxu1 %v14102_v12  ;;  %5048 = vmatprep.mubr.bf16.mxu0 %v14102_v12 }
0x1208   :  { %4976 = vmatpush1.bf16.msra.mxu1 %v12614_v33  ;;  %5019 = vmatpush1.bf16.msra.mxu0 %v12616_v45 }
0x1209   :  { %4977 = vmatprep.subr.bf16.mxu1 %v12620_v60  ;;  %5020 = vmatprep.subr.bf16.mxu0 %v12622_v16 }
0x120c   :  { %4978 = vmatpush1.bf16.msra.mxu1 %v12628_v54  ;;  %5021 = vmatpush1.bf16.msra.mxu0 %v12630_v25 }
0x120d   :  { %4979 = vmatprep.subr.bf16.mxu1 %v12634_v55  ;;  %5022 = vmatprep.subr.bf16.mxu0 %v12636_v49 }
0x1210   :  { %4980 = vmatpush1.bf16.msra.mxu1 %v12640_v30  ;;  %5023 = vmatpush1.bf16.msra.mxu0 %v12642_v9 }
0x1211   :  { %4981 = vmatprep.subr.bf16.mxu1 %v12646_v15  ;;  %5024 = vmatprep.subr.bf16.mxu0 %v12648_v4 }
0x1214   :  { %4982 = vmatpush1.bf16.msra.mxu1 %v12652_v57  ;;  %5025 = vmatpush1.bf16.msra.mxu0 %v12654_v8 }
0x1215   :  { %4983 = vmatprep.subr.bf16.mxu1 %v12658_v43  ;;  %5026 = vmatprep.subr.bf16.mxu0 %v12660_v62 }
0x1218   :  { %4984 = vmatpush1.bf16.msra.mxu1 %v12664_v44  ;;  %5027 = vmatpush1.bf16.msra.mxu0 %v12666_v51 }
0x1219   :  { %4985 = vmatprep.subr.bf16.mxu1 %v12670_v11  ;;  %5028 = vmatprep.subr.bf16.mxu0 %v12672_v7 }
0x121c   :  { %4986 = vmatpush1.bf16.msra.mxu1 %v12676_v50  ;;  %5029 = vmatpush1.bf16.msra.mxu0 %v12678_v18 }
0x121d   :  { %4987 = vmatprep.subr.bf16.mxu1 %v12682_v10  ;;  %5030 = vmatprep.subr.bf16.mxu0 %v12684_v53 }
0x1220   :  { %4988 = vmatpush1.bf16.msra.mxu1 %v12688_v27  ;;  %5031 = vmatpush1.bf16.msra.mxu0 %v12690_v56 }
0x1221   :  { %5118 = vmatprep.subr.bf16.mxu1 %v12596_v63  ;;  %5161 = vmatprep.subr.bf16.mxu0 %v12598_v28 }
0x12a3   :  { %v4584_v5 = vpop.f32.mrf.mxu1  ;;  %v4627_v38 = vpop.f32.mrf.mxu0 }
0x12a4   :  { %v12739_v22 = vadd.f32 %v4584_v5, %v4373_v41 }
0x12a5   :  { %v4586_v37 = vpop.f32.mrf.mxu1  ;;  %v4629_v59 = vpop.f32.mrf.mxu0 }
0x12a6   :  { %v12741_v61 = vadd.f32 %v4586_v37, %v4377_v2  ;;  %v4385_v37 = vrot.slane %v4368_v48, %v14197_v23 }
0x12a7   :  { %v4588_v58 = vpop.f32.mrf.mxu1  ;;  %v4631_v42 = vpop.f32.mrf.mxu0 }
0x12a8   :  { %v12744_v20 = vadd.f32 %v4588_v58, %v4373_v41 }
0x12a9   :  { %v4590_v26 = vpop.f32.mrf.mxu1  ;;  %v4633_v21 = vpop.f32.mrf.mxu0 }
0x12aa   :  { %v12747_v29 = vadd.f32 %v4590_v26, %v4377_v2  ;;  %v12753_v2 = vadd.f32 %v4629_v59, %v4385_v37 }
0x12c3   :  { %v4862_v19 = vpop.f32.mrf.mxu1  ;;  %v4905_v40 = vpop.f32.mrf.mxu0 }
0x12c4   :  { %v4914_v52 = vadd.f32 %v4862_v19, %v12739_v22  ;;  %v4381_v19 = vrot.slane %v4368_v48, %v14198_v0 }
0x12c5   :  { %v4864_v14 = vpop.f32.mrf.mxu1  ;;  %v4907_v24 = vpop.f32.mrf.mxu0 }
0x12c6   :  { %v8584_v47 = vmul.f32 -1.442695, %v4914_v52  ;;  %v4915_v17 = vadd.f32 %v4864_v14, %v12741_v61  ;;  %v12755_v52 = vadd.f32 %v4627_v38, %v4381_v19  ;;  %v12757_v14 = vadd.f32 %v4633_v21, %v4385_v37 }
0x12c7   :  { %v4866_v31 = vpop.f32.mrf.mxu1  ;;  %v4909_v58 = vpop.f32.mrf.mxu0 }
0x12c8   :  { %9844 = vpow2.f32 %v8584_v47  ;;  %v8586_v36 = vmul.f32 -1.442695, %v4915_v17  ;;  %v4918_v39 = vadd.f32 %v4866_v31, %v12744_v20  ;;  %v4917_v47 = vadd.f32 %v4907_v24, %v12753_v2 }
0x12c9   :  { %v4868_v1 = vpop.f32.mrf.mxu1  ;;  %v4911_v26 = vpop.f32.mrf.mxu0  ;;  %v4916_v17 = vadd.f32 %v4905_v40, %v12755_v52 }
0x12ca   :  { %9846 = vpow2.f32 %v8586_v36  ;;  %v8585_v6 = vmul.f32 -1.442695, %v4918_v39  ;;  %v4919_v5 = vadd.f32 %v4868_v1, %v12747_v29  ;;  %v4921_v31 = vadd.f32 %v4911_v26, %v12757_v14 }
0x12cb   :  { %v8588_v39 = vmul.f32 -1.442695, %v4917_v47 }
0x12cc   :  { %9848 = vpow2.f32 %v8585_v6  ;;  %v8587_v41 = vmul.f32 -1.442695, %v4919_v5  ;;  %v12762_v5 = vadd.f32 %v4631_v42, %v4381_v19  ;;  %v8589_v59 = vmul.f32 -1.442695, %v4921_v31 }
0x12ce   :  { %9850 = vpow2.f32 %v8587_v41  ;;  %v4920_v21 = vadd.f32 %v4909_v58, %v12762_v5 }
0x12cf   :  { %9852 = vtanh.f32 %v4916_v17 }
0x12d5   :  { %v9845_v36 = vpop.eup %9844 }
0x12d6   :  { %v4928_v1 = vadd.f32 1.0, %v9845_v36 }
0x12d7   :  { %v9847_v6 = vpop.eup %9846 }
0x12d8   :  { %9854 = vrcp.f32 %v4928_v1  ;;  %v4940_v48 = vadd.f32 1.0, %v9847_v6 }
0x12d9   :  { %v9849_v38 = vpop.eup %9848  ;;  %9856 = vpow2.f32 %v8588_v39 }
0x12da   :  { %9858 = vrcp.f32 %v4940_v48  ;;  %v4929_v24 = vadd.f32 1.0, %v9849_v38 }
0x12db   :  { %v9851_v37 = vpop.eup %9850  ;;  %9860 = vpow2.f32 %v8589_v59 }
0x12dc   :  { %9862 = vrcp.f32 %v4929_v24  ;;  %v4941_v40 = vadd.f32 1.0, %v9851_v37  ;;  %v9853_v41 = vpop.eup %9852 }
0x12dd   :  { %9864 = vtanh.f32 %v4920_v21 }
0x12de   :  { %9866 = vrcp.f32 %v4941_v40 }
0x12e5   :  { %v9855_v26 = vpop.eup %9854 }
0x12e6   :  { %v9857_v42 = vpop.eup %9856  ;;  %v4962_v31 = vmul.f32 %v9855_v26, %v9853_v41 }
0x12e7   :  { %v9859_v19 = vpop.eup %9858  ;;  %v4954_v1 = vadd.f32 1.0, %v9857_v42 }
0x12e8   :  { %v9861_v47 = vpop.eup %9860  ;;  %v4960_v17 = vmul.f32 0.0, %v9859_v19 }
0x12e9   :  { %v9863_v36 = vpop.eup %9862  ;;  %v4955_v48 = vadd.f32 1.0, %v9861_v47  ;;  %9868 = vrcp.f32 %v4954_v1 }
0x12ea   :  { %v9865_v39 = vpop.eup %9864  ;;  %v12765_v6 = vadd.f32 %v4962_v31, %v4960_v17 }
0x12eb   :  { %v9867_v58 = vpop.eup %9866  ;;  %v4963_v59 = vmul.f32 %v9865_v39, %v9863_v36 }
0x12ec   :  { %v4961_v38 = vmul.f32 0.0, %v9867_v58  ;;  %9870 = vtanh.f32 %v12765_v6 }
0x12ed   :  { %9872 = vrcp.f32 %v4955_v48 }
0x12ee   :  { %v12768_v21 = vadd.f32 %v4963_v59, %v4961_v38 }
0x12f0   :  { %9874 = vtanh.f32 %v12768_v21 }
0x12f6   :  { %v9869_v24 = vpop.eup %9868 }
0x12f9   :  { %v9871_v37 = vpop.eup %9870 }
0x12fa   :  { %v9873_v40 = vpop.eup %9872  ;;  %v4968_v26 = vmul.f32 %v9871_v37, %v9869_v24 }
0x12fd   :  { %v9875_v41 = vpop.eup %9874 }
0x12fe   :  { %v4969_v42 = vmul.f32 %v9875_v41, %v9873_v40 }
0x1300   :  { %v12771_v19 = vpack.c.bf16 %v4969_v42, %v4968_v26 }
0x1302   :  { %5006 = vmatmul.mubr.bf16.vlgmr.msra.gmra.mxu1 %v12771_v19  ;;  %5049 = vmatmul.mubr.bf16.vlgmr.msra.gmra.mxu0 %v12771_v19 }
0x1303   :  { %5119 = vmatpush1.bf16.msra.mxu1 %v12604_v13  ;;  %5162 = vmatpush1.bf16.msra.mxu0 %v12606_v46 }
0x1304   :  { %5120 = vmatprep.subr.bf16.mxu1 %v12608_v34  ;;  %5163 = vmatprep.subr.bf16.mxu0 %v12610_v3 }
0x1305   :  { %5150 = vmatprep.mubr.bf16.mxu1 %v14102_v12  ;;  %5193 = vmatprep.mubr.bf16.mxu0 %v14102_v12 }
0x1307   :  { %5121 = vmatpush1.bf16.msra.mxu1 %v12614_v33  ;;  %5164 = vmatpush1.bf16.msra.mxu0 %v12616_v45 }
0x1308   :  { %5122 = vmatprep.subr.bf16.mxu1 %v12620_v60  ;;  %5165 = vmatprep.subr.bf16.mxu0 %v12622_v16 }
0x130b   :  { %5123 = vmatpush1.bf16.msra.mxu1 %v12628_v54  ;;  %5166 = vmatpush1.bf16.msra.mxu0 %v12630_v25 }
0x130c   :  { %5124 = vmatprep.subr.bf16.mxu1 %v12634_v55  ;;  %5167 = vmatprep.subr.bf16.mxu0 %v12636_v49 }
0x130f   :  { %5125 = vmatpush1.bf16.msra.mxu1 %v12640_v30  ;;  %5168 = vmatpush1.bf16.msra.mxu0 %v12642_v9 }
0x1310   :  { %5126 = vmatprep.subr.bf16.mxu1 %v12646_v15  ;;  %5169 = vmatprep.subr.bf16.mxu0 %v12648_v4 }
0x1313   :  { %5127 = vmatpush1.bf16.msra.mxu1 %v12652_v57  ;;  %5170 = vmatpush1.bf16.msra.mxu0 %v12654_v8 }
0x1314   :  { %5128 = vmatprep.subr.bf16.mxu1 %v12658_v43  ;;  %5171 = vmatprep.subr.bf16.mxu0 %v12660_v62 }
0x1317   :  { %5129 = vmatpush1.bf16.msra.mxu1 %v12664_v44  ;;  %5172 = vmatpush1.bf16.msra.mxu0 %v12666_v51 }
0x1318   :  { %5130 = vmatprep.subr.bf16.mxu1 %v12670_v11  ;;  %5173 = vmatprep.subr.bf16.mxu0 %v12672_v7 }
0x131b   :  { %5131 = vmatpush1.bf16.msra.mxu1 %v12676_v50  ;;  %5174 = vmatpush1.bf16.msra.mxu0 %v12678_v18 }
0x131c   :  { %5132 = vmatprep.subr.bf16.mxu1 %v12682_v10  ;;  %5175 = vmatprep.subr.bf16.mxu0 %v12684_v53 }
0x131f   :  { %5133 = vmatpush1.bf16.msra.mxu1 %v12688_v27  ;;  %5176 = vmatpush1.bf16.msra.mxu0 %v12690_v56 }
0x1320   :  { %5263 = vmatprep.subr.bf16.mxu1 %v12596_v63  ;;  %5306 = vmatprep.subr.bf16.mxu0 %v12598_v28 }
0x13c2   :  { %v5007_v47 = vpop.f32.mrf.mxu1  ;;  %v5050_v31 = vpop.f32.mrf.mxu0 }
0x13c3   :  { %v5059_v17 = vadd.f32 %v5007_v47, %v12739_v22 }
0x13c4   :  { %v5009_v36 = vpop.f32.mrf.mxu1  ;;  %v5052_v38 = vpop.f32.mrf.mxu0 }
0x13c5   :  { %v8590_v1 = vmul.f32 -1.442695, %v5059_v17  ;;  %v5060_v39 = vadd.f32 %v5009_v36, %v12741_v61  ;;  %v5062_v47 = vadd.f32 %v5052_v38, %v12753_v2  ;;  %v5061_v17 = vadd.f32 %v5050_v31, %v12755_v52 }
0x13c6   :  { %v5011_v58 = vpop.f32.mrf.mxu1  ;;  %v5054_v41 = vpop.f32.mrf.mxu0 }
0x13c7   :  { %9876 = vpow2.f32 %v8590_v1  ;;  %v8592_v48 = vmul.f32 -1.442695, %v5060_v39  ;;  %v5063_v59 = vadd.f32 %v5011_v58, %v12744_v20  ;;  %v8594_v39 = vmul.f32 -1.442695, %v5062_v47 }
0x13c8   :  { %v5013_v24 = vpop.f32.mrf.mxu1  ;;  %v5056_v42 = vpop.f32.mrf.mxu0 }
0x13c9   :  { %9878 = vpow2.f32 %v8592_v48  ;;  %v8591_v37 = vmul.f32 -1.442695, %v5063_v59  ;;  %v5064_v40 = vadd.f32 %v5013_v24, %v12747_v29  ;;  %v5066_v36 = vadd.f32 %v5056_v42, %v12757_v14 }
0x13cb   :  { %9880 = vpow2.f32 %v8591_v37  ;;  %v8593_v26 = vmul.f32 -1.442695, %v5064_v40  ;;  %v8595_v48 = vmul.f32 -1.442695, %v5066_v36  ;;  %v5065_v37 = vadd.f32 %v5054_v41, %v12762_v5 }
0x13cd   :  { %9882 = vpow2.f32 %v8593_v26 }
0x13ce   :  { %9884 = vtanh.f32 %v5061_v17 }
0x13d4   :  { %v9877_v1 = vpop.eup %9876 }
0x13d5   :  { %v5073_v0 = vadd.f32 1.0, %v9877_v1 }
0x13d6   :  { %v9879_v58 = vpop.eup %9878 }
0x13d7   :  { %9886 = vrcp.f32 %v5073_v0  ;;  %v5085_v59 = vadd.f32 1.0, %v9879_v58 }
0x13d8   :  { %v9881_v24 = vpop.eup %9880  ;;  %9888 = vpow2.f32 %v8594_v39 }
0x13d9   :  { %9890 = vrcp.f32 %v5085_v59  ;;  %v5074_v40 = vadd.f32 1.0, %v9881_v24 }
0x13da   :  { %v9883_v26 = vpop.eup %9882  ;;  %9892 = vpow2.f32 %v8595_v48 }
0x13db   :  { %9894 = vrcp.f32 %v5074_v40  ;;  %v5086_v31 = vadd.f32 1.0, %v9883_v26  ;;  %v9885_v38 = vpop.eup %9884 }
0x13dc   :  { %9896 = vtanh.f32 %v5065_v37 }
0x13dd   :  { %9898 = vrcp.f32 %v5086_v31 }
0x13e4   :  { %v9887_v42 = vpop.eup %9886 }
0x13e5   :  { %v9889_v47 = vpop.eup %9888  ;;  %v5107_v36 = vmul.f32 %v9887_v42, %v9885_v38 }
0x13e6   :  { %v9891_v1 = vpop.eup %9890  ;;  %v5099_v39 = vadd.f32 1.0, %v9889_v47 }
0x13e7   :  { %v9893_v17 = vpop.eup %9892  ;;  %v5105_v0 = vmul.f32 %v9891_v1, %v12765_v6 }
0x13e8   :  { %v9895_v58 = vpop.eup %9894  ;;  %v5100_v24 = vadd.f32 1.0, %v9893_v17  ;;  %9900 = vrcp.f32 %v5099_v39 }
0x13e9   :  { %v9897_v23 = vpop.eup %9896  ;;  %v12818_v41 = vadd.f32 %v5107_v36, %v5105_v0 }
0x13ea   :  { %v9899_v59 = vpop.eup %9898  ;;  %v5108_v48 = vmul.f32 %v9897_v23, %v9895_v58 }
0x13eb   :  { %v5106_v40 = vmul.f32 %v9899_v59, %v12768_v21  ;;  %9902 = vtanh.f32 %v12818_v41 }
0x13ec   :  { %9904 = vrcp.f32 %v5100_v24 }
0x13ed   :  { %v12822_v37 = vadd.f32 %v5108_v48, %v5106_v40 }
0x13ef   :  { %9906 = vtanh.f32 %v12822_v37 }
0x13f5   :  { %v9901_v26 = vpop.eup %9900 }
0x13f8   :  { %v9903_v6 = vpop.eup %9902 }
0x13f9   :  { %v9905_v31 = vpop.eup %9904  ;;  %v5113_v42 = vmul.f32 %v9903_v6, %v9901_v26 }
0x13fc   :  { %v9907_v38 = vpop.eup %9906 }
0x13fd   :  { %v5114_v47 = vmul.f32 %v9907_v38, %v9905_v31 }
0x13ff   :  { %v12825_v1 = vpack.c.bf16 %v5114_v47, %v5113_v42 }
0x1401   :  { %5151 = vmatmul.mubr.bf16.vlgmr.msra.gmra.mxu1 %v12825_v1  ;;  %5194 = vmatmul.mubr.bf16.vlgmr.msra.gmra.mxu0 %v12825_v1 }
0x1402   :  { %5264 = vmatpush1.bf16.msra.mxu1 %v12604_v13  ;;  %5307 = vmatpush1.bf16.msra.mxu0 %v12606_v46 }
0x1403   :  { %5265 = vmatprep.subr.bf16.mxu1 %v12608_v34  ;;  %5308 = vmatprep.subr.bf16.mxu0 %v12610_v3 }
0x1404   :  { %5295 = vmatprep.mubr.bf16.mxu1 %v14102_v12  ;;  %5338 = vmatprep.mubr.bf16.mxu0 %v14102_v12 }
0x1406   :  { %5266 = vmatpush1.bf16.msra.mxu1 %v12614_v33  ;;  %5309 = vmatpush1.bf16.msra.mxu0 %v12616_v45 }
0x1407   :  { %5267 = vmatprep.subr.bf16.mxu1 %v12620_v60  ;;  %5310 = vmatprep.subr.bf16.mxu0 %v12622_v16 }
0x140a   :  { %5268 = vmatpush1.bf16.msra.mxu1 %v12628_v54  ;;  %5311 = vmatpush1.bf16.msra.mxu0 %v12630_v25 }
0x140b   :  { %5269 = vmatprep.subr.bf16.mxu1 %v12634_v55  ;;  %5312 = vmatprep.subr.bf16.mxu0 %v12636_v49 }
0x140e   :  { %5270 = vmatpush1.bf16.msra.mxu1 %v12640_v30  ;;  %5313 = vmatpush1.bf16.msra.mxu0 %v12642_v9 }
0x140f   :  { %5271 = vmatprep.subr.bf16.mxu1 %v12646_v15  ;;  %5314 = vmatprep.subr.bf16.mxu0 %v12648_v4 }
0x1412   :  { %5272 = vmatpush1.bf16.msra.mxu1 %v12652_v57  ;;  %5315 = vmatpush1.bf16.msra.mxu0 %v12654_v8 }
0x1413   :  { %5273 = vmatprep.subr.bf16.mxu1 %v12658_v43  ;;  %5316 = vmatprep.subr.bf16.mxu0 %v12660_v62 }
0x1416   :  { %5274 = vmatpush1.bf16.msra.mxu1 %v12664_v44  ;;  %5317 = vmatpush1.bf16.msra.mxu0 %v12666_v51 }
0x1417   :  { %5275 = vmatprep.subr.bf16.mxu1 %v12670_v11  ;;  %5318 = vmatprep.subr.bf16.mxu0 %v12672_v7 }
0x141a   :  { %5276 = vmatpush1.bf16.msra.mxu1 %v12676_v50  ;;  %5319 = vmatpush1.bf16.msra.mxu0 %v12678_v18 }
0x141b   :  { %5277 = vmatprep.subr.bf16.mxu1 %v12682_v10  ;;  %5320 = vmatprep.subr.bf16.mxu0 %v12684_v53 }
0x141e   :  { %5278 = vmatpush1.bf16.msra.mxu1 %v12688_v27  ;;  %5321 = vmatpush1.bf16.msra.mxu0 %v12690_v56 }
0x141f   :  { %5408 = vmatprep.subr.bf16.mxu1 %v12596_v63  ;;  %5451 = vmatprep.subr.bf16.mxu0 %v12598_v28 }
0x14c1   :  { %v5152_v23 = vpop.f32.mrf.mxu1  ;;  %v5195_v17 = vpop.f32.mrf.mxu0 }
0x14c2   :  { %v5204_v21 = vadd.f32 %v5152_v23, %v12739_v22  ;;  %v5206_v23 = vadd.f32 %v5195_v17, %v12755_v52 }
0x14c3   :  { %v5154_v36 = vpop.f32.mrf.mxu1  ;;  %v5197_v24 = vpop.f32.mrf.mxu0 }
0x14c4   :  { %v8596_v0 = vmul.f32 -1.442695, %v5204_v21  ;;  %v5205_v58 = vadd.f32 %v5154_v36, %v12741_v61  ;;  %v5207_v47 = vadd.f32 %v5197_v24, %v12753_v2 }
0x14c5   :  { %v5156_v39 = vpop.f32.mrf.mxu1  ;;  %v5199_v31 = vpop.f32.mrf.mxu0 }
0x14c6   :  { %9908 = vpow2.f32 %v8596_v0  ;;  %v8598_v59 = vmul.f32 -1.442695, %v5205_v58  ;;  %v5208_v48 = vadd.f32 %v5156_v39, %v12744_v20  ;;  %v8600_v0 = vmul.f32 -1.442695, %v5207_v47 }
0x14c7   :  { %v5158_v40 = vpop.f32.mrf.mxu1  ;;  %v5201_v42 = vpop.f32.mrf.mxu0 }
0x14c8   :  { %9910 = vpow2.f32 %v8598_v59  ;;  %v8597_v26 = vmul.f32 -1.442695, %v5208_v48  ;;  %v5209_v6 = vadd.f32 %v5158_v40, %v12747_v29  ;;  %v5211_v21 = vadd.f32 %v5201_v42, %v12757_v14 }
0x14ca   :  { %9912 = vpow2.f32 %v8597_v26  ;;  %v8599_v38 = vmul.f32 -1.442695, %v5209_v6  ;;  %v8601_v59 = vmul.f32 -1.442695, %v5211_v21  ;;  %v5210_v26 = vadd.f32 %v5199_v31, %v12762_v5 }
0x14cc   :  { %9914 = vpow2.f32 %v8599_v38 }
0x14cd   :  { %9916 = vtanh.f32 %v5206_v23 }
0x14d3   :  { %v9909_v36 = vpop.eup %9908 }
0x14d4   :  { %v5218_v58 = vadd.f32 1.0, %v9909_v36 }
0x14d5   :  { %v9911_v39 = vpop.eup %9910 }
0x14d6   :  { %9918 = vrcp.f32 %v5218_v58  ;;  %v5230_v48 = vadd.f32 1.0, %v9911_v39 }
0x14d7   :  { %v9913_v40 = vpop.eup %9912  ;;  %9920 = vpow2.f32 %v8600_v0 }
0x14d8   :  { %9922 = vrcp.f32 %v5230_v48  ;;  %v5219_v6 = vadd.f32 1.0, %v9913_v40 }
0x14d9   :  { %v9915_v38 = vpop.eup %9914  ;;  %9924 = vpow2.f32 %v8601_v59 }
0x14da   :  { %9926 = vrcp.f32 %v5219_v6  ;;  %v5231_v17 = vadd.f32 1.0, %v9915_v38  ;;  %v9917_v24 = vpop.eup %9916 }
0x14db   :  { %9928 = vtanh.f32 %v5210_v26 }
0x14dc   :  { %9930 = vrcp.f32 %v5231_v17 }
0x14e3   :  { %v9919_v42 = vpop.eup %9918 }
0x14e4   :  { %v9921_v47 = vpop.eup %9920  ;;  %v5252_v21 = vmul.f32 %v9919_v42, %v9917_v24 }
0x14e5   :  { %v9923_v36 = vpop.eup %9922  ;;  %v5244_v0 = vadd.f32 1.0, %v9921_v47 }
0x14e6   :  { %v9925_v23 = vpop.eup %9924  ;;  %v5250_v58 = vmul.f32 %v9923_v36, %v12818_v41 }
0x14e7   :  { %v9927_v39 = vpop.eup %9926  ;;  %v5245_v40 = vadd.f32 1.0, %v9925_v23  ;;  %9932 = vrcp.f32 %v5244_v0 }
0x14e8   :  { %v9929_v32 = vpop.eup %9928  ;;  %v12872_v31 = vadd.f32 %v5252_v21, %v5250_v58 }
0x14e9   :  { %v9931_v48 = vpop.eup %9930  ;;  %v5253_v59 = vmul.f32 %v9929_v32, %v9927_v39 }
0x14ea   :  { %v5251_v6 = vmul.f32 %v9931_v48, %v12822_v37  ;;  %9934 = vtanh.f32 %v12872_v31 }
0x14eb   :  { %9936 = vrcp.f32 %v5245_v40 }
0x14ec   :  { %v12876_v26 = vadd.f32 %v5253_v59, %v5251_v6 }
0x14ee   :  { %9938 = vtanh.f32 %v12876_v26 }
0x14f4   :  { %v9933_v38 = vpop.eup %9932 }
0x14f7   :  { %v9935_v41 = vpop.eup %9934 }
0x14f8   :  { %v9937_v17 = vpop.eup %9936  ;;  %v5258_v42 = vmul.f32 %v9935_v41, %v9933_v38 }
0x14fb   :  { %v9939_v24 = vpop.eup %9938 }
0x14fc   :  { %v5259_v47 = vmul.f32 %v9939_v24, %v9937_v17 }
0x14fe   :  { %v12879_v36 = vpack.c.bf16 %v5259_v47, %v5258_v42 }
0x1500   :  { %5296 = vmatmul.mubr.bf16.vlgmr.msra.gmra.mxu1 %v12879_v36  ;;  %5339 = vmatmul.mubr.bf16.vlgmr.msra.gmra.mxu0 %v12879_v36 }
0x1501   :  { %5409 = vmatpush1.bf16.msra.mxu1 %v12604_v13  ;;  %5452 = vmatpush1.bf16.msra.mxu0 %v12606_v46 }
0x1502   :  { %5410 = vmatprep.subr.bf16.mxu1 %v12608_v34  ;;  %5453 = vmatprep.subr.bf16.mxu0 %v12610_v3 }
0x1503   :  { %5440 = vmatprep.mubr.bf16.mxu1 %v14102_v12  ;;  %5483 = vmatprep.mubr.bf16.mxu0 %v14102_v12 }
0x1505   :  { %5411 = vmatpush1.bf16.msra.mxu1 %v12614_v33  ;;  %5454 = vmatpush1.bf16.msra.mxu0 %v12616_v45 }
0x1506   :  { %5412 = vmatprep.subr.bf16.mxu1 %v12620_v60  ;;  %5455 = vmatprep.subr.bf16.mxu0 %v12622_v16 }
0x1509   :  { %5413 = vmatpush1.bf16.msra.mxu1 %v12628_v54  ;;  %5456 = vmatpush1.bf16.msra.mxu0 %v12630_v25 }
0x150a   :  { %5414 = vmatprep.subr.bf16.mxu1 %v12634_v55  ;;  %5457 = vmatprep.subr.bf16.mxu0 %v12636_v49 }
0x150d   :  { %5415 = vmatpush1.bf16.msra.mxu1 %v12640_v30  ;;  %5458 = vmatpush1.bf16.msra.mxu0 %v12642_v9 }
0x150e   :  { %5416 = vmatprep.subr.bf16.mxu1 %v12646_v15  ;;  %5459 = vmatprep.subr.bf16.mxu0 %v12648_v4 }
0x1511   :  { %5417 = vmatpush1.bf16.msra.mxu1 %v12652_v57  ;;  %5460 = vmatpush1.bf16.msra.mxu0 %v12654_v8 }
0x1512   :  { %5418 = vmatprep.subr.bf16.mxu1 %v12658_v43  ;;  %5461 = vmatprep.subr.bf16.mxu0 %v12660_v62 }
0x1515   :  { %5419 = vmatpush1.bf16.msra.mxu1 %v12664_v44  ;;  %5462 = vmatpush1.bf16.msra.mxu0 %v12666_v51 }
0x1516   :  { %5420 = vmatprep.subr.bf16.mxu1 %v12670_v11  ;;  %5463 = vmatprep.subr.bf16.mxu0 %v12672_v7 }
0x1519   :  { %5421 = vmatpush1.bf16.msra.mxu1 %v12676_v50  ;;  %5464 = vmatpush1.bf16.msra.mxu0 %v12678_v18 }
0x151a   :  { %5422 = vmatprep.subr.bf16.mxu1 %v12682_v10  ;;  %5465 = vmatprep.subr.bf16.mxu0 %v12684_v53 }
0x151d   :  { %5423 = vmatpush1.bf16.msra.mxu1 %v12688_v27  ;;  %5466 = vmatpush1.bf16.msra.mxu0 %v12690_v56 }
0x151e   :  { %5553 = vmatprep.subr.bf16.mxu1 %v12596_v63  ;;  %5596 = vmatprep.subr.bf16.mxu0 %v12598_v28 }
0x15c0   :  { %v5297_v32 = vpop.f32.mrf.mxu1  ;;  %v5340_v23 = vpop.f32.mrf.mxu0 }
0x15c1   :  { %v5349_v37 = vadd.f32 %v5297_v32, %v12739_v22  ;;  %v5351_v42 = vadd.f32 %v5340_v23, %v12755_v52 }
0x15c2   :  { %v5299_v21 = vpop.f32.mrf.mxu1  ;;  %v5342_v40 = vpop.f32.mrf.mxu0 }
0x15c3   :  { %v8602_v58 = vmul.f32 -1.442695, %v5349_v37  ;;  %v5350_v39 = vadd.f32 %v5299_v21, %v12741_v61  ;;  %v5352_v24 = vadd.f32 %v5342_v40, %v12753_v2 }
0x15c4   :  { %v5301_v0 = vpop.f32.mrf.mxu1  ;;  %v5344_v28 = vpop.f32.mrf.mxu0 }
0x15c5   :  { %9940 = vpow2.f32 %v8602_v58  ;;  %v8604_v48 = vmul.f32 -1.442695, %v5350_v39  ;;  %v5353_v59 = vadd.f32 %v5301_v0, %v12744_v20  ;;  %v8606_v37 = vmul.f32 -1.442695, %v5352_v24 }
0x15c6   :  { %v5303_v6 = vpop.f32.mrf.mxu1  ;;  %v5346_v17 = vpop.f32.mrf.mxu0 }
0x15c7   :  { %9942 = vpow2.f32 %v8604_v48  ;;  %v8603_v38 = vmul.f32 -1.442695, %v5353_v59  ;;  %v5354_v63 = vadd.f32 %v5303_v6, %v12747_v29  ;;  %v5356_v47 = vadd.f32 %v5346_v17, %v12757_v14 }
0x15c8   :  { %v5355_v59 = vadd.f32 %v5344_v28, %v12762_v5 }
0x15c9   :  { %9944 = vpow2.f32 %v8603_v38  ;;  %v8605_v41 = vmul.f32 -1.442695, %v5354_v63  ;;  %v8607_v39 = vmul.f32 -1.442695, %v5356_v47 }
0x15cb   :  { %9946 = vpow2.f32 %v8605_v41 }
0x15cc   :  { %9948 = vtanh.f32 %v5351_v42 }
0x15d2   :  { %v9941_v32 = vpop.eup %9940 }
0x15d3   :  { %v5363_v21 = vadd.f32 1.0, %v9941_v32 }
0x15d4   :  { %v9943_v58 = vpop.eup %9942 }
0x15d5   :  { %9950 = vrcp.f32 %v5363_v21  ;;  %v5375_v0 = vadd.f32 1.0, %v9943_v58 }
0x15d6   :  { %v9945_v48 = vpop.eup %9944  ;;  %9952 = vpow2.f32 %v8606_v37 }
0x15d7   :  { %9954 = vrcp.f32 %v5375_v0  ;;  %v5364_v6 = vadd.f32 1.0, %v9945_v48 }
0x15d8   :  { %v9947_v38 = vpop.eup %9946  ;;  %9956 = vpow2.f32 %v8607_v39 }
0x15d9   :  { %9958 = vrcp.f32 %v5364_v6  ;;  %v5376_v23 = vadd.f32 1.0, %v9947_v38  ;;  %v9949_v40 = vpop.eup %9948 }
0x15da   :  { %9960 = vtanh.f32 %v5355_v59 }
0x15db   :  { %9962 = vrcp.f32 %v5376_v23 }
0x15e2   :  { %v9951_v63 = vpop.eup %9950 }
0x15e3   :  { %v9953_v41 = vpop.eup %9952  ;;  %v5397_v42 = vmul.f32 %v9951_v63, %v9949_v40 }
0x15e4   :  { %v9955_v17 = vpop.eup %9954  ;;  %v5389_v37 = vadd.f32 1.0, %v9953_v41 }
0x15e5   :  { %v9957_v24 = vpop.eup %9956  ;;  %v5395_v47 = vmul.f32 %v9955_v17, %v12872_v31 }
0x15e6   :  { %v9959_v32 = vpop.eup %9958  ;;  %v5390_v0 = vadd.f32 1.0, %v9957_v24  ;;  %9964 = vrcp.f32 %v5389_v37 }
0x15e7   :  { %v9961_v21 = vpop.eup %9960  ;;  %v12926_v28 = vadd.f32 %v5397_v42, %v5395_v47 }
0x15e8   :  { %v9963_v58 = vpop.eup %9962  ;;  %v5398_v39 = vmul.f32 %v9961_v21, %v9959_v32 }
0x15e9   :  { %v5396_v48 = vmul.f32 %v9963_v58, %v12876_v26  ;;  %9966 = vtanh.f32 %v12926_v28 }
0x15ea   :  { %9968 = vrcp.f32 %v5390_v0 }
0x15eb   :  { %v12930_v59 = vadd.f32 %v5398_v39, %v5396_v48 }
0x15ed   :  { %9970 = vtanh.f32 %v12930_v59 }
0x15f3   :  { %v9965_v6 = vpop.eup %9964 }
0x15f6   :  { %v9967_v31 = vpop.eup %9966 }
0x15f7   :  { %v9969_v38 = vpop.eup %9968  ;;  %v5403_v40 = vmul.f32 %v9967_v31, %v9965_v6 }
0x15fa   :  { %v9971_v23 = vpop.eup %9970 }
0x15fb   :  { %v5404_v63 = vmul.f32 %v9971_v23, %v9969_v38 }
0x15fd   :  { %v12933_v41 = vpack.c.bf16 %v5404_v63, %v5403_v40 }
0x15ff   :  { %5441 = vmatmul.mubr.bf16.vlgmr.msra.gmra.mxu1 %v12933_v41  ;;  %5484 = vmatmul.mubr.bf16.vlgmr.msra.gmra.mxu0 %v12933_v41 }
0x1600   :  { %5554 = vmatpush1.bf16.msra.mxu1 %v12604_v13  ;;  %5597 = vmatpush1.bf16.msra.mxu0 %v12606_v46  ;;  %v12969_v13 = vld [vmem:[#allocation19 + $0xe4] ss:$16 sps:$4 sm:$0xff]   ;;  %v12972_v46 = vld [vmem:[#allocation19 + $0xec] ss:$16 sps:$4 sm:$0xff]  }
0x1601   :  { %5555 = vmatprep.subr.bf16.mxu1 %v12608_v34  ;;  %5598 = vmatprep.subr.bf16.mxu0 %v12610_v3 }
0x1602   :  { %5585 = vmatprep.mubr.bf16.mxu1 %v14102_v12  ;;  %5628 = vmatprep.mubr.bf16.mxu0 %v14102_v12 }
0x1604   :  { %5556 = vmatpush1.bf16.msra.mxu1 %v12614_v33  ;;  %5599 = vmatpush1.bf16.msra.mxu0 %v12616_v45 }
0x1605   :  { %5557 = vmatprep.subr.bf16.mxu1 %v12620_v60  ;;  %5600 = vmatprep.subr.bf16.mxu0 %v12622_v16 }
0x1608   :  { %5558 = vmatpush1.bf16.msra.mxu1 %v12628_v54  ;;  %5601 = vmatpush1.bf16.msra.mxu0 %v12630_v25 }
0x1609   :  { %5559 = vmatprep.subr.bf16.mxu1 %v12634_v55  ;;  %5602 = vmatprep.subr.bf16.mxu0 %v12636_v49 }
0x160c   :  { %5560 = vmatpush1.bf16.msra.mxu1 %v12640_v30  ;;  %5603 = vmatpush1.bf16.msra.mxu0 %v12642_v9 }
0x160d   :  { %5561 = vmatprep.subr.bf16.mxu1 %v12646_v15  ;;  %5604 = vmatprep.subr.bf16.mxu0 %v12648_v4 }
0x1610   :  { %5562 = vmatpush1.bf16.msra.mxu1 %v12652_v57  ;;  %5605 = vmatpush1.bf16.msra.mxu0 %v12654_v8 }
0x1611   :  { %5563 = vmatprep.subr.bf16.mxu1 %v12658_v43  ;;  %5606 = vmatprep.subr.bf16.mxu0 %v12660_v62 }
0x1614   :  { %5564 = vmatpush1.bf16.msra.mxu1 %v12664_v44  ;;  %5607 = vmatpush1.bf16.msra.mxu0 %v12666_v51 }
0x1615   :  { %5565 = vmatprep.subr.bf16.mxu1 %v12670_v11  ;;  %5608 = vmatprep.subr.bf16.mxu0 %v12672_v7 }
0x1618   :  { %5566 = vmatpush1.bf16.msra.mxu1 %v12676_v50  ;;  %5609 = vmatpush1.bf16.msra.mxu0 %v12678_v18 }
0x1619   :  { %5567 = vmatprep.subr.bf16.mxu1 %v12682_v10  ;;  %5610 = vmatprep.subr.bf16.mxu0 %v12684_v53 }
0x161c   :  { %5568 = vmatpush1.bf16.msra.mxu1 %v12688_v27  ;;  %5611 = vmatpush1.bf16.msra.mxu0 %v12690_v56 }
0x161d   :  { %5698 = vmatprep.subr.bf16.mxu1 %v12969_v13  ;;  %5741 = vmatprep.subr.bf16.mxu0 %v12972_v46 }
0x16bf   :  { %v5442_v34 = vpop.f32.mrf.mxu1  ;;  %v5485_v33 = vpop.f32.mrf.mxu0 }
0x16c0   :  { %v5494_v3 = vadd.f32 %v5442_v34, %v12739_v22  ;;  %v5496_v62 = vadd.f32 %v5485_v33, %v12755_v52 }
0x16c1   :  { %v5444_v45 = vpop.f32.mrf.mxu1  ;;  %v5487_v55 = vpop.f32.mrf.mxu0 }
0x16c2   :  { %v8608_v60 = vmul.f32 -1.442695, %v5494_v3  ;;  %v5495_v16 = vadd.f32 %v5444_v45, %v12741_v61  ;;  %v5497_v43 = vadd.f32 %v5487_v55, %v12753_v2  ;;  %v13004_v55 = vld [vmem:[#allocation19 + $0xcc] ss:$16 sps:$4 sm:$0xff]  }
0x16c3   :  { %v5446_v54 = vpop.f32.mrf.mxu1  ;;  %v5489_v4 = vpop.f32.mrf.mxu0 }
0x16c4   :  { %9972 = vpow2.f32 %v8608_v60  ;;  %v8610_v25 = vmul.f32 -1.442695, %v5495_v16  ;;  %v5498_v49 = vadd.f32 %v5446_v54, %v12744_v20  ;;  %v8612_v11 = vmul.f32 -1.442695, %v5497_v43  ;;  %v12998_v54 = vld [vmem:[#allocation19 + $0xe8] ss:$16 sps:$4 sm:$0xff]  }
0x16c5   :  { %v5448_v30 = vpop.f32.mrf.mxu1  ;;  %v5491_v8 = vpop.f32.mrf.mxu0  ;;  %v5500_v27 = vadd.f32 %v5489_v4, %v12762_v5  ;;  %v13021_v4 = vld [vmem:[#allocation19 + $0xa0] ss:$16 sps:$4 sm:$0xff]   ;;  %v13030_v43 = vld [vmem:[#allocation19 + $0x8c] ss:$16 sps:$4 sm:$0xff]  }
0x16c6   :  { %9974 = vpow2.f32 %v8610_v25  ;;  %v8609_v9 = vmul.f32 -1.442695, %v5498_v49  ;;  %v5499_v15 = vadd.f32 %v5448_v30, %v12747_v29  ;;  %v5501_v44 = vadd.f32 %v5491_v8, %v12757_v14  ;;  %v13001_v25 = vld [vmem:[#allocation19 + $0xc4] ss:$16 sps:$4 sm:$0xff]   ;;  %v13009_v49 = vld [vmem:[#allocation19 + $0xc0] ss:$16 sps:$4 sm:$0xff]  }
0x16c7   :  { %v13012_v30 = vld [vmem:[#allocation19 + $0xc8] ss:$16 sps:$4 sm:$0xff]   ;;  %v13027_v8 = vld [vmem:[#allocation19 + $0x84] ss:$16 sps:$4 sm:$0xff]  }
0x16c8   :  { %9976 = vpow2.f32 %v8609_v9  ;;  %v8611_v57 = vmul.f32 -1.442695, %v5499_v15  ;;  %v8613_v18 = vmul.f32 -1.442695, %v5501_v44  ;;  %v13015_v9 = vld [vmem:[#allocation19 + $0xa4] ss:$16 sps:$4 sm:$0xff]  }
0x16c9   :  { %v13018_v15 = vld [vmem:[#allocation19 + $0xac] ss:$16 sps:$4 sm:$0xff]   ;;  %v13036_v44 = vld [vmem:[#allocation19 + $0x88] ss:$16 sps:$4 sm:$0xff]  }
0x16ca   :  { %9978 = vpow2.f32 %v8611_v57  ;;  %v13024_v57 = vld [vmem:[#allocation19 + $0xa8] ss:$16 sps:$4 sm:$0xff]  }
0x16cb   :  { %9980 = vtanh.f32 %v5496_v62  ;;  %v13033_v62 = vld [vmem:[#allocation19 + $0x80] ss:$16 sps:$4 sm:$0xff]  }
0x16d1   :  { %v9973_v51 = vpop.eup %9972 }
0x16d2   :  { %v5508_v7 = vadd.f32 1.0, %v9973_v51  ;;  %v13039_v51 = vld [vmem:[#allocation19 + $0x64] ss:$16 sps:$4 sm:$0xff]  }
0x16d3   :  { %v9975_v50 = vpop.eup %9974 }
0x16d4   :  { %9982 = vrcp.f32 %v5508_v7  ;;  %v5520_v10 = vadd.f32 1.0, %v9975_v50  ;;  %v13045_v7 = vld [vmem:[#allocation19 + $0x60] ss:$16 sps:$4 sm:$0xff]   ;;  %v13048_v50 = vld [vmem:[#allocation19 + $0x68] ss:$16 sps:$4 sm:$0xff]  }
0x16d5   :  { %v9977_v53 = vpop.eup %9976  ;;  %9984 = vpow2.f32 %v8612_v11  ;;  %v13042_v11 = vld [vmem:[#allocation19 + $0x6c] ss:$16 sps:$4 sm:$0xff]  }
0x16d6   :  { %9986 = vrcp.f32 %v5520_v10  ;;  %v5509_v56 = vadd.f32 1.0, %v9977_v53  ;;  %v13054_v10 = vld [vmem:[#allocation19 + $0x4c] ss:$16 sps:$4 sm:$0xff]   ;;  %v13057_v53 = vld [vmem:[#allocation19 + $0x40] ss:$16 sps:$4 sm:$0xff]  }
0x16d7   :  { %v9979_v26 = vpop.eup %9978  ;;  %9988 = vpow2.f32 %v8613_v18  ;;  %v13051_v18 = vld [vmem:[#allocation19 + $0x44] ss:$16 sps:$4 sm:$0xff]  }
0x16d8   :  { %9990 = vrcp.f32 %v5509_v56  ;;  %v5521_v17 = vadd.f32 1.0, %v9979_v26  ;;  %v9981_v24 = vpop.eup %9980  ;;  %v13063_v56 = vld [vmem:[#allocation19 + $0x24] ss:$16 sps:$4 sm:$0xff]   ;;  %v13066_v26 = vld [vmem:[#allocation19 + $0x2c] ss:$16 sps:$4 sm:$0xff]  }
0x16d9   :  { %9992 = vtanh.f32 %v5500_v27  ;;  %v13060_v27 = vld [vmem:[#allocation19 + $0x48] ss:$16 sps:$4 sm:$0xff]  }
0x16da   :  { %9994 = vrcp.f32 %v5521_v17  ;;  %v13069_v17 = vld [vmem:[#allocation19 + $0x20] ss:$16 sps:$4 sm:$0xff]  }
0x16e1   :  { %v9983_v42 = vpop.eup %9982 }
0x16e2   :  { %v9985_v47 = vpop.eup %9984  ;;  %v5542_v21 = vmul.f32 %v9983_v42, %v9981_v24  ;;  %v13072_v24 = vld [vmem:[#allocation19 + $0x28] ss:$16 sps:$4 sm:$0xff]   ;;  %v13075_v42 = vld [vmem:[#allocation19 + $0x4] ss:$16 sps:$4 sm:$0xff]  }
0x16e3   :  { %v9987_v32 = vpop.eup %9986  ;;  %v5534_v39 = vadd.f32 1.0, %v9985_v47  ;;  %v13078_v47 = vld [vmem:[#allocation19 + $0xc] ss:$16 sps:$4 sm:$0xff]  }
0x16e4   :  { %v9989_v37 = vpop.eup %9988  ;;  %v5540_v58 = vmul.f32 %v9987_v32, %v12926_v28  ;;  %v13081_v32 = vld [vmem:[#allocation19] ss:$16 sps:$4 sm:$0xff]  }
0x16e5   :  { %v9991_v0 = vpop.eup %9990  ;;  %v5535_v38 = vadd.f32 1.0, %v9989_v37  ;;  %9996 = vrcp.f32 %v5534_v39  ;;  %v13084_v37 = vld [vmem:[#allocation19 + $0x8] ss:$16 sps:$4 sm:$0xff]  }
0x16e6   :  { %v9993_v48 = vpop.eup %9992  ;;  %v12984_v6 = vadd.f32 %v5542_v21, %v5540_v58 }
0x16e7   :  { %v9995_v31 = vpop.eup %9994  ;;  %v5543_v23 = vmul.f32 %v9993_v48, %v9991_v0 }
0x16e8   :  { %v5541_v40 = vmul.f32 %v9995_v31, %v12930_v59  ;;  %9998 = vtanh.f32 %v12984_v6  ;;  %v12995_v59 = vld [vmem:[#allocation19 + $0xe0] ss:$16 sps:$4 sm:$0xff]  }
0x16e9   :  { %10000 = vrcp.f32 %v5535_v38 }
0x16ea   :  { %v12988_v63 = vadd.f32 %v5543_v23, %v5541_v40 }
0x16ec   :  { %10002 = vtanh.f32 %v12988_v63 }
0x16f2   :  { %v9997_v34 = vpop.eup %9996 }
0x16f5   :  { %v9999_v28 = vpop.eup %9998 }
0x16f6   :  { %v10001_v3 = vpop.eup %10000  ;;  %v5548_v45 = vmul.f32 %v9999_v28, %v9997_v34 }
0x16f9   :  { %v10003_v33 = vpop.eup %10002 }
0x16fa   :  { %v5549_v60 = vmul.f32 %v10003_v33, %v10001_v3 }
0x16fc   :  { %v12991_v16 = vpack.c.bf16 %v5549_v60, %v5548_v45 }
0x16fe   :  { %5586 = vmatmul.mubr.bf16.vlgmr.msra.gmra.mxu1 %v12991_v16  ;;  %5629 = vmatmul.mubr.bf16.vlgmr.msra.gmra.mxu0 %v12991_v16 }
0x16ff   :  { %5699 = vmatpush1.bf16.msra.mxu1 %v12995_v59  ;;  %5742 = vmatpush1.bf16.msra.mxu0 %v12998_v54 }
0x1700   :  { %5700 = vmatprep.subr.bf16.mxu1 %v13001_v25  ;;  %5743 = vmatprep.subr.bf16.mxu0 %v13004_v55 }
0x1701   :  { %5730 = vmatprep.mubr.bf16.mxu1 %v14102_v12  ;;  %5773 = vmatprep.mubr.bf16.mxu0 %v14102_v12 }
0x1703   :  { %5701 = vmatpush1.bf16.msra.mxu1 %v13009_v49  ;;  %5744 = vmatpush1.bf16.msra.mxu0 %v13012_v30 }
0x1704   :  { %5702 = vmatprep.subr.bf16.mxu1 %v13015_v9  ;;  %5745 = vmatprep.subr.bf16.mxu0 %v13018_v15 }
0x1707   :  { %5703 = vmatpush1.bf16.msra.mxu1 %v13021_v4  ;;  %5746 = vmatpush1.bf16.msra.mxu0 %v13024_v57 }
0x1708   :  { %5704 = vmatprep.subr.bf16.mxu1 %v13027_v8  ;;  %5747 = vmatprep.subr.bf16.mxu0 %v13030_v43 }
0x170b   :  { %5705 = vmatpush1.bf16.msra.mxu1 %v13033_v62  ;;  %5748 = vmatpush1.bf16.msra.mxu0 %v13036_v44 }
0x170c   :  { %5706 = vmatprep.subr.bf16.mxu1 %v13039_v51  ;;  %5749 = vmatprep.subr.bf16.mxu0 %v13042_v11 }
0x170f   :  { %5707 = vmatpush1.bf16.msra.mxu1 %v13045_v7  ;;  %5750 = vmatpush1.bf16.msra.mxu0 %v13048_v50 }
0x1710   :  { %5708 = vmatprep.subr.bf16.mxu1 %v13051_v18  ;;  %5751 = vmatprep.subr.bf16.mxu0 %v13054_v10 }
0x1713   :  { %5709 = vmatpush1.bf16.msra.mxu1 %v13057_v53  ;;  %5752 = vmatpush1.bf16.msra.mxu0 %v13060_v27 }
0x1714   :  { %5710 = vmatprep.subr.bf16.mxu1 %v13063_v56  ;;  %5753 = vmatprep.subr.bf16.mxu0 %v13066_v26 }
0x1717   :  { %5711 = vmatpush1.bf16.msra.mxu1 %v13069_v17  ;;  %5754 = vmatpush1.bf16.msra.mxu0 %v13072_v24 }
0x1718   :  { %5712 = vmatprep.subr.bf16.mxu1 %v13075_v42  ;;  %5755 = vmatprep.subr.bf16.mxu0 %v13078_v47 }
0x171b   :  { %5713 = vmatpush1.bf16.msra.mxu1 %v13081_v32  ;;  %5756 = vmatpush1.bf16.msra.mxu0 %v13084_v37 }
0x171c   :  { %5843 = vmatprep.subr.bf16.mxu1 %v12969_v13  ;;  %5886 = vmatprep.subr.bf16.mxu0 %v12972_v46 }
0x17be   :  { %v5587_v21 = vpop.f32.mrf.mxu1  ;;  %v5630_v0 = vpop.f32.mrf.mxu0 }
0x17bf   :  { %v5639_v58 = vadd.f32 %v5587_v21, %v12739_v22  ;;  %v5641_v21 = vadd.f32 %v5630_v0, %v12755_v52 }
0x17c0   :  { %v5589_v39 = vpop.f32.mrf.mxu1  ;;  %v5632_v40 = vpop.f32.mrf.mxu0 }
0x17c1   :  { %v8614_v48 = vmul.f32 -1.442695, %v5639_v58  ;;  %v5640_v31 = vadd.f32 %v5589_v39, %v12741_v61  ;;  %v5642_v60 = vadd.f32 %v5632_v40, %v12753_v2 }
0x17c2   :  { %v5591_v38 = vpop.f32.mrf.mxu1  ;;  %v5634_v46 = vpop.f32.mrf.mxu0 }
0x17c3   :  { %10004 = vpow2.f32 %v8614_v48  ;;  %v8616_v23 = vmul.f32 -1.442695, %v5640_v31  ;;  %v5643_v34 = vadd.f32 %v5591_v38, %v12744_v20  ;;  %v8618_v48 = vmul.f32 -1.442695, %v5642_v60 }
0x17c4   :  { %v5593_v28 = vpop.f32.mrf.mxu1  ;;  %v5636_v45 = vpop.f32.mrf.mxu0 }
0x17c5   :  { %10006 = vpow2.f32 %v8616_v23  ;;  %v8615_v3 = vmul.f32 -1.442695, %v5643_v34  ;;  %v5644_v13 = vadd.f32 %v5593_v28, %v12747_v29  ;;  %v5646_v58 = vadd.f32 %v5636_v45, %v12757_v14 }
0x17c7   :  { %10008 = vpow2.f32 %v8615_v3  ;;  %v8617_v33 = vmul.f32 -1.442695, %v5644_v13  ;;  %v8619_v23 = vmul.f32 -1.442695, %v5646_v58  ;;  %v5645_v3 = vadd.f32 %v5634_v46, %v12762_v5 }
0x17c9   :  { %10010 = vpow2.f32 %v8617_v33 }
0x17ca   :  { %10012 = vtanh.f32 %v5641_v21 }
0x17d0   :  { %v10005_v39 = vpop.eup %10004 }
0x17d1   :  { %v5653_v31 = vadd.f32 1.0, %v10005_v39 }
0x17d2   :  { %v10007_v38 = vpop.eup %10006 }
0x17d3   :  { %10014 = vrcp.f32 %v5653_v31  ;;  %v5665_v34 = vadd.f32 1.0, %v10007_v38 }
0x17d4   :  { %v10009_v28 = vpop.eup %10008  ;;  %10016 = vpow2.f32 %v8618_v48 }
0x17d5   :  { %10018 = vrcp.f32 %v5665_v34  ;;  %v5654_v13 = vadd.f32 1.0, %v10009_v28 }
0x17d6   :  { %v10011_v33 = vpop.eup %10010  ;;  %10020 = vpow2.f32 %v8619_v23 }
0x17d7   :  { %10022 = vrcp.f32 %v5654_v13  ;;  %v5666_v0 = vadd.f32 1.0, %v10011_v33  ;;  %v10013_v40 = vpop.eup %10012 }
0x17d8   :  { %10024 = vtanh.f32 %v5645_v3 }
0x17d9   :  { %10026 = vrcp.f32 %v5666_v0 }
0x17e0   :  { %v10015_v45 = vpop.eup %10014 }
0x17e1   :  { %v10017_v60 = vpop.eup %10016  ;;  %v5687_v58 = vmul.f32 %v10015_v45, %v10013_v40 }
0x17e2   :  { %v10019_v39 = vpop.eup %10018  ;;  %v5679_v48 = vadd.f32 1.0, %v10017_v60 }
0x17e3   :  { %v10021_v21 = vpop.eup %10020  ;;  %v5685_v31 = vmul.f32 %v10019_v39, %v12984_v6 }
0x17e4   :  { %v10023_v38 = vpop.eup %10022  ;;  %v5680_v28 = vadd.f32 1.0, %v10021_v21  ;;  %10028 = vrcp.f32 %v5679_v48 }
0x17e5   :  { %v10025_v35 = vpop.eup %10024  ;;  %v13098_v46 = vadd.f32 %v5687_v58, %v5685_v31 }
0x17e6   :  { %v10027_v34 = vpop.eup %10026  ;;  %v5688_v23 = vmul.f32 %v10025_v35, %v10023_v38  ;;  %v9226_v35 = vld [vmem:[#allocation21 + $0xe4] ss:$16 sps:$4 sm:$0xff]  }
0x17e7   :  { %v5686_v13 = vmul.f32 %v10027_v34, %v12988_v63  ;;  %10030 = vtanh.f32 %v13098_v46  ;;  %v9229_v63 = vld [vmem:[#allocation21 + $0xec] ss:$16 sps:$4 sm:$0xff]  }
0x17e8   :  { %10032 = vrcp.f32 %v5680_v28 }
0x17e9   :  { %v13102_v3 = vadd.f32 %v5688_v23, %v5686_v13 }
0x17eb   :  { %10034 = vtanh.f32 %v13102_v3 }
0x17f1   :  { %v10029_v33 = vpop.eup %10028 }
0x17f4   :  { %v10031_v6 = vpop.eup %10030 }
0x17f5   :  { %v10033_v0 = vpop.eup %10032  ;;  %v5693_v45 = vmul.f32 %v10031_v6, %v10029_v33 }
0x17f8   :  { %v10035_v40 = vpop.eup %10034 }
0x17f9   :  { %v5694_v60 = vmul.f32 %v10035_v40, %v10033_v0 }
0x17fb   :  { %v13105_v39 = vpack.c.bf16 %v5694_v60, %v5693_v45 }
0x17fd   :  { %5731 = vmatmul.mubr.bf16.vlgmr.msra.gmra.mxu1 %v13105_v39  ;;  %5774 = vmatmul.mubr.bf16.vlgmr.msra.gmra.mxu0 %v13105_v39 }
0x17fe   :  { %5844 = vmatpush1.bf16.msra.mxu1 %v12995_v59  ;;  %5887 = vmatpush1.bf16.msra.mxu0 %v12998_v54 }
0x17ff   :  { %5845 = vmatprep.subr.bf16.mxu1 %v13001_v25  ;;  %5888 = vmatprep.subr.bf16.mxu0 %v13004_v55 }
0x1800   :  { %5875 = vmatprep.mubr.bf16.mxu1 %v14102_v12  ;;  %5918 = vmatprep.mubr.bf16.mxu0 %v14102_v12 }
0x1802   :  { %5846 = vmatpush1.bf16.msra.mxu1 %v13009_v49  ;;  %5889 = vmatpush1.bf16.msra.mxu0 %v13012_v30 }
0x1803   :  { %5847 = vmatprep.subr.bf16.mxu1 %v13015_v9  ;;  %5890 = vmatprep.subr.bf16.mxu0 %v13018_v15 }
0x1806   :  { %5848 = vmatpush1.bf16.msra.mxu1 %v13021_v4  ;;  %5891 = vmatpush1.bf16.msra.mxu0 %v13024_v57 }
0x1807   :  { %5849 = vmatprep.subr.bf16.mxu1 %v13027_v8  ;;  %5892 = vmatprep.subr.bf16.mxu0 %v13030_v43 }
0x180a   :  { %5850 = vmatpush1.bf16.msra.mxu1 %v13033_v62  ;;  %5893 = vmatpush1.bf16.msra.mxu0 %v13036_v44 }
0x180b   :  { %5851 = vmatprep.subr.bf16.mxu1 %v13039_v51  ;;  %5894 = vmatprep.subr.bf16.mxu0 %v13042_v11 }
0x180e   :  { %5852 = vmatpush1.bf16.msra.mxu1 %v13045_v7  ;;  %5895 = vmatpush1.bf16.msra.mxu0 %v13048_v50 }
0x180f   :  { %5853 = vmatprep.subr.bf16.mxu1 %v13051_v18  ;;  %5896 = vmatprep.subr.bf16.mxu0 %v13054_v10 }
0x1812   :  { %5854 = vmatpush1.bf16.msra.mxu1 %v13057_v53  ;;  %5897 = vmatpush1.bf16.msra.mxu0 %v13060_v27 }
0x1813   :  { %5855 = vmatprep.subr.bf16.mxu1 %v13063_v56  ;;  %5898 = vmatprep.subr.bf16.mxu0 %v13066_v26 }
0x1816   :  { %5856 = vmatpush1.bf16.msra.mxu1 %v13069_v17  ;;  %5899 = vmatpush1.bf16.msra.mxu0 %v13072_v24 }
0x1817   :  { %5857 = vmatprep.subr.bf16.mxu1 %v13075_v42  ;;  %5900 = vmatprep.subr.bf16.mxu0 %v13078_v47 }
0x181a   :  { %5858 = vmatpush1.bf16.msra.mxu1 %v13081_v32  ;;  %5901 = vmatpush1.bf16.msra.mxu0 %v13084_v37 }
0x181b   :  { %6225 = vmatprep.subr.bf16.mxu1 %v9226_v35  ;;  %6338 = vmatprep.subr.bf16.mxu0 %v9229_v63 }
0x18bd   :  { %v5732_v59 = vpop.f32.mrf.mxu1  ;;  %v5775_v25 = vpop.f32.mrf.mxu0 }
0x18be   :  { %v5784_v54 = vadd.f32 %v5732_v59, %v12739_v22  ;;  %v5786_v50 = vadd.f32 %v5775_v25, %v12755_v52 }
0x18bf   :  { %v5734_v55 = vpop.f32.mrf.mxu1  ;;  %v5777_v4 = vpop.f32.mrf.mxu0 }
0x18c0   :  { %v8620_v49 = vmul.f32 -1.442695, %v5784_v54  ;;  %v5785_v30 = vadd.f32 %v5734_v55, %v12741_v61  ;;  %v5787_v7 = vadd.f32 %v5777_v4, %v12753_v2  ;;  %v9230_v4 = vld [vmem:[#allocation21 + $0xc0] ss:$16 sps:$4 sm:$0xff]  }
0x18c1   :  { %v5736_v9 = vpop.f32.mrf.mxu1  ;;  %v5779_v44 = vpop.f32.mrf.mxu0 }
0x18c2   :  { %10036 = vpow2.f32 %v8620_v49  ;;  %v8622_v15 = vmul.f32 -1.442695, %v5785_v30  ;;  %v5788_v57 = vadd.f32 %v5736_v9, %v12744_v20  ;;  %v8624_v53 = vmul.f32 -1.442695, %v5787_v7  ;;  %v9224_v49 = vld [vmem:[#allocation21 + $0xe0] ss:$16 sps:$4 sm:$0xff]  }
0x18c3   :  { %v5738_v8 = vpop.f32.mrf.mxu1  ;;  %v5781_v11 = vpop.f32.mrf.mxu0  ;;  %v5790_v42 = vadd.f32 %v5779_v44, %v12762_v5  ;;  %v9227_v30 = vld [vmem:[#allocation21 + $0xe8] ss:$16 sps:$4 sm:$0xff]   ;;  %v9242_v7 = vld [vmem:[#allocation21 + $0x80] ss:$16 sps:$4 sm:$0xff]  }
0x18c4   :  { %10038 = vpow2.f32 %v8622_v15  ;;  %v8621_v43 = vmul.f32 -1.442695, %v5788_v57  ;;  %v5789_v62 = vadd.f32 %v5738_v8, %v12747_v29  ;;  %v5791_v18 = vadd.f32 %v5781_v11, %v12757_v14  ;;  %v9232_v15 = vld [vmem:[#allocation21 + $0xc4] ss:$16 sps:$4 sm:$0xff]   ;;  %v9233_v57 = vld [vmem:[#allocation21 + $0xc8] ss:$16 sps:$4 sm:$0xff]  }
0x18c5   :  { %v9238_v8 = vld [vmem:[#allocation21 + $0xa4] ss:$16 sps:$4 sm:$0xff]   ;;  %v9239_v44 = vld [vmem:[#allocation21 + $0xa8] ss:$16 sps:$4 sm:$0xff]   ;;  %v9247_v11 = vld [vmem:[#allocation21 + $0x8c] ss:$16 sps:$4 sm:$0xff]  }
0x18c6   :  { %10040 = vpow2.f32 %v8621_v43  ;;  %v8623_v51 = vmul.f32 -1.442695, %v5789_v62  ;;  %v8625_v26 = vmul.f32 -1.442695, %v5791_v18  ;;  %v9241_v43 = vld [vmem:[#allocation21 + $0xac] ss:$16 sps:$4 sm:$0xff]  }
0x18c7   :  { %v9236_v62 = vld [vmem:[#allocation21 + $0xa0] ss:$16 sps:$4 sm:$0xff]   ;;  %v9250_v18 = vld [vmem:[#allocation21 + $0x64] ss:$16 sps:$4 sm:$0xff]  }
0x18c8   :  { %10042 = vpow2.f32 %v8623_v51  ;;  %v9244_v51 = vld [vmem:[#allocation21 + $0x84] ss:$16 sps:$4 sm:$0xff]  }
0x18c9   :  { %10044 = vtanh.f32 %v5786_v50  ;;  %v9245_v50 = vld [vmem:[#allocation21 + $0x88] ss:$16 sps:$4 sm:$0xff]  }
0x18cf   :  { %v10037_v10 = vpop.eup %10036 }
0x18d0   :  { %v5798_v27 = vadd.f32 1.0, %v10037_v10  ;;  %v9253_v10 = vld [vmem:[#allocation21 + $0x6c] ss:$16 sps:$4 sm:$0xff]  }
0x18d1   :  { %v10039_v56 = vpop.eup %10038 }
0x18d2   :  { %10046 = vrcp.f32 %v5798_v27  ;;  %v5810_v17 = vadd.f32 1.0, %v10039_v56  ;;  %v9251_v27 = vld [vmem:[#allocation21 + $0x68] ss:$16 sps:$4 sm:$0xff]   ;;  %v9256_v56 = vld [vmem:[#allocation21 + $0x44] ss:$16 sps:$4 sm:$0xff]  }
0x18d3   :  { %v10041_v24 = vpop.eup %10040  ;;  %10048 = vpow2.f32 %v8624_v53  ;;  %v9248_v53 = vld [vmem:[#allocation21 + $0x60] ss:$16 sps:$4 sm:$0xff]  }
0x18d4   :  { %10050 = vrcp.f32 %v5810_v17  ;;  %v5799_v47 = vadd.f32 1.0, %v10041_v24  ;;  %v9254_v17 = vld [vmem:[#allocation21 + $0x40] ss:$16 sps:$4 sm:$0xff]   ;;  %v9257_v24 = vld [vmem:[#allocation21 + $0x48] ss:$16 sps:$4 sm:$0xff]  }
0x18d5   :  { %v10043_v32 = vpop.eup %10042  ;;  %10052 = vpow2.f32 %v8625_v26  ;;  %v9259_v26 = vld [vmem:[#allocation21 + $0x4c] ss:$16 sps:$4 sm:$0xff]  }
0x18d6   :  { %10054 = vrcp.f32 %v5799_v47  ;;  %v5811_v37 = vadd.f32 1.0, %v10043_v32  ;;  %v10045_v21 = vpop.eup %10044  ;;  %v9265_v47 = vld [vmem:[#allocation21 + $0x2c] ss:$16 sps:$4 sm:$0xff]   ;;  %v9260_v32 = vld [vmem:[#allocation21 + $0x20] ss:$16 sps:$4 sm:$0xff]  }
0x18d7   :  { %10056 = vtanh.f32 %v5790_v42  ;;  %v9262_v42 = vld [vmem:[#allocation21 + $0x24] ss:$16 sps:$4 sm:$0xff]  }
0x18d8   :  { %10058 = vrcp.f32 %v5811_v37  ;;  %v9263_v37 = vld [vmem:[#allocation21 + $0x28] ss:$16 sps:$4 sm:$0xff]  }
0x18df   :  { %v10047_v58 = vpop.eup %10046 }
0x18e0   :  { %v10049_v31 = vpop.eup %10048  ;;  %v5832_v34 = vmul.f32 %v10047_v58, %v10045_v21  ;;  %v9268_v21 = vld [vmem:[#allocation21 + $0x4] ss:$16 sps:$4 sm:$0xff]   ;;  %v9271_v58 = vld [vmem:[#allocation21 + $0xc] ss:$16 sps:$4 sm:$0xff]  }
0x18e1   :  { %v10051_v38 = vpop.eup %10050  ;;  %v5824_v13 = vadd.f32 1.0, %v10049_v31  ;;  %v9266_v31 = vld [vmem:[#allocation21] ss:$16 sps:$4 sm:$0xff]  }
0x18e2   :  { %v10053_v48 = vpop.eup %10052  ;;  %v5830_v28 = vmul.f32 %v10051_v38, %v13098_v46  ;;  %v9269_v38 = vld [vmem:[#allocation21 + $0x8] ss:$16 sps:$4 sm:$0xff]  }
0x18e3   :  { %v10055_v23 = vpop.eup %10054  ;;  %v5825_v40 = vadd.f32 1.0, %v10053_v48  ;;  %10060 = vrcp.f32 %v5824_v13  ;;  %v13207_v48 = vld [vmem:[#allocation22 + $0xc0] ss:$16 sps:$4 sm:$0xff]   ;;  %v13218_v13 = vld [vmem:[#allocation22 + $0xac] ss:$16 sps:$4 sm:$0xff]  }
0x18e4   :  { %v10057_v33 = vpop.eup %10056  ;;  %v13150_v6 = vadd.f32 %v5832_v34, %v5830_v28  ;;  %v13209_v34 = vld [vmem:[#allocation22 + $0xa4] ss:$16 sps:$4 sm:$0xff]   ;;  %v13213_v28 = vld [vmem:[#allocation22 + $0xc8] ss:$16 sps:$4 sm:$0xff]  }
0x18e5   :  { %v10059_v0 = vpop.eup %10058  ;;  %v5833_v45 = vmul.f32 %v10057_v33, %v10055_v23  ;;  %v13216_v23 = vld [vmem:[#allocation22 + $0xa0] ss:$16 sps:$4 sm:$0xff]   ;;  %v13221_v33 = vld [vmem:[#allocation22 + $0x84] ss:$16 sps:$4 sm:$0xff]  }
0x18e6   :  { %v5831_v60 = vmul.f32 %v10059_v0, %v13102_v3  ;;  %10062 = vtanh.f32 %v13150_v6  ;;  %v9235_v3 = vld [vmem:[#allocation21 + $0xcc] ss:$16 sps:$4 sm:$0xff]   ;;  %v13224_v0 = vld [vmem:[#allocation22 + $0xa8] ss:$16 sps:$4 sm:$0xff]  }
0x18e7   :  { %10064 = vrcp.f32 %v5825_v40  ;;  %v13228_v40 = vld [vmem:[#allocation22 + $0x80] ss:$16 sps:$4 sm:$0xff]  }
0x18e8   :  { %v13154_v35 = vadd.f32 %v5833_v45, %v5831_v60  ;;  %v13230_v45 = vld [vmem:[#allocation22 + $0x8c] ss:$16 sps:$4 sm:$0xff]   ;;  %v13233_v60 = vld [vmem:[#allocation22 + $0x64] ss:$16 sps:$4 sm:$0xff]  }
0x18ea   :  { %10066 = vtanh.f32 %v13154_v35 }
0x18f0   :  { %v10061_v63 = vpop.eup %10060 }
0x18f3   :  { %v10063_v46 = vpop.eup %10062 }
0x18f4   :  { %v10065_v59 = vpop.eup %10064  ;;  %v5838_v25 = vmul.f32 %v10063_v46, %v10061_v63  ;;  %v13236_v63 = vld [vmem:[#allocation22 + $0x88] ss:$16 sps:$4 sm:$0xff]   ;;  %v13240_v46 = vld [vmem:[#allocation22 + $0x60] ss:$16 sps:$4 sm:$0xff]  }
0x18f7   :  { %v10067_v54 = vpop.eup %10066 }
0x18f8   :  { %v5839_v55 = vmul.f32 %v10067_v54, %v10065_v59  ;;  %v13243_v59 = vld [vmem:[#allocation22 + $0x44] ss:$16 sps:$4 sm:$0xff]   ;;  %v13246_v54 = vld [vmem:[#allocation22 + $0x6c] ss:$16 sps:$4 sm:$0xff]  }
0x18fa   :  { %v13157_v9 = vpack.c.bf16 %v5839_v55, %v5838_v25  ;;  %v13248_v25 = vld [vmem:[#allocation22 + $0x68] ss:$16 sps:$4 sm:$0xff]   ;;  %v13252_v55 = vld [vmem:[#allocation22 + $0x40] ss:$16 sps:$4 sm:$0xff]  }
0x18fc   :  { %5876 = vmatmul.mubr.bf16.vlgmr.msra.gmra.mxu1 %v13157_v9  ;;  %5919 = vmatmul.mubr.bf16.vlgmr.msra.gmra.mxu0 %v13157_v9 }
0x18fd   :  { %6226 = vmatpush1.bf16.msra.mxu1 %v9224_v49  ;;  %6339 = vmatpush1.bf16.msra.mxu0 %v9227_v30  ;;  %v13255_v49 = vld [vmem:[#allocation22 + $0x24] ss:$16 sps:$4 sm:$0xff]   ;;  %v13258_v30 = vld [vmem:[#allocation22 + $0x4c] ss:$16 sps:$4 sm:$0xff]  }
0x18fe   :  { %6227 = vmatprep.subr.bf16.mxu1 %v9232_v15  ;;  %6340 = vmatprep.subr.bf16.mxu0 %v9235_v3  ;;  %v13264_v15 = vld [vmem:[#allocation22 + $0x20] ss:$16 sps:$4 sm:$0xff]   ;;  %v13268_v3 = vld [vmem:[#allocation22 + $0x2c] ss:$16 sps:$4 sm:$0xff]  }
0x18ff   :  { %6257 = vmatprep.mubr.bf16.mxu1 %v14102_v12  ;;  %6370 = vmatprep.mubr.bf16.mxu0 %v14102_v12 }
0x1901   :  { %6228 = vmatpush1.bf16.msra.mxu1 %v9230_v4  ;;  %6341 = vmatpush1.bf16.msra.mxu0 %v9233_v57  ;;  %v13270_v4 = vld [vmem:[#allocation22 + $0x4] ss:$16 sps:$4 sm:$0xff]   ;;  %v13272_v57 = vld [vmem:[#allocation22 + $0x28] ss:$16 sps:$4 sm:$0xff]  }
0x1902   :  { %6229 = vmatprep.subr.bf16.mxu1 %v9238_v8  ;;  %6342 = vmatprep.subr.bf16.mxu0 %v9241_v43  ;;  %v13276_v8 = vld [vmem:[#allocation22] ss:$16 sps:$4 sm:$0xff]   ;;  %v13280_v43 = vld [vmem:[#allocation22 + $0xc] ss:$16 sps:$4 sm:$0xff]  }
0x1905   :  { %6230 = vmatpush1.bf16.msra.mxu1 %v9236_v62  ;;  %6343 = vmatpush1.bf16.msra.mxu0 %v9239_v44  ;;  %v13282_v62 = vld [vmem:[#allocation22 + $0x8] ss:$16 sps:$4 sm:$0xff]  }
0x1906   :  { %6231 = vmatprep.subr.bf16.mxu1 %v9244_v51  ;;  %6344 = vmatprep.subr.bf16.mxu0 %v9247_v11 }
0x1909   :  { %6232 = vmatpush1.bf16.msra.mxu1 %v9242_v7  ;;  %6345 = vmatpush1.bf16.msra.mxu0 %v9245_v50 }
0x190a   :  { %6233 = vmatprep.subr.bf16.mxu1 %v9250_v18  ;;  %6346 = vmatprep.subr.bf16.mxu0 %v9253_v10 }
0x190d   :  { %6234 = vmatpush1.bf16.msra.mxu1 %v9248_v53  ;;  %6347 = vmatpush1.bf16.msra.mxu0 %v9251_v27 }
0x190e   :  { %6235 = vmatprep.subr.bf16.mxu1 %v9256_v56  ;;  %6348 = vmatprep.subr.bf16.mxu0 %v9259_v26 }
0x1911   :  { %6236 = vmatpush1.bf16.msra.mxu1 %v9254_v17  ;;  %6349 = vmatpush1.bf16.msra.mxu0 %v9257_v24 }
0x1912   :  { %6237 = vmatprep.subr.bf16.mxu1 %v9262_v42  ;;  %6350 = vmatprep.subr.bf16.mxu0 %v9265_v47 }
0x1915   :  { %6238 = vmatpush1.bf16.msra.mxu1 %v9260_v32  ;;  %6351 = vmatpush1.bf16.msra.mxu0 %v9263_v37 }
0x1916   :  { %6239 = vmatprep.subr.bf16.mxu1 %v9268_v21  ;;  %6352 = vmatprep.subr.bf16.mxu0 %v9271_v58 }
0x1919   :  { %6240 = vmatpush1.bf16.msra.mxu1 %v9266_v31  ;;  %6353 = vmatpush1.bf16.msra.mxu0 %v9269_v38 }
0x191c   :  { %6258 = vmatmul.mubr.bf16.vlgmr.msra.gmra.mxu1 %v12771_v19  ;;  %6371 = vmatmul.mubr.bf16.vlgmr.msra.gmra.mxu0 %v12771_v19  ;;  %v13191_v19 = vld [vmem:[#allocation22 + $0xe4] ss:$16 sps:$4 sm:$0xff]  }
0x191d   :  { %6267 = vmatprep.mubr.bf16.mxu1 %v14102_v12  ;;  %6380 = vmatprep.mubr.bf16.mxu0 %v14102_v12 }
0x191e   :  { %6715 = vmatprep.subr.bf16.mxu1 %v13191_v19 }
0x1924   :  { %6268 = vmatmul.mubr.bf16.gmra.mxu1 %v12825_v1  ;;  %6381 = vmatmul.mubr.bf16.gmra.mxu0 %v12825_v1  ;;  %v13193_v1 = vld [vmem:[#allocation22 + $0xec] ss:$16 sps:$4 sm:$0xff]  }
0x1925   :  { %6277 = vmatprep.mubr.bf16.mxu1 %v14102_v12  ;;  %6390 = vmatprep.mubr.bf16.mxu0 %v14102_v12 }
0x1926   :  { %6758 = vmatprep.subr.bf16.mxu0 %v13193_v1 }
0x192c   :  { %6278 = vmatmul.mubr.bf16.gmra.mxu1 %v12879_v36  ;;  %6391 = vmatmul.mubr.bf16.gmra.mxu0 %v12879_v36  ;;  %v13195_v36 = vld [vmem:[#allocation22 + $0xe0] ss:$16 sps:$4 sm:$0xff]  }
0x192d   :  { %6287 = vmatprep.mubr.bf16.mxu1 %v14102_v12  ;;  %6400 = vmatprep.mubr.bf16.mxu0 %v14102_v12 }
0x192e   :  { %6716 = vmatpush1.bf16.msra.mxu1 %v13195_v36 }
0x1934   :  { %6288 = vmatmul.mubr.bf16.gmra.mxu1 %v12933_v41  ;;  %6401 = vmatmul.mubr.bf16.gmra.mxu0 %v12933_v41  ;;  %v13197_v41 = vld [vmem:[#allocation22 + $0xe8] ss:$16 sps:$4 sm:$0xff]  }
0x1935   :  { %6297 = vmatprep.mubr.bf16.mxu1 %v14102_v12  ;;  %6410 = vmatprep.mubr.bf16.mxu0 %v14102_v12 }
0x1936   :  { %6759 = vmatpush1.bf16.msra.mxu0 %v13197_v41 }
0x193c   :  { %6298 = vmatmul.mubr.bf16.gmra.mxu1 %v12991_v16  ;;  %6411 = vmatmul.mubr.bf16.gmra.mxu0 %v12991_v16  ;;  %v13203_v16 = vld [vmem:[#allocation22 + $0xc4] ss:$16 sps:$4 sm:$0xff]  }
0x193d   :  { %6307 = vmatprep.mubr.bf16.mxu1 %v14102_v12  ;;  %6420 = vmatprep.mubr.bf16.mxu0 %v14102_v12 }
0x193e   :  { %6717 = vmatprep.subr.bf16.mxu1 %v13203_v16 }
0x193f   :  { %6718 = vmatpush1.bf16.msra.mxu1 %v13207_v48 }
0x1940   :  { %6719 = vmatprep.subr.bf16.mxu1 %v13209_v34 }
0x1943   :  { %6720 = vmatpush1.bf16.msra.mxu1 %v13216_v23 }
0x1944   :  { %6308 = vmatmul.mubr.bf16.gmra.mxu1 %v13105_v39  ;;  %6421 = vmatmul.mubr.bf16.gmra.mxu0 %v13105_v39  ;;  %v13205_v39 = vld [vmem:[#allocation22 + $0xcc] ss:$16 sps:$4 sm:$0xff]  }
0x1945   :  { %6317 = vmatprep.mubr.bf16.mxu1 %v14102_v12  ;;  %6430 = vmatprep.mubr.bf16.mxu0 %v14102_v12 }
0x1946   :  { %6760 = vmatprep.subr.bf16.mxu0 %v13205_v39  ;;  %6721 = vmatprep.subr.bf16.mxu1 %v13221_v33 }
0x1947   :  { %6761 = vmatpush1.bf16.msra.mxu0 %v13213_v28  ;;  %6722 = vmatpush1.bf16.msra.mxu1 %v13228_v40 }
0x1948   :  { %6762 = vmatprep.subr.bf16.mxu0 %v13218_v13  ;;  %6723 = vmatprep.subr.bf16.mxu1 %v13233_v60 }
0x194b   :  { %6763 = vmatpush1.bf16.msra.mxu0 %v13224_v0  ;;  %6724 = vmatpush1.bf16.msra.mxu1 %v13240_v46 }
0x194c   :  { %6318 = vmatmul.mubr.bf16.gmra.mxu1 %v13157_v9  ;;  %6431 = vmatmul.mubr.bf16.gmra.mxu0 %v13157_v9  ;;  %v13260_v9 = vld [vmem:[#allocation22 + $0x48] ss:$16 sps:$4 sm:$0xff]  }
0x194d   :  { %6327 = vmatprep.mubr.bf16.mxu1 %v14102_v12  ;;  %6440 = vmatprep.mubr.bf16.mxu0 %v14102_v12 }
0x194e   :  { %6764 = vmatprep.subr.bf16.mxu0 %v13230_v45  ;;  %6725 = vmatprep.subr.bf16.mxu1 %v13243_v59 }
0x194f   :  { %6765 = vmatpush1.bf16.msra.mxu0 %v13236_v63  ;;  %6726 = vmatpush1.bf16.msra.mxu1 %v13252_v55 }
0x1950   :  { %6766 = vmatprep.subr.bf16.mxu0 %v13246_v54  ;;  %6727 = vmatprep.subr.bf16.mxu1 %v13255_v49 }
0x1953   :  { %6767 = vmatpush1.bf16.msra.mxu0 %v13248_v25  ;;  %6728 = vmatpush1.bf16.msra.mxu1 %v13264_v15 }
0x1954   :  { %6768 = vmatprep.subr.bf16.mxu0 %v13258_v30  ;;  %6729 = vmatprep.subr.bf16.mxu1 %v13270_v4 }
0x1957   :  { %6769 = vmatpush1.bf16.msra.mxu0 %v13260_v9  ;;  %6730 = vmatpush1.bf16.msra.mxu1 %v13276_v8 }
0x1958   :  { %6770 = vmatprep.subr.bf16.mxu0 %v13268_v3  ;;  %6868 = vmatprep.subr.bf16.mxu1 %v13191_v19 }
0x195b   :  { %6771 = vmatpush1.bf16.msra.mxu0 %v13272_v57 }
0x195c   :  { %6772 = vmatprep.subr.bf16.mxu0 %v13280_v43 }
0x195f   :  { %6773 = vmatpush1.bf16.msra.mxu0 %v13282_v62 }
0x1960   :  { %6911 = vmatprep.subr.bf16.mxu0 %v13193_v1 }
0x19bc   :  { %v5877_v44 = vpop.f32.mrf.mxu1  ;;  %v5920_v11 = vpop.f32.mrf.mxu0 }
0x19bd   :  { %v5929_v51 = vadd.f32 %v5877_v44, %v12739_v22 }
0x19be   :  { %v5879_v7 = vpop.f32.mrf.mxu1  ;;  %v5922_v27 = vpop.f32.mrf.mxu0 }
0x19bf   :  { %v8626_v50 = vmul.f32 -1.442695, %v5929_v51  ;;  %v5930_v18 = vadd.f32 %v5879_v7, %v12741_v61  ;;  %v5932_v32 = vadd.f32 %v5922_v27, %v12753_v2  ;;  %v5931_v61 = vadd.f32 %v5920_v11, %v12755_v52 }
0x19c0   :  { %v5881_v10 = vpop.f32.mrf.mxu1  ;;  %v5924_v42 = vpop.f32.mrf.mxu0 }
0x19c1   :  { %10068 = vpow2.f32 %v8626_v50  ;;  %v8628_v53 = vmul.f32 -1.442695, %v5930_v18  ;;  %v5933_v56 = vadd.f32 %v5881_v10, %v12744_v20  ;;  %v8630_v58 = vmul.f32 -1.442695, %v5932_v32 }
0x19c2   :  { %v5883_v26 = vpop.f32.mrf.mxu1  ;;  %v5926_v22 = vpop.f32.mrf.mxu0  ;;  %v5935_v51 = vadd.f32 %v5924_v42, %v12762_v5 }
0x19c3   :  { %10070 = vpow2.f32 %v8628_v53  ;;  %v8627_v17 = vmul.f32 -1.442695, %v5933_v56  ;;  %v5934_v24 = vadd.f32 %v5883_v26, %v12747_v29  ;;  %v5936_v37 = vadd.f32 %v5926_v22, %v12757_v14 }
0x19c5   :  { %10072 = vpow2.f32 %v8627_v17  ;;  %v8629_v47 = vmul.f32 -1.442695, %v5934_v24  ;;  %v8631_v38 = vmul.f32 -1.442695, %v5936_v37 }
0x19c7   :  { %10074 = vpow2.f32 %v8629_v47 }
0x19c8   :  { %10076 = vtanh.f32 %v5931_v61 }
0x19ce   :  { %v10069_v21 = vpop.eup %10068 }
0x19cf   :  { %v5943_v31 = vadd.f32 1.0, %v10069_v21 }
0x19d0   :  { %v10071_v20 = vpop.eup %10070 }
0x19d1   :  { %10078 = vrcp.f32 %v5943_v31  ;;  %v5955_v44 = vadd.f32 1.0, %v10071_v20 }
0x19d2   :  { %v10073_v29 = vpop.eup %10072  ;;  %10080 = vpow2.f32 %v8630_v58 }
0x19d3   :  { %10082 = vrcp.f32 %v5955_v44  ;;  %v5944_v7 = vadd.f32 1.0, %v10073_v29 }
0x19d4   :  { %v10075_v50 = vpop.eup %10074  ;;  %10084 = vpow2.f32 %v8631_v38 }
0x19d5   :  { %10086 = vrcp.f32 %v5944_v7  ;;  %v5956_v2 = vadd.f32 1.0, %v10075_v50  ;;  %v10077_v52 = vpop.eup %10076 }
0x19d6   :  { %10088 = vtanh.f32 %v5935_v51 }
0x19d7   :  { %10090 = vrcp.f32 %v5956_v2 }
0x19dc   :  { %v13339_v38 = vpop.f32.mrf.mxu0 }
0x19de   :  { %v10079_v14 = vpop.eup %10078  ;;  %v13343_v29 = vpop.f32.mrf.mxu0 }
0x19df   :  { %v10081_v11 = vpop.eup %10080  ;;  %v5977_v53 = vmul.f32 %v10079_v14, %v10077_v52 }
0x19e0   :  { %v10083_v18 = vpop.eup %10082  ;;  %v5969_v26 = vadd.f32 1.0, %v10081_v11  ;;  %v13347_v7 = vpop.f32.mrf.mxu0 }
0x19e1   :  { %v10085_v10 = vpop.eup %10084  ;;  %v5975_v27 = vmul.f32 %v10083_v18, %v13150_v6 }
0x19e2   :  { %v10087_v56 = vpop.eup %10086  ;;  %v5970_v42 = vadd.f32 1.0, %v10085_v10  ;;  %10092 = vrcp.f32 %v5969_v26  ;;  %v13351_v2 = vpop.f32.mrf.mxu0 }
0x19e3   :  { %v10089_v17 = vpop.eup %10088  ;;  %v5979_v5 = vadd.f32 %v5977_v53, %v5975_v27 }
0x19e4   :  { %v10091_v24 = vpop.eup %10090  ;;  %v5978_v47 = vmul.f32 %v10089_v17, %v10087_v56  ;;  %v13355_v14 = vpop.f32.mrf.mxu0 }
0x19e5   :  { %v5976_v22 = vmul.f32 %v10091_v24, %v13154_v35  ;;  %10094 = vtanh.f32 %v5979_v5  ;;  %v13337_v35 = vpop.f32.mrf.mxu1  ;;  %14254 = vst [vmem:[#allocation50_spill] sm:$0xff] %v13355_v14 }
0x19e6   :  { %10096 = vrcp.f32 %v5970_v42  ;;  %v13359_v18 = vpop.f32.mrf.mxu0 }
0x19e7   :  { %v5980_v32 = vadd.f32 %v5978_v47, %v5976_v22  ;;  %v13341_v44 = vpop.f32.mrf.mxu1  ;;  %14255 = vst [vmem:[#allocation47_spill] sm:$0xff] %v13359_v18  ;;  %v14310_v18 = vld [vmem:[#allocation42_spill] sm:$0xff] }
0x19e8   :  { %v13363_v53 = vpop.f32.mrf.mxu0 }
0x19e9   :  { %10098 = vtanh.f32 %v5980_v32  ;;  %v13345_v51 = vpop.f32.mrf.mxu1  ;;  %14256 = vst [vmem:[#allocation49_spill] sm:$0xff] %v13363_v53 }
0x19ea   :  { %v13367_v56 = vpop.f32.mrf.mxu0 }
0x19eb   :  { %v13349_v50 = vpop.f32.mrf.mxu1  ;;  %14258 = vst [vmem:[#allocation46_spill] sm:$0xff] %v13367_v56  ;;  %v14309_v56 = vld [vmem:[#allocation44_spill] sm:$0xff] }
0x19ec   :  { %v13371_v17 = vpop.f32.mrf.mxu0 }
0x19ed   :  { %v13353_v52 = vpop.f32.mrf.mxu1  ;;  %14260 = vst [vmem:[#allocation53_spill] sm:$0xff] %v13371_v17 }
0x19ee   :  { %v13375_v24 = vpop.f32.mrf.mxu0 }
0x19ef   :  { %v10093_v61 = vpop.eup %10092  ;;  %v13357_v11 = vpop.f32.mrf.mxu1  ;;  %14262 = vst [vmem:[#allocation58_spill] sm:$0xff] %v13375_v24 }
0x19f0   :  { %v13379_v47 = vpop.f32.mrf.mxu0 }
0x19f1   :  { %v13361_v10 = vpop.f32.mrf.mxu1  ;;  %14264 = vst [vmem:[#allocation51_spill] sm:$0xff] %v13379_v47 }
0x19f2   :  { %v10095_v37 = vpop.eup %10094  ;;  %v13383_v32 = vpop.f32.mrf.mxu0 }
0x19f3   :  { %v10097_v21 = vpop.eup %10096  ;;  %v5983_v31 = vmul.f32 %v10095_v37, %v10093_v61  ;;  %v13365_v27 = vpop.f32.mrf.mxu1  ;;  %14266 = vst [vmem:[#allocation54_spill] sm:$0xff] %v13383_v32 }
0x19f4   :  { %14257 = vst [vmem:[#allocation45_spill] sm:$0xff] %v13365_v27  ;;  %v13387_v37 = vpop.f32.mrf.mxu0 }
0x19f5   :  { %v13369_v26 = vpop.f32.mrf.mxu1  ;;  %14268 = vst [vmem:[#allocation61_spill] sm:$0xff] %v13387_v37 }
0x19f6   :  { %v10099_v58 = vpop.eup %10098  ;;  %14259 = vst [vmem:[#allocation48_spill] sm:$0xff] %v13369_v26 }
0x19f7   :  { %v5984_v6 = vmul.f32 %v10099_v58, %v10097_v21  ;;  %v13373_v5 = vpop.f32.mrf.mxu1  ;;  %v13391_v58 = vpop.f32.mrf.mxu0 }
0x19f8   :  { %14261 = vst [vmem:[#allocation55_spill] sm:$0xff] %v13373_v5  ;;  %14270 = vst [vmem:[#allocation66_spill] sm:$0xff] %v13391_v58 }
0x19f9   :  { %v6010_v20 = vpack.c.bf16 %v5984_v6, %v5983_v31  ;;  %v13377_v42 = vpop.f32.mrf.mxu1  ;;  %v13395_v6 = vpop.f32.mrf.mxu0 }
0x19fa   :  { %14263 = vst [vmem:[#allocation57_spill] sm:$0xff] %v13377_v42  ;;  %14272 = vst [vmem:[#allocation59_spill] sm:$0xff] %v13395_v6 }
0x19fb   :  { %6328 = vmatmul.mubr.bf16.gmra.mxu1 %v6010_v20  ;;  %6441 = vmatmul.mubr.bf16.gmra.mxu0 %v6010_v20  ;;  %v13381_v22 = vpop.f32.mrf.mxu1  ;;  %v13399_v17 = vpop.f32.mrf.mxu0 }
0x19fc   :  { %6747 = vmatprep.mubr.bf16.mxu1 %v14102_v12  ;;  %6790 = vmatprep.mubr.bf16.mxu0 %v14102_v12  ;;  %14265 = vst [vmem:[#allocation52_spill] sm:$0xff] %v13381_v22  ;;  %14274 = vst [vmem:[#allocation62_spill] sm:$0xff] %v13399_v17 }
0x19fd   :  { %v13385_v61 = vpop.f32.mrf.mxu1  ;;  %v13403_v24 = vpop.f32.mrf.mxu0 }
0x19fe   :  { %14267 = vst [vmem:[#allocation56_spill] sm:$0xff] %v13385_v61  ;;  %14276 = vst [vmem:[#allocation69_spill] sm:$0xff] %v13403_v24 }
0x19ff   :  { %v13389_v21 = vpop.f32.mrf.mxu1  ;;  %v13407_v61 = vpop.f32.mrf.mxu0 }
0x1a00   :  { %14269 = vst [vmem:[#allocation63_spill] sm:$0xff] %v13389_v21  ;;  %14278 = vst [vmem:[#allocation74_spill] sm:$0xff] %v13407_v61 }
0x1a01   :  { %v13393_v31 = vpop.f32.mrf.mxu1  ;;  %v13411_v21 = vpop.f32.mrf.mxu0 }
0x1a02   :  { %14271 = vst [vmem:[#allocation65_spill] sm:$0xff] %v13393_v31  ;;  %14280 = vst [vmem:[#allocation67_spill] sm:$0xff] %v13411_v21 }
0x1a03   :  { %6748 = vmatmul.mubr.bf16.vlgmr.msra.gmra.mxu1 %v14102_v12  ;;  %6791 = vmatmul.mubr.bf16.vlgmr.msra.gmra.mxu0 %v14102_v12  ;;  %v13397_v20 = vpop.f32.mrf.mxu1  ;;  %v13415_v31 = vpop.f32.mrf.mxu0 }
0x1a04   :  { %6869 = vmatpush1.bf16.msra.mxu1 %v13195_v36  ;;  %6912 = vmatpush1.bf16.msra.mxu0 %v13197_v41  ;;  %14273 = vst [vmem:[#allocation60_spill] sm:$0xff] %v13397_v20  ;;  %14282 = vst [vmem:[#allocation70_spill] sm:$0xff] %v13415_v31 }
0x1a05   :  { %6870 = vmatprep.subr.bf16.mxu1 %v13203_v16  ;;  %6913 = vmatprep.subr.bf16.mxu0 %v13205_v39  ;;  %v13401_v47 = vpop.f32.mrf.mxu1  ;;  %v13419_v20 = vpop.f32.mrf.mxu0 }
0x1a06   :  { %6900 = vmatprep.mubr.bf16.mxu1 %v14102_v12  ;;  %6943 = vmatprep.mubr.bf16.mxu0 %v14102_v12  ;;  %14275 = vst [vmem:[#allocation64_spill] sm:$0xff] %v13401_v47  ;;  %14284 = vst [vmem:[#allocation75_spill] sm:$0xff] %v13419_v20 }
0x1a07   :  { %v13405_v32 = vpop.f32.mrf.mxu1  ;;  %v13423_v47 = vpop.f32.mrf.mxu0 }
0x1a08   :  { %6871 = vmatpush1.bf16.msra.mxu1 %v13207_v48  ;;  %6914 = vmatpush1.bf16.msra.mxu0 %v13213_v28  ;;  %14277 = vst [vmem:[#allocation71_spill] sm:$0xff] %v13405_v32  ;;  %14286 = vst [vmem:[#allocation78_spill] sm:$0xff] %v13423_v47 }
0x1a09   :  { %6872 = vmatprep.subr.bf16.mxu1 %v13209_v34  ;;  %6915 = vmatprep.subr.bf16.mxu0 %v13218_v13  ;;  %v13409_v37 = vpop.f32.mrf.mxu1  ;;  %v13427_v32 = vpop.f32.mrf.mxu0 }
0x1a0a   :  { %14279 = vst [vmem:[#allocation73_spill] sm:$0xff] %v13409_v37  ;;  %14288 = vst [vmem:[#allocation83_spill] sm:$0xff] %v13427_v32  ;;  %v6043_v32 = vld [vmem:[%s14024_s15] sm:$0xf] }
0x1a0b   :  { %v13413_v58 = vpop.f32.mrf.mxu1  ;;  %v13431_v37 = vpop.f32.mrf.mxu0  ;;  %v13483_v14 = vrot.slane %v6043_v32, %v14309_v56  ;;  %v13486_v27 = vrot.slane %v6043_v32, %v14310_v18 }
0x1a0c   :  { %6873 = vmatpush1.bf16.msra.mxu1 %v13216_v23  ;;  %6916 = vmatpush1.bf16.msra.mxu0 %v13224_v0  ;;  %14281 = vst [vmem:[#allocation68_spill] sm:$0xff] %v13413_v58  ;;  %14290 = vst [vmem:[#allocation79_spill] sm:$0xff] %v13431_v37 }
0x1a0d   :  { %6874 = vmatprep.subr.bf16.mxu1 %v13221_v33  ;;  %6917 = vmatprep.subr.bf16.mxu0 %v13230_v45  ;;  %v13417_v6 = vpop.f32.mrf.mxu1  ;;  %v13435_v58 = vpop.f32.mrf.mxu0  ;;  %v6377_v18 = vadd.f32 %v13347_v7, %v13486_v27 }
0x1a0e   :  { %14283 = vst [vmem:[#allocation72_spill] sm:$0xff] %v13417_v6  ;;  %14292 = vst [vmem:[#allocation84_spill] sm:$0xff] %v13435_v58 }
0x1a0f   :  { %v13421_v17 = vpop.f32.mrf.mxu1  ;;  %v13439_v6 = vpop.f32.mrf.mxu0 }
0x1a10   :  { %6875 = vmatpush1.bf16.msra.mxu1 %v13228_v40  ;;  %6918 = vmatpush1.bf16.msra.mxu0 %v13236_v63  ;;  %14285 = vst [vmem:[#allocation81_spill] sm:$0xff] %v13421_v17  ;;  %14294 = vst [vmem:[#allocation88_spill] sm:$0xff] %v13439_v6  ;;  %v14303_v6 = vld [vmem:[#allocation41_spill] sm:$0xff] }
0x1a11   :  { %6876 = vmatprep.subr.bf16.mxu1 %v13233_v60  ;;  %6919 = vmatprep.subr.bf16.mxu0 %v13246_v54  ;;  %v13425_v24 = vpop.f32.mrf.mxu1  ;;  %v13443_v17 = vpop.f32.mrf.mxu0 }
0x1a12   :  { %14287 = vst [vmem:[#allocation77_spill] sm:$0xff] %v13425_v24  ;;  %14296 = vst [vmem:[#allocation80_spill] sm:$0xff] %v13443_v17 }
0x1a13   :  { %v13429_v61 = vpop.f32.mrf.mxu1  ;;  %v13447_v24 = vpop.f32.mrf.mxu0 }
0x1a14   :  { %6877 = vmatpush1.bf16.msra.mxu1 %v13240_v46  ;;  %6920 = vmatpush1.bf16.msra.mxu0 %v13248_v25  ;;  %14289 = vst [vmem:[#allocation82_spill] sm:$0xff] %v13429_v61  ;;  %14298 = vst [vmem:[#allocation87_spill] sm:$0xff] %v13447_v24  ;;  %v14306_v24 = vld [vmem:[#allocation43_spill] sm:$0xff] }
0x1a15   :  { %6878 = vmatprep.subr.bf16.mxu1 %v13243_v59  ;;  %6921 = vmatprep.subr.bf16.mxu0 %v13258_v30  ;;  %v13433_v21 = vpop.f32.mrf.mxu1  ;;  %v13468_v61 = vrot.slane %v6043_v32, %v14306_v24 }
0x1a16   :  { %14291 = vst [vmem:[#allocation76_spill] sm:$0xff] %v13433_v21 }
0x1a17   :  { %v13437_v31 = vpop.f32.mrf.mxu1 }
0x1a18   :  { %6879 = vmatpush1.bf16.msra.mxu1 %v13252_v55  ;;  %6922 = vmatpush1.bf16.msra.mxu0 %v13260_v9  ;;  %14293 = vst [vmem:[#allocation86_spill] sm:$0xff] %v13437_v31 }
0x1a19   :  { %6880 = vmatprep.subr.bf16.mxu1 %v13255_v49  ;;  %6923 = vmatprep.subr.bf16.mxu0 %v13268_v3  ;;  %v13441_v20 = vpop.f32.mrf.mxu1 }
0x1a1a   :  { %14295 = vst [vmem:[#allocation85_spill] sm:$0xff] %v13441_v20  ;;  %v13461_v20 = vrot.slane %v6043_v32, %v14303_v6 }
0x1a1b   :  { %v13445_v47 = vpop.f32.mrf.mxu1 }
0x1a1c   :  { %6881 = vmatpush1.bf16.msra.mxu1 %v13264_v15  ;;  %6924 = vmatpush1.bf16.msra.mxu0 %v13272_v57  ;;  %14297 = vst [vmem:[#allocation89_spill] sm:$0xff] %v13445_v47 }
0x1a1d   :  { %6882 = vmatprep.subr.bf16.mxu1 %v13270_v4  ;;  %6925 = vmatprep.subr.bf16.mxu0 %v13280_v43 }
0x1a20   :  { %6883 = vmatpush1.bf16.msra.mxu1 %v13276_v8  ;;  %6926 = vmatpush1.bf16.msra.mxu0 %v13282_v62 }
0x1a21   :  { %7021 = vmatprep.subr.bf16.mxu1 %v13191_v19  ;;  %7064 = vmatprep.subr.bf16.mxu0 %v13193_v1 }
0x1abb   :  { %v13452_v37 = vpop.f32.mrf.mxu1  ;;  %v13454_v21 = vpop.f32.mrf.mxu0 }
0x1abc   :  { %14299 = vst [vmem:[#allocation90_spill] sm:$0xff] %v13452_v37  ;;  %14300 = vst [vmem:[#allocation92_spill] sm:$0xff] %v13454_v21  ;;  %v6260_v21 = vadd.f32 %v13337_v35, %v13461_v20 }
0x1abd   :  { %v13456_v58 = vpop.f32.mrf.mxu1  ;;  %v13458_v31 = vpop.f32.mrf.mxu0 }
0x1abe   :  { %14301 = vst [vmem:[#allocation94_spill] sm:$0xff] %v13456_v58  ;;  %14302 = vst [vmem:[#allocation96_spill] sm:$0xff] %v13458_v31  ;;  %v6262_v31 = vadd.f32 %v13341_v44, %v13468_v61 }
0x1abf   :  { %v13463_v17 = vpop.f32.mrf.mxu1  ;;  %v13465_v47 = vpop.f32.mrf.mxu0 }
0x1ac0   :  { %14304 = vst [vmem:[#allocation93_spill] sm:$0xff] %v13463_v17  ;;  %14305 = vst [vmem:[#allocation91_spill] sm:$0xff] %v13465_v47  ;;  %v6264_v47 = vadd.f32 %v13345_v51, %v13461_v20 }
0x1ac1   :  { %v13470_v22 = vpop.f32.mrf.mxu1  ;;  %v13472_v42 = vpop.f32.mrf.mxu0 }
0x1ac2   :  { %14307 = vst [vmem:[#allocation97_spill] sm:$0xff] %v13470_v22  ;;  %14308 = vst [vmem:[#allocation95_spill] sm:$0xff] %v13472_v42  ;;  %v6266_v22 = vadd.f32 %v13349_v50, %v13468_v61  ;;  %v6375_v50 = vadd.f32 %v13343_v29, %v13483_v14 }
0x1ac3   :  { %v6749_v58 = vpop.f32.mrf.mxu1  ;;  %v6792_v37 = vpop.f32.mrf.mxu0 }
0x1ac4   :  { %v6801_v6 = vadd.f32 %v6749_v58, %v6260_v21 }
0x1ac5   :  { %v6751_v5 = vpop.f32.mrf.mxu1  ;;  %v6794_v53 = vpop.f32.mrf.mxu0 }
0x1ac6   :  { %v8696_v17 = vmul.f32 -1.442695, %v6801_v6  ;;  %v6802_v24 = vadd.f32 %v6751_v5, %v6262_v31 }
0x1ac7   :  { %v6753_v26 = vpop.f32.mrf.mxu1  ;;  %v6796_v51 = vpop.f32.mrf.mxu0 }
0x1ac8   :  { %10100 = vpow2.f32 %v8696_v17  ;;  %v8698_v42 = vmul.f32 -1.442695, %v6802_v24  ;;  %v6805_v35 = vadd.f32 %v6753_v26, %v6264_v47  ;;  %v6804_v17 = vadd.f32 %v6794_v53, %v6375_v50 }
0x1ac9   :  { %v6755_v44 = vpop.f32.mrf.mxu1  ;;  %v6373_v26 = vadd.f32 %v13339_v38, %v13486_v27  ;;  %v6798_v56 = vpop.f32.mrf.mxu0  ;;  %v6807_v6 = vadd.f32 %v6796_v51, %v6377_v18 }
0x1aca   :  { %10102 = vpow2.f32 %v8698_v42  ;;  %v8697_v21 = vmul.f32 -1.442695, %v6805_v35  ;;  %v6806_v58 = vadd.f32 %v6755_v44, %v6266_v22  ;;  %v6379_v42 = vadd.f32 %v13351_v2, %v13483_v14 }
0x1acb   :  { %v6803_v47 = vadd.f32 %v6792_v37, %v6373_v26  ;;  %v8700_v22 = vmul.f32 -1.442695, %v6804_v17 }
0x1acc   :  { %10104 = vpow2.f32 %v8697_v21  ;;  %v8699_v5 = vmul.f32 -1.442695, %v6806_v58  ;;  %v6808_v32 = vadd.f32 %v6798_v56, %v6379_v42 }
0x1ace   :  { %10106 = vpow2.f32 %v8699_v5  ;;  %v8701_v53 = vmul.f32 -1.442695, %v6808_v32 }
0x1acf   :  { %10108 = vtanh.f32 %v6803_v47 }
0x1ad0   :  { %10110 = vpow2.f32 %v8700_v22 }
0x1ad5   :  { %v10101_v31 = vpop.eup %10100 }
0x1ad6   :  { %v6815_v24 = vadd.f32 1.0, %v10101_v31 }
0x1ad7   :  { %v10103_v29 = vpop.eup %10102 }
0x1ad8   :  { %10112 = vrcp.f32 %v6815_v24  ;;  %v6827_v35 = vadd.f32 1.0, %v10103_v29 }
0x1ad9   :  { %v10105_v38 = vpop.eup %10104  ;;  %10114 = vtanh.f32 %v6807_v6 }
0x1ada   :  { %10116 = vrcp.f32 %v6827_v35  ;;  %v6816_v44 = vadd.f32 1.0, %v10105_v38 }
0x1adb   :  { %v10107_v2 = vpop.eup %10106  ;;  %10118 = vpow2.f32 %v8701_v53 }
0x1adc   :  { %10120 = vrcp.f32 %v6816_v44  ;;  %v6828_v37 = vadd.f32 1.0, %v10107_v2  ;;  %v10109_v7 = vpop.eup %10108 }
0x1add   :  { %v10111_v21 = vpop.eup %10110 }
0x1ade   :  { %10122 = vrcp.f32 %v6828_v37  ;;  %v6841_v42 = vadd.f32 1.0, %v10111_v21  ;;  %v6270_v37 = vadd.f32 %v13353_v52, %v13461_v20  ;;  %v6272_v21 = vadd.f32 %v13357_v11, %v13468_v61 }
0x1ae0   :  { %10124 = vrcp.f32 %v6841_v42  ;;  %v14311_v42 = vld [vmem:[#allocation45_spill] sm:$0xff] }
0x1ae5   :  { %v10113_v58 = vpop.eup %10112 }
0x1ae6   :  { %v10115_v51 = vpop.eup %10114  ;;  %v6849_v5 = vmul.f32 %v10113_v58, %v10109_v7 }
0x1ae7   :  { %v10117_v50 = vpop.eup %10116 }
0x1ae8   :  { %v10119_v17 = vpop.eup %10118  ;;  %v6847_v26 = vmul.f32 0.0, %v10117_v50  ;;  %v6274_v50 = vadd.f32 %v13361_v10, %v13461_v20 }
0x1ae9   :  { %v10121_v56 = vpop.eup %10120  ;;  %v6842_v32 = vadd.f32 1.0, %v10119_v17 }
0x1aea   :  { %v13496_v47 = vadd.f32 %v6849_v5, %v6847_v26  ;;  %v6850_v18 = vmul.f32 %v10121_v56, %v10115_v51 }
0x1aeb   :  { %v10123_v22 = vpop.eup %10122 }
0x1aec   :  { %v6848_v31 = vmul.f32 0.0, %v10123_v22  ;;  %10126 = vtanh.f32 %v13496_v47 }
0x1aed   :  { %10128 = vrcp.f32 %v6842_v32  ;;  %v10125_v24 = vpop.eup %10124 }
0x1aee   :  { %v13499_v6 = vadd.f32 %v6850_v18, %v6848_v31  ;;  %v6276_v18 = vadd.f32 %v14311_v42, %v13468_v61 }
0x1af0   :  { %10130 = vtanh.f32 %v13499_v6 }
0x1af9   :  { %v10127_v29 = vpop.eup %10126 }
0x1afa   :  { %v10129_v53 = vpop.eup %10128  ;;  %v6855_v38 = vmul.f32 %v10127_v29, %v10125_v24 }
0x1afd   :  { %v10131_v35 = vpop.eup %10130 }
0x1afe   :  { %v6856_v44 = vmul.f32 %v10131_v35, %v10129_v53  ;;  %v14312_v35 = vld [vmem:[#allocation47_spill] sm:$0xff] }
0x1aff   :  { %v6385_v10 = vadd.f32 %v14312_v35, %v13483_v14 }
0x1b00   :  { %v13502_v2 = vpack.c.bf16 %v6856_v44, %v6855_v38  ;;  %v14313_v44 = vld [vmem:[#allocation50_spill] sm:$0xff] }
0x1b02   :  { %6901 = vmatmul.mubr.bf16.vlgmr.msra.gmra.mxu1 %v13502_v2  ;;  %6944 = vmatmul.mubr.bf16.vlgmr.msra.gmra.mxu0 %v13502_v2 }
0x1b03   :  { %7022 = vmatpush1.bf16.msra.mxu1 %v13195_v36  ;;  %7065 = vmatpush1.bf16.msra.mxu0 %v13197_v41 }
0x1b04   :  { %7023 = vmatprep.subr.bf16.mxu1 %v13203_v16  ;;  %7066 = vmatprep.subr.bf16.mxu0 %v13205_v39 }
0x1b05   :  { %7053 = vmatprep.mubr.bf16.mxu1 %v14102_v12  ;;  %7096 = vmatprep.mubr.bf16.mxu0 %v14102_v12 }
0x1b07   :  { %7024 = vmatpush1.bf16.msra.mxu1 %v13207_v48  ;;  %7067 = vmatpush1.bf16.msra.mxu0 %v13213_v28 }
0x1b08   :  { %7025 = vmatprep.subr.bf16.mxu1 %v13209_v34  ;;  %7068 = vmatprep.subr.bf16.mxu0 %v13218_v13 }
0x1b0b   :  { %7026 = vmatpush1.bf16.msra.mxu1 %v13216_v23  ;;  %7069 = vmatpush1.bf16.msra.mxu0 %v13224_v0 }
0x1b0c   :  { %7027 = vmatprep.subr.bf16.mxu1 %v13221_v33  ;;  %7070 = vmatprep.subr.bf16.mxu0 %v13230_v45 }
0x1b0f   :  { %7028 = vmatpush1.bf16.msra.mxu1 %v13228_v40  ;;  %7071 = vmatpush1.bf16.msra.mxu0 %v13236_v63 }
0x1b10   :  { %7029 = vmatprep.subr.bf16.mxu1 %v13233_v60  ;;  %7072 = vmatprep.subr.bf16.mxu0 %v13246_v54 }
0x1b13   :  { %7030 = vmatpush1.bf16.msra.mxu1 %v13240_v46  ;;  %7073 = vmatpush1.bf16.msra.mxu0 %v13248_v25 }
0x1b14   :  { %7031 = vmatprep.subr.bf16.mxu1 %v13243_v59  ;;  %7074 = vmatprep.subr.bf16.mxu0 %v13258_v30 }
0x1b17   :  { %7032 = vmatpush1.bf16.msra.mxu1 %v13252_v55  ;;  %7075 = vmatpush1.bf16.msra.mxu0 %v13260_v9 }
0x1b18   :  { %7033 = vmatprep.subr.bf16.mxu1 %v13255_v49  ;;  %7076 = vmatprep.subr.bf16.mxu0 %v13268_v3 }
0x1b1b   :  { %7034 = vmatpush1.bf16.msra.mxu1 %v13264_v15  ;;  %7077 = vmatpush1.bf16.msra.mxu0 %v13272_v57 }
0x1b1c   :  { %7035 = vmatprep.subr.bf16.mxu1 %v13270_v4  ;;  %7078 = vmatprep.subr.bf16.mxu0 %v13280_v43 }
0x1b1f   :  { %7036 = vmatpush1.bf16.msra.mxu1 %v13276_v8  ;;  %7079 = vmatpush1.bf16.msra.mxu0 %v13282_v62 }
0x1b20   :  { %7174 = vmatprep.subr.bf16.mxu1 %v13191_v19  ;;  %7217 = vmatprep.subr.bf16.mxu0 %v13193_v1 }
0x1bc2   :  { %v6902_v7 = vpop.f32.mrf.mxu1  ;;  %v6945_v51 = vpop.f32.mrf.mxu0 }
0x1bc3   :  { %v6954_v58 = vadd.f32 %v6902_v7, %v6270_v37  ;;  %v6383_v37 = vadd.f32 %v14313_v44, %v13486_v27 }
0x1bc4   :  { %v6904_v5 = vpop.f32.mrf.mxu1  ;;  %v6947_v32 = vpop.f32.mrf.mxu0 }
0x1bc5   :  { %v8702_v17 = vmul.f32 -1.442695, %v6954_v58  ;;  %v6955_v26 = vadd.f32 %v6904_v5, %v6272_v21  ;;  %v6957_v38 = vadd.f32 %v6947_v32, %v6385_v10  ;;  %v14314_v21 = vld [vmem:[#allocation46_spill] sm:$0xff]  ;;  %v6956_v5 = vadd.f32 %v6945_v51, %v6383_v37 }
0x1bc6   :  { %v6906_v56 = vpop.f32.mrf.mxu1  ;;  %v6949_v29 = vpop.f32.mrf.mxu0  ;;  %v6389_v58 = vadd.f32 %v14314_v21, %v13483_v14 }
0x1bc7   :  { %10132 = vpow2.f32 %v8702_v17  ;;  %v8704_v22 = vmul.f32 -1.442695, %v6955_v26  ;;  %v6958_v52 = vadd.f32 %v6906_v56, %v6274_v50  ;;  %v14315_v50 = vld [vmem:[#allocation49_spill] sm:$0xff]  ;;  %v8706_v26 = vmul.f32 -1.442695, %v6957_v38 }
0x1bc8   :  { %v6908_v31 = vpop.f32.mrf.mxu1  ;;  %v6951_v7 = vpop.f32.mrf.mxu0  ;;  %v6387_v17 = vadd.f32 %v14315_v50, %v13486_v27 }
0x1bc9   :  { %10134 = vpow2.f32 %v8704_v22  ;;  %v8703_v24 = vmul.f32 -1.442695, %v6958_v52  ;;  %v6959_v11 = vadd.f32 %v6908_v31, %v6276_v18  ;;  %v6961_v56 = vadd.f32 %v6951_v7, %v6389_v58 }
0x1bca   :  { %v6960_v18 = vadd.f32 %v6949_v29, %v6387_v17 }
0x1bcb   :  { %10136 = vpow2.f32 %v8703_v24  ;;  %v8705_v53 = vmul.f32 -1.442695, %v6959_v11  ;;  %v8707_v32 = vmul.f32 -1.442695, %v6961_v56 }
0x1bcd   :  { %10138 = vpow2.f32 %v8705_v53 }
0x1bce   :  { %10140 = vtanh.f32 %v6956_v5 }
0x1bcf   :  { %10142 = vpow2.f32 %v8706_v26 }
0x1bd4   :  { %v10133_v42 = vpop.eup %10132 }
0x1bd5   :  { %v6968_v22 = vadd.f32 1.0, %v10133_v42 }
0x1bd6   :  { %v10135_v52 = vpop.eup %10134 }
0x1bd7   :  { %10144 = vrcp.f32 %v6968_v22  ;;  %v6980_v31 = vadd.f32 1.0, %v10135_v52 }
0x1bd8   :  { %v10137_v24 = vpop.eup %10136  ;;  %10146 = vtanh.f32 %v6960_v18 }
0x1bd9   :  { %10148 = vrcp.f32 %v6980_v31  ;;  %v6969_v11 = vadd.f32 1.0, %v10137_v24 }
0x1bda   :  { %v10139_v53 = vpop.eup %10138  ;;  %10150 = vpow2.f32 %v8707_v32 }
0x1bdb   :  { %10152 = vrcp.f32 %v6969_v11  ;;  %v6981_v51 = vadd.f32 1.0, %v10139_v53  ;;  %v10141_v35 = vpop.eup %10140 }
0x1bdc   :  { %v10143_v10 = vpop.eup %10142 }
0x1bdd   :  { %10154 = vrcp.f32 %v6981_v51  ;;  %v6994_v5 = vadd.f32 1.0, %v10143_v10 }
0x1bdf   :  { %10156 = vrcp.f32 %v6994_v5 }
0x1be4   :  { %v10145_v38 = vpop.eup %10144 }
0x1be5   :  { %v10147_v29 = vpop.eup %10146  ;;  %v7002_v44 = vmul.f32 %v10145_v38, %v10141_v35 }
0x1be6   :  { %v10149_v37 = vpop.eup %10148 }
0x1be7   :  { %v10151_v7 = vpop.eup %10150  ;;  %v7000_v21 = vmul.f32 %v10149_v37, %v13496_v47 }
0x1be8   :  { %v10153_v58 = vpop.eup %10152  ;;  %v6995_v56 = vadd.f32 1.0, %v10151_v7 }
0x1be9   :  { %v13557_v50 = vadd.f32 %v7002_v44, %v7000_v21  ;;  %v7003_v17 = vmul.f32 %v10153_v58, %v10147_v29 }
0x1bea   :  { %v10155_v26 = vpop.eup %10154 }
0x1beb   :  { %v7001_v42 = vmul.f32 %v10155_v26, %v13499_v6  ;;  %10158 = vtanh.f32 %v13557_v50  ;;  %v14323_v6 = vld [vmem:[#allocation51_spill] sm:$0xff] }
0x1bec   :  { %10160 = vrcp.f32 %v6995_v56  ;;  %v10157_v22 = vpop.eup %10156  ;;  %v6397_v53 = vadd.f32 %v14323_v6, %v13486_v27  ;;  %v13692_v6 = vld [vmem:[#allocation22 + $0x40] ss:$16 sps:$4 sm:$0xff]  }
0x1bed   :  { %v13561_v18 = vadd.f32 %v7003_v17, %v7001_v42 }
0x1bef   :  { %10162 = vtanh.f32 %v13561_v18 }
0x1bf8   :  { %v10159_v52 = vpop.eup %10158 }
0x1bf9   :  { %v10161_v47 = vpop.eup %10160  ;;  %v7008_v31 = vmul.f32 %v10159_v52, %v10157_v22 }
0x1bfc   :  { %v10163_v32 = vpop.eup %10162 }
0x1bfd   :  { %v7009_v24 = vmul.f32 %v10163_v32, %v10161_v47 }
0x1bff   :  { %v13564_v11 = vpack.c.bf16 %v7009_v24, %v7008_v31 }
0x1c01   :  { %7054 = vmatmul.mubr.bf16.vlgmr.msra.gmra.mxu1 %v13564_v11  ;;  %7097 = vmatmul.mubr.bf16.vlgmr.msra.gmra.mxu0 %v13564_v11 }
0x1c02   :  { %7175 = vmatpush1.bf16.msra.mxu1 %v13195_v36  ;;  %7218 = vmatpush1.bf16.msra.mxu0 %v13197_v41  ;;  %v14316_v36 = vld [vmem:[#allocation48_spill] sm:$0xff] }
0x1c03   :  { %7176 = vmatprep.subr.bf16.mxu1 %v13203_v16  ;;  %7219 = vmatprep.subr.bf16.mxu0 %v13205_v39  ;;  %v6280_v41 = vadd.f32 %v14316_v36, %v13461_v20  ;;  %v14317_v39 = vld [vmem:[#allocation55_spill] sm:$0xff] }
0x1c04   :  { %7206 = vmatprep.mubr.bf16.mxu1 %v14102_v12  ;;  %7249 = vmatprep.mubr.bf16.mxu0 %v14102_v12 }
0x1c06   :  { %7177 = vmatpush1.bf16.msra.mxu1 %v13207_v48  ;;  %7220 = vmatpush1.bf16.msra.mxu0 %v13213_v28  ;;  %v6282_v48 = vadd.f32 %v14317_v39, %v13468_v61 }
0x1c07   :  { %7178 = vmatprep.subr.bf16.mxu1 %v13209_v34  ;;  %7221 = vmatprep.subr.bf16.mxu0 %v13218_v13  ;;  %v14318_v13 = vld [vmem:[#allocation57_spill] sm:$0xff] }
0x1c0a   :  { %7179 = vmatpush1.bf16.msra.mxu1 %v13216_v23  ;;  %7222 = vmatpush1.bf16.msra.mxu0 %v13224_v0 }
0x1c0b   :  { %7180 = vmatprep.subr.bf16.mxu1 %v13221_v33  ;;  %7223 = vmatprep.subr.bf16.mxu0 %v13230_v45  ;;  %v6284_v33 = vadd.f32 %v14318_v13, %v13461_v20 }
0x1c0e   :  { %7181 = vmatpush1.bf16.msra.mxu1 %v13228_v40  ;;  %7224 = vmatpush1.bf16.msra.mxu0 %v13236_v63 }
0x1c0f   :  { %7182 = vmatprep.subr.bf16.mxu1 %v13233_v60  ;;  %7225 = vmatprep.subr.bf16.mxu0 %v13246_v54 }
0x1c12   :  { %7183 = vmatpush1.bf16.msra.mxu1 %v13240_v46  ;;  %7226 = vmatpush1.bf16.msra.mxu0 %v13248_v25 }
0x1c13   :  { %7184 = vmatprep.subr.bf16.mxu1 %v13243_v59  ;;  %7227 = vmatprep.subr.bf16.mxu0 %v13258_v30  ;;  %v14320_v30 = vld [vmem:[#allocation58_spill] sm:$0xff] }
0x1c16   :  { %7185 = vmatpush1.bf16.msra.mxu1 %v13252_v55  ;;  %7228 = vmatpush1.bf16.msra.mxu0 %v13260_v9  ;;  %v6395_v9 = vadd.f32 %v14320_v30, %v13483_v14  ;;  %v13665_v30 = vld [vmem:[#allocation22 + $0x8c] ss:$16 sps:$4 sm:$0xff]  }
0x1c17   :  { %7186 = vmatprep.subr.bf16.mxu1 %v13255_v49  ;;  %7229 = vmatprep.subr.bf16.mxu0 %v13268_v3  ;;  %v14321_v3 = vld [vmem:[#allocation53_spill] sm:$0xff] }
0x1c1a   :  { %7187 = vmatpush1.bf16.msra.mxu1 %v13264_v15  ;;  %7230 = vmatpush1.bf16.msra.mxu0 %v13272_v57 }
0x1c1b   :  { %7188 = vmatprep.subr.bf16.mxu1 %v13270_v4  ;;  %7231 = vmatprep.subr.bf16.mxu0 %v13280_v43  ;;  %v6393_v4 = vadd.f32 %v14321_v3, %v13486_v27  ;;  %v13674_v3 = vld [vmem:[#allocation22 + $0x64] ss:$16 sps:$4 sm:$0xff]  }
0x1c1e   :  { %7189 = vmatpush1.bf16.msra.mxu1 %v13276_v8  ;;  %7232 = vmatpush1.bf16.msra.mxu0 %v13282_v62  ;;  %v14322_v8 = vld [vmem:[#allocation54_spill] sm:$0xff] }
0x1c1f   :  { %7327 = vmatprep.subr.bf16.mxu1 %v13191_v19  ;;  %7370 = vmatprep.subr.bf16.mxu0 %v13193_v1  ;;  %v14319_v19 = vld [vmem:[#allocation52_spill] sm:$0xff]  ;;  %v6399_v43 = vadd.f32 %v14322_v8, %v13483_v14 }
0x1c20   :  { %v6286_v60 = vadd.f32 %v14319_v19, %v13468_v61  ;;  %v13633_v19 = vld [vmem:[#allocation22 + $0xe8] ss:$16 sps:$4 sm:$0xff]  }
0x1c21   :  { %v13683_v8 = vld [vmem:[#allocation22 + $0x68] ss:$16 sps:$4 sm:$0xff]  }
0x1cc1   :  { %v7055_v16 = vpop.f32.mrf.mxu1  ;;  %v7098_v28 = vpop.f32.mrf.mxu0 }
0x1cc2   :  { %v7107_v34 = vadd.f32 %v7055_v16, %v6280_v41  ;;  %v7109_v62 = vadd.f32 %v7098_v28, %v6393_v4  ;;  %v13677_v4 = vld [vmem:[#allocation22 + $0x6c] ss:$16 sps:$4 sm:$0xff]  }
0x1cc3   :  { %v7057_v23 = vpop.f32.mrf.mxu1  ;;  %v7100_v63 = vpop.f32.mrf.mxu0 }
0x1cc4   :  { %v8708_v0 = vmul.f32 -1.442695, %v7107_v34  ;;  %v7108_v40 = vadd.f32 %v7057_v23, %v6282_v48  ;;  %v7110_v15 = vadd.f32 %v7100_v63, %v6395_v9  ;;  %v13644_v63 = vld [vmem:[#allocation22 + $0xc0] ss:$16 sps:$4 sm:$0xff]  }
0x1cc5   :  { %v7059_v45 = vpop.f32.mrf.mxu1  ;;  %v7102_v55 = vpop.f32.mrf.mxu0  ;;  %v13668_v9 = vld [vmem:[#allocation22 + $0x80] ss:$16 sps:$4 sm:$0xff]  }
0x1cc6   :  { %10164 = vpow2.f32 %v8708_v0  ;;  %v8710_v1 = vmul.f32 -1.442695, %v7108_v40  ;;  %v7111_v46 = vadd.f32 %v7059_v45, %v6284_v33  ;;  %v8712_v51 = vmul.f32 -1.442695, %v7110_v15  ;;  %v13671_v15 = vld [vmem:[#allocation22 + $0x88] ss:$16 sps:$4 sm:$0xff]  }
0x1cc7   :  { %v7061_v59 = vpop.f32.mrf.mxu1  ;;  %v7104_v57 = vpop.f32.mrf.mxu0  ;;  %v7113_v38 = vadd.f32 %v7102_v55, %v6397_v53  ;;  %v13659_v55 = vld [vmem:[#allocation22 + $0xa8] ss:$16 sps:$4 sm:$0xff]  }
0x1cc8   :  { %10166 = vpow2.f32 %v8710_v1  ;;  %v8709_v54 = vmul.f32 -1.442695, %v7111_v46  ;;  %v7112_v25 = vadd.f32 %v7061_v59, %v6286_v60  ;;  %v7114_v35 = vadd.f32 %v7104_v57, %v6399_v43  ;;  %v13636_v60 = vld [vmem:[#allocation22 + $0xc4] ss:$16 sps:$4 sm:$0xff]   ;;  %v13639_v1 = vld [vmem:[#allocation22 + $0xcc] ss:$16 sps:$4 sm:$0xff]  }
0x1cc9   :  { %v13647_v46 = vld [vmem:[#allocation22 + $0xc8] ss:$16 sps:$4 sm:$0xff]   ;;  %v13650_v59 = vld [vmem:[#allocation22 + $0xa4] ss:$16 sps:$4 sm:$0xff]   ;;  %v13680_v57 = vld [vmem:[#allocation22 + $0x60] ss:$16 sps:$4 sm:$0xff]  }
0x1cca   :  { %10168 = vpow2.f32 %v8709_v54  ;;  %v8711_v49 = vmul.f32 -1.442695, %v7112_v25  ;;  %v8713_v37 = vmul.f32 -1.442695, %v7114_v35  ;;  %v13653_v54 = vld [vmem:[#allocation22 + $0xac] ss:$16 sps:$4 sm:$0xff]  }
0x1ccb   :  { %v13656_v25 = vld [vmem:[#allocation22 + $0xa0] ss:$16 sps:$4 sm:$0xff]   ;;  %v13686_v43 = vld [vmem:[#allocation22 + $0x44] ss:$16 sps:$4 sm:$0xff]   ;;  %v13695_v53 = vld [vmem:[#allocation22 + $0x48] ss:$16 sps:$4 sm:$0xff]  }
0x1ccc   :  { %10170 = vpow2.f32 %v8711_v49  ;;  %v13662_v49 = vld [vmem:[#allocation22 + $0x84] ss:$16 sps:$4 sm:$0xff]   ;;  %v13701_v35 = vld [vmem:[#allocation22 + $0x2c] ss:$16 sps:$4 sm:$0xff]  }
0x1ccd   :  { %10172 = vtanh.f32 %v7109_v62  ;;  %v13689_v62 = vld [vmem:[#allocation22 + $0x4c] ss:$16 sps:$4 sm:$0xff]  }
0x1cce   :  { %10174 = vpow2.f32 %v8712_v51  ;;  %v13698_v51 = vld [vmem:[#allocation22 + $0x24] ss:$16 sps:$4 sm:$0xff]  }
0x1cd3   :  { %v10165_v10 = vpop.eup %10164 }
0x1cd4   :  { %v7121_v29 = vadd.f32 1.0, %v10165_v10  ;;  %v13704_v10 = vld [vmem:[#allocation22 + $0x20] ss:$16 sps:$4 sm:$0xff]  }
0x1cd5   :  { %v10167_v44 = vpop.eup %10166 }
0x1cd6   :  { %10176 = vrcp.f32 %v7121_v29  ;;  %v7133_v7 = vadd.f32 1.0, %v10167_v44  ;;  %v13710_v29 = vld [vmem:[#allocation22 + $0x4] ss:$16 sps:$4 sm:$0xff]   ;;  %v13713_v44 = vld [vmem:[#allocation22 + $0xc] ss:$16 sps:$4 sm:$0xff]  }
0x1cd7   :  { %v10169_v21 = vpop.eup %10168  ;;  %10178 = vtanh.f32 %v7113_v38  ;;  %v13707_v38 = vld [vmem:[#allocation22 + $0x28] ss:$16 sps:$4 sm:$0xff]  }
0x1cd8   :  { %10180 = vrcp.f32 %v7133_v7  ;;  %v7122_v58 = vadd.f32 1.0, %v10169_v21  ;;  %v13719_v7 = vld [vmem:[#allocation22 + $0x8] ss:$16 sps:$4 sm:$0xff]   ;;  %v13722_v21 = vld [vmem:[#allocation22 + $0xe4] ss:$16 sps:$4 sm:$0xff]  }
0x1cd9   :  { %v10171_v5 = vpop.eup %10170  ;;  %10182 = vpow2.f32 %v8713_v37  ;;  %v13716_v37 = vld [vmem:[#allocation22] ss:$16 sps:$4 sm:$0xff]  }
0x1cda   :  { %10184 = vrcp.f32 %v7122_v58  ;;  %v7134_v17 = vadd.f32 1.0, %v10171_v5  ;;  %v10173_v26 = vpop.eup %10172  ;;  %v13725_v58 = vld [vmem:[#allocation22 + $0xec] ss:$16 sps:$4 sm:$0xff]  }
0x1cdb   :  { %v10175_v56 = vpop.eup %10174  ;;  %v14324_v5 = vld [vmem:[#allocation56_spill] sm:$0xff] }
0x1cdc   :  { %10186 = vrcp.f32 %v7134_v17  ;;  %v7147_v36 = vadd.f32 1.0, %v10175_v56  ;;  %v6290_v17 = vadd.f32 %v14324_v5, %v13461_v20  ;;  %v14325_v56 = vld [vmem:[#allocation63_spill] sm:$0xff] }
0x1cde   :  { %10188 = vrcp.f32 %v7147_v36 }
0x1ce3   :  { %v10177_v42 = vpop.eup %10176 }
0x1ce4   :  { %v10179_v22 = vpop.eup %10178  ;;  %v7155_v52 = vmul.f32 %v10177_v42, %v10173_v26  ;;  %v6292_v42 = vadd.f32 %v14325_v56, %v13468_v61 }
0x1ce5   :  { %v10181_v47 = vpop.eup %10180 }
0x1ce6   :  { %v10183_v32 = vpop.eup %10182  ;;  %v7153_v31 = vmul.f32 %v10181_v47, %v13557_v50 }
0x1ce7   :  { %v10185_v24 = vpop.eup %10184  ;;  %v7148_v48 = vadd.f32 1.0, %v10183_v32  ;;  %v14326_v32 = vld [vmem:[#allocation65_spill] sm:$0xff] }
0x1ce8   :  { %v13619_v41 = vadd.f32 %v7155_v52, %v7153_v31  ;;  %v7156_v16 = vmul.f32 %v10185_v24, %v10179_v22  ;;  %v6294_v31 = vadd.f32 %v14326_v32, %v13461_v20  ;;  %v14330_v32 = vld [vmem:[#allocation62_spill] sm:$0xff] }
0x1ce9   :  { %v10187_v39 = vpop.eup %10186 }
0x1cea   :  { %v7154_v34 = vmul.f32 %v10187_v39, %v13561_v18  ;;  %10190 = vtanh.f32 %v13619_v41  ;;  %v13630_v18 = vld [vmem:[#allocation22 + $0xe0] ss:$16 sps:$4 sm:$0xff]   ;;  %v14327_v39 = vld [vmem:[#allocation60_spill] sm:$0xff] }
0x1ceb   :  { %10192 = vrcp.f32 %v7148_v48  ;;  %v10189_v23 = vpop.eup %10188  ;;  %v6296_v48 = vadd.f32 %v14327_v39, %v13468_v61 }
0x1cec   :  { %v13623_v28 = vadd.f32 %v7156_v16, %v7154_v34 }
0x1cee   :  { %10194 = vtanh.f32 %v13623_v28 }
0x1cf7   :  { %v10191_v13 = vpop.eup %10190 }
0x1cf8   :  { %v10193_v50 = vpop.eup %10192  ;;  %v7161_v0 = vmul.f32 %v10191_v13, %v10189_v23 }
0x1cfb   :  { %v10195_v33 = vpop.eup %10194 }
0x1cfc   :  { %v7162_v40 = vmul.f32 %v10195_v33, %v10193_v50 }
0x1cfe   :  { %v13626_v45 = vpack.c.bf16 %v7162_v40, %v7161_v0 }
0x1d00   :  { %7207 = vmatmul.mubr.bf16.vlgmr.msra.gmra.mxu1 %v13626_v45  ;;  %7250 = vmatmul.mubr.bf16.vlgmr.msra.gmra.mxu0 %v13626_v45 }
0x1d01   :  { %7328 = vmatpush1.bf16.msra.mxu1 %v13630_v18  ;;  %7371 = vmatpush1.bf16.msra.mxu0 %v13633_v19 }
0x1d02   :  { %7329 = vmatprep.subr.bf16.mxu1 %v13636_v60  ;;  %7372 = vmatprep.subr.bf16.mxu0 %v13639_v1 }
0x1d03   :  { %7359 = vmatprep.mubr.bf16.mxu1 %v14102_v12  ;;  %7402 = vmatprep.mubr.bf16.mxu0 %v14102_v12 }
0x1d05   :  { %7330 = vmatpush1.bf16.msra.mxu1 %v13644_v63  ;;  %7373 = vmatpush1.bf16.msra.mxu0 %v13647_v46 }
0x1d06   :  { %7331 = vmatprep.subr.bf16.mxu1 %v13650_v59  ;;  %7374 = vmatprep.subr.bf16.mxu0 %v13653_v54 }
0x1d09   :  { %7332 = vmatpush1.bf16.msra.mxu1 %v13656_v25  ;;  %7375 = vmatpush1.bf16.msra.mxu0 %v13659_v55 }
0x1d0a   :  { %7333 = vmatprep.subr.bf16.mxu1 %v13662_v49  ;;  %7376 = vmatprep.subr.bf16.mxu0 %v13665_v30 }
0x1d0d   :  { %7334 = vmatpush1.bf16.msra.mxu1 %v13668_v9  ;;  %7377 = vmatpush1.bf16.msra.mxu0 %v13671_v15 }
0x1d0e   :  { %7335 = vmatprep.subr.bf16.mxu1 %v13674_v3  ;;  %7378 = vmatprep.subr.bf16.mxu0 %v13677_v4 }
0x1d11   :  { %7336 = vmatpush1.bf16.msra.mxu1 %v13680_v57  ;;  %7379 = vmatpush1.bf16.msra.mxu0 %v13683_v8 }
0x1d12   :  { %7337 = vmatprep.subr.bf16.mxu1 %v13686_v43  ;;  %7380 = vmatprep.subr.bf16.mxu0 %v13689_v62 }
0x1d15   :  { %7338 = vmatpush1.bf16.msra.mxu1 %v13692_v6  ;;  %7381 = vmatpush1.bf16.msra.mxu0 %v13695_v53 }
0x1d16   :  { %7339 = vmatprep.subr.bf16.mxu1 %v13698_v51  ;;  %7382 = vmatprep.subr.bf16.mxu0 %v13701_v35 }
0x1d19   :  { %7340 = vmatpush1.bf16.msra.mxu1 %v13704_v10  ;;  %7383 = vmatpush1.bf16.msra.mxu0 %v13707_v38 }
0x1d1a   :  { %7341 = vmatprep.subr.bf16.mxu1 %v13710_v29  ;;  %7384 = vmatprep.subr.bf16.mxu0 %v13713_v44 }
0x1d1d   :  { %7342 = vmatpush1.bf16.msra.mxu1 %v13716_v37  ;;  %7385 = vmatpush1.bf16.msra.mxu0 %v13719_v7 }
0x1d1e   :  { %7480 = vmatprep.subr.bf16.mxu1 %v13722_v21  ;;  %7523 = vmatprep.subr.bf16.mxu0 %v13725_v58 }
0x1dc0   :  { %v7208_v26 = vpop.f32.mrf.mxu1  ;;  %v7251_v52 = vpop.f32.mrf.mxu0 }
0x1dc1   :  { %v7260_v22 = vadd.f32 %v7208_v26, %v6290_v17  ;;  %v14328_v17 = vld [vmem:[#allocation66_spill] sm:$0xff] }
0x1dc2   :  { %v7210_v47 = vpop.f32.mrf.mxu1  ;;  %v7253_v23 = vpop.f32.mrf.mxu0  ;;  %v6405_v26 = vadd.f32 %v14328_v17, %v13483_v14 }
0x1dc3   :  { %v8714_v24 = vmul.f32 -1.442695, %v7260_v22  ;;  %v7261_v36 = vadd.f32 %v7210_v47, %v6292_v42  ;;  %v14329_v42 = vld [vmem:[#allocation61_spill] sm:$0xff] }
0x1dc4   :  { %v7212_v16 = vpop.f32.mrf.mxu1  ;;  %v7255_v40 = vpop.f32.mrf.mxu0  ;;  %v7263_v56 = vadd.f32 %v7253_v23, %v6405_v26  ;;  %v6403_v22 = vadd.f32 %v14329_v42, %v13486_v27 }
0x1dc5   :  { %10196 = vpow2.f32 %v8714_v24  ;;  %v8716_v34 = vmul.f32 -1.442695, %v7261_v36  ;;  %v7264_v13 = vadd.f32 %v7212_v16, %v6294_v31  ;;  %v6409_v24 = vadd.f32 %v14330_v32, %v13483_v14  ;;  %v14331_v36 = vld [vmem:[#allocation59_spill] sm:$0xff] }
0x1dc6   :  { %v7214_v50 = vpop.f32.mrf.mxu1  ;;  %v7257_v47 = vpop.f32.mrf.mxu0  ;;  %v7262_v31 = vadd.f32 %v7251_v52, %v6403_v22  ;;  %v6407_v16 = vadd.f32 %v14331_v36, %v13486_v27  ;;  %v8718_v39 = vmul.f32 -1.442695, %v7263_v56 }
0x1dc7   :  { %10198 = vpow2.f32 %v8716_v34  ;;  %v8715_v33 = vmul.f32 -1.442695, %v7264_v13  ;;  %v7265_v0 = vadd.f32 %v7214_v50, %v6296_v48  ;;  %v7267_v48 = vadd.f32 %v7257_v47, %v6409_v24 }
0x1dc8   :  { %v7266_v13 = vadd.f32 %v7255_v40, %v6407_v16 }
0x1dc9   :  { %10200 = vpow2.f32 %v8715_v33  ;;  %v8717_v5 = vmul.f32 -1.442695, %v7265_v0  ;;  %v8719_v23 = vmul.f32 -1.442695, %v7267_v48 }
0x1dcb   :  { %10202 = vpow2.f32 %v8717_v5 }
0x1dcc   :  { %10204 = vtanh.f32 %v7262_v31 }
0x1dcd   :  { %10206 = vpow2.f32 %v8718_v39 }
0x1dd2   :  { %v10197_v34 = vpop.eup %10196 }
0x1dd3   :  { %v7274_v50 = vadd.f32 1.0, %v10197_v34 }
0x1dd4   :  { %v10199_v33 = vpop.eup %10198 }
0x1dd5   :  { %10208 = vrcp.f32 %v7274_v50  ;;  %v7286_v0 = vadd.f32 1.0, %v10199_v33 }
0x1dd6   :  { %v10201_v5 = vpop.eup %10200  ;;  %10210 = vtanh.f32 %v7266_v13 }
0x1dd7   :  { %10212 = vrcp.f32 %v7286_v0  ;;  %v7275_v17 = vadd.f32 1.0, %v10201_v5 }
0x1dd8   :  { %v10203_v26 = vpop.eup %10202  ;;  %10214 = vpow2.f32 %v8719_v23 }
0x1dd9   :  { %10216 = vrcp.f32 %v7275_v17  ;;  %v7287_v52 = vadd.f32 1.0, %v10203_v26  ;;  %v10205_v56 = vpop.eup %10204 }
0x1dda   :  { %v10207_v42 = vpop.eup %10206 }
0x1ddb   :  { %10218 = vrcp.f32 %v7287_v52  ;;  %v7300_v16 = vadd.f32 1.0, %v10207_v42 }
0x1ddd   :  { %10220 = vrcp.f32 %v7300_v16 }
0x1de2   :  { %v10209_v22 = vpop.eup %10208 }
0x1de3   :  { %v10211_v40 = vpop.eup %10210  ;;  %v7308_v47 = vmul.f32 %v10209_v22, %v10205_v56  ;;  %v14333_v22 = vld [vmem:[#allocation71_spill] sm:$0xff] }
0x1de4   :  { %v10213_v32 = vpop.eup %10212 }
0x1de5   :  { %v10215_v24 = vpop.eup %10214  ;;  %v7306_v31 = vmul.f32 %v10213_v32, %v13619_v41 }
0x1de6   :  { %v10217_v36 = vpop.eup %10216  ;;  %v7301_v13 = vadd.f32 1.0, %v10215_v24 }
0x1de7   :  { %v13745_v39 = vadd.f32 %v7308_v47, %v7306_v31  ;;  %v7309_v48 = vmul.f32 %v10217_v36, %v10211_v40  ;;  %v6302_v40 = vadd.f32 %v14333_v22, %v13468_v61  ;;  %v14334_v31 = vld [vmem:[#allocation73_spill] sm:$0xff] }
0x1de8   :  { %v10219_v34 = vpop.eup %10218  ;;  %v6304_v36 = vadd.f32 %v14334_v31, %v13461_v20 }
0x1de9   :  { %v7307_v50 = vmul.f32 %v10219_v34, %v13623_v28  ;;  %10222 = vtanh.f32 %v13745_v39  ;;  %v14332_v28 = vld [vmem:[#allocation64_spill] sm:$0xff] }
0x1dea   :  { %10224 = vrcp.f32 %v7301_v13  ;;  %v10221_v23 = vpop.eup %10220  ;;  %v6300_v56 = vadd.f32 %v14332_v28, %v13461_v20  ;;  %v14335_v13 = vld [vmem:[#allocation68_spill] sm:$0xff] }
0x1deb   :  { %v13749_v33 = vadd.f32 %v7309_v48, %v7307_v50  ;;  %v6306_v50 = vadd.f32 %v14335_v13, %v13468_v61 }
0x1ded   :  { %10226 = vtanh.f32 %v13749_v33 }
0x1df6   :  { %v10223_v0 = vpop.eup %10222 }
0x1df7   :  { %v10225_v41 = vpop.eup %10224  ;;  %v7314_v17 = vmul.f32 %v10223_v0, %v10221_v23 }
0x1dfa   :  { %v10227_v5 = vpop.eup %10226 }
0x1dfb   :  { %v7315_v26 = vmul.f32 %v10227_v5, %v10225_v41 }
0x1dfd   :  { %v13752_v52 = vpack.c.bf16 %v7315_v26, %v7314_v17 }
0x1dff   :  { %7360 = vmatmul.mubr.bf16.vlgmr.msra.gmra.mxu1 %v13752_v52  ;;  %7403 = vmatmul.mubr.bf16.vlgmr.msra.gmra.mxu0 %v13752_v52 }
0x1e00   :  { %7481 = vmatpush1.bf16.msra.mxu1 %v13630_v18  ;;  %7524 = vmatpush1.bf16.msra.mxu0 %v13633_v19 }
0x1e01   :  { %7482 = vmatprep.subr.bf16.mxu1 %v13636_v60  ;;  %7525 = vmatprep.subr.bf16.mxu0 %v13639_v1 }
0x1e02   :  { %7512 = vmatprep.mubr.bf16.mxu1 %v14102_v12  ;;  %7555 = vmatprep.mubr.bf16.mxu0 %v14102_v12 }
0x1e04   :  { %7483 = vmatpush1.bf16.msra.mxu1 %v13644_v63  ;;  %7526 = vmatpush1.bf16.msra.mxu0 %v13647_v46 }
0x1e05   :  { %7484 = vmatprep.subr.bf16.mxu1 %v13650_v59  ;;  %7527 = vmatprep.subr.bf16.mxu0 %v13653_v54 }
0x1e08   :  { %7485 = vmatpush1.bf16.msra.mxu1 %v13656_v25  ;;  %7528 = vmatpush1.bf16.msra.mxu0 %v13659_v55 }
0x1e09   :  { %7486 = vmatprep.subr.bf16.mxu1 %v13662_v49  ;;  %7529 = vmatprep.subr.bf16.mxu0 %v13665_v30 }
0x1e0c   :  { %7487 = vmatpush1.bf16.msra.mxu1 %v13668_v9  ;;  %7530 = vmatpush1.bf16.msra.mxu0 %v13671_v15 }
0x1e0d   :  { %7488 = vmatprep.subr.bf16.mxu1 %v13674_v3  ;;  %7531 = vmatprep.subr.bf16.mxu0 %v13677_v4 }
0x1e10   :  { %7489 = vmatpush1.bf16.msra.mxu1 %v13680_v57  ;;  %7532 = vmatpush1.bf16.msra.mxu0 %v13683_v8 }
0x1e11   :  { %7490 = vmatprep.subr.bf16.mxu1 %v13686_v43  ;;  %7533 = vmatprep.subr.bf16.mxu0 %v13689_v62 }
0x1e14   :  { %7491 = vmatpush1.bf16.msra.mxu1 %v13692_v6  ;;  %7534 = vmatpush1.bf16.msra.mxu0 %v13695_v53 }
0x1e15   :  { %7492 = vmatprep.subr.bf16.mxu1 %v13698_v51  ;;  %7535 = vmatprep.subr.bf16.mxu0 %v13701_v35 }
0x1e18   :  { %7493 = vmatpush1.bf16.msra.mxu1 %v13704_v10  ;;  %7536 = vmatpush1.bf16.msra.mxu0 %v13707_v38 }
0x1e19   :  { %7494 = vmatprep.subr.bf16.mxu1 %v13710_v29  ;;  %7537 = vmatprep.subr.bf16.mxu0 %v13713_v44 }
0x1e1c   :  { %7495 = vmatpush1.bf16.msra.mxu1 %v13716_v37  ;;  %7538 = vmatpush1.bf16.msra.mxu0 %v13719_v7 }
0x1e1d   :  { %7633 = vmatprep.subr.bf16.mxu1 %v13722_v21  ;;  %7676 = vmatprep.subr.bf16.mxu0 %v13725_v58 }
0x1ebf   :  { %v7361_v42 = vpop.f32.mrf.mxu1  ;;  %v7404_v32 = vpop.f32.mrf.mxu0 }
0x1ec0   :  { %v7413_v47 = vadd.f32 %v7361_v42, %v6300_v56  ;;  %v14336_v42 = vld [vmem:[#allocation74_spill] sm:$0xff] }
0x1ec1   :  { %v7363_v24 = vpop.f32.mrf.mxu1  ;;  %v7406_v0 = vpop.f32.mrf.mxu0  ;;  %v6415_v22 = vadd.f32 %v14336_v42, %v13483_v14 }
0x1ec2   :  { %v8720_v16 = vmul.f32 -1.442695, %v7413_v47  ;;  %v7414_v48 = vadd.f32 %v7363_v24, %v6302_v40  ;;  %v14337_v47 = vld [vmem:[#allocation69_spill] sm:$0xff] }
0x1ec3   :  { %v7365_v34 = vpop.f32.mrf.mxu1  ;;  %v7408_v28 = vpop.f32.mrf.mxu0  ;;  %v7416_v40 = vadd.f32 %v7406_v0, %v6415_v22  ;;  %v6413_v24 = vadd.f32 %v14337_v47, %v13486_v27 }
0x1ec4   :  { %10228 = vpow2.f32 %v8720_v16  ;;  %v8722_v23 = vmul.f32 -1.442695, %v7414_v48  ;;  %v7417_v41 = vadd.f32 %v7365_v34, %v6304_v36  ;;  %v14338_v16 = vld [vmem:[#allocation70_spill] sm:$0xff]  ;;  %v14339_v34 = vld [vmem:[#allocation67_spill] sm:$0xff] }
0x1ec5   :  { %v7367_v5 = vpop.f32.mrf.mxu1  ;;  %v7410_v31 = vpop.f32.mrf.mxu0  ;;  %v6419_v48 = vadd.f32 %v14338_v16, %v13483_v14  ;;  %v7415_v36 = vadd.f32 %v7404_v32, %v6413_v24  ;;  %v6417_v13 = vadd.f32 %v14339_v34, %v13486_v27 }
0x1ec6   :  { %10230 = vpow2.f32 %v8722_v23  ;;  %v8721_v17 = vmul.f32 -1.442695, %v7417_v41  ;;  %v7418_v26 = vadd.f32 %v7367_v5, %v6306_v50  ;;  %v8724_v50 = vmul.f32 -1.442695, %v7416_v40 }
0x1ec7   :  { %v7420_v23 = vadd.f32 %v7410_v31, %v6419_v48  ;;  %v7419_v5 = vadd.f32 %v7408_v28, %v6417_v13 }
0x1ec8   :  { %10232 = vpow2.f32 %v8721_v17  ;;  %v8723_v56 = vmul.f32 -1.442695, %v7418_v26 }
0x1ec9   :  { %v8725_v0 = vmul.f32 -1.442695, %v7420_v23 }
0x1eca   :  { %10234 = vpow2.f32 %v8723_v56 }
0x1ecb   :  { %10236 = vtanh.f32 %v7415_v36 }
0x1ecc   :  { %10238 = vpow2.f32 %v8724_v50 }
0x1ed1   :  { %v10229_v41 = vpop.eup %10228 }
0x1ed2   :  { %v7427_v17 = vadd.f32 1.0, %v10229_v41 }
0x1ed3   :  { %v10231_v26 = vpop.eup %10230 }
0x1ed4   :  { %10240 = vrcp.f32 %v7427_v17  ;;  %v7439_v56 = vadd.f32 1.0, %v10231_v26 }
0x1ed5   :  { %v10233_v42 = vpop.eup %10232  ;;  %10242 = vtanh.f32 %v7419_v5 }
0x1ed6   :  { %10244 = vrcp.f32 %v7439_v56  ;;  %v7428_v22 = vadd.f32 1.0, %v10233_v42 }
0x1ed7   :  { %v10235_v47 = vpop.eup %10234  ;;  %10246 = vpow2.f32 %v8725_v0 }
0x1ed8   :  { %10248 = vrcp.f32 %v7428_v22  ;;  %v7440_v32 = vadd.f32 1.0, %v10235_v47  ;;  %v10237_v40 = vpop.eup %10236 }
0x1ed9   :  { %v10239_v24 = vpop.eup %10238 }
0x1eda   :  { %10250 = vrcp.f32 %v7440_v32  ;;  %v7453_v50 = vadd.f32 1.0, %v10239_v24 }
0x1edc   :  { %10252 = vrcp.f32 %v7453_v50 }
0x1ee1   :  { %v10241_v31 = vpop.eup %10240 }
0x1ee2   :  { %v10243_v28 = vpop.eup %10242  ;;  %v7461_v16 = vmul.f32 %v10241_v31, %v10237_v40 }
0x1ee3   :  { %v10245_v48 = vpop.eup %10244 }
0x1ee4   :  { %v10247_v36 = vpop.eup %10246  ;;  %v7459_v34 = vmul.f32 %v10245_v48, %v13745_v39 }
0x1ee5   :  { %v10249_v13 = vpop.eup %10248  ;;  %v7454_v17 = vadd.f32 1.0, %v10247_v36 }
0x1ee6   :  { %v13807_v23 = vadd.f32 %v7461_v16, %v7459_v34  ;;  %v7462_v41 = vmul.f32 %v10249_v13, %v10243_v28  ;;  %v14341_v28 = vld [vmem:[#allocation81_spill] sm:$0xff] }
0x1ee7   :  { %v10251_v5 = vpop.eup %10250  ;;  %v6312_v16 = vadd.f32 %v14341_v28, %v13468_v61  ;;  %v14342_v13 = vld [vmem:[#allocation77_spill] sm:$0xff] }
0x1ee8   :  { %v7460_v26 = vmul.f32 %v10251_v5, %v13749_v33  ;;  %10254 = vtanh.f32 %v13807_v23  ;;  %v14340_v33 = vld [vmem:[#allocation72_spill] sm:$0xff]  ;;  %v6314_v50 = vadd.f32 %v14342_v13, %v13461_v20  ;;  %v14346_v13 = vld [vmem:[#allocation79_spill] sm:$0xff] }
0x1ee9   :  { %10256 = vrcp.f32 %v7454_v17  ;;  %v10253_v56 = vpop.eup %10252  ;;  %v6310_v24 = vadd.f32 %v14340_v33, %v13461_v20 }
0x1eea   :  { %v13811_v0 = vadd.f32 %v7462_v41, %v7460_v26 }
0x1eec   :  { %10258 = vtanh.f32 %v13811_v0 }
0x1ef5   :  { %v10255_v42 = vpop.eup %10254 }
0x1ef6   :  { %v10257_v39 = vpop.eup %10256  ;;  %v7467_v47 = vmul.f32 %v10255_v42, %v10253_v56 }
0x1ef9   :  { %v10259_v22 = vpop.eup %10258 }
0x1efa   :  { %v7468_v32 = vmul.f32 %v10259_v22, %v10257_v39 }
0x1efc   :  { %v13814_v40 = vpack.c.bf16 %v7468_v32, %v7467_v47 }
0x1efe   :  { %7513 = vmatmul.mubr.bf16.vlgmr.msra.gmra.mxu1 %v13814_v40  ;;  %7556 = vmatmul.mubr.bf16.vlgmr.msra.gmra.mxu0 %v13814_v40 }
0x1eff   :  { %7634 = vmatpush1.bf16.msra.mxu1 %v13630_v18  ;;  %7677 = vmatpush1.bf16.msra.mxu0 %v13633_v19 }
0x1f00   :  { %7635 = vmatprep.subr.bf16.mxu1 %v13636_v60  ;;  %7678 = vmatprep.subr.bf16.mxu0 %v13639_v1 }
0x1f01   :  { %7665 = vmatprep.mubr.bf16.mxu1 %v14102_v12  ;;  %7708 = vmatprep.mubr.bf16.mxu0 %v14102_v12 }
0x1f03   :  { %7636 = vmatpush1.bf16.msra.mxu1 %v13644_v63  ;;  %7679 = vmatpush1.bf16.msra.mxu0 %v13647_v46 }
0x1f04   :  { %7637 = vmatprep.subr.bf16.mxu1 %v13650_v59  ;;  %7680 = vmatprep.subr.bf16.mxu0 %v13653_v54 }
0x1f07   :  { %7638 = vmatpush1.bf16.msra.mxu1 %v13656_v25  ;;  %7681 = vmatpush1.bf16.msra.mxu0 %v13659_v55 }
0x1f08   :  { %7639 = vmatprep.subr.bf16.mxu1 %v13662_v49  ;;  %7682 = vmatprep.subr.bf16.mxu0 %v13665_v30 }
0x1f0b   :  { %7640 = vmatpush1.bf16.msra.mxu1 %v13668_v9  ;;  %7683 = vmatpush1.bf16.msra.mxu0 %v13671_v15 }
0x1f0c   :  { %7641 = vmatprep.subr.bf16.mxu1 %v13674_v3  ;;  %7684 = vmatprep.subr.bf16.mxu0 %v13677_v4 }
0x1f0f   :  { %7642 = vmatpush1.bf16.msra.mxu1 %v13680_v57  ;;  %7685 = vmatpush1.bf16.msra.mxu0 %v13683_v8 }
0x1f10   :  { %7643 = vmatprep.subr.bf16.mxu1 %v13686_v43  ;;  %7686 = vmatprep.subr.bf16.mxu0 %v13689_v62 }
0x1f13   :  { %7644 = vmatpush1.bf16.msra.mxu1 %v13692_v6  ;;  %7687 = vmatpush1.bf16.msra.mxu0 %v13695_v53 }
0x1f14   :  { %7645 = vmatprep.subr.bf16.mxu1 %v13698_v51  ;;  %7688 = vmatprep.subr.bf16.mxu0 %v13701_v35 }
0x1f17   :  { %7646 = vmatpush1.bf16.msra.mxu1 %v13704_v10  ;;  %7689 = vmatpush1.bf16.msra.mxu0 %v13707_v38 }
0x1f18   :  { %7647 = vmatprep.subr.bf16.mxu1 %v13710_v29  ;;  %7690 = vmatprep.subr.bf16.mxu0 %v13713_v44 }
0x1f1b   :  { %7648 = vmatpush1.bf16.msra.mxu1 %v13716_v37  ;;  %7691 = vmatpush1.bf16.msra.mxu0 %v13719_v7 }
0x1f1c   :  { %7786 = vmatprep.subr.bf16.mxu1 %v13722_v21  ;;  %7829 = vmatprep.subr.bf16.mxu0 %v13725_v58  ;;  %v14343_v21 = vld [vmem:[#allocation82_spill] sm:$0xff] }
0x1f1d   :  { %v6316_v26 = vadd.f32 %v14343_v21, %v13468_v61 }
0x1fbe   :  { %v7514_v31 = vpop.f32.mrf.mxu1  ;;  %v7557_v36 = vpop.f32.mrf.mxu0 }
0x1fbf   :  { %v7566_v48 = vadd.f32 %v7514_v31, %v6310_v24  ;;  %v14344_v24 = vld [vmem:[#allocation78_spill] sm:$0xff] }
0x1fc0   :  { %v7516_v34 = vpop.f32.mrf.mxu1  ;;  %v7559_v56 = vpop.f32.mrf.mxu0  ;;  %v6425_v31 = vadd.f32 %v14344_v24, %v13483_v14 }
0x1fc1   :  { %v8726_v41 = vmul.f32 -1.442695, %v7566_v48  ;;  %v7567_v5 = vadd.f32 %v7516_v34, %v6312_v16  ;;  %v14345_v16 = vld [vmem:[#allocation75_spill] sm:$0xff] }
0x1fc2   :  { %v7518_v17 = vpop.f32.mrf.mxu1  ;;  %v7561_v32 = vpop.f32.mrf.mxu0  ;;  %v7569_v28 = vadd.f32 %v7559_v56, %v6425_v31  ;;  %v6423_v48 = vadd.f32 %v14345_v16, %v13486_v27 }
0x1fc3   :  { %10260 = vpow2.f32 %v8726_v41  ;;  %v8728_v58 = vmul.f32 -1.442695, %v7567_v5  ;;  %v7570_v42 = vadd.f32 %v7518_v17, %v6314_v50  ;;  %v6429_v41 = vadd.f32 %v14346_v13, %v13483_v14  ;;  %v14347_v5 = vld [vmem:[#allocation83_spill] sm:$0xff] }
0x1fc4   :  { %v7520_v39 = vpop.f32.mrf.mxu1  ;;  %v7563_v34 = vpop.f32.mrf.mxu0  ;;  %v7568_v50 = vadd.f32 %v7557_v36, %v6423_v48  ;;  %v6427_v17 = vadd.f32 %v14347_v5, %v13486_v27  ;;  %v8730_v21 = vmul.f32 -1.442695, %v7569_v28 }
0x1fc5   :  { %10262 = vpow2.f32 %v8728_v58  ;;  %v8727_v22 = vmul.f32 -1.442695, %v7570_v42  ;;  %v7571_v47 = vadd.f32 %v7520_v39, %v6316_v26  ;;  %v7573_v26 = vadd.f32 %v7563_v34, %v6429_v41 }
0x1fc6   :  { %v7572_v42 = vadd.f32 %v7561_v32, %v6427_v17 }
0x1fc7   :  { %10264 = vpow2.f32 %v8727_v22  ;;  %v8729_v33 = vmul.f32 -1.442695, %v7571_v47  ;;  %v8731_v56 = vmul.f32 -1.442695, %v7573_v26 }
0x1fc9   :  { %10266 = vpow2.f32 %v8729_v33 }
0x1fca   :  { %10268 = vtanh.f32 %v7568_v50 }
0x1fcb   :  { %10270 = vpow2.f32 %v8730_v21 }
0x1fd0   :  { %v10261_v58 = vpop.eup %10260 }
0x1fd1   :  { %v7580_v39 = vadd.f32 1.0, %v10261_v58 }
0x1fd2   :  { %v10263_v22 = vpop.eup %10262 }
0x1fd3   :  { %10272 = vrcp.f32 %v7580_v39  ;;  %v7592_v47 = vadd.f32 1.0, %v10263_v22 }
0x1fd4   :  { %v10265_v33 = vpop.eup %10264  ;;  %10274 = vtanh.f32 %v7572_v42 }
0x1fd5   :  { %10276 = vrcp.f32 %v7592_v47  ;;  %v7581_v24 = vadd.f32 1.0, %v10265_v33 }
0x1fd6   :  { %v10267_v31 = vpop.eup %10266  ;;  %10278 = vpow2.f32 %v8731_v56 }
0x1fd7   :  { %10280 = vrcp.f32 %v7581_v24  ;;  %v7593_v36 = vadd.f32 1.0, %v10267_v31  ;;  %v10269_v28 = vpop.eup %10268 }
0x1fd8   :  { %v10271_v16 = vpop.eup %10270 }
0x1fd9   :  { %10282 = vrcp.f32 %v7593_v36  ;;  %v7606_v17 = vadd.f32 1.0, %v10271_v16  ;;  %v14355_v16 = vld [vmem:[#allocation80_spill] sm:$0xff] }
0x1fdb   :  { %10284 = vrcp.f32 %v7606_v17 }
0x1fe0   :  { %v10273_v48 = vpop.eup %10272 }
0x1fe1   :  { %v10275_v32 = vpop.eup %10274  ;;  %v7614_v34 = vmul.f32 %v10273_v48, %v10269_v28  ;;  %v6437_v48 = vadd.f32 %v14355_v16, %v13486_v27 }
0x1fe2   :  { %v10277_v13 = vpop.eup %10276 }
0x1fe3   :  { %v10279_v41 = vpop.eup %10278  ;;  %v7612_v50 = vmul.f32 %v10277_v13, %v13807_v23 }
0x1fe4   :  { %v10281_v5 = vpop.eup %10280  ;;  %v7607_v42 = vadd.f32 1.0, %v10279_v41 }
0x1fe5   :  { %v13869_v21 = vadd.f32 %v7614_v34, %v7612_v50  ;;  %v7615_v26 = vmul.f32 %v10281_v5, %v10275_v32 }
0x1fe6   :  { %v10283_v58 = vpop.eup %10282 }
0x1fe7   :  { %v7613_v39 = vmul.f32 %v10283_v58, %v13811_v0  ;;  %10286 = vtanh.f32 %v13869_v21 }
0x1fe8   :  { %10288 = vrcp.f32 %v7607_v42  ;;  %v10285_v56 = vpop.eup %10284 }
0x1fe9   :  { %v13873_v22 = vadd.f32 %v7615_v26, %v7613_v39 }
0x1feb   :  { %10290 = vtanh.f32 %v13873_v22 }
0x1ff4   :  { %v10287_v47 = vpop.eup %10286 }
0x1ff5   :  { %v10289_v23 = vpop.eup %10288  ;;  %v7620_v24 = vmul.f32 %v10287_v47, %v10285_v56 }
0x1ff8   :  { %v10291_v33 = vpop.eup %10290 }
0x1ff9   :  { %v7621_v31 = vmul.f32 %v10291_v33, %v10289_v23 }
0x1ffb   :  { %v13876_v36 = vpack.c.bf16 %v7621_v31, %v7620_v24 }
0x1ffd   :  { %7666 = vmatmul.mubr.bf16.vlgmr.msra.gmra.mxu1 %v13876_v36  ;;  %7709 = vmatmul.mubr.bf16.vlgmr.msra.gmra.mxu0 %v13876_v36 }
0x1ffe   :  { %7787 = vmatpush1.bf16.msra.mxu1 %v13630_v18  ;;  %7830 = vmatpush1.bf16.msra.mxu0 %v13633_v19  ;;  %v14348_v18 = vld [vmem:[#allocation76_spill] sm:$0xff] }
0x1fff   :  { %7788 = vmatprep.subr.bf16.mxu1 %v13636_v60  ;;  %7831 = vmatprep.subr.bf16.mxu0 %v13639_v1  ;;  %v6320_v19 = vadd.f32 %v14348_v18, %v13461_v20  ;;  %v14349_v1 = vld [vmem:[#allocation86_spill] sm:$0xff] }
0x2000   :  { %7818 = vmatprep.mubr.bf16.mxu1 %v14102_v12  ;;  %7861 = vmatprep.mubr.bf16.mxu0 %v14102_v12  ;;  %v13912_v12 = vld [vmem:[#allocation24 + $0x38] sm:$0xff]  }
0x2002   :  { %7789 = vmatpush1.bf16.msra.mxu1 %v13644_v63  ;;  %7832 = vmatpush1.bf16.msra.mxu0 %v13647_v46  ;;  %v6322_v63 = vadd.f32 %v14349_v1, %v13468_v61 }
0x2003   :  { %7790 = vmatprep.subr.bf16.mxu1 %v13650_v59  ;;  %7833 = vmatprep.subr.bf16.mxu0 %v13653_v54 }
0x2006   :  { %7791 = vmatpush1.bf16.msra.mxu1 %v13656_v25  ;;  %7834 = vmatpush1.bf16.msra.mxu0 %v13659_v55  ;;  %v14350_v25 = vld [vmem:[#allocation85_spill] sm:$0xff] }
0x2007   :  { %7792 = vmatprep.subr.bf16.mxu1 %v13662_v49  ;;  %7835 = vmatprep.subr.bf16.mxu0 %v13665_v30  ;;  %v6324_v55 = vadd.f32 %v14350_v25, %v13461_v20 }
0x200a   :  { %7793 = vmatpush1.bf16.msra.mxu1 %v13668_v9  ;;  %7836 = vmatpush1.bf16.msra.mxu0 %v13671_v15  ;;  %v14351_v15 = vld [vmem:[#allocation89_spill] sm:$0xff] }
0x200b   :  { %7794 = vmatprep.subr.bf16.mxu1 %v13674_v3  ;;  %7837 = vmatprep.subr.bf16.mxu0 %v13677_v4  ;;  %v6326_v3 = vadd.f32 %v14351_v15, %v13468_v61 }
0x200e   :  { %7795 = vmatpush1.bf16.msra.mxu1 %v13680_v57  ;;  %7838 = vmatpush1.bf16.msra.mxu0 %v13683_v8 }
0x200f   :  { %7796 = vmatprep.subr.bf16.mxu1 %v13686_v43  ;;  %7839 = vmatprep.subr.bf16.mxu0 %v13689_v62 }
0x2012   :  { %7797 = vmatpush1.bf16.msra.mxu1 %v13692_v6  ;;  %7840 = vmatpush1.bf16.msra.mxu0 %v13695_v53 }
0x2013   :  { %7798 = vmatprep.subr.bf16.mxu1 %v13698_v51  ;;  %7841 = vmatprep.subr.bf16.mxu0 %v13701_v35  ;;  %v14352_v35 = vld [vmem:[#allocation88_spill] sm:$0xff] }
0x2016   :  { %7799 = vmatpush1.bf16.msra.mxu1 %v13704_v10  ;;  %7842 = vmatpush1.bf16.msra.mxu0 %v13707_v38  ;;  %v6435_v10 = vadd.f32 %v14352_v35, %v13483_v14 }
0x2017   :  { %7800 = vmatprep.subr.bf16.mxu1 %v13710_v29  ;;  %7843 = vmatprep.subr.bf16.mxu0 %v13713_v44  ;;  %v14353_v29 = vld [vmem:[#allocation84_spill] sm:$0xff] }
0x2018   :  { %v6433_v44 = vadd.f32 %v14353_v29, %v13486_v27 }
0x201a   :  { %7801 = vmatpush1.bf16.msra.mxu1 %v13716_v37  ;;  %7844 = vmatpush1.bf16.msra.mxu0 %v13719_v7  ;;  %v14354_v7 = vld [vmem:[#allocation87_spill] sm:$0xff] }
0x201b   :  { %8848 = vmatprep.subr.bf16.mxu1 %v13912_v12  ;;  %v6439_v0 = vadd.f32 %v14354_v7, %v13483_v14 }
0x20bd   :  { %v7667_v60 = vpop.f32.mrf.mxu1  ;;  %v7710_v59 = vpop.f32.mrf.mxu0 }
0x20be   :  { %v7719_v46 = vadd.f32 %v7667_v60, %v6320_v19  ;;  %v7721_v28 = vadd.f32 %v7710_v59, %v6433_v44 }
0x20bf   :  { %v7669_v54 = vpop.f32.mrf.mxu1  ;;  %v7712_v57 = vpop.f32.mrf.mxu0 }
0x20c0   :  { %v8732_v49 = vmul.f32 -1.442695, %v7719_v46  ;;  %v7720_v30 = vadd.f32 %v7669_v54, %v6322_v63  ;;  %v7722_v38 = vadd.f32 %v7712_v57, %v6435_v10  ;;  %v14357_v10 = vld [vmem:[#allocation94_spill] sm:$0xff] }
0x20c1   :  { %v7671_v9 = vpop.f32.mrf.mxu1  ;;  %v7714_v53 = vpop.f32.mrf.mxu0 }
0x20c2   :  { %10292 = vpow2.f32 %v8732_v49  ;;  %v8734_v4 = vmul.f32 -1.442695, %v7720_v30  ;;  %v7723_v8 = vadd.f32 %v7671_v9, %v6324_v55  ;;  %v8736_v32 = vmul.f32 -1.442695, %v7722_v38 }
0x20c3   :  { %v7673_v43 = vpop.f32.mrf.mxu1  ;;  %v7716_v37 = vpop.f32.mrf.mxu0  ;;  %v7725_v41 = vadd.f32 %v7714_v53, %v6437_v48  ;;  %v9326_v53 = vld [vmem:[#allocation24 + $0x8] sm:$0xff]   ;;  %v6332_v38 = vadd.f32 %v14357_v10, %v13468_v61 }
0x20c4   :  { %10294 = vpow2.f32 %v8734_v4  ;;  %v8733_v62 = vmul.f32 -1.442695, %v7723_v8  ;;  %v7724_v6 = vadd.f32 %v7673_v43, %v6326_v3  ;;  %v7726_v34 = vadd.f32 %v7716_v37, %v6439_v0  ;;  %v9321_v8 = vld [vmem:[#allocation24 + $0x30] sm:$0xff]   ;;  %v9323_v43 = vld [vmem:[#allocation24 + $0x20] sm:$0xff]  }
0x20c6   :  { %10296 = vpow2.f32 %v8733_v62  ;;  %v8735_v51 = vmul.f32 -1.442695, %v7724_v6  ;;  %v8737_v17 = vmul.f32 -1.442695, %v7726_v34  ;;  %v9324_v62 = vld [vmem:[#allocation24 + $0x18] sm:$0xff]   ;;  %v9325_v6 = vld [vmem:[#allocation24 + $0x10] sm:$0xff]  }
0x20c8   :  { %10298 = vpow2.f32 %v8735_v51  ;;  %v9327_v51 = vld [vmem:[#allocation24] sm:$0xff]  }
0x20c9   :  { %10300 = vtanh.f32 %v7721_v28 }
0x20ca   :  { %10302 = vpow2.f32 %v8736_v32 }
0x20cf   :  { %v10293_v13 = vpop.eup %10292 }
0x20d0   :  { %v7733_v50 = vadd.f32 1.0, %v10293_v13 }
0x20d1   :  { %v10295_v5 = vpop.eup %10294 }
0x20d2   :  { %10304 = vrcp.f32 %v7733_v50  ;;  %v7745_v26 = vadd.f32 1.0, %v10295_v5  ;;  %v14360_v5 = vld [vmem:[#allocation96_spill] sm:$0xff] }
0x20d3   :  { %v10297_v58 = vpop.eup %10296  ;;  %10306 = vtanh.f32 %v7725_v41 }
0x20d4   :  { %10308 = vrcp.f32 %v7745_v26  ;;  %v7734_v42 = vadd.f32 1.0, %v10297_v58  ;;  %v14361_v26 = vld [vmem:[#allocation92_spill] sm:$0xff] }
0x20d5   :  { %v10299_v39 = vpop.eup %10298  ;;  %10310 = vpow2.f32 %v8737_v17  ;;  %v6443_v58 = vadd.f32 %v14361_v26, %v13486_v27 }
0x20d6   :  { %10312 = vrcp.f32 %v7734_v42  ;;  %v7746_v56 = vadd.f32 1.0, %v10299_v39  ;;  %v10301_v47 = vpop.eup %10300  ;;  %v14362_v42 = vld [vmem:[#allocation95_spill] sm:$0xff] }
0x20d7   :  { %v10303_v23 = vpop.eup %10302  ;;  %v6449_v39 = vadd.f32 %v14362_v42, %v13483_v14 }
0x20d8   :  { %10314 = vrcp.f32 %v7746_v56  ;;  %v7759_v63 = vadd.f32 1.0, %v10303_v23 }
0x20da   :  { %10316 = vrcp.f32 %v7759_v63 }
0x20df   :  { %v10305_v33 = vpop.eup %10304 }
0x20e0   :  { %v10307_v24 = vpop.eup %10306  ;;  %v7767_v31 = vmul.f32 %v10305_v33, %v10301_v47  ;;  %v14363_v47 = vld [vmem:[#allocation91_spill] sm:$0xff] }
0x20e1   :  { %v10309_v18 = vpop.eup %10308  ;;  %v6447_v23 = vadd.f32 %v14363_v47, %v13486_v27 }
0x20e2   :  { %v10311_v19 = vpop.eup %10310  ;;  %v7765_v60 = vmul.f32 %v10309_v18, %v13869_v21 }
0x20e3   :  { %v10313_v1 = vpop.eup %10312  ;;  %v7760_v25 = vadd.f32 1.0, %v10311_v19 }
0x20e4   :  { %v13932_v46 = vadd.f32 %v7767_v31, %v7765_v60  ;;  %v7768_v59 = vmul.f32 %v10313_v1, %v10307_v24 }
0x20e5   :  { %v10315_v54 = vpop.eup %10314 }
0x20e6   :  { %v7766_v55 = vmul.f32 %v10315_v54, %v13873_v22  ;;  %10318 = vtanh.f32 %v13932_v46  ;;  %v9322_v22 = vld [vmem:[#allocation24 + $0x28] sm:$0xff]  }
0x20e7   :  { %10320 = vrcp.f32 %v7760_v25  ;;  %v10317_v30 = vpop.eup %10316 }
0x20e8   :  { %v13936_v49 = vadd.f32 %v7768_v59, %v7766_v55 }
0x20ea   :  { %10322 = vtanh.f32 %v13936_v49 }
0x20f3   :  { %v10319_v9 = vpop.eup %10318 }
0x20f4   :  { %v10321_v21 = vpop.eup %10320  ;;  %v7773_v3 = vmul.f32 %v10319_v9, %v10317_v30 }
0x20f7   :  { %v10323_v15 = vpop.eup %10322 }
0x20f8   :  { %v7774_v4 = vmul.f32 %v10323_v15, %v10321_v21  ;;  %v13965_v21 = vld [vmem:[%s14026_s17] ss:$0 sm:$0xff]  ;;  %s10888_s17 = smov [#allocation26]  }
0x20f9   :  { %s8219_s9 = sshll.u32 %s10888_s17, 4  ;;  %s8220_s9 = int_to_ptr.vmem [resolvable:$true] %s8219_s9 }
0x20fa   :  { %v7785_v57 = vpack.c.bf16 %v7774_v4, %v7773_v3  ;;  %s10768_s28 = scalar_lea.vmem %s8220_s9, 256  ;;  %p10773_p10 = scmp.lt.s32.totalorder %s8220_s9, %s8220_s9 }
0x20fb   :  { %p10769_p9 = scmp.ne.s32.totalorder %s8220_s9, %s10768_s28  ;;  %p10774_p11 = scmp.lt.s32.totalorder %s10768_s28, %s10768_s28 }
0x20fc   :  { %7819 = vmatmul.mubr.bf16.vlgmr.msra.gmra.mxu1 %v7785_v57  ;;  %7862 = vmatmul.mubr.bf16.vlgmr.msra.gmra.mxu0 %v7785_v57 }
0x20fd   :  { %8849 = vmatpush3.bf16.msra.mxu1 %v13912_v12  ;;  %8864 = vmatprep.mubr.bf16.mxu1 %v13502_v2  ;;  %v14356_v2 = vld [vmem:[#allocation90_spill] sm:$0xff]  ;;  %p10775_p12 = por %p10774_p11, %p10773_p10 }
0x20fe   :  { %8850 = vmatprep.subr.bf16.mxu1 %v9321_v8  ;;  %v6330_v12 = vadd.f32 %v14356_v2, %v13461_v20 }
0x20ff   :  { %p10776_p13 = pnand %p10775_p12, %p10769_p9 }
0x2101   :  { %8851 = vmatpush3.bf16.msra.mxu1 %v9321_v8 }
0x2102   :  { %8852 = vmatprep.subr.bf16.mxu1 %v9322_v22 }
0x2105   :  { %8853 = vmatpush3.bf16.msra.mxu1 %v9322_v22 }
0x2106   :  { %8854 = vmatprep.subr.bf16.mxu1 %v9323_v43 }
0x2109   :  { %8855 = vmatpush3.bf16.msra.mxu1 %v9323_v43 }
0x210a   :  { %8856 = vmatprep.subr.bf16.mxu1 %v9324_v62 }
0x210d   :  { %8857 = vmatpush3.bf16.msra.mxu1 %v9324_v62 }
0x210e   :  { %8858 = vmatprep.subr.bf16.mxu1 %v9325_v6 }
0x2111   :  { %8859 = vmatpush3.bf16.msra.mxu1 %v9325_v6 }
0x2112   :  { %8860 = vmatprep.subr.bf16.mxu1 %v9326_v53 }
0x2115   :  { %8861 = vmatpush3.bf16.msra.mxu1 %v9326_v53 }
0x2116   :  { %8862 = vmatprep.subr.bf16.mxu1 %v9327_v51 }
0x2119   :  { %8863 = vmatpush3.bf16.msra.mxu1 %v9327_v51 }
0x211c   :  { %8865 = vmatmul.mubr.bf16.vlgmr.msra.gmra.mxu1 %v13564_v11  ;;  %v14358_v11 = vld [vmem:[#allocation93_spill] sm:$0xff] }
0x211d   :  { %8868 = vmatprep.mubr.bf16.mxu1 %v13626_v45  ;;  %v6334_v45 = vadd.f32 %v14358_v11, %v13461_v20  ;;  %v6445_v20 = vadd.f32 %v14360_v5, %v13483_v14 }
0x2124   :  { %8869 = vmatmul.mubr.bf16.gmra.mxu1 %v13752_v52 }
0x2125   :  { %8872 = vmatprep.mubr.bf16.mxu1 %v13814_v40  ;;  %v14359_v40 = vld [vmem:[#allocation97_spill] sm:$0xff] }
0x212c   :  { %8873 = vmatmul.mubr.bf16.gmra.mxu1 %v13876_v36  ;;  %v6336_v36 = vadd.f32 %v14359_v40, %v13468_v61 }
0x212d   :  { %8876 = vmatprep.mubr.bf16.mxu1 %v7785_v57 }
0x21bc   :  { %v7820_v35 = vpop.f32.mrf.mxu1  ;;  %v7863_v44 = vpop.f32.mrf.mxu0 }
0x21bd   :  { %v7872_v29 = vadd.f32 %v7820_v35, %v6330_v12  ;;  %v7874_v56 = vadd.f32 %v7863_v44, %v6443_v58 }
0x21be   :  { %v7822_v37 = vpop.f32.mrf.mxu1  ;;  %v7865_v16 = vpop.f32.mrf.mxu0 }
0x21bf   :  { %v8738_v7 = vmul.f32 -1.442695, %v7872_v29  ;;  %v7873_v52 = vadd.f32 %v7822_v37, %v6332_v38  ;;  %v7875_v17 = vadd.f32 %v7865_v16, %v6445_v20 }
0x21c0   :  { %v7824_v0 = vpop.f32.mrf.mxu1  ;;  %v7867_v41 = vpop.f32.mrf.mxu0 }
0x21c1   :  { %10324 = vpow2.f32 %v8738_v7  ;;  %v8740_v28 = vmul.f32 -1.442695, %v7873_v52  ;;  %v7876_v48 = vadd.f32 %v7824_v0, %v6334_v45  ;;  %v8742_v33 = vmul.f32 -1.442695, %v7875_v17 }
0x21c2   :  { %v7826_v32 = vpop.f32.mrf.mxu1  ;;  %v7869_v61 = vpop.f32.mrf.mxu0  ;;  %v7878_v18 = vadd.f32 %v7867_v41, %v6447_v23 }
0x21c3   :  { %10326 = vpow2.f32 %v8740_v28  ;;  %v8739_v34 = vmul.f32 -1.442695, %v7876_v48  ;;  %v7877_v13 = vadd.f32 %v7826_v32, %v6336_v36  ;;  %v7879_v24 = vadd.f32 %v7869_v61, %v6449_v39 }
0x21c5   :  { %10328 = vpow2.f32 %v8739_v34  ;;  %v8741_v50 = vmul.f32 -1.442695, %v7877_v13  ;;  %v8743_v1 = vmul.f32 -1.442695, %v7879_v24 }
0x21c7   :  { %10330 = vpow2.f32 %v8741_v50 }
0x21c8   :  { %10332 = vtanh.f32 %v7874_v56 }
0x21c9   :  { %10334 = vpow2.f32 %v8742_v33 }
0x21ce   :  { %v10325_v31 = vpop.eup %10324 }
0x21cf   :  { %v7886_v19 = vadd.f32 1.0, %v10325_v31 }
0x21d0   :  { %v10327_v60 = vpop.eup %10326 }
0x21d1   :  { %10336 = vrcp.f32 %v7886_v19  ;;  %v7898_v63 = vadd.f32 1.0, %v10327_v60 }
0x21d2   :  { %v10329_v59 = vpop.eup %10328  ;;  %10338 = vtanh.f32 %v7878_v18 }
0x21d3   :  { %10340 = vrcp.f32 %v7898_v63  ;;  %v7887_v54 = vadd.f32 1.0, %v10329_v59 }
0x21d4   :  { %v10331_v14 = vpop.eup %10330  ;;  %10342 = vpow2.f32 %v8743_v1 }
0x21d5   :  { %10344 = vrcp.f32 %v7887_v54  ;;  %v7899_v25 = vadd.f32 1.0, %v10331_v14  ;;  %v10333_v27 = vpop.eup %10332 }
0x21d6   :  { %v10335_v30 = vpop.eup %10334 }
0x21d7   :  { %10346 = vrcp.f32 %v7899_v25  ;;  %v7912_v8 = vadd.f32 1.0, %v10335_v30 }
0x21d9   :  { %10348 = vrcp.f32 %v7912_v8 }
0x21dc   :  { %v8866_v55 = vpop.f32.mrf.mxu1 }
0x21dd   :  { %v8068_v6 = vadd.f32 %v8866_v55, %v13965_v21 }
0x21de   :  { %v10337_v9 = vpop.eup %10336  ;;  %v8059_v15 = vpop.f32.mrf.mxu1 }
0x21df   :  { %v10339_v3 = vpop.eup %10338  ;;  %v7920_v4 = vmul.f32 %v10337_v9, %v10333_v27  ;;  %v8060_v2 = vadd.f32 %v13965_v21, %v8059_v15 }
0x21e0   :  { %v10341_v57 = vpop.eup %10340  ;;  %v8867_v22 = vpop.f32.mrf.mxu1 }
0x21e1   :  { %v10343_v43 = vpop.eup %10342  ;;  %v7918_v62 = vmul.f32 %v10341_v57, %v13932_v46  ;;  %v8071_v53 = vadd.f32 %v8867_v22, %v13965_v21 }
0x21e2   :  { %v10345_v51 = vpop.eup %10344  ;;  %v8062_v12 = vpop.f32.mrf.mxu1  ;;  %v7913_v37 = vadd.f32 1.0, %v10343_v43 }
0x21e3   :  { %v7922_v35 = vadd.f32 %v7920_v4, %v7918_v62  ;;  %v7921_v10 = vmul.f32 %v10345_v51, %v10339_v3  ;;  %v8793_v38 = vpack.c.bf16 %v8071_v53, %v8068_v6  ;;  %v8063_v29 = vadd.f32 %v13965_v21, %v8062_v12 }
0x21e4   :  { %v10347_v44 = vpop.eup %10346  ;;  %v8870_v11 = vpop.f32.mrf.mxu1 }
0x21e5   :  { %10350 = vtanh.f32 %v7922_v35  ;;  %v7919_v46 = vmul.f32 %v10347_v44, %v13936_v49  ;;  %8825 = vst [vmem:[#allocation29 + $0x8] sm:$0xff] %v8793_v38   ;;  %v8788_v45 = vpack.c.bf16 %v8063_v29, %v8060_v2  ;;  %v8084_v40 = vadd.f32 %v8870_v11, %v13965_v21 }
0x21e6   :  { %v8075_v7 = vpop.f32.mrf.mxu1  ;;  %10352 = vrcp.f32 %v7913_v37  ;;  %v10349_v50 = vpop.eup %10348 }
0x21e7   :  { %v7923_v52 = vadd.f32 %v7921_v10, %v7919_v46  ;;  %8789 = vst [vmem:[#allocation29] sm:$0xff] %v8788_v45   ;;  %v8076_v16 = vadd.f32 %v13965_v21, %v8075_v7 }
0x21e8   :  { %v8871_v0 = vpop.f32.mrf.mxu1 }
0x21e9   :  { %10354 = vtanh.f32 %v7923_v52  ;;  %v8087_v36 = vadd.f32 %v8871_v0, %v13965_v21 }
0x21ea   :  { %v8078_v28 = vpop.f32.mrf.mxu1 }
0x21eb   :  { %v8803_v48 = vpack.c.bf16 %v8087_v36, %v8084_v40  ;;  %v8079_v32 = vadd.f32 %v13965_v21, %v8078_v28 }
0x21ec   :  { %v8874_v34 = vpop.f32.mrf.mxu1 }
0x21ed   :  { %8827 = vst [vmem:[#allocation29 + $0x18] sm:$0xff] %v8803_v48   ;;  %v8798_v49 = vpack.c.bf16 %v8079_v32, %v8076_v16  ;;  %v8100_v5 = vadd.f32 %v8874_v34, %v13965_v21 }
0x21ee   :  { %v8091_v13 = vpop.f32.mrf.mxu1 }
0x21ef   :  { %8826 = vst [vmem:[#allocation29 + $0x10] sm:$0xff] %v8798_v49   ;;  %v8092_v58 = vadd.f32 %v13965_v21, %v8091_v13 }
0x21f0   :  { %v8875_v41 = vpop.f32.mrf.mxu1 }
0x21f1   :  { %v8103_v20 = vadd.f32 %v8875_v41, %v13965_v21 }
0x21f2   :  { %v10351_v17 = vpop.eup %10350  ;;  %v8094_v26 = vpop.f32.mrf.mxu1 }
0x21f3   :  { %v8813_v61 = vpack.c.bf16 %v8103_v20, %v8100_v5  ;;  %v8095_v42 = vadd.f32 %v13965_v21, %v8094_v26  ;;  %v7926_v39 = vmul.f32 %v10351_v17, %v10349_v50  ;;  %v10353_v56 = vpop.eup %10352 }
0x21f5   :  { %8829 = vst [vmem:[#allocation29 + $0x28] sm:$0xff] %v8813_v61   ;;  %v8808_v47 = vpack.c.bf16 %v8095_v42, %v8092_v58 }
0x21f6   :  { %v10355_v23 = vpop.eup %10354 }
0x21f7   :  { %8828 = vst [vmem:[#allocation29 + $0x20] sm:$0xff] %v8808_v47   ;;  %v7927_v33 = vmul.f32 %v10355_v23, %v10353_v56 }
0x21f9   :  { %v7953_v24 = vpack.c.bf16 %v7927_v33, %v7926_v39 }
0x21fb   :  { %8877 = vmatmul.mubr.bf16.gmra.mxu1 %v7953_v24 }
0x21fc   :  { %10779 = shalt.err (!%p10776_p13)
}
0x21fd   :  { %8225 = dma.vmem_to_hbm [thread:$0]  %s8220_s9, 256, %s14028_s19, [#allocation27], %s10869_s27, %s10869_s27, %s10870_s3  }
0x21fe   :  { %s10788_s22 = scalar_lea.vmem %s8208_s25, 256  ;;  %p10793_p1 = scmp.lt.s32.totalorder %s8208_s25, %s8208_s25 }
0x21ff   :  { %p10789_p0 = scmp.ne.s32.totalorder %s8208_s25, %s10788_s22  ;;  %p10794_p2 = scmp.lt.s32.totalorder %s10788_s22, %s10788_s22 }
0x2201   :  { %p10795_p3 = por %p10794_p2, %p10793_p1 }
0x2203   :  { %p10796_p4 = pnand %p10795_p3, %p10789_p0 }
0x2205   :  { %10799 = shalt.err (!%p10796_p4)
}
0x2206   :  { %8213 = dma.vmem_to_hbm [thread:$0]  %s8208_s25, 256, %s14027_s18, [#allocation6], %s10869_s27, %s10869_s27, %s10870_s3  }
0x2207   :  { %s10890_s29 = smov [#allocation28]  }
0x2208   :  { %s8231_s4 = sshll.u32 %s10890_s29, 4  ;;  %s8232_s4 = int_to_ptr.vmem [resolvable:$true] %s8231_s4 }
0x2209   :  { %s10808_s13 = scalar_lea.vmem %s8232_s4, 256  ;;  %p10813_p6 = scmp.lt.s32.totalorder %s8232_s4, %s8232_s4 }
0x220a   :  { %p10809_p5 = scmp.ne.s32.totalorder %s8232_s4, %s10808_s13  ;;  %p10814_p7 = scmp.lt.s32.totalorder %s10808_s13, %s10808_s13 }
0x220c   :  { %p10815_p8 = por %p10814_p7, %p10813_p6 }
0x220e   :  { %p10816_p9 = pnand %p10815_p8, %p10809_p5 }
0x2210   :  { %10819 = shalt.err (!%p10816_p9)
}
0x2211   :  { %8237 = dma.vmem_to_hbm [thread:$0]  %s8232_s4, 256, %s14029_s20, [#allocation27], %s10869_s27, %s10869_s27, %s10870_s3  }
0x2212   :  { %s10891_s18 = smov [#allocation29]  }
0x2213   :  { %s8243_s1 = sshll.u32 %s10891_s18, 4  ;;  %s8244_s1 = int_to_ptr.vmem [resolvable:$true] %s8243_s1 }
0x2214   :  { %s10828_s20 = scalar_lea.vmem %s8244_s1, 1024  ;;  %p10833_p11 = scmp.lt.s32.totalorder %s8244_s1, %s8244_s1 }
0x2215   :  { %p10829_p10 = scmp.ne.s32.totalorder %s8244_s1, %s10828_s20  ;;  %p10834_p12 = scmp.lt.s32.totalorder %s10828_s20, %s10828_s20 }
0x2217   :  { %p10835_p13 = por %p10834_p12, %p10833_p11 }
0x2219   :  { %p10836_p0 = pnand %p10835_p13, %p10829_p10 }
0x22bb   :  { %v8878_v31 = vpop.f32.mrf.mxu1 }
0x22bc   :  { %v8116_v60 = vadd.f32 %v8878_v31, %v13965_v21 }
0x22bd   :  { %v8107_v18 = vpop.f32.mrf.mxu1 }
0x22be   :  { %v8108_v59 = vadd.f32 %v13965_v21, %v8107_v18 }
0x22bf   :  { %v8879_v19 = vpop.f32.mrf.mxu1 }
0x22c0   :  { %v8119_v1 = vadd.f32 %v8879_v19, %v13965_v21 }
0x22c1   :  { %v8110_v63 = vpop.f32.mrf.mxu1 }
0x22c2   :  { %v8823_v54 = vpack.c.bf16 %v8119_v1, %v8116_v60  ;;  %v8111_v14 = vadd.f32 %v13965_v21, %v8110_v63 }
0x22c4   :  { %8831 = vst [vmem:[#allocation29 + $0x38] sm:$0xff] %v8823_v54   ;;  %v8818_v25 = vpack.c.bf16 %v8111_v14, %v8108_v59 }
0x22c6   :  { %8830 = vst [vmem:[#allocation29 + $0x30] sm:$0xff] %v8818_v25  }
0x22c7   :  { %10839 = shalt.err (!%p10836_p0)
}
0x22c8   :  { %8249 = dma.vmem_to_hbm [thread:$0]  %s8244_s1, 1024, %s14030_s21, [#allocation30], %s10879_s30, %s10879_s30, %s10880_s26  }
0x22c9   :  { %10862 = dma.done.wait [#allocation6], 256  }
0x22ca   :  { %10863 = vsyncadd [#allocation6], 4294967040 }
0x22cb   :  { %10864 = dma.done.wait [#allocation27], 512  }
0x22cc   :  { %10865 = vsyncadd [#allocation27], 4294966784 }
0x22cd   :  { %10866 = dma.done.wait [#allocation30], 1024  }
0x22ce   :  { %10867 = vsyncadd [#allocation30], 4294966272 }
0x22cf   :  { %8262 = vsyncpa [#allocation5], 1 }
0x22d0   :  { %8263 = vsyncpa [#allocation8], 1 }
0x22d1   :  { %8264 = vsyncpa [#allocation11], 1 }
0x22d2   :  { %8265 = vsyncpa [#allocation14], 1 }
0x22d3   :  { %8266 = vsyncpa [#allocation17], 1 }
0x22d4   :  { %8267 = vsyncpa [#allocation20], 1 }
0x22d5   :  { %8268 = vsyncpa [#allocation23], 1 }
0x22d6   :  { %8269 = vsyncpa [#allocation6], 1 }
0x22d7   :  { %8270 = vsyncpa [#allocation27], 1 }
0x22d8   :  { %8271 = vsyncpa [#allocation30], 1 }

</bundles_post_ra>
